<compile_context>
chip_gen: v6e
topology: v6e:2x2x1
jax: 0.10.0
libtpu: 0.0.40
codegen_flags: <defaults>
</compile_context>

<pallas_src>
import functools

import jax
import jax.numpy as jnp
import numpy as np
from jax.experimental import pallas as pl
from jax.experimental.pallas import tpu as pltpu

_EPS = 1e-5
_LANE = 128


def _rup(c, m=_LANE):
    return ((c + m - 1) // m) * m


def _idx0(nd):
    return lambda i: (0,) * nd


# ---------------------------------------------------------------------------
# In-kernel helpers (traced inside Pallas kernels)
# ---------------------------------------------------------------------------
def _conv3x3_acc(src_ref, w_ref, mfull, wh, stride, lp, base):
    """3x3 conv as 9 shifted GEMMs over a row-flattened phase-split operand.

    For phase p = (kh % stride) * stride + (kw % stride) the operand holds a
    contiguous segment of `lp` rows laid out as (n, a, b) -> n*Hh*Wh + a*Wh + b
    (plus zero tail rows).  The tap (kh, kw) contribution to output row m is
    src[base + p*lp + (kh//stride)*Wh + (kw//stride) + m] @ w[kh*3 + kw].
    """
    acc = None
    for kh in range(3):
        for kw in range(3):
            ph, qh = kh % stride, kh // stride
            pw, qw = kw % stride, kw // stride
            r0 = base + (ph * stride + pw) * lp + qh * wh + qw
            part = jnp.dot(src_ref[r0:r0 + mfull, :], w_ref[kh * 3 + kw],
                           preferred_element_type=jnp.float32)
            acc = part if acc is None else acc + part
    return acc


def _bn_rows(acc, bn_ref, msk, inv_m, eps):
    """Training-mode BatchNorm over the valid rows of an (Mfull, C) slab.

    `msk` is 1.0 on the N*Ho*Wo valid rows, 0.0 on the garbage rows of the
    over-complete output grid; `inv_m` = 1/(N*Ho*Wo).  Channel axis is
    lane-dense (multiple of 128) so the axis-0 reductions use all 128 lanes.
    """
    mean = jnp.sum(acc * msk, axis=0, keepdims=True) * inv_m
    cent = acc - mean
    cm = cent * msk
    var = jnp.sum(cm * cm, axis=0, keepdims=True) * inv_m
    return cent * jax.lax.rsqrt(var + eps) * bn_ref[0:1, :] + bn_ref[1:2, :]


# ---------------------------------------------------------------------------
# Kernels
# ---------------------------------------------------------------------------
def _stem_kernel(xf_ref, w_ref, bn_ref, mask_ref, o_ref, *,
                 n, ho, wo, hh, wh, lp, eps):
    mfull = n * hh * wh
    inv_m = 1.0 / float(n * ho * wo)
    msk = mask_ref[...]
    acc = _conv3x3_acc(xf_ref, w_ref, mfull, wh, 1, lp, 0)
    o_ref[...] = jnp.maximum(_bn_rows(acc, bn_ref, msk, inv_m, eps), 0.0)


def _block_kernel(*refs, n, ho, wo, hh, wh, stride, lp, has_proj, eps):
    """Whole BasicBlock fused: conv1+BN1+ReLU -> conv2+BN2 (+ shortcut) -> ReLU."""
    if has_proj:
        (xf_ref, w1_ref, w2_ref, ws_ref, bn1_ref, bn2_ref, bns_ref, mask_ref,
         o_ref, mid_ref) = refs
    else:
        (xf_ref, w1_ref, w2_ref, bn1_ref, bn2_ref, mask_ref,
         o_ref, mid_ref) = refs
        ws_ref = bns_ref = None

    mfull = n * hh * wh
    inv_m = 1.0 / float(n * ho * wo)
    margin = wh + 1                       # zero halo rows for the staged mid
    msk = mask_ref[...]                   # (Mfull, 1) f32 validity mask

    # conv1 (3x3, stride s) + BN1 + ReLU
    acc1 = _conv3x3_acc(xf_ref, w1_ref, mfull, wh, stride, lp, 0)
    y1 = jnp.maximum(_bn_rows(acc1, bn1_ref, msk, inv_m, eps), 0.0) * msk

    # stage the intermediate in VMEM (bf16 MXU operand) with a zero halo
    mid_ref[...] = jnp.zeros_like(mid_ref)
    mid_ref[margin:margin + mfull, :] = y1.astype(mid_ref.dtype)

    # conv2 (3x3, stride 1) + BN2, reading the staged intermediate
    acc2 = _conv3x3_acc(mid_ref, w2_ref, mfull, wh, 1, 0, 0)
    y2 = _bn_rows(acc2, bn2_ref, msk, inv_m, eps)

    # shortcut: 1x1 conv (stride s) + BN, or identity
    ph0, qh0 = 1 % stride, 1 // stride    # conv pad=1 folded into the phases
    r0 = (ph0 * stride + ph0) * lp + qh0 * wh + qh0
    if has_proj:
        accs = jnp.dot(xf_ref[r0:r0 + mfull, :], ws_ref[...],
                       preferred_element_type=jnp.float32)
        sc = _bn_rows(accs, bns_ref, msk, inv_m, eps)
    else:
        sc = xf_ref[r0:r0 + mfull, :].astype(jnp.float32)

    o_ref[...] = jnp.maximum(y2 + sc, 0.0)


def _linear_kernel(x_ref, w_ref, b_ref, o_ref):
    o_ref[...] = (jnp.dot(x_ref[...], w_ref[...],
                          preferred_element_type=jnp.float32) + b_ref[...])


# ---------------------------------------------------------------------------
# Host-side layout plumbing (cheap XLA glue: pads / reshapes, ~1x the bytes)
# ---------------------------------------------------------------------------
def _prep_conv_input(x_nhwc, stride, pad=1, k=3):
    """Zero-pad, phase-split and row-flatten an NHWC activation so a kxk
    stride-s conv becomes k*k contiguous shifted GEMMs inside the kernel."""
    n, h, w, c = x_nhwc.shape
    s = stride
    hh = -(-(h + 2 * pad) // s)
    wh = -(-(w + 2 * pad) // s)
    ho = (h + 2 * pad - k) // s + 1
    wo = (w + 2 * pad - k) // s + 1
    qmax = (k - 1) // s
    xp = jnp.pad(x_nhwc, ((0, 0), (pad, s * hh - h - pad),
                          (pad, s * wh - w - pad), (0, 0)))
    xr = xp.reshape(n, hh, s, wh, s, c).transpose(2, 4, 0, 1, 3, 5)
    xr = xr.reshape(s * s, n * hh * wh, c)
    tail = qmax * wh + qmax               # keeps every tap slice in bounds
    xr = jnp.pad(xr, ((0, 0), (0, tail), (0, 0)))
    lp = n * hh * wh + tail
    xf = xr.reshape(s * s * lp, c).astype(jnp.bfloat16)
    return xf, dict(hh=hh, wh=wh, ho=ho, wo=wo, lp=lp)


def _valid_mask(n, hh, wh, ho, wo):
    m = (np.arange(hh)[:, None] < ho) & (np.arange(wh)[None, :] < wo)
    m = np.broadcast_to(m[None], (n, hh, wh)).reshape(n * hh * wh, 1)
    return jnp.asarray(m, dtype=jnp.float32)


def _pack_w3x3(w_oihw, cin_p, cout_p):
    cout, cin, kh, kw = w_oihw.shape
    w = jnp.transpose(w_oihw, (2, 3, 1, 0)).reshape(kh * kw, cin, cout)
    w = jnp.pad(w, ((0, 0), (0, cin_p - cin), (0, cout_p - cout)))
    return w.astype(jnp.bfloat16)


def _pack_w1x1(w_oihw, cin_p, cout_p):
    cout, cin = w_oihw.shape[:2]
    w = jnp.transpose(w_oihw[:, :, 0, 0], (1, 0))
    w = jnp.pad(w, ((0, cin_p - cin), (0, cout_p - cout)))
    return w.astype(jnp.bfloat16)


def _pack_bn(gamma, beta, cp):
    gb = jnp.stack([gamma, beta]).astype(jnp.float32)
    return jnp.pad(gb, ((0, 0), (0, cp - gamma.shape[0])))


# ---------------------------------------------------------------------------
# pallas_call wrappers
# ---------------------------------------------------------------------------
def _run_stem(x, stem):
    n = x.shape[0]
    xf, g = _prep_conv_input(x, 1)
    hh, wh, ho, wo, lp = g["hh"], g["wh"], g["ho"], g["wo"], g["lp"]
    cp = stem["w"].shape[-1]
    mfull = n * hh * wh
    inputs = [xf, stem["w"], stem["bn"], _valid_mask(n, hh, wh, ho, wo)]
    out = pl.pallas_call(
        functools.partial(_stem_kernel, n=n, ho=ho, wo=wo, hh=hh, wh=wh,
                          lp=lp, eps=_EPS),
        out_shape=jax.ShapeDtypeStruct((mfull, cp), jnp.float32),
        grid=(1,),
        in_specs=[pl.BlockSpec(a.shape, _idx0(a.ndim)) for a in inputs],
        out_specs=pl.BlockSpec((mfull, cp), _idx0(2)),
        compiler_params=pltpu.CompilerParams(
            dimension_semantics=("arbitrary",)),
    )(*inputs)
    return out.reshape(n, hh, wh, cp)[:, :ho, :wo, :]


def _run_block(x, blk):
    n = x.shape[0]
    s = blk["stride"]
    xf, g = _prep_conv_input(x, s)
    hh, wh, ho, wo, lp = g["hh"], g["wh"], g["ho"], g["wo"], g["lp"]
    cp = blk["w1"].shape[-1]
    mfull = n * hh * wh
    has_proj = "ws" in blk
    inputs = [xf, blk["w1"], blk["w2"]]
    if has_proj:
        inputs.append(blk["ws"])
    inputs += [blk["bn1"], blk["bn2"]]
    if has_proj:
        inputs.append(blk["bns"])
    inputs.append(_valid_mask(n, hh, wh, ho, wo))
    out = pl.pallas_call(
        functools.partial(_block_kernel, n=n, ho=ho, wo=wo, hh=hh, wh=wh,
                          stride=s, lp=lp, has_proj=has_proj, eps=_EPS),
        out_shape=jax.ShapeDtypeStruct((mfull, cp), jnp.float32),
        grid=(1,),
        in_specs=[pl.BlockSpec(a.shape, _idx0(a.ndim)) for a in inputs],
        out_specs=pl.BlockSpec((mfull, cp), _idx0(2)),
        scratch_shapes=[pltpu.VMEM((mfull + 2 * (wh + 1), cp), jnp.bfloat16)],
        compiler_params=pltpu.CompilerParams(
            dimension_semantics=("arbitrary",)),
    )(*inputs)
    return out.reshape(n, hh, wh, cp)[:, :ho, :wo, :]


def _run_linear(feat, lin_w, lin_b, num_classes):
    m = feat.shape[0]
    n_p = lin_w.shape[1]
    inputs = [feat.astype(jnp.bfloat16), lin_w, lin_b]
    out = pl.pallas_call(
        _linear_kernel,
        out_shape=jax.ShapeDtypeStruct((m, n_p), jnp.float32),
        grid=(1,),
        in_specs=[pl.BlockSpec(a.shape, _idx0(a.ndim)) for a in inputs],
        out_specs=pl.BlockSpec((m, n_p), _idx0(2)),
    )(*inputs)
    return out[:, :num_classes]


def zigzag_resnet_forward(x_nchw, kp):
    x = jnp.transpose(x_nchw, (0, 2, 3, 1)).astype(jnp.float32)   # NCHW->NHWC
    cin_p = _rup(x.shape[-1])
    x = jnp.pad(x, ((0, 0), (0, 0), (0, 0), (0, cin_p - x.shape[-1])))
    x = _run_stem(x, kp["stem"])
    for blk in kp["blocks"]:
        x = _run_block(x, blk)
    # flatten in PyTorch NCHW order (final spatial is 1x1 here)
    x = x[..., :kp["feat_channels"]]
    feat = jnp.transpose(x, (0, 3, 1, 2)).reshape(x.shape[0], -1)
    return _run_linear(feat, kp["lin_w"], kp["lin_b"], kp["num_classes"])


# ---------------------------------------------------------------------------
# Parameter construction (PyTorch layout) + conversion to kernel layout
# ---------------------------------------------------------------------------
def init_raw_params(key, num_classes=2):
    planes_cfg = [64, 128, 256, 128, 64, 128, 256]
    strides_cfg = [1, 2, 2, 2, 2, 2, 2]
    num_blocks = [1, 1, 1, 1, 1, 1, 1]
    keys = iter(jax.random.split(key, 128))

    def conv_w(cout, cin, k):
        fan = cin * k * k
        return jax.random.normal(next(keys), (cout, cin, k, k),
                                 jnp.float32) / np.sqrt(fan)

    def bn_p(c):
        return (1.0 + 0.1 * jax.random.normal(next(keys), (c,), jnp.float32),
                0.1 * jax.random.normal(next(keys), (c,), jnp.float32))

    raw = {"stem_w": conv_w(64, 3, 3)}
    raw["stem_g"], raw["stem_b"] = bn_p(64)
    blocks = []
    in_planes = 64
    for planes, stride, nb in zip(planes_cfg, strides_cfg, num_blocks):
        for st in [stride] + [1] * (nb - 1):
            b = {"stride": st, "in": in_planes, "planes": planes,
                 "w1": conv_w(planes, in_planes, 3),
                 "w2": conv_w(planes, planes, 3)}
            b["g1"], b["b1"] = bn_p(planes)
            b["g2"], b["b2"] = bn_p(planes)
            if st != 1 or in_planes != planes:
                b["ws"] = conv_w(planes, in_planes, 1)
                b["gs"], b["bs"] = bn_p(planes)
            blocks.append(b)
            in_planes = planes
    raw["blocks"] = blocks
    raw["lin_w"] = jax.random.normal(next(keys), (num_classes, 256),
                                     jnp.float32) / np.sqrt(256)
    raw["lin_b"] = 0.1 * jax.random.normal(next(keys), (num_classes,),
                                           jnp.float32)
    raw["num_classes"] = num_classes
    return raw


def to_kernel_params(raw):
    kp = {"num_classes": raw["num_classes"], "feat_channels": 256}
    cp = _rup(64)
    kp["stem"] = {"w": _pack_w3x3(raw["stem_w"], _rup(3), cp),
                  "bn": _pack_bn(raw["stem_g"], raw["stem_b"], cp)}
    blocks = []
    for b in raw["blocks"]:
        cin_p, cout_p = _rup(b["in"]), _rup(b["planes"])
        kb = {"stride": b["stride"],
              "w1": _pack_w3x3(b["w1"], cin_p, cout_p),
              "w2": _pack_w3x3(b["w2"], cout_p, cout_p),
              "bn1": _pack_bn(b["g1"], b["b1"], cout_p),
              "bn2": _pack_bn(b["g2"], b["b2"], cout_p)}
        if "ws" in b:
            kb["ws"] = _pack_w1x1(b["ws"], cin_p, cout_p)
            kb["bns"] = _pack_bn(b["gs"], b["bs"], cout_p)
        blocks.append(kb)
    kp["blocks"] = blocks
    ncp = _rup(raw["num_classes"])
    kp["lin_w"] = jnp.pad(raw["lin_w"].T,
                          ((0, 0), (0, ncp - raw["num_classes"]))
                          ).astype(jnp.bfloat16)
    kp["lin_b"] = jnp.pad(raw["lin_b"][None, :],
                          ((0, 0), (0, ncp - raw["num_classes"]))
                          ).astype(jnp.float32)
    return kp


# ---------------------------------------------------------------------------
# Pure-JAX reference (same bf16 operand precision as the kernel's MXU path;
# semantics otherwise follow the PyTorch module in training mode)
# ---------------------------------------------------------------------------
def _bf(v):
    return v.astype(jnp.bfloat16).astype(jnp.float32)


def _conv_ref(x, w_oihw, stride, pad):
    return jax.lax.conv_general_dilated(
        x, jnp.transpose(w_oihw, (2, 3, 1, 0)), (stride, stride),
        ((pad, pad), (pad, pad)),
        dimension_numbers=("NHWC", "HWIO", "NHWC"),
        preferred_element_type=jnp.float32)


def _bn_ref(y, g, b, eps=_EPS):
    mean = jnp.mean(y, axis=(0, 1, 2), keepdims=True)
    cent = y - mean
    var = jnp.mean(cent * cent, axis=(0, 1, 2), keepdims=True)
    return cent * jax.lax.rsqrt(var + eps) * g + b


def zigzag_resnet_ref(x_nchw, raw):
    x = jnp.transpose(x_nchw, (0, 2, 3, 1)).astype(jnp.float32)
    x = jax.nn.relu(_bn_ref(_conv_ref(_bf(x), _bf(raw["stem_w"]), 1, 1),
                            raw["stem_g"], raw["stem_b"]))
    for b in raw["blocks"]:
        xb = _bf(x)
        o = jax.nn.relu(_bn_ref(_conv_ref(xb, _bf(b["w1"]), b["stride"], 1),
                                b["g1"], b["b1"]))
        o = _bn_ref(_conv_ref(_bf(o), _bf(b["w2"]), 1, 1), b["g2"], b["b2"])
        if "ws" in b:
            sc = _bn_ref(_conv_ref(xb, _bf(b["ws"]), b["stride"], 0),
                         b["gs"], b["bs"])
        else:
            sc = xb
        x = jax.nn.relu(o + sc)
    feat = jnp.transpose(x, (0, 3, 1, 2)).reshape(x.shape[0], -1)
    return (jnp.dot(_bf(feat), _bf(raw["lin_w"]).T,
                    preferred_element_type=jnp.float32) + raw["lin_b"])


# ---------------------------------------------------------------------------
if __name__ == "__main__":
    key = jax.random.PRNGKey(0)
    k_param, k_x = jax.random.split(key)
    raw = init_raw_params(k_param, num_classes=2)
    kp = to_kernel_params(raw)

    # Input consistent with the module: conv1 expects 3 channels; a 16x16
    # spatial extent reduces to 1x1 across the six stride-2 stages, so the
    # flatten feeds Linear(256*expansion, 2) exactly as in the PyTorch forward.
    x = jax.random.normal(k_x, (2, 3, 16, 16), jnp.float32)

    out = jax.block_until_ready(zigzag_resnet_forward(x, kp))
    ref = jax.block_until_ready(zigzag_resnet_ref(x, raw))

    assert out.shape == (2, 2), out.shape
    np.testing.assert_allclose(np.asarray(out), np.asarray(ref),
                               rtol=1e-2, atol=1e-2)
    print("KERNEL_OK")
</pallas_src>

<mosaic_0001>
module attributes {stable_mosaic.version = 11 : i64} {
  func.func @_stem_kernel(%arg0: i32, %arg1: memref<686x128xbf16, #tpu.memory_space<vmem>>, %arg2: memref<9x128x128xbf16, #tpu.memory_space<vmem>>, %arg3: memref<2x128xf32, #tpu.memory_space<vmem>>, %arg4: memref<648x1xf32, #tpu.memory_space<vmem>>, %arg5: memref<648x128xf32, #tpu.memory_space<vmem>>) attributes {dimension_semantics = [#tpu.dimension_semantics<arbitrary>], iteration_bounds = array<i64: 1>, scalar_prefetch = 0 : i64, scratch_operands = 0 : i64, tpu.core_type = #tpu.core_type<tc>, window_params = [{pipeline_mode = #tpu.pipeline_mode<synchronous>, transform_indices = @transform_0, window_bounds = array<i64: 686, 128>}, {pipeline_mode = #tpu.pipeline_mode<synchronous>, transform_indices = @transform_1, window_bounds = array<i64: 9, 128, 128>}, {pipeline_mode = #tpu.pipeline_mode<synchronous>, transform_indices = @transform_2, window_bounds = array<i64: 2, 128>}, {pipeline_mode = #tpu.pipeline_mode<synchronous>, transform_indices = @transform_3, window_bounds = array<i64: 648, 1>}, {pipeline_mode = #tpu.pipeline_mode<synchronous>, transform_indices = @transform_4, window_bounds = array<i64: 648, 128>}]} {
    %c0 = arith.constant 0 : index
    %c0_0 = arith.constant 0 : index
    %0 = vector.load %arg4[%c0, %c0_0] : memref<648x1xf32, #tpu.memory_space<vmem>>, vector<648x1xf32>
    %c0_1 = arith.constant 0 : index
    %c0_2 = arith.constant 0 : index
    %1 = vector.load %arg1[%c0_1, %c0_2] : memref<686x128xbf16, #tpu.memory_space<vmem>>, vector<648x128xbf16>
    %c0_3 = arith.constant 0 : index
    %c0_4 = arith.constant 0 : index
    %c0_5 = arith.constant 0 : index
    %2 = vector.load %arg2[%c0_3, %c0_4, %c0_5] : memref<9x128x128xbf16, #tpu.memory_space<vmem>>, vector<1x128x128xbf16>
    %3 = vector.shape_cast %2 : vector<1x128x128xbf16> to vector<128x128xbf16>
    %cst = arith.constant dense<0.000000e+00> : vector<648x128xf32>
    %4 = tpu.matmul %1, %3, %cst {dimension_numbers = #tpu.dot_dimension_numbers<[1], [0], [0], [1], [0, 0, 1, 1], [], []>} : vector<648x128xbf16>, vector<128x128xbf16>, vector<648x128xf32> -> vector<648x128xf32>
    %c1 = arith.constant 1 : index
    %c0_6 = arith.constant 0 : index
    %5 = vector.load %arg1[%c1, %c0_6] : memref<686x128xbf16, #tpu.memory_space<vmem>>, vector<648x128xbf16>
    %c1_7 = arith.constant 1 : index
    %c0_8 = arith.constant 0 : index
    %c0_9 = arith.constant 0 : index
    %6 = vector.load %arg2[%c1_7, %c0_8, %c0_9] : memref<9x128x128xbf16, #tpu.memory_space<vmem>>, vector<1x128x128xbf16>
    %7 = vector.shape_cast %6 : vector<1x128x128xbf16> to vector<128x128xbf16>
    %cst_10 = arith.constant dense<0.000000e+00> : vector<648x128xf32>
    %8 = tpu.matmul %5, %7, %cst_10 {dimension_numbers = #tpu.dot_dimension_numbers<[1], [0], [0], [1], [0, 0, 1, 1], [], []>} : vector<648x128xbf16>, vector<128x128xbf16>, vector<648x128xf32> -> vector<648x128xf32>
    %9 = arith.addf %4, %8 : vector<648x128xf32>
    %c2 = arith.constant 2 : index
    %c0_11 = arith.constant 0 : index
    %10 = vector.load %arg1[%c2, %c0_11] : memref<686x128xbf16, #tpu.memory_space<vmem>>, vector<648x128xbf16>
    %c2_12 = arith.constant 2 : index
    %c0_13 = arith.constant 0 : index
    %c0_14 = arith.constant 0 : index
    %11 = vector.load %arg2[%c2_12, %c0_13, %c0_14] : memref<9x128x128xbf16, #tpu.memory_space<vmem>>, vector<1x128x128xbf16>
    %12 = vector.shape_cast %11 : vector<1x128x128xbf16> to vector<128x128xbf16>
    %cst_15 = arith.constant dense<0.000000e+00> : vector<648x128xf32>
    %13 = tpu.matmul %10, %12, %cst_15 {dimension_numbers = #tpu.dot_dimension_numbers<[1], [0], [0], [1], [0, 0, 1, 1], [], []>} : vector<648x128xbf16>, vector<128x128xbf16>, vector<648x128xf32> -> vector<648x128xf32>
    %14 = arith.addf %9, %13 : vector<648x128xf32>
    %c18 = arith.constant 18 : index
    %c0_16 = arith.constant 0 : index
    %15 = vector.load %arg1[%c18, %c0_16] : memref<686x128xbf16, #tpu.memory_space<vmem>>, vector<648x128xbf16>
    %c3 = arith.constant 3 : index
    %c0_17 = arith.constant 0 : index
    %c0_18 = arith.constant 0 : index
    %16 = vector.load %arg2[%c3, %c0_17, %c0_18] : memref<9x128x128xbf16, #tpu.memory_space<vmem>>, vector<1x128x128xbf16>
    %17 = vector.shape_cast %16 : vector<1x128x128xbf16> to vector<128x128xbf16>
    %cst_19 = arith.constant dense<0.000000e+00> : vector<648x128xf32>
    %18 = tpu.matmul %15, %17, %cst_19 {dimension_numbers = #tpu.dot_dimension_numbers<[1], [0], [0], [1], [0, 0, 1, 1], [], []>} : vector<648x128xbf16>, vector<128x128xbf16>, vector<648x128xf32> -> vector<648x128xf32>
    %19 = arith.addf %14, %18 : vector<648x128xf32>
    %c19 = arith.constant 19 : index
    %c0_20 = arith.constant 0 : index
    %20 = vector.load %arg1[%c19, %c0_20] : memref<686x128xbf16, #tpu.memory_space<vmem>>, vector<648x128xbf16>
    %c4 = arith.constant 4 : index
    %c0_21 = arith.constant 0 : index
    %c0_22 = arith.constant 0 : index
    %21 = vector.load %arg2[%c4, %c0_21, %c0_22] : memref<9x128x128xbf16, #tpu.memory_space<vmem>>, vector<1x128x128xbf16>
    %22 = vector.shape_cast %21 : vector<1x128x128xbf16> to vector<128x128xbf16>
    %cst_23 = arith.constant dense<0.000000e+00> : vector<648x128xf32>
    %23 = tpu.matmul %20, %22, %cst_23 {dimension_numbers = #tpu.dot_dimension_numbers<[1], [0], [0], [1], [0, 0, 1, 1], [], []>} : vector<648x128xbf16>, vector<128x128xbf16>, vector<648x128xf32> -> vector<648x128xf32>
    %24 = arith.addf %19, %23 : vector<648x128xf32>
    %c20 = arith.constant 20 : index
    %c0_24 = arith.constant 0 : index
    %25 = vector.load %arg1[%c20, %c0_24] : memref<686x128xbf16, #tpu.memory_space<vmem>>, vector<648x128xbf16>
    %c5 = arith.constant 5 : index
    %c0_25 = arith.constant 0 : index
    %c0_26 = arith.constant 0 : index
    %26 = vector.load %arg2[%c5, %c0_25, %c0_26] : memref<9x128x128xbf16, #tpu.memory_space<vmem>>, vector<1x128x128xbf16>
    %27 = vector.shape_cast %26 : vector<1x128x128xbf16> to vector<128x128xbf16>
    %cst_27 = arith.constant dense<0.000000e+00> : vector<648x128xf32>
    %28 = tpu.matmul %25, %27, %cst_27 {dimension_numbers = #tpu.dot_dimension_numbers<[1], [0], [0], [1], [0, 0, 1, 1], [], []>} : vector<648x128xbf16>, vector<128x128xbf16>, vector<648x128xf32> -> vector<648x128xf32>
    %29 = arith.addf %24, %28 : vector<648x128xf32>
    %c36 = arith.constant 36 : index
    %c0_28 = arith.constant 0 : index
    %30 = vector.load %arg1[%c36, %c0_28] : memref<686x128xbf16, #tpu.memory_space<vmem>>, vector<648x128xbf16>
    %c6 = arith.constant 6 : index
    %c0_29 = arith.constant 0 : index
    %c0_30 = arith.constant 0 : index
    %31 = vector.load %arg2[%c6, %c0_29, %c0_30] : memref<9x128x128xbf16, #tpu.memory_space<vmem>>, vector<1x128x128xbf16>
    %32 = vector.shape_cast %31 : vector<1x128x128xbf16> to vector<128x128xbf16>
    %cst_31 = arith.constant dense<0.000000e+00> : vector<648x128xf32>
    %33 = tpu.matmul %30, %32, %cst_31 {dimension_numbers = #tpu.dot_dimension_numbers<[1], [0], [0], [1], [0, 0, 1, 1], [], []>} : vector<648x128xbf16>, vector<128x128xbf16>, vector<648x128xf32> -> vector<648x128xf32>
    %34 = arith.addf %29, %33 : vector<648x128xf32>
    %c37 = arith.constant 37 : index
    %c0_32 = arith.constant 0 : index
    %35 = vector.load %arg1[%c37, %c0_32] : memref<686x128xbf16, #tpu.memory_space<vmem>>, vector<648x128xbf16>
    %c7 = arith.constant 7 : index
    %c0_33 = arith.constant 0 : index
    %c0_34 = arith.constant 0 : index
    %36 = vector.load %arg2[%c7, %c0_33, %c0_34] : memref<9x128x128xbf16, #tpu.memory_space<vmem>>, vector<1x128x128xbf16>
    %37 = vector.shape_cast %36 : vector<1x128x128xbf16> to vector<128x128xbf16>
    %cst_35 = arith.constant dense<0.000000e+00> : vector<648x128xf32>
    %38 = tpu.matmul %35, %37, %cst_35 {dimension_numbers = #tpu.dot_dimension_numbers<[1], [0], [0], [1], [0, 0, 1, 1], [], []>} : vector<648x128xbf16>, vector<128x128xbf16>, vector<648x128xf32> -> vector<648x128xf32>
    %39 = arith.addf %34, %38 : vector<648x128xf32>
    %c38 = arith.constant 38 : index
    %c0_36 = arith.constant 0 : index
    %40 = vector.load %arg1[%c38, %c0_36] : memref<686x128xbf16, #tpu.memory_space<vmem>>, vector<648x128xbf16>
    %c8 = arith.constant 8 : index
    %c0_37 = arith.constant 0 : index
    %c0_38 = arith.constant 0 : index
    %41 = vector.load %arg2[%c8, %c0_37, %c0_38] : memref<9x128x128xbf16, #tpu.memory_space<vmem>>, vector<1x128x128xbf16>
    %42 = vector.shape_cast %41 : vector<1x128x128xbf16> to vector<128x128xbf16>
    %cst_39 = arith.constant dense<0.000000e+00> : vector<648x128xf32>
    %43 = tpu.matmul %40, %42, %cst_39 {dimension_numbers = #tpu.dot_dimension_numbers<[1], [0], [0], [1], [0, 0, 1, 1], [], []>} : vector<648x128xbf16>, vector<128x128xbf16>, vector<648x128xf32> -> vector<648x128xf32>
    %44 = arith.addf %39, %43 : vector<648x128xf32>
    %45 = vector.broadcast %0 : vector<648x1xf32> to vector<648x128xf32>
    %46 = arith.mulf %44, %45 : vector<648x128xf32>
    %cst_40 = arith.constant dense<0.000000e+00> : vector<128xf32>
    %47 = vector.multi_reduction <add>, %46, %cst_40 [0] : vector<648x128xf32> to vector<128xf32>
    %48 = vector.shape_cast %47 : vector<128xf32> to vector<1x128xf32>
    %cst_41 = arith.constant 0.001953125 : f32
    %49 = vector.broadcast %cst_41 : f32 to vector<1x128xf32>
    %50 = arith.mulf %48, %49 : vector<1x128xf32>
    %51 = vector.broadcast %50 : vector<1x128xf32> to vector<648x128xf32>
    %52 = arith.subf %44, %51 : vector<648x128xf32>
    %53 = vector.broadcast %0 : vector<648x1xf32> to vector<648x128xf32>
    %54 = arith.mulf %52, %53 : vector<648x128xf32>
    %55 = arith.mulf %54, %54 : vector<648x128xf32>
    %cst_42 = arith.constant dense<0.000000e+00> : vector<128xf32>
    %56 = vector.multi_reduction <add>, %55, %cst_42 [0] : vector<648x128xf32> to vector<128xf32>
    %57 = vector.shape_cast %56 : vector<128xf32> to vector<1x128xf32>
    %cst_43 = arith.constant 0.001953125 : f32
    %58 = vector.broadcast %cst_43 : f32 to vector<1x128xf32>
    %59 = arith.mulf %57, %58 : vector<1x128xf32>
    %cst_44 = arith.constant 9.99999974E-6 : f32
    %60 = vector.broadcast %cst_44 : f32 to vector<1x128xf32>
    %61 = arith.addf %59, %60 : vector<1x128xf32>
    %62 = math.rsqrt %61 : vector<1x128xf32>
    %63 = vector.broadcast %62 : vector<1x128xf32> to vector<648x128xf32>
    %64 = arith.mulf %52, %63 : vector<648x128xf32>
    %c0_45 = arith.constant 0 : index
    %c0_46 = arith.constant 0 : index
    %65 = vector.load %arg3[%c0_45, %c0_46] : memref<2x128xf32, #tpu.memory_space<vmem>>, vector<1x128xf32>
    %66 = vector.broadcast %65 : vector<1x128xf32> to vector<648x128xf32>
    %67 = arith.mulf %64, %66 : vector<648x128xf32>
    %c1_47 = arith.constant 1 : index
    %c0_48 = arith.constant 0 : index
    %68 = vector.load %arg3[%c1_47, %c0_48] : memref<2x128xf32, #tpu.memory_space<vmem>>, vector<1x128xf32>
    %69 = vector.broadcast %68 : vector<1x128xf32> to vector<648x128xf32>
    %70 = arith.addf %67, %69 : vector<648x128xf32>
    %cst_49 = arith.constant 0.000000e+00 : f32
    %71 = vector.broadcast %cst_49 : f32 to vector<648x128xf32>
    %72 = arith.maximumf %70, %71 : vector<648x128xf32>
    %c0_50 = arith.constant 0 : index
    %c0_51 = arith.constant 0 : index
    %73 = vector.load %arg5[%c0_50, %c0_51] : memref<648x128xf32, #tpu.memory_space<vmem>>, vector<648x128xf32>
    tpu.vector_store %arg5[%c0_50, %c0_51], %72 {strides = array<i32>} : memref<648x128xf32, #tpu.memory_space<vmem>>, vector<648x128xf32>,
    return
  }
  func.func @transform_0(%arg0: i32) -> (i32, i32) {
    %c0_i32 = arith.constant 0 : i32
    %c0_i32_0 = arith.constant 0 : i32
    %c0_i32_1 = arith.constant 0 : i32
    return %c0_i32, %c0_i32_0 : i32, i32
  }
  func.func @transform_1(%arg0: i32) -> (i32, i32, i32) {
    %c0_i32 = arith.constant 0 : i32
    %c0_i32_0 = arith.constant 0 : i32
    %c0_i32_1 = arith.constant 0 : i32
    %c0_i32_2 = arith.constant 0 : i32
    return %c0_i32, %c0_i32_0, %c0_i32_1 : i32, i32, i32
  }
  func.func @transform_2(%arg0: i32) -> (i32, i32) {
    %c0_i32 = arith.constant 0 : i32
    %c0_i32_0 = arith.constant 0 : i32
    %c0_i32_1 = arith.constant 0 : i32
    return %c0_i32, %c0_i32_0 : i32, i32
  }
  func.func @transform_3(%arg0: i32) -> (i32, i32) {
    %c0_i32 = arith.constant 0 : i32
    %c0_i32_0 = arith.constant 0 : i32
    %c0_i32_1 = arith.constant 0 : i32
    return %c0_i32, %c0_i32_0 : i32, i32
  }
  func.func @transform_4(%arg0: i32) -> (i32, i32) {
    %c0_i32 = arith.constant 0 : i32
    %c0_i32_0 = arith.constant 0 : i32
    %c0_i32_1 = arith.constant 0 : i32
    return %c0_i32, %c0_i32_0 : i32, i32
  }
}

</mosaic_0001>

<bundles_post_ra>
// kernel: tpu_custom_call.1
= control target key start
LH: loop header
LB: loop body
LE: loop exit
PB: predicated region body
PF: predicated region fallthrough
CT: control target
= control target key end

     0   :  { %9 = vsyncpa [#allocation3], 0  ;;  %s16458_s0 = inlined_call_operand.hbm [shape: bf16[686,128], index: 0, kind: input, shape index: {}]   ;;  %s16459_s1 = inlined_call_operand.vmem [shape: bf16[9,128,128], index: 1, kind: input, shape index: {}]   ;;  %s16460_s2 = inlined_call_operand.vmem [shape: f32[2,128], index: 2, kind: input, shape index: {}]   ;;  %s16461_s3 = inlined_call_operand.vmem [shape: f32[648,1], index: 3, kind: input, shape index: {}]   ;;  %s16462_s4 = inlined_call_operand.hbm [shape: f32[648,128], index: 4, kind: output, shape index: {}]  }
   0x1   :  { %10 = vsyncpa [#allocation4], 0  ;;  %s11351_s15 = smov [#allocation2]  }
   0x2   :  { %s16_s16 = sshll.u32 %s11351_s15, 4  ;;  %s17_s16 = int_to_ptr.vmem [resolvable:$true] %s16_s16 }
   0x3   :  { %s11315_s17 = scalar_lea.vmem %s17_s16, 5504  ;;  %p11320_p1 = scmp.lt.s32.totalorder %s17_s16, %s17_s16 }
   0x4   :  { %p11316_p0 = scmp.ne.s32.totalorder %s17_s16, %s11315_s17  ;;  %p11321_p2 = scmp.lt.s32.totalorder %s11315_s17, %s11315_s17 }
   0x6   :  { %p11322_p3 = por %p11321_p2, %p11320_p1 }
   0x8   :  { %p11323_p4 = pnand %p11322_p3, %p11316_p0 }
   0xa   :  { %11326 = shalt.err (!%p11323_p4)
}
   0xb   :  { %s11352_s18 = smov 64   ;;  %s11353_s19 = smov 4  }
   0xc   :  { %22 = dma.hbm_to_vmem [thread:$0]  %s16458_s0, 5504, %s17_s16, [#allocation3], %s11352_s18, %s11352_s18, %s11353_s19  }
   0xd   :  { %11347 = dma.done.wait [#allocation3], 5504  }
   0xe   :  { %11348 = vsyncadd [#allocation3], 4294961792  ;;  %v16463_v0 = vmov 0.0   ;;  %vm11355_vm0 = vmmov 0   ;;  %v10986_v1 = vld [vmem:[%s16459_s1 + $0x78] sm:$0xff]   ;;  %v10987_v2 = vld [vmem:[%s16459_s1 + $0x70] sm:$0xff]  }
   0xf   :  { %9339 = vmatprep.subr.bf16.mxu0 %v16463_v0  ;;  %10959 = vmatprep.subr.bf16.mxu1 %v16463_v0  ;;  %v10988_v3 = vld [vmem:[%s16459_s1 + $0x68] sm:$0xff]   ;;  %v10989_v4 = vld [vmem:[%s16459_s1 + $0x60] sm:$0xff]   ;;  %v10990_v7 = vld [vmem:[%s16459_s1 + $0x58] sm:$0xff]   ;;  %vm434_vm1 = vsmask.f32 7424  ;;  %vm1682_vm2 = vcmask 1046528  }
  0x10   :  { %9355 = vmatprep.mubr.msk.bf16.mxu0 %vm11355_vm0, %v16463_v0  ;;  %9439 = vmatprep.mubr.msk.bf16.mxu1 %vm11355_vm0, %v16463_v0  ;;  %v114_v5 = vld [vmem:[#allocation2] sm:$0xf]  ;;  %v115_v6 = vld [vmem:[#allocation2 + $0x4] sm:$0xf]  ;;  %v10996_v9 = vld [vmem:[#allocation2 + $0xa8] sm:$0xff]   ;;  %vm4150_vm4 = vcmask 1045504  }
  0x11   :  { %9340 = vmatpush3.bf16.msra.mxu0 %v10986_v1  ;;  %10967 = vmatpush3.bf16.msra.mxu1 %v10986_v1  ;;  %v11415_v8 = vcombine.low %v114_v5, %v115_v6  ;;  %v10995_v10 = vld [vmem:[#allocation2 + $0x8] sm:$0xff]   ;;  %v10991_v11 = vld [vmem:[%s16459_s1 + $0x50] sm:$0xff]   ;;  %v603_v14 = vshll.u32 %v10996_v9, 16  ;;  %v607_v20 = vshrl.u32 %v10996_v9, 16  ;;  %v10993_v23 = vld [vmem:[%s16459_s1 + $0x40] sm:$0xff]   ;;  %vm6618_vm6 = vcmask 1044480  }
  0x12   :  { %9341 = vmatprep.subr.bf16.mxu0 %v16463_v0  ;;  %10960 = vmatprep.subr.bf16.mxu1 %v16463_v0  ;;  %v10997_v13 = vld [vmem:[#allocation2 + $0xb0] sm:$0xff]   ;;  %v10992_v15 = vld [vmem:[%s16459_s1 + $0x48] sm:$0xff]   ;;  %v443_v17 = vshll.u32 %v10995_v10, 16  ;;  %v11001_v28 = vld [vmem:[#allocation2 + $0xb8] sm:$0xff]   ;;  %v447_v29 = vshrl.u32 %v10995_v10, 16 }
  0x13   :  { %v438_v12 = vshll.u32 %v11415_v8, 16  ;;  %v436_v16 = vshrl.u32 %v11415_v8, 16  ;;  %v11429_v19 = vrot.slane %v603_v14, 1  ;;  %v611_v21 = vshll.u32 %v10997_v13, 16  ;;  %v11000_v22 = vld [vmem:[#allocation2 + $0x10] sm:$0xff]   ;;  %v10998_v33 = vld [vmem:[%s16459_s1 + $0xb8] sm:$0xff]  }
  0x14   :  { %v445_v25 = vrot.slane %v443_v17, 1  ;;  %v451_v30 = vshll.u32 %v11000_v22, 16  ;;  %v10999_v34 = vld [vmem:[%s16459_s1 + $0x38] sm:$0xff]   ;;  %v615_v35 = vshrl.u32 %v10997_v13, 16  ;;  %v619_v36 = vshll.u32 %v11001_v28, 16  ;;  %v11451_v39 = vld [vmem:[#allocation2 + $0xc0] sm:$0xff]  }
  0x15   :  { %9342 = vmatpush3.bf16.msra.mxu0 %v10987_v2  ;;  %10968 = vmatpush3.bf16.msra.mxu1 %v10987_v2  ;;  %v440_v18 = vrot.slane %v438_v12, 1  ;;  %v609_v26 = vor.u32 %v607_v20, %v11429_v19  ;;  %v613_v27 = vrot.slane %v611_v21, 1  ;;  %v11449_v38 = vld [vmem:[#allocation2 + $0x18] sm:$0xff]   ;;  %v11004_v43 = vld [vmem:[%s16459_s1 + $0xb0] sm:$0xff]   ;;  %v455_v45 = vshrl.u32 %v11000_v22, 16  ;;  %v11012_v51 = vld [vmem:[%s16459_s1 + $0xa8] sm:$0xff]  }
  0x16   :  { %9343 = vmatprep.subr.bf16.mxu0 %v16463_v0  ;;  %10961 = vmatprep.subr.bf16.mxu1 %v16463_v0  ;;  %v453_v37 = vrot.slane %v451_v30, 1  ;;  %v449_v40 = vor.u32 %v447_v29, %v445_v25  ;;  %v621_v42 = vrot.slane %v619_v36, 1  ;;  %v11007_v44 = vld [vmem:[%s16459_s1 + $0x30] sm:$0xff]   ;;  %v459_v46 = vshll.u32 %v11449_v38, 16  ;;  %v11013_v52 = vld [vmem:[%s16459_s1 + $0x28] sm:$0xff]   ;;  %v11476_v53 = vld [vmem:[#allocation2 + $0x20] sm:$0xff]  }
  0x17   :  { %v441_v24 = vor.u32 %v440_v18, %v436_v16  ;;  %v614_v32 = vsel %vm434_vm1, %v609_v26, %v613_v27  ;;  %v617_v41 = vor.u32 %v615_v35, %v613_v27  ;;  %v623_v49 = vshrl.u32 %v11001_v28, 16  ;;  %v11479_v55 = vld [vmem:[#allocation2 + $0xc8] sm:$0xff]   ;;  %v11020_v59 = vld [vmem:[%s16459_s1 + $0xa0] sm:$0xff]   ;;  %v11026_v5 = vld [vmem:[%s16459_s1 + $0x98] sm:$0xff]  }
  0x18   :  { %v454_v47 = vsel %vm434_vm1, %v449_v40, %v453_v37  ;;  %v627_v50 = vshll.u32 %v11451_v39, 16  ;;  %v461_v54 = vrot.slane %v459_v46, 1  ;;  %v457_v56 = vor.u32 %v455_v45, %v453_v37  ;;  %v11021_v60 = vld [vmem:[%s16459_s1 + $0x20] sm:$0xff]   ;;  %v11495_v63 = vld [vmem:[#allocation2 + $0x28] sm:$0xff]   ;;  %v11027_v6 = vld [vmem:[%s16459_s1 + $0x18] sm:$0xff]  }
  0x19   :  { %9344 = vmatpush3.bf16.msra.mxu0 %v10988_v3  ;;  %10969 = vmatpush3.bf16.msra.mxu1 %v10988_v3  ;;  %v446_v31 = vsel %vm434_vm1, %v441_v24, %v445_v25  ;;  %v622_v48 = vsel %vm434_vm1, %v617_v41, %v621_v42  ;;  %v625_v57 = vor.u32 %v623_v49, %v621_v42  ;;  %v467_v61 = vshll.u32 %v11476_v53, 16  ;;  %v11507_v9 = vld [vmem:[#allocation2 + $0xd0] sm:$0xff]   ;;  %v11520_v16 = vld [vmem:[#allocation2 + $0x38] sm:$0xff]   ;;  %v11524_v20 = vld [vmem:[#allocation2 + $0xe0] sm:$0xff]  }
  0x1a   :  { %9345 = vmatprep.subr.bf16.mxu0 %v16463_v0  ;;  %10962 = vmatprep.subr.bf16.mxu1 %v16463_v0  ;;  %v629_v58 = vrot.slane %v627_v50, 1  ;;  %v463_v62 = vshrl.u32 %v11449_v38, 16  ;;  %v462_v1 = vsel %vm434_vm1, %v457_v56, %v461_v54  ;;  %v631_v3 = vshrl.u32 %v11451_v39, 16  ;;  %v11530_v24 = vld [vmem:[#allocation2 + $0x40] sm:$0xff]   ;;  %v11554_v40 = vld [vmem:[#allocation2 + $0xe8] sm:$0xff]   ;;  %v11570_v49 = vld [vmem:[#allocation2 + $0xf0] sm:$0xff]  }
  0x1b   :  { %v475_v10 = vshll.u32 %v11495_v63, 16  ;;  %v471_v17 = vshrl.u32 %v11476_v53, 16  ;;  %v643_v18 = vshll.u32 %v11507_v9, 16  ;;  %v639_v22 = vshrl.u32 %v11479_v55, 16  ;;  %v11563_v46 = vld [vmem:[#allocation2 + $0x48] sm:$0xff]   ;;  %v11581_v56 = vld [vmem:[#allocation2 + $0xf8] sm:$0xff]  }
  0x1c   :  { %v630_v2 = vsel %vm434_vm1, %v625_v57, %v629_v58  ;;  %v465_v12 = vor.u32 %v463_v62, %v461_v54  ;;  %v633_v13 = vor.u32 %v631_v3, %v629_v58  ;;  %v479_v27 = vshrl.u32 %v11495_v63, 16  ;;  %v11040_v50 = vld [vmem:[%s16459_s1 + $0x8] sm:$0xff]   ;;  %v11578_v54 = vld [vmem:[#allocation2 + $0x50] sm:$0xff]  }
  0x1d   :  { %9346 = vmatpush3.bf16.msra.mxu0 %v10989_v4  ;;  %10970 = vmatpush3.bf16.msra.mxu1 %v10989_v4  ;;  %v635_v4 = vshll.u32 %v11479_v55, 16  ;;  %v477_v21 = vrot.slane %v475_v10, 1  ;;  %v647_v29 = vshrl.u32 %v11507_v9, 16  ;;  %v491_v30 = vshll.u32 %v11520_v16, 16  ;;  %v11041_v58 = vld [vmem:[%s16459_s1 + $0x88] sm:$0xff]  }
  0x1e   :  { %9347 = vmatprep.subr.bf16.mxu0 %v16463_v0  ;;  %10963 = vmatprep.subr.bf16.mxu1 %v16463_v0  ;;  %v499_v36 = vshll.u32 %v11530_v24, 16  ;;  %v667_v53 = vshll.u32 %v11554_v40, 16  ;;  %v503_v55 = vshrl.u32 %v11530_v24, 16  ;;  %v507_v57 = vshll.u32 %v11563_v46, 16 }
  0x1f   :  { %v637_v14 = vrot.slane %v635_v4, 1  ;;  %v11557_v42 = vrot.slane %v491_v30, 1  ;;  %v515_v63 = vshll.u32 %v11578_v54, 16  ;;  %v671_v3 = vshrl.u32 %v11554_v40, 16 }
  0x20   :  { %v683_v4 = vshll.u32 %v11581_v56, 16  ;;  %vm3230_vm3 = vsmask.f32 6400  ;;  %vm5698_vm5 = vsmask.f32 5376 }
  0x21   :  { %9348 = vmatpush3.bf16.msra.mxu0 %v10990_v7  ;;  %10971 = vmatpush3.bf16.msra.mxu1 %v10990_v7  ;;  %v469_v7 = vrot.slane %v467_v61, 1  ;;  %v638_v26 = vsel %vm434_vm1, %v633_v13, %v637_v14  ;;  %v641_v38 = vor.u32 %v639_v22, %v637_v14  ;;  %v11589_v61 = vld [vmem:[#allocation2 + $0x58] sm:$0xff]   ;;  %v11615_v13 = vld [vmem:[#allocation2 + $0x68] sm:$0xff]  }
  0x22   :  { %9349 = vmatprep.subr.bf16.mxu0 %v16463_v0  ;;  %10964 = vmatprep.subr.bf16.mxu1 %v16463_v0  ;;  %v11625_v22 = vrot.slane %v683_v4, 1 }
  0x23   :  { %v470_v25 = vsel %vm434_vm1, %v465_v12, %v469_v7  ;;  %v473_v37 = vor.u32 %v471_v17, %v469_v7  ;;  %v11606_v7 = vld [vmem:[#allocation2 + $0x108] sm:$0xff]   ;;  %v679_v12 = vshrl.u32 %v11570_v49, 16  ;;  %v523_v17 = vshll.u32 %v11589_v61, 16 }
  0x25   :  { %9350 = vmatpush3.bf16.msra.mxu0 %v10991_v11  ;;  %10972 = vmatpush3.bf16.msra.mxu1 %v10991_v11  ;;  %v11512_v11 = vld [vmem:[#allocation2 + $0x30] sm:$0xff]  }
  0x26   :  { %9351 = vmatprep.subr.bf16.mxu0 %v16463_v0  ;;  %10965 = vmatprep.subr.bf16.mxu1 %v16463_v0  ;;  %v487_v41 = vshrl.u32 %v11512_v11, 16 }
  0x29   :  { %9352 = vmatpush3.bf16.msra.mxu0 %v10992_v15  ;;  %10973 = vmatpush3.bf16.msra.mxu1 %v10992_v15  ;;  %v11518_v15 = vld [vmem:[#allocation2 + $0xd8] sm:$0xff]  }
  0x2a   :  { %9353 = vmatprep.subr.bf16.mxu0 %v16463_v0  ;;  %10966 = vmatprep.subr.bf16.mxu1 %v16463_v0  ;;  %v651_v28 = vshll.u32 %v11518_v15, 16 }
  0x2c   :  { %v11552_v39 = vrot.slane %v651_v28, 1  ;;  %v11048_v28 = vld [vmem:[%s16459_s1] sm:$0xff]  }
  0x2d   :  { %9354 = vmatpush3.bf16.msra.mxu0 %v10993_v23  ;;  %10974 = vmatpush3.bf16.msra.mxu1 %v10993_v23  ;;  %v483_v23 = vshll.u32 %v11512_v11, 16  ;;  %v511_v11 = vshrl.u32 %v11563_v46, 16 }
  0x2e   :  { %9699 = vmatprep.subr.bf16.mxu0 %v16463_v0  ;;  %9519 = vmatprep.subr.bf16.mxu1 %v16463_v0 }
  0x2f   :  { %v11545_v35 = vrot.slane %v483_v23, 1  ;;  %v519_v23 = vshrl.u32 %v11578_v54, 16 }
  0x30   :  { %9356 = vmatmul.mubr.bf16.vlgmr.msra.gmra.mxu0 %v446_v31  ;;  %9440 = vmatmul.mubr.bf16.vlgmr.msra.gmra.mxu1 %v614_v32  ;;  %v645_v31 = vrot.slane %v643_v18, 1  ;;  %v659_v32 = vshll.u32 %v11524_v20, 16 }
  0x31   :  { %9700 = vmatpush3.bf16.msra.mxu0 %v10998_v33  ;;  %9359 = vmatprep.mubr.msk.bf16.mxu0 %vm11355_vm0, %v16463_v0  ;;  %v11034_v33 = vld [vmem:[%s16459_s1 + $0x90] sm:$0xff]  }
  0x32   :  { %9443 = vmatprep.mubr.msk.bf16.mxu1 %vm11355_vm0, %v16463_v0  ;;  %9520 = vmatpush3.bf16.msra.mxu1 %v10999_v34  ;;  %v11035_v34 = vld [vmem:[%s16459_s1 + $0x10] sm:$0xff]   ;;  %v11561_v45 = vrot.slane %v659_v32, 1  ;;  %v649_v62 = vor.u32 %v647_v29, %v645_v31  ;;  %v489_v29 = vor.u32 %v487_v41, %v11545_v35  ;;  %v11049_v32 = vld [vmem:[%s16459_s1 + $0x80] sm:$0xff]  }
  0x33   :  { %9701 = vmatprep.subr.bf16.mxu0 %v16463_v0  ;;  %9521 = vmatprep.subr.bf16.mxu1 %v16463_v0 }
  0x34   :  { %v654_v14 = vsel %vm434_vm1, %v649_v62, %v11552_v39 }
  0x35   :  { %9702 = vmatpush3.bf16.msra.mxu0 %v11004_v43  ;;  %v655_v43 = vshrl.u32 %v11518_v15, 16  ;;  %v11619_v15 = vrot.slane %v515_v63, 1 }
  0x36   :  { %9522 = vmatpush3.bf16.msra.mxu1 %v11007_v44  ;;  %9703 = vmatprep.subr.bf16.mxu0 %v16463_v0  ;;  %v495_v44 = vshrl.u32 %v11520_v16, 16 }
  0x37   :  { %9523 = vmatprep.subr.bf16.mxu1 %v16463_v0  ;;  %v657_v30 = vor.u32 %v655_v43, %v11552_v39  ;;  %v527_v39 = vshrl.u32 %v11589_v61, 16  ;;  %v521_v46 = vor.u32 %v519_v23, %v11619_v15 }
  0x38   :  { %9360 = vmatmul.mubr.bf16.gmra.mxu0 %v454_v47  ;;  %9444 = vmatmul.mubr.bf16.gmra.mxu1 %v622_v48  ;;  %v11567_v47 = vrot.slane %v499_v36, 1  ;;  %v663_v48 = vshrl.u32 %v11524_v20, 16  ;;  %v497_v4 = vor.u32 %v495_v44, %v11557_v42 }
  0x39   :  { %9363 = vmatprep.mubr.msk.bf16.mxu0 %vm11355_vm0, %v16463_v0  ;;  %9447 = vmatprep.mubr.msk.bf16.mxu1 %vm11355_vm0, %v16463_v0 }
  0x3a   :  { %9704 = vmatpush3.bf16.msra.mxu0 %v11012_v51  ;;  %9524 = vmatpush3.bf16.msra.mxu1 %v11013_v52  ;;  %v478_v51 = vsel %vm434_vm1, %v473_v37, %v477_v21  ;;  %v646_v52 = vsel %vm434_vm1, %v641_v38, %v645_v31  ;;  %v539_v31 = vshll.u32 %v11615_v13, 16  ;;  %v11652_v38 = vld [vmem:[#allocation2 + $0x118] sm:$0xff]   ;;  %v505_v16 = vor.u32 %v503_v55, %v11567_v47 }
  0x3b   :  { %9705 = vmatprep.subr.bf16.mxu0 %v16463_v0  ;;  %9525 = vmatprep.subr.bf16.mxu1 %v16463_v0  ;;  %v715_v63 = vshll.u32 %v11652_v38, 16 }
  0x3e   :  { %9706 = vmatpush3.bf16.msra.mxu0 %v11020_v59  ;;  %9526 = vmatpush3.bf16.msra.mxu1 %v11021_v60  ;;  %v481_v59 = vor.u32 %v479_v27, %v477_v21  ;;  %v675_v60 = vshll.u32 %v11570_v49, 16  ;;  %v11623_v21 = vld [vmem:[#allocation2 + $0x110] sm:$0xff]   ;;  %v699_v27 = vshll.u32 %v11606_v7, 16 }
  0x3f   :  { %9707 = vmatprep.subr.bf16.mxu0 %v16463_v0  ;;  %9527 = vmatprep.subr.bf16.mxu1 %v16463_v0 }
  0x40   :  { %9364 = vmatmul.mubr.bf16.gmra.mxu0 %v462_v1  ;;  %9448 = vmatmul.mubr.bf16.gmra.mxu1 %v630_v2  ;;  %v11596_v1 = vld [vmem:[#allocation2 + $0x100] sm:$0xff]   ;;  %v11598_v2 = vrot.slane %v667_v53, 1  ;;  %v486_v9 = vsel %vm434_vm1, %v481_v59, %v11545_v35  ;;  %v11611_v10 = vrot.slane %v675_v60, 1  ;;  %v707_v35 = vshll.u32 %v11623_v21, 16 }
  0x41   :  { %9367 = vmatprep.mubr.msk.bf16.mxu0 %vm11355_vm0, %v16463_v0  ;;  %9451 = vmatprep.mubr.msk.bf16.mxu1 %vm11355_vm0, %v16463_v0  ;;  %v691_v18 = vshll.u32 %v11596_v1, 16  ;;  %v695_v43 = vshrl.u32 %v11596_v1, 16  ;;  %v703_v53 = vshrl.u32 %v11606_v7, 16  ;;  %v711_v60 = vshrl.u32 %v11623_v21, 16 }
  0x42   :  { %9708 = vmatpush3.bf16.msra.mxu0 %v11026_v5  ;;  %9528 = vmatpush3.bf16.msra.mxu1 %v11027_v6  ;;  %v11602_v5 = vld [vmem:[#allocation2 + $0x60] sm:$0xff]   ;;  %v11604_v6 = vrot.slane %v507_v57, 1  ;;  %v494_v57 = vsel %vm434_vm1, %v489_v29, %v11557_v42  ;;  %v11671_v59 = vrot.slane %v707_v35, 1  ;;  %v673_v20 = vor.u32 %v671_v3, %v11598_v2 }
  0x43   :  { %9709 = vmatprep.subr.bf16.mxu0 %v16463_v0  ;;  %9529 = vmatprep.subr.bf16.mxu1 %v16463_v0  ;;  %v11648_v36 = vrot.slane %v691_v18, 1  ;;  %v11691_v18 = vrot.slane %v715_v63, 1  ;;  %v681_v40 = vor.u32 %v679_v12, %v11611_v10  ;;  %v11731_v29 = vld [vmem:[#allocation2 + $0x80] sm:$0xff]   ;;  %v11043_v63 = vld [vmem:[#allocation2 + $0x130] sm:$0xff]  }
  0x44   :  { %v510_v42 = vsel %vm434_vm1, %v505_v16, %v11604_v6  ;;  %v678_v44 = vsel %vm434_vm1, %v673_v20, %v11611_v10  ;;  %v513_v24 = vor.u32 %v511_v11, %v11604_v6  ;;  %v11741_v6 = vld [vmem:[#allocation2 + $0x128] sm:$0xff]   ;;  %v713_v7 = vor.u32 %v711_v60, %v11671_v59  ;;  %v11824_v16 = vld [vmem:[#allocation2 + $0x98] sm:$0xff]  }
  0x45   :  { %v686_v55 = vsel %vm434_vm1, %v681_v40, %v11625_v22  ;;  %v731_v54 = vshll.u32 %v11741_v6, 16  ;;  %v743_v60 = vshrl.u32 %v11043_v63, 16 }
  0x46   :  { %9710 = vmatpush3.bf16.msra.mxu0 %v11034_v33  ;;  %9530 = vmatpush3.bf16.msra.mxu1 %v11035_v34  ;;  %v11645_v33 = vrot.slane %v523_v17, 1  ;;  %v687_v34 = vshrl.u32 %v11581_v56, 16  ;;  %v543_v56 = vshrl.u32 %v11615_v13, 16 }
  0x47   :  { %9531 = vmatprep.subr.bf16.mxu1 %v16463_v0  ;;  %9711 = vmatprep.subr.bf16.mxu0 %v16463_v0 }
  0x48   :  { %9368 = vmatmul.mubr.bf16.gmra.mxu0 %v470_v25  ;;  %9452 = vmatmul.mubr.bf16.gmra.mxu1 %v638_v26  ;;  %v531_v25 = vshll.u32 %v11602_v5, 16  ;;  %v11629_v26 = vld [vmem:[#allocation2 + $0x70] sm:$0xff]   ;;  %v689_v49 = vor.u32 %v687_v34, %v11625_v22  ;;  %v526_v10 = vsel %vm434_vm1, %v521_v46, %v11645_v33  ;;  %v697_v22 = vor.u32 %v695_v43, %v11648_v36 }
  0x49   :  { %9371 = vmatprep.mubr.msk.bf16.mxu0 %vm11355_vm0, %v16463_v0  ;;  %9455 = vmatprep.mubr.msk.bf16.mxu1 %vm11355_vm0, %v16463_v0  ;;  %v547_v37 = vshll.u32 %v11629_v26, 16  ;;  %v735_v43 = vshrl.u32 %v11741_v6, 16 }
  0x4a   :  { %9532 = vmatpush3.bf16.msra.mxu1 %v11040_v50  ;;  %9712 = vmatpush3.bf16.msra.mxu0 %v11041_v58  ;;  %v11655_v41 = vrot.slane %v531_v25, 1  ;;  %v535_v50 = vshrl.u32 %v11602_v5, 16  ;;  %v662_v58 = vsel %vm434_vm1, %v657_v30, %v11561_v45  ;;  %v551_v25 = vshrl.u32 %v11629_v26, 16 }
  0x4b   :  { %9533 = vmatprep.subr.bf16.mxu1 %v16463_v0  ;;  %9713 = vmatprep.subr.bf16.mxu0 %v16463_v0  ;;  %v11674_v62 = vrot.slane %v547_v37, 1  ;;  %v694_v11 = vsel %vm434_vm1, %v689_v49, %v11648_v36  ;;  %v563_v30 = vshll.u32 %v11731_v29, 16  ;;  %v733_v37 = vrot.slane %v731_v54, 1 }
  0x4c   :  { %v537_v61 = vor.u32 %v535_v50, %v11655_v41  ;;  %v718_v50 = vsel %vm434_vm1, %v713_v7, %v11691_v18  ;;  %v11190_v7 = vld [vmem:[#allocation2 + $0x8] sm:$0xff]  }
  0x4d   :  { %v553_v13 = vor.u32 %v551_v25, %v11674_v62  ;;  %v737_v20 = vor.u32 %v735_v43, %v733_v37 }
  0x4e   :  { %9534 = vmatpush3.bf16.msra.mxu1 %v11048_v28  ;;  %9714 = vmatpush3.bf16.msra.mxu0 %v11049_v32  ;;  %v11729_v28 = vld [vmem:[#allocation2 + $0x120] sm:$0xff]   ;;  %v565_v32 = vrot.slane %v563_v30, 1 }
  0x4f   :  { %9879 = vmatprep.subr.bf16.mxu1 %v16463_v0  ;;  %10059 = vmatprep.subr.bf16.mxu0 %v16463_v0  ;;  %v723_v12 = vshll.u32 %v11729_v28, 16 }
  0x50   :  { %9372 = vmatmul.mubr.bf16.gmra.mxu0 %v478_v51  ;;  %9456 = vmatmul.mubr.bf16.gmra.mxu1 %v646_v52  ;;  %v11661_v51 = vrot.slane %v699_v27, 1  ;;  %v11663_v52 = vrot.slane %v539_v31, 1  ;;  %v11694_v27 = vld [vmem:[#allocation2 + $0x78] sm:$0xff]   ;;  %v727_v31 = vshrl.u32 %v11729_v28, 16 }
  0x51   :  { %9375 = vmatprep.mubr.msk.bf16.mxu0 %vm11355_vm0, %v16463_v0  ;;  %9459 = vmatprep.mubr.msk.bf16.mxu1 %vm11355_vm0, %v16463_v0  ;;  %v559_v3 = vshrl.u32 %v11694_v27, 16  ;;  %v725_v23 = vrot.slane %v723_v12, 1 }
  0x52   :  { %v702_v35 = vsel %vm434_vm1, %v697_v22, %v11661_v51  ;;  %v705_v1 = vor.u32 %v703_v53, %v11661_v51  ;;  %v545_v5 = vor.u32 %v543_v56, %v11663_v52  ;;  %v739_v51 = vshll.u32 %v11043_v63, 16  ;;  %v11051_v63 = vld [vmem:[%s16459_s1 + $0xf8] sm:$0xff]  }
  0x53   :  { %v591_v22 = vshrl.u32 %v11824_v16, 16 }
  0x54   :  { %v710_v36 = vsel %vm434_vm1, %v705_v1, %v11671_v59  ;;  %v741_v25 = vrot.slane %v739_v51, 1  ;;  %v11056_v51 = vld [vmem:[%s16459_s1 + $0xe8] sm:$0xff]  }
  0x56   :  { %v742_v40 = vsel %vm434_vm1, %v737_v20, %v741_v25 }
  0x58   :  { %9376 = vmatmul.mubr.bf16.gmra.mxu0 %v486_v9  ;;  %9460 = vmatmul.mubr.bf16.gmra.mxu1 %v654_v14  ;;  %v665_v9 = vor.u32 %v663_v48, %v11561_v45  ;;  %v502_v14 = vsel %vm434_vm1, %v497_v4, %v11567_v47  ;;  %v555_v45 = vshll.u32 %v11694_v27, 16  ;;  %v719_v48 = vshrl.u32 %v11652_v38, 16  ;;  %v11812_v4 = vld [vmem:[#allocation2 + $0x90] sm:$0xff]  }
  0x59   :  { %9379 = vmatprep.mubr.msk.bf16.mxu0 %vm11355_vm0, %v16463_v0  ;;  %9463 = vmatprep.mubr.msk.bf16.mxu1 %vm11355_vm0, %v16463_v0  ;;  %v518_v47 = vsel %vm434_vm1, %v513_v24, %v11619_v15  ;;  %v529_v15 = vor.u32 %v527_v39, %v11645_v33  ;;  %v542_v33 = vsel %vm434_vm1, %v537_v61, %v11663_v52 }
  0x5a   :  { %v670_v17 = vsel %vm434_vm1, %v665_v9, %v11598_v2  ;;  %v11726_v2 = vrot.slane %v555_v45, 1  ;;  %v721_v21 = vor.u32 %v719_v48, %v11691_v18  ;;  %v11045_v9 = vld [vmem:[#allocation2 + $0x138] sm:$0xff]   ;;  %v729_v38 = vor.u32 %v727_v31, %v725_v23  ;;  %v194_v45 = vld [vmem:[#allocation2 + $0x140] sm:$0xf]  ;;  %v211_v48 = vld [vmem:[#allocation2 + $0x144] sm:$0x1] }
  0x5b   :  { %v534_v34 = vsel %vm434_vm1, %v529_v15, %v11655_v41  ;;  %v550_v41 = vsel %vm434_vm1, %v545_v5, %v11674_v62  ;;  %v747_v18 = vshll.u32 %v11045_v9, 16  ;;  %v11838_v28 = vcombine.low %v194_v45, %v211_v48  ;;  %v11847_v31 = vld [vmem:[#allocation2 + $0xa0] sm:$0xff]  }
  0x5c   :  { %v558_v52 = vsel %vm434_vm1, %v553_v13, %v11726_v2  ;;  %v726_v56 = vsel %vm434_vm1, %v721_v21, %v725_v23  ;;  %v561_v26 = vor.u32 %v559_v3, %v11726_v2  ;;  %v745_v3 = vor.u32 %v743_v60, %v741_v25  ;;  %v11055_v21 = vld [vmem:[%s16459_s1 + $0x130] sm:$0xff]   ;;  %v11192_v60 = vld [vmem:[#allocation2 + $0x18] sm:$0xff]  }
  0x5d   :  { %v751_v49 = vshrl.u32 %v11045_v9, 16  ;;  %v755_v6 = vshll.u32 %v11838_v28, 16  ;;  %v595_v23 = vshll.u32 %v11847_v31, 16  ;;  %v599_v61 = vshrl.u32 %v11847_v31, 16 }
  0x5e   :  { %v566_v62 = vsel %vm434_vm1, %v561_v26, %v565_v32  ;;  %v1688_v9 = vrot.slane %v11192_v60, 1  ;;  %v11059_v26 = vld [vmem:[%s16459_s1 + $0x120] sm:$0xff]  }
  0x5f   :  { %v757_v30 = vrot.slane %v755_v6, 1  ;;  %v11060_v6 = vld [vmem:[%s16459_s1 + $0xd8] sm:$0xff]  }
  0x60   :  { %9380 = vmatmul.mubr.bf16.gmra.mxu0 %v494_v57  ;;  %9464 = vmatmul.mubr.bf16.gmra.mxu1 %v662_v58  ;;  %v567_v57 = vshrl.u32 %v11731_v29, 16  ;;  %v11766_v58 = vld [vmem:[#allocation2 + $0x88] sm:$0xff]  }
  0x61   :  { %9383 = vmatprep.mubr.msk.bf16.mxu0 %vm11355_vm0, %v16463_v0  ;;  %9467 = vmatprep.mubr.msk.bf16.mxu1 %vm11355_vm0, %v16463_v0  ;;  %v571_v39 = vshll.u32 %v11766_v58, 16  ;;  %v575_v53 = vshrl.u32 %v11766_v58, 16 }
  0x62   :  { %v569_v27 = vor.u32 %v567_v57, %v565_v32  ;;  %v759_v32 = vshrl.u32 %v11838_v28, 16 }
  0x63   :  { %v573_v59 = vrot.slane %v571_v39, 1  ;;  %v11189_v39 = vld [vmem:[#allocation2 + $0x4] sm:$0xf] }
  0x65   :  { %v574_v24 = vsel %vm434_vm1, %v569_v27, %v573_v59  ;;  %v577_v2 = vor.u32 %v575_v53, %v573_v59  ;;  %v11191_v53 = vld [vmem:[#allocation2 + $0x10] sm:$0xff]   ;;  %v11057_v59 = vld [vmem:[%s16459_s1 + $0x128] sm:$0xff]  }
  0x66   :  { %v1686_v13 = vrot.slane %v11191_v53, 1  ;;  %v11194_v27 = vld [vmem:[#allocation2 + $0x28] sm:$0xff]  }
  0x67   :  { %v1692_v20 = vrot.slane %v11194_v27, 1 }
  0x68   :  { %9384 = vmatmul.mubr.bf16.gmra.mxu0 %v502_v14  ;;  %9468 = vmatmul.mubr.bf16.gmra.mxu1 %v670_v17  ;;  %v734_v14 = vsel %vm434_vm1, %v729_v38, %v733_v37  ;;  %v579_v17 = vshll.u32 %v11812_v4, 16  ;;  %v761_v37 = vor.u32 %v759_v32, %v757_v30  ;;  %v1689_v38 = vsel %vm1682_vm2, %v1686_v13, %v1688_v9  ;;  %v11196_v32 = vld [vmem:[#allocation2 + $0x38] sm:$0xff]  }
  0x69   :  { %9387 = vmatprep.mubr.msk.bf16.mxu0 %vm11355_vm0, %v16463_v0  ;;  %9471 = vmatprep.mubr.msk.bf16.mxu1 %vm11355_vm0, %v16463_v0 }
  0x70   :  { %9388 = vmatmul.mubr.bf16.gmra.mxu0 %v510_v42  ;;  %9472 = vmatmul.mubr.bf16.gmra.mxu1 %v678_v44  ;;  %v581_v42 = vrot.slane %v579_v17, 1  ;;  %v583_v44 = vshrl.u32 %v11812_v4, 16 }
  0x71   :  { %9391 = vmatprep.mubr.msk.bf16.mxu0 %vm11355_vm0, %v16463_v0  ;;  %9475 = vmatprep.mubr.msk.bf16.mxu1 %vm11355_vm0, %v16463_v0 }
  0x72   :  { %v582_v29 = vsel %vm434_vm1, %v577_v2, %v581_v42 }
  0x78   :  { %9392 = vmatmul.mubr.bf16.gmra.mxu0 %v518_v47  ;;  %9476 = vmatmul.mubr.bf16.gmra.mxu1 %v686_v55  ;;  %v749_v47 = vrot.slane %v747_v18, 1  ;;  %v587_v55 = vshll.u32 %v11824_v16, 16 }
  0x79   :  { %9395 = vmatprep.mubr.msk.bf16.mxu0 %vm11355_vm0, %v16463_v0  ;;  %9479 = vmatprep.mubr.msk.bf16.mxu1 %vm11355_vm0, %v16463_v0 }
  0x7a   :  { %v750_v46 = vsel %vm434_vm1, %v745_v3, %v749_v47  ;;  %v753_v12 = vor.u32 %v751_v49, %v749_v47  ;;  %v11195_v3 = vld [vmem:[#allocation2 + $0x30] sm:$0xff]  }
  0x7c   :  { %v758_v15 = vsel %vm434_vm1, %v753_v12, %v757_v30  ;;  %v11061_v12 = vld [vmem:[%s16459_s1 + $0x118] sm:$0xff]  }
  0x80   :  { %9396 = vmatmul.mubr.bf16.gmra.mxu0 %v526_v10  ;;  %9480 = vmatmul.mubr.bf16.gmra.mxu1 %v694_v11  ;;  %v585_v10 = vor.u32 %v583_v44, %v581_v42  ;;  %v589_v11 = vrot.slane %v587_v55, 1 }
  0x81   :  { %9399 = vmatprep.mubr.msk.bf16.mxu0 %vm11355_vm0, %v16463_v0  ;;  %9483 = vmatprep.mubr.msk.bf16.mxu1 %vm11355_vm0, %v16463_v0 }
  0x82   :  { %v590_v54 = vsel %vm434_vm1, %v585_v10, %v589_v11 }
  0x88   :  { %9400 = vmatmul.mubr.bf16.gmra.mxu0 %v534_v34  ;;  %9484 = vmatmul.mubr.bf16.gmra.mxu1 %v702_v35  ;;  %v593_v34 = vor.u32 %v591_v22, %v589_v11  ;;  %v597_v35 = vrot.slane %v595_v23, 1 }
  0x89   :  { %9403 = vmatprep.mubr.msk.bf16.mxu0 %vm11355_vm0, %v16463_v0  ;;  %9487 = vmatprep.mubr.msk.bf16.mxu1 %vm11355_vm0, %v16463_v0 }
  0x8a   :  { %v598_v57 = vsel %vm434_vm1, %v593_v34, %v597_v35  ;;  %v601_v1 = vor.u32 %v599_v61, %v597_v35  ;;  %v1696_v34 = vrot.slane %v11196_v32, 1 }
  0x90   :  { %9404 = vmatmul.mubr.bf16.gmra.mxu0 %v542_v33  ;;  %9488 = vmatmul.mubr.bf16.gmra.mxu1 %v710_v36  ;;  %v1661_v33 = vld [vmem:[#allocation2] sm:$0xe]  ;;  %v606_v36 = vsel %vm434_vm1, %v601_v1, %v11429_v19  ;;  %v11054_v19 = vld [vmem:[%s16459_s1 + $0xf0] sm:$0xff]  }
  0x91   :  { %9407 = vmatprep.mubr.msk.bf16.mxu0 %vm11355_vm0, %v16463_v0  ;;  %9491 = vmatprep.mubr.msk.bf16.mxu1 %vm11355_vm0, %v16463_v0  ;;  %v8657_v43 = vcombine.low %v1661_v33, %v11189_v39 }
  0x93   :  { %v1683_v5 = vrot.slane %v8657_v43, 1 }
  0x98   :  { %9408 = vmatmul.mubr.bf16.gmra.mxu0 %v550_v41  ;;  %9492 = vmatmul.mubr.bf16.gmra.mxu1 %v718_v50  ;;  %v1684_v41 = vrot.slane %v11190_v7, 1 }
  0x99   :  { %9411 = vmatprep.mubr.msk.bf16.mxu0 %vm11355_vm0, %v16463_v0  ;;  %9495 = vmatprep.mubr.msk.bf16.mxu1 %vm11355_vm0, %v16463_v0 }
  0x9a   :  { %v1685_v50 = vsel %vm1682_vm2, %v1683_v5, %v1684_v41 }
  0xa0   :  { %9412 = vmatmul.mubr.bf16.gmra.mxu0 %v558_v52  ;;  %9496 = vmatmul.mubr.bf16.gmra.mxu1 %v726_v56  ;;  %v11058_v52 = vld [vmem:[%s16459_s1 + $0xe0] sm:$0xff]   ;;  %v1687_v56 = vsel %vm1682_vm2, %v1684_v41, %v1686_v13 }
  0xa1   :  { %9415 = vmatprep.mubr.msk.bf16.mxu0 %vm11355_vm0, %v16463_v0  ;;  %9499 = vmatprep.mubr.msk.bf16.mxu1 %vm11355_vm0, %v16463_v0 }
  0xa8   :  { %9416 = vmatmul.mubr.bf16.gmra.mxu0 %v566_v62  ;;  %9500 = vmatmul.mubr.bf16.gmra.mxu1 %v734_v14  ;;  %v11193_v62 = vld [vmem:[#allocation2 + $0x20] sm:$0xff]  }
  0xa9   :  { %9419 = vmatprep.mubr.msk.bf16.mxu0 %vm11355_vm0, %v16463_v0  ;;  %9503 = vmatprep.mubr.msk.bf16.mxu1 %vm11355_vm0, %v16463_v0  ;;  %v1690_v14 = vrot.slane %v11193_v62, 1 }
  0xab   :  { %v1691_v17 = vsel %vm1682_vm2, %v1688_v9, %v1690_v14 }
  0xb0   :  { %9420 = vmatmul.mubr.bf16.gmra.mxu0 %v574_v24  ;;  %9504 = vmatmul.mubr.bf16.gmra.mxu1 %v742_v40  ;;  %v1693_v24 = vsel %vm1682_vm2, %v1690_v14, %v1692_v20 }
  0xb1   :  { %9423 = vmatprep.mubr.msk.bf16.mxu0 %vm11355_vm0, %v16463_v0  ;;  %9507 = vmatprep.mubr.msk.bf16.mxu1 %vm11355_vm0, %v16463_v0 }
  0xb8   :  { %9424 = vmatmul.mubr.bf16.gmra.mxu0 %v582_v29  ;;  %9508 = vmatmul.mubr.bf16.gmra.mxu1 %v750_v46  ;;  %v1694_v29 = vrot.slane %v11195_v3, 1 }
  0xb9   :  { %9427 = vmatprep.mubr.msk.bf16.mxu0 %vm11355_vm0, %v16463_v0  ;;  %9511 = vmatprep.mubr.msk.bf16.mxu1 %vm11355_vm0, %v16463_v0 }
  0xba   :  { %v1695_v30 = vsel %vm1682_vm2, %v1692_v20, %v1694_v29  ;;  %v1697_v1 = vsel %vm1682_vm2, %v1694_v29, %v1696_v34  ;;  %v11199_v20 = vld [vmem:[#allocation2 + $0x50] sm:$0xff]  }
  0xc0   :  { %9428 = vmatmul.mubr.bf16.gmra.mxu0 %v590_v54  ;;  %9512 = vmatmul.mubr.bf16.gmra.mxu1 %v758_v15 }
  0xc1   :  { %9431 = vmatprep.mubr.msk.bf16.mxu0 %vm11355_vm0, %v16463_v0  ;;  %9515 = vmatprep.mubr.msk.bf16.mxu1 %vm11355_vm0, %v16463_v0 }
  0xc8   :  { %9432 = vmatmul.mubr.bf16.gmra.mxu0 %v598_v57  ;;  %9516 = vmatmul.mubr.bf16.gmra.mxu1 %v761_v37 }
  0xc9   :  { %9435 = vmatprep.mubr.msk.bf16.mxu0 %vm11355_vm0, %v16463_v0  ;;  %9535 = vmatprep.mubr.msk.bf16.mxu1 %vm11355_vm0, %v16463_v0 }
  0xd0   :  { %9436 = vmatmul.mubr.bf16.gmra.mxu0 %v606_v36  ;;  %9536 = vmatmul.mubr.bf16.vlgmr.msra.gmra.mxu1 %v11415_v8  ;;  %v11053_v8 = vld [vmem:[%s16459_s1 + $0x138] sm:$0xff]  }
  0xd1   :  { %9539 = vmatprep.mubr.msk.bf16.mxu1 %vm11355_vm0, %v16463_v0  ;;  %9715 = vmatprep.mubr.msk.bf16.mxu0 %vm11355_vm0, %v16463_v0 }
  0xd2   :  { %9880 = vmatpush3.bf16.msra.mxu1 %v11051_v63  ;;  %v11197_v63 = vld [vmem:[#allocation2 + $0x40] sm:$0xff]  }
  0xd3   :  { %9881 = vmatprep.subr.bf16.mxu1 %v16463_v0  ;;  %v1698_v5 = vrot.slane %v11197_v63, 1 }
  0xd6   :  { %9882 = vmatpush3.bf16.msra.mxu1 %v11054_v19 }
  0xd7   :  { %9883 = vmatprep.subr.bf16.mxu1 %v16463_v0 }
  0xd8   :  { %9540 = vmatmul.mubr.bf16.gmra.mxu1 %v11190_v7  ;;  %9716 = vmatmul.mubr.bf16.vlgmr.msra.gmra.mxu0 %v1685_v50 }
  0xd9   :  { %10060 = vmatpush3.bf16.msra.mxu0 %v11053_v8  ;;  %9543 = vmatprep.mubr.msk.bf16.mxu1 %vm11355_vm0, %v16463_v0  ;;  %v1699_v8 = vsel %vm1682_vm2, %v1696_v34, %v1698_v5 }
  0xda   :  { %9719 = vmatprep.mubr.msk.bf16.mxu0 %vm11355_vm0, %v16463_v0  ;;  %10061 = vmatprep.subr.bf16.mxu0 %v16463_v0 }
  0xdb   :  { %9884 = vmatpush3.bf16.msra.mxu1 %v11056_v51 }
  0xdc   :  { %9885 = vmatprep.subr.bf16.mxu1 %v16463_v0 }
  0xdd   :  { %10062 = vmatpush3.bf16.msra.mxu0 %v11055_v21 }
  0xde   :  { %10063 = vmatprep.subr.bf16.mxu0 %v16463_v0 }
  0xdf   :  { %9886 = vmatpush3.bf16.msra.mxu1 %v11058_v52  ;;  %v11198_v52 = vld [vmem:[#allocation2 + $0x48] sm:$0xff]  }
  0xe0   :  { %9544 = vmatmul.mubr.bf16.gmra.mxu1 %v11191_v53  ;;  %9720 = vmatmul.mubr.bf16.gmra.mxu0 %v1687_v56  ;;  %v1700_v56 = vrot.slane %v11198_v52, 1 }
  0xe1   :  { %9547 = vmatprep.mubr.msk.bf16.mxu1 %vm11355_vm0, %v16463_v0  ;;  %9723 = vmatprep.mubr.msk.bf16.mxu0 %vm11355_vm0, %v16463_v0 }
  0xe2   :  { %10064 = vmatpush3.bf16.msra.mxu0 %v11057_v59  ;;  %9887 = vmatprep.subr.bf16.mxu1 %v16463_v0 }
  0xe3   :  { %10065 = vmatprep.subr.bf16.mxu0 %v16463_v0  ;;  %9888 = vmatpush3.bf16.msra.mxu1 %v11060_v6 }
  0xe4   :  { %9889 = vmatprep.subr.bf16.mxu1 %v16463_v0 }
  0xe6   :  { %10066 = vmatpush3.bf16.msra.mxu0 %v11059_v26 }
  0xe7   :  { %10067 = vmatprep.subr.bf16.mxu0 %v16463_v0 }
  0xe8   :  { %9548 = vmatmul.mubr.bf16.gmra.mxu1 %v11192_v60  ;;  %9724 = vmatmul.mubr.bf16.gmra.mxu0 %v1689_v38  ;;  %v1701_v38 = vsel %vm1682_vm2, %v1698_v5, %v1700_v56 }
  0xe9   :  { %9551 = vmatprep.mubr.msk.bf16.mxu1 %vm11355_vm0, %v16463_v0  ;;  %9727 = vmatprep.mubr.msk.bf16.mxu0 %vm11355_vm0, %v16463_v0 }
  0xea   :  { %10068 = vmatpush3.bf16.msra.mxu0 %v11061_v12  ;;  %v11200_v12 = vld [vmem:[#allocation2 + $0x58] sm:$0xff]  }
  0xeb   :  { %10069 = vmatprep.subr.bf16.mxu0 %v16463_v0 }
  0xf0   :  { %v11919_v18 = vpop.f32.mrf.mxu0  ;;  %v11921_v25 = vpop.f32.mrf.mxu1  ;;  %9552 = vmatmul.mubr.bf16.gmra.mxu1 %v11193_v62  ;;  %9728 = vmatmul.mubr.bf16.gmra.mxu0 %v1691_v17 }
  0xf1   :  { %9555 = vmatprep.mubr.msk.bf16.mxu1 %vm11355_vm0, %v16463_v0  ;;  %9731 = vmatprep.mubr.msk.bf16.mxu0 %vm11355_vm0, %v16463_v0 }
  0xf2   :  { %v9357_v42 = vpop.f32.mrf.mxu0  ;;  %v9441_v44 = vpop.f32.mrf.mxu1 }
  0xf3   :  { %v1702_v42 = vrot.slane %v11199_v20, 1 }
  0xf4   :  { %v11927_v45 = vpop.f32.mrf.mxu0  ;;  %v11929_v48 = vpop.f32.mrf.mxu1 }
  0xf6   :  { %v9358_v40 = vpop.f32.mrf.mxu0  ;;  %v9442_v47 = vpop.f32.mrf.mxu1 }
  0xf8   :  { %v11932_v55 = vpop.f32.mrf.mxu0  ;;  %v11934_v2 = vpop.f32.mrf.mxu1  ;;  %9556 = vmatmul.mubr.bf16.gmra.mxu1 %v11194_v27  ;;  %9732 = vmatmul.mubr.bf16.gmra.mxu0 %v1693_v24 }
  0xf9   :  { %9559 = vmatprep.mubr.msk.bf16.mxu1 %vm11355_vm0, %v16463_v0  ;;  %9735 = vmatprep.mubr.msk.bf16.mxu0 %vm11355_vm0, %v16463_v0 }
  0xfa   :  { %v9361_v46 = vpop.f32.mrf.mxu0  ;;  %v9445_v49 = vpop.f32.mrf.mxu1 }
  0xfc   :  { %v11943_v10 = vpop.f32.mrf.mxu0  ;;  %v11945_v11 = vpop.f32.mrf.mxu1 }
  0xfd   :  { %16629 = vst [vmem:[#allocation8_spill] sm:$0xff] %v11945_v11 }
  0xfe   :  { %v9362_v54 = vpop.f32.mrf.mxu0  ;;  %v9446_v15 = vpop.f32.mrf.mxu1 }
 0x100   :  { %v11953_v22 = vpop.f32.mrf.mxu0  ;;  %v11955_v23 = vpop.f32.mrf.mxu1  ;;  %9560 = vmatmul.mubr.bf16.gmra.mxu1 %v11195_v3  ;;  %9736 = vmatmul.mubr.bf16.gmra.mxu0 %v1695_v30  ;;  %v1703_v3 = vsel %vm1682_vm2, %v1700_v56, %v1702_v42  ;;  %v1704_v30 = vrot.slane %v11200_v12, 1 }
 0x101   :  { %16630 = vst [vmem:[#allocation9_spill] sm:$0xff] %v11955_v23  ;;  %9563 = vmatprep.mubr.msk.bf16.mxu1 %vm11355_vm0, %v16463_v0  ;;  %9739 = vmatprep.mubr.msk.bf16.mxu0 %vm11355_vm0, %v16463_v0 }
 0x102   :  { %v9365_v35 = vpop.f32.mrf.mxu0  ;;  %v9449_v37 = vpop.f32.mrf.mxu1 }
 0x103   :  { %v1705_v35 = vsel %vm1682_vm2, %v1702_v42, %v1704_v30  ;;  %v11062_v37 = vld [vmem:[%s16459_s1 + $0xd0] sm:$0xff]  }
 0x104   :  { %v11961_v57 = vpop.f32.mrf.mxu0  ;;  %v11963_v61 = vpop.f32.mrf.mxu1  ;;  %9890 = vmatpush3.bf16.msra.mxu1 %v11062_v37 }
 0x105   :  { %16631 = vst [vmem:[#allocation10_spill] sm:$0xff] %v11963_v61  ;;  %9891 = vmatprep.subr.bf16.mxu1 %v16463_v0 }
 0x106   :  { %v9366_v33 = vpop.f32.mrf.mxu0  ;;  %v9450_v36 = vpop.f32.mrf.mxu1 }
 0x107   :  { %v11063_v36 = vld [vmem:[%s16459_s1 + $0x110] sm:$0xff]  }
 0x108   :  { %v11966_v39 = vpop.f32.mrf.mxu0  ;;  %v11968_v43 = vpop.f32.mrf.mxu1  ;;  %9564 = vmatmul.mubr.bf16.gmra.mxu1 %v11196_v32  ;;  %9740 = vmatmul.mubr.bf16.gmra.mxu0 %v1697_v1 }
 0x109   :  { %16632 = vst [vmem:[#allocation11_spill] sm:$0xff] %v11968_v43  ;;  %9567 = vmatprep.mubr.msk.bf16.mxu1 %vm11355_vm0, %v16463_v0  ;;  %9743 = vmatprep.mubr.msk.bf16.mxu0 %vm11355_vm0, %v16463_v0 }
 0x10a   :  { %v9369_v7 = vpop.f32.mrf.mxu0  ;;  %v9453_v41 = vpop.f32.mrf.mxu1  ;;  %10070 = vmatpush3.bf16.msra.mxu0 %v11063_v36 }
 0x10b   :  { %v11201_v7 = vld [vmem:[#allocation2 + $0x60] sm:$0xff]   ;;  %10071 = vmatprep.subr.bf16.mxu0 %v16463_v0 }
 0x10c   :  { %v11974_v19 = vpop.f32.mrf.mxu0  ;;  %v11976_v50 = vpop.f32.mrf.mxu1  ;;  %v1706_v41 = vrot.slane %v11201_v7, 1 }
 0x10d   :  { %16633 = vst [vmem:[#allocation12_spill] sm:$0xff] %v11976_v50 }
 0x10e   :  { %v9370_v51 = vpop.f32.mrf.mxu0  ;;  %v9454_v53 = vpop.f32.mrf.mxu1  ;;  %v1707_v56 = vsel %vm1682_vm2, %v1704_v30, %v1706_v41 }
 0x110   :  { %v11979_v13 = vpop.f32.mrf.mxu0  ;;  %v11981_v21 = vpop.f32.mrf.mxu1  ;;  %9568 = vmatmul.mubr.bf16.gmra.mxu1 %v11197_v63  ;;  %9744 = vmatmul.mubr.bf16.gmra.mxu0 %v1699_v8 }
 0x111   :  { %16634 = vst [vmem:[#allocation13_spill] sm:$0xff] %v11981_v21  ;;  %9571 = vmatprep.mubr.msk.bf16.mxu1 %vm11355_vm0, %v16463_v0  ;;  %9747 = vmatprep.mubr.msk.bf16.mxu0 %vm11355_vm0, %v16463_v0 }
 0x112   :  { %v9373_v59 = vpop.f32.mrf.mxu0  ;;  %v9457_v60 = vpop.f32.mrf.mxu1 }
 0x114   :  { %v11987_v9 = vpop.f32.mrf.mxu0  ;;  %v11989_v26 = vpop.f32.mrf.mxu1 }
 0x115   :  { %16635 = vst [vmem:[#allocation14_spill] sm:$0xff] %v11989_v26 }
 0x116   :  { %v9374_v62 = vpop.f32.mrf.mxu0  ;;  %v9458_v14 = vpop.f32.mrf.mxu1 }
 0x117   :  { %v11202_v14 = vld [vmem:[#allocation2 + $0x68] sm:$0xff]  }
 0x118   :  { %v11992_v17 = vpop.f32.mrf.mxu0  ;;  %v11994_v27 = vpop.f32.mrf.mxu1  ;;  %9572 = vmatmul.mubr.bf16.gmra.mxu1 %v11198_v52  ;;  %9748 = vmatmul.mubr.bf16.gmra.mxu0 %v1701_v38 }
 0x119   :  { %16636 = vst [vmem:[#allocation15_spill] sm:$0xff] %v11994_v27  ;;  %9575 = vmatprep.mubr.msk.bf16.mxu1 %vm11355_vm0, %v16463_v0  ;;  %9751 = vmatprep.mubr.msk.bf16.mxu0 %vm11355_vm0, %v16463_v0 }
 0x11a   :  { %v9377_v44 = vpop.f32.mrf.mxu0  ;;  %v9461_v24 = vpop.f32.mrf.mxu1 }
 0x11c   :  { %v12000_v40 = vpop.f32.mrf.mxu0  ;;  %v12002_v47 = vpop.f32.mrf.mxu1 }
 0x11d   :  { %16637 = vst [vmem:[#allocation16_spill] sm:$0xff] %v12002_v47 }
 0x11e   :  { %v9378_v29 = vpop.f32.mrf.mxu0  ;;  %v9462_v46 = vpop.f32.mrf.mxu1 }
 0x120   :  { %v12005_v49 = vpop.f32.mrf.mxu0  ;;  %v12007_v6 = vpop.f32.mrf.mxu1  ;;  %9576 = vmatmul.mubr.bf16.gmra.mxu1 %v11199_v20  ;;  %9752 = vmatmul.mubr.bf16.gmra.mxu0 %v1703_v3  ;;  %v1708_v20 = vrot.slane %v11202_v14, 1 }
 0x121   :  { %16638 = vst [vmem:[#allocation17_spill] sm:$0xff] %v12007_v6  ;;  %9579 = vmatprep.mubr.msk.bf16.mxu1 %vm11355_vm0, %v16463_v0  ;;  %9755 = vmatprep.mubr.msk.bf16.mxu0 %vm11355_vm0, %v16463_v0 }
 0x122   :  { %v9381_v54 = vpop.f32.mrf.mxu0  ;;  %v9465_v15 = vpop.f32.mrf.mxu1  ;;  %v1709_v29 = vsel %vm1682_vm2, %v1706_v41, %v1708_v20 }
 0x123   :  { %v11203_v15 = vld [vmem:[#allocation2 + $0x70] sm:$0xff]  }
 0x124   :  { %v12013_v32 = vpop.f32.mrf.mxu0  ;;  %v12015_v34 = vpop.f32.mrf.mxu1 }
 0x125   :  { %16639 = vst [vmem:[#allocation18_spill] sm:$0xff] %v12015_v34 }
 0x126   :  { %v9382_v1 = vpop.f32.mrf.mxu0  ;;  %v9466_v33 = vpop.f32.mrf.mxu1 }
 0x128   :  { %v12024_v63 = vpop.f32.mrf.mxu0  ;;  %v12026_v5 = vpop.f32.mrf.mxu1  ;;  %9580 = vmatmul.mubr.bf16.gmra.mxu1 %v11200_v12  ;;  %9756 = vmatmul.mubr.bf16.gmra.mxu0 %v1705_v35  ;;  %v1710_v35 = vrot.slane %v11203_v15, 1 }
 0x129   :  { %16640 = vst [vmem:[#allocation19_spill] sm:$0xff] %v12026_v5  ;;  %9583 = vmatprep.mubr.msk.bf16.mxu1 %vm11355_vm0, %v16463_v0  ;;  %9759 = vmatprep.mubr.msk.bf16.mxu0 %vm11355_vm0, %v16463_v0 }
 0x12a   :  { %v9385_v8 = vpop.f32.mrf.mxu0  ;;  %v9469_v51 = vpop.f32.mrf.mxu1 }
 0x12c   :  { %v12034_v53 = vpop.f32.mrf.mxu0  ;;  %v12036_v52 = vpop.f32.mrf.mxu1 }
 0x12d   :  { %16641 = vst [vmem:[#allocation20_spill] sm:$0xff] %v12036_v52 }
 0x12e   :  { %v9386_v59 = vpop.f32.mrf.mxu0  ;;  %v9470_v60 = vpop.f32.mrf.mxu1 }
 0x12f   :  { %v11204_v59 = vld [vmem:[#allocation2 + $0x78] sm:$0xff]  }
 0x130   :  { %v12039_v38 = vpop.f32.mrf.mxu0  ;;  %v12041_v62 = vpop.f32.mrf.mxu1  ;;  %9584 = vmatmul.mubr.bf16.gmra.mxu1 %v11201_v7  ;;  %9760 = vmatmul.mubr.bf16.gmra.mxu0 %v1707_v56  ;;  %v1711_v7 = vsel %vm1682_vm2, %v1708_v20, %v1710_v35  ;;  %v1712_v60 = vrot.slane %v11204_v59, 1 }
 0x131   :  { %16642 = vst [vmem:[#allocation21_spill] sm:$0xff] %v12041_v62  ;;  %9587 = vmatprep.mubr.msk.bf16.mxu1 %vm11355_vm0, %v16463_v0  ;;  %9763 = vmatprep.mubr.msk.bf16.mxu0 %vm11355_vm0, %v16463_v0 }
 0x132   :  { %v9389_v42 = vpop.f32.mrf.mxu0  ;;  %v9473_v44 = vpop.f32.mrf.mxu1 }
 0x134   :  { %v12047_v24 = vpop.f32.mrf.mxu0  ;;  %v12049_v3 = vpop.f32.mrf.mxu1 }
 0x135   :  { %16643 = vst [vmem:[#allocation22_spill] sm:$0xff] %v12049_v3 }
 0x136   :  { %v9390_v46 = vpop.f32.mrf.mxu0  ;;  %v9474_v12 = vpop.f32.mrf.mxu1 }
 0x138   :  { %v12052_v30 = vpop.f32.mrf.mxu0  ;;  %v12054_v54 = vpop.f32.mrf.mxu1  ;;  %9588 = vmatmul.mubr.bf16.gmra.mxu1 %v11202_v14  ;;  %9764 = vmatmul.mubr.bf16.gmra.mxu0 %v1709_v29  ;;  %v1713_v29 = vsel %vm1682_vm2, %v1710_v35, %v1712_v60 }
 0x139   :  { %16644 = vst [vmem:[#allocation23_spill] sm:$0xff] %v12054_v54  ;;  %9591 = vmatprep.mubr.msk.bf16.mxu1 %vm11355_vm0, %v16463_v0  ;;  %9767 = vmatprep.mubr.msk.bf16.mxu0 %vm11355_vm0, %v16463_v0 }
 0x13a   :  { %v9393_v37 = vpop.f32.mrf.mxu0  ;;  %v9477_v1 = vpop.f32.mrf.mxu1 }
 0x13b   :  { %v11205_v1 = vld [vmem:[#allocation2 + $0x80] sm:$0xff]  }
 0x13c   :  { %v12060_v33 = vpop.f32.mrf.mxu0  ;;  %v12062_v36 = vpop.f32.mrf.mxu1 }
 0x13d   :  { %16645 = vst [vmem:[#allocation24_spill] sm:$0xff] %v12062_v36 }
 0x13e   :  { %v9394_v41 = vpop.f32.mrf.mxu0  ;;  %v9478_v8 = vpop.f32.mrf.mxu1 }
 0x140   :  { %v12065_v51 = vpop.f32.mrf.mxu0  ;;  %v12067_v56 = vpop.f32.mrf.mxu1  ;;  %9592 = vmatmul.mubr.bf16.gmra.mxu1 %v11203_v15  ;;  %9768 = vmatmul.mubr.bf16.gmra.mxu0 %v1711_v7  ;;  %v1714_v7 = vrot.slane %v11205_v1, 1 }
 0x141   :  { %16646 = vst [vmem:[#allocation25_spill] sm:$0xff] %v12067_v56  ;;  %9595 = vmatprep.mubr.msk.bf16.mxu1 %vm11355_vm0, %v16463_v0  ;;  %9771 = vmatprep.mubr.msk.bf16.mxu0 %vm11355_vm0, %v16463_v0 }
 0x142   :  { %v9397_v14 = vpop.f32.mrf.mxu0  ;;  %v9481_v42 = vpop.f32.mrf.mxu1 }
 0x143   :  { %v1715_v42 = vsel %vm1682_vm2, %v1712_v60, %v1714_v7  ;;  %v1716_v60 = vrot.slane %v11766_v58, 1 }
 0x144   :  { %v12073_v44 = vpop.f32.mrf.mxu0  ;;  %v12075_v20 = vpop.f32.mrf.mxu1 }
 0x145   :  { %16647 = vst [vmem:[#allocation26_spill] sm:$0xff] %v12075_v20 }
 0x146   :  { %v9398_v46 = vpop.f32.mrf.mxu0  ;;  %v9482_v12 = vpop.f32.mrf.mxu1 }
 0x147   :  { %v11065_v12 = vld [vmem:[%s16459_s1 + $0x108] sm:$0xff]  }
 0x148   :  { %v12078_v15 = vpop.f32.mrf.mxu0  ;;  %v12080_v37 = vpop.f32.mrf.mxu1  ;;  %9596 = vmatmul.mubr.bf16.gmra.mxu1 %v11204_v59  ;;  %9772 = vmatmul.mubr.bf16.gmra.mxu0 %v1713_v29  ;;  %v11064_v59 = vld [vmem:[%s16459_s1 + $0xc8] sm:$0xff]  }
 0x149   :  { %16648 = vst [vmem:[#allocation27_spill] sm:$0xff] %v12080_v37  ;;  %9599 = vmatprep.mubr.msk.bf16.mxu1 %vm11355_vm0, %v16463_v0  ;;  %9775 = vmatprep.mubr.msk.bf16.mxu0 %vm11355_vm0, %v16463_v0 }
 0x14a   :  { %v9401_v41 = vpop.f32.mrf.mxu0  ;;  %v9485_v8 = vpop.f32.mrf.mxu1  ;;  %9892 = vmatpush3.bf16.msra.mxu1 %v11064_v59  ;;  %10072 = vmatpush3.bf16.msra.mxu0 %v11065_v12  ;;  %v1718_v12 = vrot.slane %v11812_v4, 1 }
 0x14b   :  { %v16651_v8 = vmov 0.0  }
 0x14c   :  { %v12086_v14 = vpop.f32.mrf.mxu0  ;;  %v12088_v35 = vpop.f32.mrf.mxu1  ;;  %9893 = vmatprep.subr.bf16.mxu1 %v16651_v8  ;;  %10073 = vmatprep.subr.bf16.mxu0 %v16651_v8 }
 0x14d   :  { %16649 = vst [vmem:[#allocation28_spill] sm:$0xff] %v12088_v35 }
 0x14e   :  { %v9402_v29 = vpop.f32.mrf.mxu0  ;;  %v9486_v46 = vpop.f32.mrf.mxu1 }
 0x150   :  { %v12097_v0 = vpop.f32.mrf.mxu0  ;;  %v12099_v41 = vpop.f32.mrf.mxu1  ;;  %9600 = vmatmul.mubr.bf16.gmra.mxu1 %v11205_v1  ;;  %9776 = vmatmul.mubr.bf16.gmra.mxu0 %v1715_v42  ;;  %v1717_v1 = vsel %vm1682_vm2, %v1714_v7, %v1716_v60 }
 0x151   :  { %16650 = vst [vmem:[#allocation29_spill] sm:$0xff] %v12099_v41  ;;  %9603 = vmatprep.mubr.msk.bf16.mxu1 %vm11355_vm0, %v16651_v8  ;;  %9779 = vmatprep.mubr.msk.bf16.mxu0 %vm11355_vm0, %v16651_v8 }
 0x152   :  { %v9405_v29 = vpop.f32.mrf.mxu0  ;;  %v9489_v46 = vpop.f32.mrf.mxu1 }
 0x154   :  { %v12108_v59 = vpop.f32.mrf.mxu0  ;;  %v12110_v41 = vpop.f32.mrf.mxu1 }
 0x155   :  { %16652 = vst [vmem:[#allocation30_spill] sm:$0xff] %v12110_v41 }
 0x156   :  { %v9406_v42 = vpop.f32.mrf.mxu0  ;;  %v9490_v35 = vpop.f32.mrf.mxu1 }
 0x157   :  { %v1719_v42 = vsel %vm1682_vm2, %v1716_v60, %v1718_v12 }
 0x158   :  { %v12113_v37 = vpop.f32.mrf.mxu0  ;;  %v12115_v20 = vpop.f32.mrf.mxu1  ;;  %9604 = vmatmul.mubr.bf16.gmra.mxu1 %v11766_v58  ;;  %9780 = vmatmul.mubr.bf16.gmra.mxu0 %v1717_v1 }
 0x159   :  { %16653 = vst [vmem:[#allocation31_spill] sm:$0xff] %v12115_v20  ;;  %9607 = vmatprep.mubr.msk.bf16.mxu1 %vm11355_vm0, %v16651_v8  ;;  %9783 = vmatprep.mubr.msk.bf16.mxu0 %vm11355_vm0, %v16651_v8 }
 0x15a   :  { %v9409_v29 = vpop.f32.mrf.mxu0  ;;  %v9493_v46 = vpop.f32.mrf.mxu1 }
 0x15b   :  { %v1720_v29 = vrot.slane %v11824_v16, 1 }
 0x15c   :  { %v12123_v7 = vpop.f32.mrf.mxu0  ;;  %v12125_v35 = vpop.f32.mrf.mxu1 }
 0x15d   :  { %16654 = vst [vmem:[#allocation32_spill] sm:$0xff] %v12125_v35 }
 0x15e   :  { %v9410_v20 = vpop.f32.mrf.mxu0  ;;  %v9494_v41 = vpop.f32.mrf.mxu1 }
 0x15f   :  { %v1721_v41 = vsel %vm1682_vm2, %v1718_v12, %v1720_v29 }
 0x160   :  { %v12128_v58 = vpop.f32.mrf.mxu0  ;;  %v12130_v1 = vpop.f32.mrf.mxu1  ;;  %9608 = vmatmul.mubr.bf16.gmra.mxu1 %v11812_v4  ;;  %9784 = vmatmul.mubr.bf16.gmra.mxu0 %v1719_v42 }
 0x161   :  { %16655 = vst [vmem:[#allocation33_spill] sm:$0xff] %v12130_v1  ;;  %9611 = vmatprep.mubr.msk.bf16.mxu1 %vm11355_vm0, %v16651_v8  ;;  %9787 = vmatprep.mubr.msk.bf16.mxu0 %vm11355_vm0, %v16651_v8 }
 0x162   :  { %v9413_v46 = vpop.f32.mrf.mxu0  ;;  %v9497_v35 = vpop.f32.mrf.mxu1 }
 0x163   :  { %v1722_v35 = vrot.slane %v11847_v31, 1 }
 0x164   :  { %v12138_v60 = vpop.f32.mrf.mxu0  ;;  %v12140_v20 = vpop.f32.mrf.mxu1 }
 0x165   :  { %16656 = vst [vmem:[#allocation34_spill] sm:$0xff] %v12140_v20 }
 0x166   :  { %v9414_v1 = vpop.f32.mrf.mxu0  ;;  %v9498_v56 = vpop.f32.mrf.mxu1 }
 0x167   :  { %v1723_v1 = vsel %vm1682_vm2, %v1720_v29, %v1722_v35 }
 0x168   :  { %v12143_v4 = vpop.f32.mrf.mxu0  ;;  %v12145_v42 = vpop.f32.mrf.mxu1  ;;  %9612 = vmatmul.mubr.bf16.gmra.mxu1 %v11824_v16  ;;  %9788 = vmatmul.mubr.bf16.gmra.mxu0 %v1721_v41 }
 0x169   :  { %16657 = vst [vmem:[#allocation35_spill] sm:$0xff] %v12145_v42  ;;  %9615 = vmatprep.mubr.msk.bf16.mxu1 %vm11355_vm0, %v16651_v8  ;;  %9791 = vmatprep.mubr.msk.bf16.mxu0 %vm11355_vm0, %v16651_v8 }
 0x16a   :  { %v9417_v46 = vpop.f32.mrf.mxu0  ;;  %v9501_v20 = vpop.f32.mrf.mxu1 }
 0x16b   :  { %v11206_v20 = vld [vmem:[#allocation2 + $0xa8] sm:$0xff]  }
 0x16c   :  { %v12153_v12 = vpop.f32.mrf.mxu0  ;;  %v12155_v56 = vpop.f32.mrf.mxu1  ;;  %v1724_v46 = vrot.slane %v11206_v20, 1 }
 0x16d   :  { %16658 = vst [vmem:[#allocation36_spill] sm:$0xff] %v12155_v56 }
 0x16e   :  { %v9418_v42 = vpop.f32.mrf.mxu0  ;;  %v9502_v36 = vpop.f32.mrf.mxu1 }
 0x16f   :  { %v1725_v42 = vsel %vm1682_vm2, %v1722_v35, %v1724_v46 }
 0x170   :  { %v12158_v16 = vpop.f32.mrf.mxu0  ;;  %v12160_v41 = vpop.f32.mrf.mxu1  ;;  %9616 = vmatmul.mubr.bf16.gmra.mxu1 %v11847_v31  ;;  %9792 = vmatmul.mubr.bf16.gmra.mxu0 %v1723_v1  ;;  %v11066_v31 = vld [vmem:[%s16459_s1 + $0xc0] sm:$0xff]  }
 0x171   :  { %16659 = vst [vmem:[#allocation37_spill] sm:$0xff] %v12160_v41  ;;  %9619 = vmatprep.mubr.msk.bf16.mxu1 %vm11355_vm0, %v16651_v8  ;;  %9795 = vmatprep.mubr.msk.bf16.mxu0 %vm11355_vm0, %v16651_v8 }
 0x172   :  { %v9421_v56 = vpop.f32.mrf.mxu0  ;;  %v9505_v54 = vpop.f32.mrf.mxu1  ;;  %9894 = vmatpush3.bf16.msra.mxu1 %v11066_v31  ;;  %v11208_v31 = vld [vmem:[#allocation2 + $0xb8] sm:$0xff]  }
 0x173   :  { %v11207_v54 = vld [vmem:[#allocation2 + $0xb0] sm:$0xff]   ;;  %10239 = vmatprep.subr.bf16.mxu1 %v16651_v8 }
 0x174   :  { %v12167_v29 = vpop.f32.mrf.mxu0  ;;  %v12169_v36 = vpop.f32.mrf.mxu1  ;;  %v1726_v35 = vrot.slane %v11207_v54, 1 }
 0x175   :  { %16660 = vst [vmem:[#allocation38_spill] sm:$0xff] %v12169_v36 }
 0x176   :  { %v9422_v41 = vpop.f32.mrf.mxu0  ;;  %v9506_v3 = vpop.f32.mrf.mxu1 }
 0x177   :  { %v11067_v3 = vld [vmem:[%s16459_s1 + $0x100] sm:$0xff]  }
 0x178   :  { %v12175_v1 = vpop.f32.mrf.mxu0  ;;  %v12177_v62 = vpop.f32.mrf.mxu1  ;;  %9620 = vmatmul.mubr.bf16.gmra.mxu1 %v11206_v20  ;;  %9796 = vmatmul.mubr.bf16.gmra.mxu0 %v1725_v42 }
 0x179   :  { %16661 = vst [vmem:[#allocation39_spill] sm:$0xff] %v12177_v62  ;;  %9623 = vmatprep.mubr.msk.bf16.mxu1 %vm11355_vm0, %v16651_v8  ;;  %9799 = vmatprep.mubr.msk.bf16.mxu0 %vm11355_vm0, %v16651_v8  ;;  %v1727_v62 = vsel %vm1682_vm2, %v1724_v46, %v1726_v35 }
 0x17a   :  { %v9425_v56 = vpop.f32.mrf.mxu0  ;;  %v9509_v41 = vpop.f32.mrf.mxu1  ;;  %10074 = vmatpush3.bf16.msra.mxu0 %v11067_v3  ;;  %v1728_v3 = vrot.slane %v11208_v31, 1 }
 0x17b   :  { %10419 = vmatprep.subr.bf16.mxu0 %v16651_v8 }
 0x17c   :  { %v12187_v20 = vpop.f32.mrf.mxu0  ;;  %v12189_v42 = vpop.f32.mrf.mxu1 }
 0x17d   :  { %16662 = vst [vmem:[#allocation40_spill] sm:$0xff] %v12189_v42 }
 0x17e   :  { %v9426_v36 = vpop.f32.mrf.mxu0  ;;  %v9510_v52 = vpop.f32.mrf.mxu1 }
 0x17f   :  { %v1729_v52 = vsel %vm1682_vm2, %v1726_v35, %v1728_v3 }
 0x180   :  { %v12193_v5 = vpop.f32.mrf.mxu0  ;;  %v12195_v34 = vpop.f32.mrf.mxu1  ;;  %9624 = vmatmul.mubr.bf16.gmra.mxu1 %v11207_v54  ;;  %9800 = vmatmul.mubr.bf16.gmra.mxu0 %v1727_v62 }
 0x181   :  { %16663 = vst [vmem:[#allocation41_spill] sm:$0xff] %v12195_v34  ;;  %9627 = vmatprep.mubr.msk.bf16.mxu1 %vm11355_vm0, %v16651_v8  ;;  %9803 = vmatprep.mubr.msk.bf16.mxu0 %vm11355_vm0, %v16651_v8 }
 0x182   :  { %v9429_v56 = vpop.f32.mrf.mxu0  ;;  %v9513_v41 = vpop.f32.mrf.mxu1 }
 0x183   :  { %v11209_v56 = vld [vmem:[#allocation2 + $0xc0] sm:$0xff]  }
 0x184   :  { %v12201_v42 = vpop.f32.mrf.mxu0  ;;  %v12203_v46 = vpop.f32.mrf.mxu1  ;;  %v1730_v41 = vrot.slane %v11209_v56, 1 }
 0x185   :  { %16664 = vst [vmem:[#allocation42_spill] sm:$0xff] %v12203_v46 }
 0x186   :  { %v9430_v36 = vpop.f32.mrf.mxu0  ;;  %v9514_v34 = vpop.f32.mrf.mxu1 }
 0x187   :  { %v1731_v34 = vsel %vm1682_vm2, %v1728_v3, %v1730_v41 }
 0x188   :  { %v12206_v54 = vpop.f32.mrf.mxu0  ;;  %v12208_v62 = vpop.f32.mrf.mxu1  ;;  %9628 = vmatmul.mubr.bf16.gmra.mxu1 %v11208_v31  ;;  %9804 = vmatmul.mubr.bf16.gmra.mxu0 %v1729_v52 }
 0x189   :  { %16665 = vst [vmem:[#allocation43_spill] sm:$0xff] %v12208_v62  ;;  %9631 = vmatprep.mubr.msk.bf16.mxu1 %vm11355_vm0, %v16651_v8  ;;  %9807 = vmatprep.mubr.msk.bf16.mxu0 %vm11355_vm0, %v16651_v8 }
 0x18a   :  { %v9433_v6 = vpop.f32.mrf.mxu0  ;;  %v9517_v46 = vpop.f32.mrf.mxu1 }
 0x18b   :  { %v11210_v6 = vld [vmem:[#allocation2 + $0xc8] sm:$0xff]  }
 0x18c   :  { %v12214_v47 = vpop.f32.mrf.mxu0  ;;  %v1208_v35 = vpop.f32.mrf.mxu1  ;;  %v1732_v46 = vrot.slane %v11210_v6, 1 }
 0x18e   :  { %v9434_v36 = vpop.f32.mrf.mxu0  ;;  %v9518_v27 = vpop.f32.mrf.mxu1 }
 0x18f   :  { %v1733_v27 = vsel %vm1682_vm2, %v1730_v41, %v1732_v46 }
 0x190   :  { %v12217_v62 = vpop.f32.mrf.mxu0  ;;  %v1335_v31 = vpop.f32.mrf.mxu1  ;;  %9632 = vmatmul.mubr.bf16.gmra.mxu1 %v11209_v56  ;;  %9808 = vmatmul.mubr.bf16.gmra.mxu0 %v1731_v34 }
 0x191   :  { %9635 = vmatprep.mubr.msk.bf16.mxu1 %vm11355_vm0, %v16651_v8  ;;  %9811 = vmatprep.mubr.msk.bf16.mxu0 %vm11355_vm0, %v16651_v8  ;;  %v1336_v56 = vadd.f32 %v1335_v31, %v11919_v18 }
 0x192   :  { %v9437_v52 = vpop.f32.mrf.mxu0  ;;  %v9537_v26 = vpop.f32.mrf.mxu1 }
 0x193   :  { %v11211_v26 = vld [vmem:[#allocation2 + $0xd0] sm:$0xff]  }
 0x194   :  { %v12223_v35 = vpop.f32.mrf.mxu0  ;;  %v1338_v3 = vpop.f32.mrf.mxu1  ;;  %v1734_v52 = vrot.slane %v11211_v26, 1 }
 0x196   :  { %v9438_v36 = vpop.f32.mrf.mxu0  ;;  %v9538_v21 = vpop.f32.mrf.mxu1 }
 0x197   :  { %v1339_v21 = vadd.f32 %v1338_v3, %v11927_v45  ;;  %v11212_v45 = vld [vmem:[#allocation2 + $0xd8] sm:$0xff]  }
 0x198   :  { %v1343_v34 = vpop.f32.mrf.mxu1  ;;  %9636 = vmatmul.mubr.bf16.gmra.mxu1 %v11210_v6  ;;  %v1887_v50 = vpop.f32.mrf.mxu0  ;;  %9812 = vmatmul.mubr.bf16.gmra.mxu0 %v1733_v27  ;;  %v1735_v6 = vsel %vm1682_vm2, %v1732_v46, %v1734_v52 }
 0x199   :  { %v12227_v43 = vadd.f32 %v1887_v50, %v1336_v56  ;;  %9639 = vmatprep.mubr.msk.bf16.mxu1 %vm11355_vm0, %v16651_v8  ;;  %9815 = vmatprep.mubr.msk.bf16.mxu0 %vm11355_vm0, %v16651_v8  ;;  %v1344_v56 = vadd.f32 %v1343_v34, %v11932_v55 }
 0x19a   :  { %v9541_v61 = vpop.f32.mrf.mxu1  ;;  %v9717_v41 = vpop.f32.mrf.mxu0 }
 0x19b   :  { %16666 = vst [vmem:[#allocation44_spill] sm:$0xff] %v12227_v43  ;;  %v1736_v61 = vrot.slane %v11212_v45, 1 }
 0x19c   :  { %v1346_v36 = vpop.f32.mrf.mxu1  ;;  %v1890_v18 = vpop.f32.mrf.mxu0 }
 0x19d   :  { %v12234_v31 = vadd.f32 %v1890_v18, %v1339_v21  ;;  %v1347_v41 = vadd.f32 %v1346_v36, %v11943_v10  ;;  %v11213_v10 = vld [vmem:[#allocation2 + $0xe0] sm:$0xff]  }
 0x19e   :  { %v9542_v50 = vpop.f32.mrf.mxu1  ;;  %v9718_v27 = vpop.f32.mrf.mxu0  ;;  %v1738_v36 = vrot.slane %v11213_v10, 1 }
 0x1a0   :  { %v1351_v43 = vpop.f32.mrf.mxu1  ;;  %9640 = vmatmul.mubr.bf16.gmra.mxu1 %v11211_v26  ;;  %v1895_v23 = vpop.f32.mrf.mxu0  ;;  %9816 = vmatmul.mubr.bf16.gmra.mxu0 %v1735_v6  ;;  %v1737_v26 = vsel %vm1682_vm2, %v1734_v52, %v1736_v61 }
 0x1a1   :  { %v12238_v11 = vadd.f32 %v1895_v23, %v1344_v56  ;;  %9643 = vmatprep.mubr.msk.bf16.mxu1 %vm11355_vm0, %v16651_v8  ;;  %9819 = vmatprep.mubr.msk.bf16.mxu0 %vm11355_vm0, %v16651_v8  ;;  %v1352_v6 = vadd.f32 %v1351_v43, %v11953_v22 }
 0x1a2   :  { %v9545_v3 = vpop.f32.mrf.mxu1  ;;  %v9721_v46 = vpop.f32.mrf.mxu0 }
 0x1a4   :  { %v1354_v21 = vpop.f32.mrf.mxu1  ;;  %v1898_v55 = vpop.f32.mrf.mxu0 }
 0x1a5   :  { %v12245_v34 = vadd.f32 %v1898_v55, %v1347_v41  ;;  %v1355_v46 = vadd.f32 %v1354_v21, %v11961_v57  ;;  %v11214_v57 = vld [vmem:[#allocation2 + $0xe8] sm:$0xff]  }
 0x1a6   :  { %v9546_v23 = vpop.f32.mrf.mxu1  ;;  %v9722_v18 = vpop.f32.mrf.mxu0  ;;  %v1740_v21 = vrot.slane %v11214_v57, 1 }
 0x1a8   :  { %v1359_v50 = vpop.f32.mrf.mxu1  ;;  %9644 = vmatmul.mubr.bf16.gmra.mxu1 %v11212_v45  ;;  %v1903_v27 = vpop.f32.mrf.mxu0  ;;  %9820 = vmatmul.mubr.bf16.gmra.mxu0 %v1737_v26  ;;  %v1739_v45 = vsel %vm1682_vm2, %v1736_v61, %v1738_v36 }
 0x1a9   :  { %v12249_v56 = vadd.f32 %v1903_v27, %v1352_v6  ;;  %9647 = vmatprep.mubr.msk.bf16.mxu1 %vm11355_vm0, %v16651_v8  ;;  %9823 = vmatprep.mubr.msk.bf16.mxu0 %vm11355_vm0, %v16651_v8  ;;  %v1360_v23 = vadd.f32 %v1359_v50, %v11966_v39 }
 0x1aa   :  { %v9549_v3 = vpop.f32.mrf.mxu1  ;;  %v9725_v52 = vpop.f32.mrf.mxu0 }
 0x1ac   :  { %v1362_v41 = vpop.f32.mrf.mxu1  ;;  %v1906_v22 = vpop.f32.mrf.mxu0 }
 0x1ad   :  { %v12256_v43 = vadd.f32 %v1906_v22, %v1355_v46  ;;  %v1363_v52 = vadd.f32 %v1362_v41, %v11974_v19  ;;  %v11215_v19 = vld [vmem:[#allocation2 + $0xf0] sm:$0xff]  }
 0x1ae   :  { %v9550_v55 = vpop.f32.mrf.mxu1  ;;  %v9726_v26 = vpop.f32.mrf.mxu0  ;;  %v1742_v41 = vrot.slane %v11215_v19, 1 }
 0x1b0   :  { %v1367_v18 = vpop.f32.mrf.mxu1  ;;  %9648 = vmatmul.mubr.bf16.gmra.mxu1 %v11213_v10  ;;  %v1911_v6 = vpop.f32.mrf.mxu0  ;;  %9824 = vmatmul.mubr.bf16.gmra.mxu0 %v1739_v45  ;;  %v1741_v10 = vsel %vm1682_vm2, %v1738_v36, %v1740_v21 }
 0x1b1   :  { %v12260_v27 = vadd.f32 %v1911_v6, %v1360_v23  ;;  %9651 = vmatprep.mubr.msk.bf16.mxu1 %vm11355_vm0, %v16651_v8  ;;  %9827 = vmatprep.mubr.msk.bf16.mxu0 %vm11355_vm0, %v16651_v8  ;;  %v1368_v55 = vadd.f32 %v1367_v18, %v11979_v13 }
 0x1b2   :  { %v9553_v3 = vpop.f32.mrf.mxu1  ;;  %v9729_v61 = vpop.f32.mrf.mxu0 }
 0x1b4   :  { %v1370_v46 = vpop.f32.mrf.mxu1  ;;  %v1914_v39 = vpop.f32.mrf.mxu0 }
 0x1b5   :  { %v12267_v50 = vadd.f32 %v1914_v39, %v1363_v52  ;;  %v1371_v61 = vadd.f32 %v1370_v46, %v11987_v9  ;;  %v11216_v9 = vld [vmem:[#allocation2 + $0xf8] sm:$0xff]  }
 0x1b6   :  { %v9554_v22 = vpop.f32.mrf.mxu1  ;;  %v9730_v45 = vpop.f32.mrf.mxu0  ;;  %v1744_v46 = vrot.slane %v11216_v9, 1 }
 0x1b8   :  { %v1375_v26 = vpop.f32.mrf.mxu1  ;;  %9652 = vmatmul.mubr.bf16.gmra.mxu1 %v11214_v57  ;;  %v1919_v23 = vpop.f32.mrf.mxu0  ;;  %9828 = vmatmul.mubr.bf16.gmra.mxu0 %v1741_v10  ;;  %v1743_v57 = vsel %vm1682_vm2, %v1740_v21, %v1742_v41 }
 0x1b9   :  { %v12271_v6 = vadd.f32 %v1919_v23, %v1368_v55  ;;  %9655 = vmatprep.mubr.msk.bf16.mxu1 %vm11355_vm0, %v16651_v8  ;;  %9831 = vmatprep.mubr.msk.bf16.mxu0 %vm11355_vm0, %v16651_v8  ;;  %v1376_v22 = vadd.f32 %v1375_v26, %v11992_v17 }
 0x1ba   :  { %v9557_v3 = vpop.f32.mrf.mxu1  ;;  %v9733_v36 = vpop.f32.mrf.mxu0 }
 0x1bc   :  { %v1378_v52 = vpop.f32.mrf.mxu1  ;;  %v1922_v13 = vpop.f32.mrf.mxu0 }
 0x1bd   :  { %v12278_v18 = vadd.f32 %v1922_v13, %v1371_v61  ;;  %v1379_v36 = vadd.f32 %v1378_v52, %v12000_v40  ;;  %v11217_v40 = vld [vmem:[#allocation2 + $0x100] sm:$0xff]  }
 0x1be   :  { %v9558_v39 = vpop.f32.mrf.mxu1  ;;  %v9734_v10 = vpop.f32.mrf.mxu0  ;;  %v1746_v52 = vrot.slane %v11217_v40, 1 }
 0x1c0   :  { %v1383_v45 = vpop.f32.mrf.mxu1  ;;  %9656 = vmatmul.mubr.bf16.gmra.mxu1 %v11215_v19  ;;  %v1927_v55 = vpop.f32.mrf.mxu0  ;;  %9832 = vmatmul.mubr.bf16.gmra.mxu0 %v1743_v57  ;;  %v1745_v19 = vsel %vm1682_vm2, %v1742_v41, %v1744_v46 }
 0x1c1   :  { %v12282_v23 = vadd.f32 %v1927_v55, %v1376_v22  ;;  %9659 = vmatprep.mubr.msk.bf16.mxu1 %vm11355_vm0, %v16651_v8  ;;  %9835 = vmatprep.mubr.msk.bf16.mxu0 %vm11355_vm0, %v16651_v8  ;;  %v1384_v39 = vadd.f32 %v1383_v45, %v12005_v49 }
 0x1c2   :  { %v9561_v3 = vpop.f32.mrf.mxu1  ;;  %v9737_v21 = vpop.f32.mrf.mxu0 }
 0x1c4   :  { %v1386_v61 = vpop.f32.mrf.mxu1  ;;  %v1930_v17 = vpop.f32.mrf.mxu0 }
 0x1c5   :  { %v12289_v26 = vadd.f32 %v1930_v17, %v1379_v36  ;;  %v1387_v21 = vadd.f32 %v1386_v61, %v12013_v32  ;;  %v11218_v32 = vld [vmem:[#allocation2 + $0x108] sm:$0xff]  }
 0x1c6   :  { %v9562_v13 = vpop.f32.mrf.mxu1  ;;  %v9738_v57 = vpop.f32.mrf.mxu0  ;;  %v1748_v61 = vrot.slane %v11218_v32, 1 }
 0x1c8   :  { %v1391_v10 = vpop.f32.mrf.mxu1  ;;  %9660 = vmatmul.mubr.bf16.gmra.mxu1 %v11216_v9  ;;  %v1935_v22 = vpop.f32.mrf.mxu0  ;;  %9836 = vmatmul.mubr.bf16.gmra.mxu0 %v1745_v19  ;;  %v1747_v9 = vsel %vm1682_vm2, %v1744_v46, %v1746_v52 }
 0x1c9   :  { %v12293_v55 = vadd.f32 %v1935_v22, %v1384_v39  ;;  %9663 = vmatprep.mubr.msk.bf16.mxu1 %vm11355_vm0, %v16651_v8  ;;  %9839 = vmatprep.mubr.msk.bf16.mxu0 %vm11355_vm0, %v16651_v8  ;;  %v1392_v13 = vadd.f32 %v1391_v10, %v12024_v63 }
 0x1ca   :  { %v9565_v3 = vpop.f32.mrf.mxu1  ;;  %v9741_v41 = vpop.f32.mrf.mxu0 }
 0x1cc   :  { %v1394_v36 = vpop.f32.mrf.mxu1  ;;  %v1938_v49 = vpop.f32.mrf.mxu0 }
 0x1cd   :  { %v12300_v45 = vadd.f32 %v1938_v49, %v1387_v21  ;;  %v1395_v41 = vadd.f32 %v1394_v36, %v12034_v53  ;;  %v11219_v53 = vld [vmem:[#allocation2 + $0x110] sm:$0xff]  }
 0x1ce   :  { %v9566_v17 = vpop.f32.mrf.mxu1  ;;  %v9742_v19 = vpop.f32.mrf.mxu0  ;;  %v1750_v36 = vrot.slane %v11219_v53, 1 }
 0x1d0   :  { %v1399_v57 = vpop.f32.mrf.mxu1  ;;  %9664 = vmatmul.mubr.bf16.gmra.mxu1 %v11217_v40  ;;  %v1943_v39 = vpop.f32.mrf.mxu0  ;;  %9840 = vmatmul.mubr.bf16.gmra.mxu0 %v1747_v9  ;;  %v1749_v40 = vsel %vm1682_vm2, %v1746_v52, %v1748_v61 }
 0x1d1   :  { %v12304_v22 = vadd.f32 %v1943_v39, %v1392_v13  ;;  %9667 = vmatprep.mubr.msk.bf16.mxu1 %vm11355_vm0, %v16651_v8  ;;  %9843 = vmatprep.mubr.msk.bf16.mxu0 %vm11355_vm0, %v16651_v8  ;;  %v1400_v17 = vadd.f32 %v1399_v57, %v12039_v38 }
 0x1d2   :  { %v9569_v3 = vpop.f32.mrf.mxu1  ;;  %v9745_v46 = vpop.f32.mrf.mxu0 }
 0x1d4   :  { %v1402_v21 = vpop.f32.mrf.mxu1  ;;  %v1946_v63 = vpop.f32.mrf.mxu0 }
 0x1d5   :  { %v12311_v10 = vadd.f32 %v1946_v63, %v1395_v41  ;;  %v1403_v46 = vadd.f32 %v1402_v21, %v12047_v24  ;;  %v11220_v24 = vld [vmem:[#allocation2 + $0x118] sm:$0xff]  }
 0x1d6   :  { %v9570_v49 = vpop.f32.mrf.mxu1  ;;  %v9746_v9 = vpop.f32.mrf.mxu0  ;;  %v1752_v21 = vrot.slane %v11220_v24, 1 }
 0x1d8   :  { %v1407_v19 = vpop.f32.mrf.mxu1  ;;  %9668 = vmatmul.mubr.bf16.gmra.mxu1 %v11218_v32  ;;  %v1951_v13 = vpop.f32.mrf.mxu0  ;;  %9844 = vmatmul.mubr.bf16.gmra.mxu0 %v1749_v40  ;;  %v1751_v32 = vsel %vm1682_vm2, %v1748_v61, %v1750_v36 }
 0x1d9   :  { %v12315_v39 = vadd.f32 %v1951_v13, %v1400_v17  ;;  %9671 = vmatprep.mubr.msk.bf16.mxu1 %vm11355_vm0, %v16651_v8  ;;  %9847 = vmatprep.mubr.msk.bf16.mxu0 %vm11355_vm0, %v16651_v8  ;;  %v1408_v49 = vadd.f32 %v1407_v19, %v12052_v30 }
 0x1da   :  { %v9573_v3 = vpop.f32.mrf.mxu1  ;;  %v9749_v52 = vpop.f32.mrf.mxu0 }
 0x1dc   :  { %v1410_v41 = vpop.f32.mrf.mxu1  ;;  %v1954_v38 = vpop.f32.mrf.mxu0 }
 0x1dd   :  { %v12322_v57 = vadd.f32 %v1954_v38, %v1403_v46  ;;  %v1411_v52 = vadd.f32 %v1410_v41, %v12060_v33  ;;  %v11221_v33 = vld [vmem:[#allocation2 + $0x120] sm:$0xff]  }
 0x1de   :  { %v9574_v63 = vpop.f32.mrf.mxu1  ;;  %v9750_v40 = vpop.f32.mrf.mxu0  ;;  %v1754_v41 = vrot.slane %v11221_v33, 1 }
 0x1e0   :  { %v1415_v9 = vpop.f32.mrf.mxu1  ;;  %9672 = vmatmul.mubr.bf16.gmra.mxu1 %v11219_v53  ;;  %v1959_v17 = vpop.f32.mrf.mxu0  ;;  %9848 = vmatmul.mubr.bf16.gmra.mxu0 %v1751_v32  ;;  %v1753_v53 = vsel %vm1682_vm2, %v1750_v36, %v1752_v21 }
 0x1e1   :  { %v12326_v13 = vadd.f32 %v1959_v17, %v1408_v49  ;;  %9675 = vmatprep.mubr.msk.bf16.mxu1 %vm11355_vm0, %v16651_v8  ;;  %9851 = vmatprep.mubr.msk.bf16.mxu0 %vm11355_vm0, %v16651_v8  ;;  %v1416_v63 = vadd.f32 %v1415_v9, %v12065_v51 }
 0x1e2   :  { %v9577_v3 = vpop.f32.mrf.mxu1  ;;  %v9753_v61 = vpop.f32.mrf.mxu0 }
 0x1e4   :  { %v1418_v46 = vpop.f32.mrf.mxu1  ;;  %v1962_v30 = vpop.f32.mrf.mxu0 }
 0x1e5   :  { %v12333_v19 = vadd.f32 %v1962_v30, %v1411_v52  ;;  %v1419_v61 = vadd.f32 %v1418_v46, %v12073_v44  ;;  %v11222_v44 = vld [vmem:[#allocation2 + $0x128] sm:$0xff]  }
 0x1e6   :  { %v9578_v38 = vpop.f32.mrf.mxu1  ;;  %v9754_v32 = vpop.f32.mrf.mxu0  ;;  %v1756_v46 = vrot.slane %v11222_v44, 1 }
 0x1e8   :  { %v1423_v40 = vpop.f32.mrf.mxu1  ;;  %9676 = vmatmul.mubr.bf16.gmra.mxu1 %v11220_v24  ;;  %v1967_v49 = vpop.f32.mrf.mxu0  ;;  %9852 = vmatmul.mubr.bf16.gmra.mxu0 %v1753_v53  ;;  %v1755_v24 = vsel %vm1682_vm2, %v1752_v21, %v1754_v41 }
 0x1e9   :  { %v12337_v17 = vadd.f32 %v1967_v49, %v1416_v63  ;;  %9679 = vmatprep.mubr.msk.bf16.mxu1 %vm11355_vm0, %v16651_v8  ;;  %9855 = vmatprep.mubr.msk.bf16.mxu0 %vm11355_vm0, %v16651_v8  ;;  %v1424_v38 = vadd.f32 %v1423_v40, %v12078_v15 }
 0x1ea   :  { %v9581_v3 = vpop.f32.mrf.mxu1  ;;  %v9757_v36 = vpop.f32.mrf.mxu0 }
 0x1ec   :  { %v1426_v52 = vpop.f32.mrf.mxu1  ;;  %v1970_v51 = vpop.f32.mrf.mxu0 }
 0x1ed   :  { %v12344_v9 = vadd.f32 %v1970_v51, %v1419_v61  ;;  %v1427_v36 = vadd.f32 %v1426_v52, %v12086_v14  ;;  %v11223_v14 = vld [vmem:[#allocation2 + $0x130] sm:$0xff]  }
 0x1ee   :  { %v9582_v30 = vpop.f32.mrf.mxu1  ;;  %v9758_v53 = vpop.f32.mrf.mxu0  ;;  %v1758_v52 = vrot.slane %v11223_v14, 1 }
 0x1f0   :  { %v1431_v32 = vpop.f32.mrf.mxu1  ;;  %9680 = vmatmul.mubr.bf16.gmra.mxu1 %v11221_v33  ;;  %v1975_v63 = vpop.f32.mrf.mxu0  ;;  %9856 = vmatmul.mubr.bf16.gmra.mxu0 %v1755_v24  ;;  %v1757_v33 = vsel %vm1682_vm2, %v1754_v41, %v1756_v46 }
 0x1f1   :  { %v12348_v49 = vadd.f32 %v1975_v63, %v1424_v38  ;;  %9683 = vmatprep.mubr.msk.bf16.mxu1 %vm11355_vm0, %v16651_v8  ;;  %9859 = vmatprep.mubr.msk.bf16.mxu0 %vm11355_vm0, %v16651_v8  ;;  %v1432_v30 = vadd.f32 %v1431_v32, %v12097_v0 }
 0x1f2   :  { %v9585_v3 = vpop.f32.mrf.mxu1  ;;  %v9761_v21 = vpop.f32.mrf.mxu0 }
 0x1f4   :  { %v1434_v61 = vpop.f32.mrf.mxu1  ;;  %v1978_v15 = vpop.f32.mrf.mxu0 }
 0x1f5   :  { %v12355_v40 = vadd.f32 %v1978_v15, %v1427_v36  ;;  %v1435_v21 = vadd.f32 %v1434_v61, %v12108_v59  ;;  %v11224_v59 = vld [vmem:[#allocation2 + $0x138] sm:$0xff]  }
 0x1f6   :  { %v9586_v51 = vpop.f32.mrf.mxu1  ;;  %v9762_v24 = vpop.f32.mrf.mxu0  ;;  %v1760_v61 = vrot.slane %v11224_v59, 1 }
 0x1f8   :  { %v1439_v53 = vpop.f32.mrf.mxu1  ;;  %9684 = vmatmul.mubr.bf16.gmra.mxu1 %v11222_v44  ;;  %v1983_v38 = vpop.f32.mrf.mxu0  ;;  %9860 = vmatmul.mubr.bf16.gmra.mxu0 %v1757_v33  ;;  %v1759_v44 = vsel %vm1682_vm2, %v1756_v46, %v1758_v52 }
 0x1f9   :  { %v12359_v63 = vadd.f32 %v1983_v38, %v1432_v30  ;;  %9687 = vmatprep.mubr.msk.bf16.mxu1 %vm11355_vm0, %v16651_v8  ;;  %9863 = vmatprep.mubr.msk.bf16.mxu0 %vm11355_vm0, %v16651_v8  ;;  %v1440_v51 = vadd.f32 %v1439_v53, %v12113_v37 }
 0x1fa   :  { %v9589_v3 = vpop.f32.mrf.mxu1  ;;  %v9765_v41 = vpop.f32.mrf.mxu0 }
 0x1fc   :  { %v1442_v36 = vpop.f32.mrf.mxu1  ;;  %v1986_v0 = vpop.f32.mrf.mxu0 }
 0x1fd   :  { %v12366_v32 = vadd.f32 %v1986_v0, %v1435_v21  ;;  %v1443_v41 = vadd.f32 %v1442_v36, %v12123_v7  ;;  %v1762_v7 = vrot.slane %v11838_v28, 1  ;;  %v2294_v36 = vld [vmem:[#allocation2 + $0x8] sm:$0xe] }
 0x1fe   :  { %v9590_v15 = vpop.f32.mrf.mxu1  ;;  %v9766_v33 = vpop.f32.mrf.mxu0 }
 0x200   :  { %v1447_v24 = vpop.f32.mrf.mxu1  ;;  %9688 = vmatmul.mubr.bf16.gmra.mxu1 %v11223_v14  ;;  %v1991_v30 = vpop.f32.mrf.mxu0  ;;  %9864 = vmatmul.mubr.bf16.gmra.mxu0 %v1759_v44  ;;  %v1761_v14 = vsel %vm1682_vm2, %v1758_v52, %v1760_v61  ;;  %v2295_v52 = vld [vmem:[#allocation2 + $0xc] sm:$0xf] }
 0x201   :  { %v12370_v38 = vadd.f32 %v1991_v30, %v1440_v51  ;;  %9691 = vmatprep.mubr.msk.bf16.mxu1 %vm11355_vm0, %v16651_v8  ;;  %9867 = vmatprep.mubr.msk.bf16.mxu0 %vm11355_vm0, %v16651_v8  ;;  %v1448_v15 = vadd.f32 %v1447_v24, %v12128_v58 }
 0x202   :  { %v9593_v3 = vpop.f32.mrf.mxu1  ;;  %v9769_v46 = vpop.f32.mrf.mxu0 }
 0x203   :  { %16667 = vst [vmem:[#allocation45_spill] sm:$0xff] %v12370_v38 }
 0x204   :  { %v1450_v21 = vpop.f32.mrf.mxu1  ;;  %v1994_v37 = vpop.f32.mrf.mxu0 }
 0x205   :  { %v12377_v53 = vadd.f32 %v1994_v37, %v1443_v41  ;;  %v1451_v58 = vadd.f32 %v1450_v21, %v12138_v60  ;;  %v11225_v41 = vld [vmem:[#allocation2 + $0x140] sm:$0xf] }
 0x206   :  { %v9594_v0 = vpop.f32.mrf.mxu1  ;;  %v9770_v44 = vpop.f32.mrf.mxu0  ;;  %v8632_v37 = vcombine.low %v11225_v41, %v11225_v41  ;;  %v12400_v41 = vld [vmem:[#allocation2 + $0x18] sm:$0xff]  }
 0x207   :  { %16668 = vst [vmem:[#allocation46_spill] sm:$0xff] %v12377_v53  ;;  %v1763_v44 = vsel %vm1682_vm2, %v1760_v61, %v1762_v7 }
 0x208   :  { %v1455_v33 = vpop.f32.mrf.mxu1  ;;  %9692 = vmatmul.mubr.bf16.gmra.mxu1 %v11224_v59  ;;  %v1999_v51 = vpop.f32.mrf.mxu0  ;;  %9868 = vmatmul.mubr.bf16.gmra.mxu0 %v1761_v14  ;;  %v8682_v14 = vcombine.low %v2294_v36, %v2295_v52 }
 0x209   :  { %v12381_v30 = vadd.f32 %v1999_v51, %v1448_v15  ;;  %9695 = vmatprep.mubr.msk.bf16.mxu1 %vm11355_vm0, %v16651_v8  ;;  %9871 = vmatprep.mubr.msk.bf16.mxu0 %vm11355_vm0, %v16651_v8  ;;  %v11070_v15 = vld [vmem:[#allocation2 + $0x10] sm:$0xff]   ;;  %v1456_v28 = vadd.f32 %v1455_v33, %v12143_v4 }
 0x20a   :  { %v9597_v3 = vpop.f32.mrf.mxu1  ;;  %v9773_v46 = vpop.f32.mrf.mxu0  ;;  %v3232_v60 = vshrl.u32 %v8682_v14, 16  ;;  %v3235_v21 = vshll.u32 %v8682_v14, 16  ;;  %v2599_v61 = vrot.slane %v11070_v15, 1  ;;  %v3240_v36 = vshrl.u32 %v11070_v15, 16 }
 0x20b   :  { %16669 = vst [vmem:[#allocation47_spill] sm:$0xff] %v12381_v30  ;;  %v2598_v46 = vrot.slane %v8682_v14, 1 }
 0x20c   :  { %v1458_v24 = vpop.f32.mrf.mxu1  ;;  %v2002_v59 = vpop.f32.mrf.mxu0  ;;  %v3237_v14 = vrot.slane %v3235_v21, 2 }
 0x20d   :  { %v12389_v0 = vadd.f32 %v2002_v59, %v1451_v58  ;;  %v1459_v33 = vadd.f32 %v1458_v24, %v12153_v12 }
 0x20e   :  { %v9598_v51 = vpop.f32.mrf.mxu1  ;;  %v9774_v30 = vpop.f32.mrf.mxu0 }
 0x20f   :  { %16670 = vst [vmem:[#allocation48_spill] sm:$0xff] %v12389_v0  ;;  %v3243_v30 = vshll.u32 %v11070_v15, 16  ;;  %v2600_v51 = vsel %vm1682_vm2, %v2598_v46, %v2599_v61  ;;  %v11071_v15 = vld [vmem:[%s16459_s1 + $0x178] sm:$0xff]  }
 0x210   :  { %v1463_v53 = vpop.f32.mrf.mxu1  ;;  %9696 = vmatmul.mubr.bf16.gmra.mxu1 %v8632_v37  ;;  %v2007_v3 = vpop.f32.mrf.mxu0  ;;  %9872 = vmatmul.mubr.bf16.gmra.mxu0 %v1763_v44  ;;  %v3234_v37 = vrot.slane %v3232_v60, 1  ;;  %v2601_v60 = vrot.slane %v12400_v41, 1 }
 0x211   :  { %v12393_v38 = vadd.f32 %v2007_v3, %v1456_v28  ;;  %9875 = vmatprep.mubr.msk.bf16.mxu0 %vm11355_vm0, %v16651_v8  ;;  %9895 = vmatprep.mubr.msk.bf16.mxu1 %vm11355_vm0, %v16651_v8  ;;  %v3242_v28 = vrot.slane %v3240_v36, 1  ;;  %v3245_v3 = vrot.slane %v3243_v30, 2  ;;  %v1464_v12 = vadd.f32 %v1463_v53, %v12158_v16 }
 0x212   :  { %v9601_v52 = vpop.f32.mrf.mxu1  ;;  %v9777_v4 = vpop.f32.mrf.mxu0  ;;  %v3238_v21 = vor.u32 %v3237_v14, %v3234_v37  ;;  %v3252_v16 = vshll.u32 %v12400_v41, 16  ;;  %v12424_v37 = vld [vmem:[#allocation2 + $0x20] sm:$0xff]  }
 0x213   :  { %16671 = vst [vmem:[#allocation49_spill] sm:$0xff] %v12393_v38 }
 0x214   :  { %v1466_v58 = vpop.f32.mrf.mxu1  ;;  %v2010_v59 = vpop.f32.mrf.mxu0 }
 0x215   :  { %v12402_v44 = vadd.f32 %v2010_v59, %v1459_v33  ;;  %v1467_v36 = vadd.f32 %v1466_v58, %v12167_v29  ;;  %v2602_v59 = vsel %vm1682_vm2, %v2599_v61, %v2601_v60  ;;  %v11086_v61 = vld [vmem:[%s16459_s1 + $0x168] sm:$0xff]  }
 0x216   :  { %v9602_v38 = vpop.f32.mrf.mxu1  ;;  %v9778_v0 = vpop.f32.mrf.mxu0 }
 0x217   :  { %v3246_v38 = vor.u32 %v3245_v3, %v3242_v28  ;;  %v3249_v0 = vshrl.u32 %v12400_v41, 16  ;;  %v3254_v3 = vrot.slane %v3252_v16, 2  ;;  %v11080_v16 = vld [vmem:[%s16459_s1 + $0x1b0] sm:$0xff]  }
 0x218   :  { %v1471_v24 = vpop.f32.mrf.mxu1  ;;  %v2015_v52 = vpop.f32.mrf.mxu0  ;;  %9876 = vmatmul.mubr.bf16.gmra.mxu0 %v1762_v7  ;;  %9896 = vmatmul.mubr.bf16.vlgmr.msra.gmra.mxu1 %v2600_v51  ;;  %v11079_v7 = vld [vmem:[%s16459_s1 + $0x170] sm:$0xff]   ;;  %v11073_v51 = vld [vmem:[%s16459_s1 + $0x1b8] sm:$0xff]  }
 0x219   :  { %v12410_v4 = vadd.f32 %v2015_v52, %v1464_v12  ;;  %9899 = vmatprep.mubr.msk.bf16.mxu1 %vm11355_vm0, %v16651_v8  ;;  %10075 = vmatprep.mubr.msk.bf16.mxu0 %vm11355_vm0, %v16651_v8  ;;  %v3247_v41 = vsel %vm3230_vm3, %v3238_v21, %v3246_v38  ;;  %v3251_v28 = vrot.slane %v3249_v0, 1  ;;  %v1472_v58 = vadd.f32 %v1471_v24, %v12175_v1 }
 0x21a   :  { %v9605_v53 = vpop.f32.mrf.mxu1  ;;  %v9781_v46 = vpop.f32.mrf.mxu0  ;;  %10240 = vmatpush3.bf16.msra.mxu1 %v11071_v15  ;;  %v2603_v21 = vrot.slane %v12424_v37, 1  ;;  %v3258_v1 = vshrl.u32 %v12424_v37, 16  ;;  %v3261_v24 = vshll.u32 %v12424_v37, 16 }
 0x21b   :  { %10241 = vmatprep.subr.bf16.mxu1 %v16651_v8  ;;  %v3255_v0 = vor.u32 %v3254_v3, %v3251_v28 }
 0x21c   :  { %v1474_v30 = vpop.f32.mrf.mxu1  ;;  %v2018_v33 = vpop.f32.mrf.mxu0 }
 0x21d   :  { %v12426_v14 = vadd.f32 %v2018_v33, %v1467_v36  ;;  %v1475_v36 = vadd.f32 %v1474_v30, %v12187_v20  ;;  %v11093_v33 = vld [vmem:[%s16459_s1 + $0x160] sm:$0xff]   ;;  %v3256_v3 = vsel %vm3230_vm3, %v3246_v38, %v3255_v0 }
 0x21e   :  { %v9606_v15 = vpop.f32.mrf.mxu1  ;;  %v9782_v29 = vpop.f32.mrf.mxu0  ;;  %10242 = vmatpush3.bf16.msra.mxu1 %v11079_v7 }
 0x21f   :  { %10243 = vmatprep.subr.bf16.mxu1 %v16651_v8  ;;  %v3260_v15 = vrot.slane %v3258_v1, 1  ;;  %v3263_v29 = vrot.slane %v3261_v24, 2 }
 0x220   :  { %v1479_v12 = vpop.f32.mrf.mxu1  ;;  %v2023_v52 = vpop.f32.mrf.mxu0  ;;  %9900 = vmatmul.mubr.bf16.gmra.mxu1 %v2602_v59  ;;  %10076 = vmatmul.mubr.bf16.vlgmr.msra.gmra.mxu0 %v3247_v41  ;;  %v2604_v41 = vsel %vm1682_vm2, %v2601_v60, %v2603_v21 }
 0x221   :  { %v12438_v53 = vadd.f32 %v2023_v52, %v1472_v58  ;;  %10420 = vmatpush3.bf16.msra.mxu0 %v11073_v51  ;;  %9903 = vmatprep.mubr.msk.bf16.mxu1 %vm11355_vm0, %v16651_v8  ;;  %v11075_v51 = vld [vmem:[#allocation2 + $0x28] sm:$0xff]   ;;  %v1480_v60 = vadd.f32 %v1479_v12, %v12193_v5  ;;  %v3264_v1 = vor.u32 %v3263_v29, %v3260_v15  ;;  %v11094_v5 = vld [vmem:[%s16459_s1 + $0x1a0] sm:$0xff]  }
 0x222   :  { %v9609_v46 = vpop.f32.mrf.mxu1  ;;  %v9785_v7 = vpop.f32.mrf.mxu0  ;;  %10079 = vmatprep.mubr.msk.bf16.mxu0 %vm11355_vm0, %v16651_v8  ;;  %10421 = vmatprep.subr.bf16.mxu0 %v16651_v8  ;;  %v11087_v58 = vld [vmem:[%s16459_s1 + $0x1a8] sm:$0xff]   ;;  %v3267_v24 = vshrl.u32 %v11075_v51, 16 }
 0x223   :  { %10244 = vmatpush3.bf16.msra.mxu1 %v11086_v61  ;;  %v2605_v46 = vrot.slane %v11075_v51, 1 }
 0x224   :  { %v1482_v59 = vpop.f32.mrf.mxu1  ;;  %v2026_v37 = vpop.f32.mrf.mxu0  ;;  %10245 = vmatprep.subr.bf16.mxu1 %v16651_v8  ;;  %v3269_v29 = vrot.slane %v3267_v24, 1 }
 0x225   :  { %v12456_v28 = vadd.f32 %v2026_v37, %v1475_v36  ;;  %10422 = vmatpush3.bf16.msra.mxu0 %v11080_v16  ;;  %v3270_v16 = vshll.u32 %v11075_v51, 16  ;;  %v1483_v12 = vadd.f32 %v1482_v59, %v12201_v42  ;;  %v3265_v51 = vsel %vm3230_vm3, %v3255_v0, %v3264_v1 }
 0x226   :  { %v9610_v20 = vpop.f32.mrf.mxu1  ;;  %v9786_v30 = vpop.f32.mrf.mxu0  ;;  %10423 = vmatprep.subr.bf16.mxu0 %v16651_v8 }
 0x227   :  { %10246 = vmatpush3.bf16.msra.mxu1 %v11093_v33  ;;  %v3272_v20 = vrot.slane %v3270_v16, 2 }
 0x228   :  { %v1487_v61 = vpop.f32.mrf.mxu1  ;;  %v2031_v52 = vpop.f32.mrf.mxu0  ;;  %9904 = vmatmul.mubr.bf16.gmra.mxu1 %v2604_v41  ;;  %10080 = vmatmul.mubr.bf16.gmra.mxu0 %v3256_v3  ;;  %v2606_v41 = vsel %vm1682_vm2, %v2603_v21, %v2605_v46  ;;  %v11076_v3 = vld [vmem:[#allocation2 + $0x30] sm:$0xff]  }
 0x229   :  { %v12464_v38 = vadd.f32 %v2031_v52, %v1480_v60  ;;  %9907 = vmatprep.mubr.msk.bf16.mxu1 %vm11355_vm0, %v16651_v8  ;;  %10083 = vmatprep.mubr.msk.bf16.mxu0 %vm11355_vm0, %v16651_v8  ;;  %v1488_v60 = vadd.f32 %v1487_v61, %v12206_v54  ;;  %v2607_v52 = vrot.slane %v11076_v3, 1  ;;  %v3273_v0 = vor.u32 %v3272_v20, %v3269_v29 }
 0x22a   :  { %v9613_v7 = vpop.f32.mrf.mxu1  ;;  %v9789_v36 = vpop.f32.mrf.mxu0  ;;  %10424 = vmatpush3.bf16.msra.mxu0 %v11087_v58  ;;  %10247 = vmatprep.subr.bf16.mxu1 %v16651_v8  ;;  %v3276_v24 = vshrl.u32 %v11076_v3, 16  ;;  %v3279_v16 = vshll.u32 %v11076_v3, 16 }
 0x22b   :  { %10425 = vmatprep.subr.bf16.mxu0 %v16651_v8 }
 0x22c   :  { %v1490_v33 = vpop.f32.mrf.mxu1  ;;  %v2034_v37 = vpop.f32.mrf.mxu0 }
 0x22d   :  { %v12477_v15 = vadd.f32 %v2034_v37, %v1483_v12  ;;  %v1491_v61 = vadd.f32 %v1490_v33, %v12214_v47  ;;  %v2608_v12 = vsel %vm1682_vm2, %v2605_v46, %v2607_v52  ;;  %v11077_v37 = vld [vmem:[#allocation2 + $0x38] sm:$0xff]  }
 0x22e   :  { %v9614_v30 = vpop.f32.mrf.mxu1  ;;  %v9790_v58 = vpop.f32.mrf.mxu0  ;;  %10426 = vmatpush3.bf16.msra.mxu0 %v11094_v5  ;;  %v2609_v47 = vrot.slane %v11077_v37, 1 }
 0x22f   :  { %10427 = vmatprep.subr.bf16.mxu0 %v16651_v8  ;;  %v3278_v30 = vrot.slane %v3276_v24, 1  ;;  %v3281_v58 = vrot.slane %v3279_v16, 2  ;;  %v3288_v24 = vshll.u32 %v11077_v37, 16 }
 0x230   :  { %v1495_v42 = vpop.f32.mrf.mxu1  ;;  %v2039_v59 = vpop.f32.mrf.mxu0  ;;  %9908 = vmatmul.mubr.bf16.gmra.mxu1 %v2606_v41  ;;  %10084 = vmatmul.mubr.bf16.gmra.mxu0 %v3265_v51  ;;  %v3274_v51 = vsel %vm3230_vm3, %v3264_v1, %v3273_v0  ;;  %v3285_v1 = vshrl.u32 %v11077_v37, 16 }
 0x231   :  { %v12482_v21 = vadd.f32 %v2039_v59, %v1488_v60  ;;  %9911 = vmatprep.mubr.msk.bf16.mxu1 %vm11355_vm0, %v16651_v8  ;;  %10087 = vmatprep.mubr.msk.bf16.mxu0 %vm11355_vm0, %v16651_v8  ;;  %v1496_v29 = vadd.f32 %v1495_v42, %v12217_v62  ;;  %v3282_v46 = vor.u32 %v3281_v58, %v3278_v30 }
 0x232   :  { %v9617_v7 = vpop.f32.mrf.mxu1  ;;  %v9793_v54 = vpop.f32.mrf.mxu0 }
 0x234   :  { %v1498_v36 = vpop.f32.mrf.mxu1  ;;  %v2042_v5 = vpop.f32.mrf.mxu0 }
 0x235   :  { %v12490_v41 = vadd.f32 %v2042_v5, %v1491_v61  ;;  %v1499_v62 = vadd.f32 %v1498_v36, %v12223_v35  ;;  %v2610_v61 = vsel %vm1682_vm2, %v2607_v52, %v2609_v47  ;;  %v11078_v5 = vld [vmem:[#allocation2 + $0x40] sm:$0xff]  }
 0x236   :  { %v9618_v60 = vpop.f32.mrf.mxu1  ;;  %v9794_v59 = vpop.f32.mrf.mxu0  ;;  %v2611_v35 = vrot.slane %v11078_v5, 1 }
 0x237   :  { %v3287_v60 = vrot.slane %v3285_v1, 1  ;;  %v3290_v59 = vrot.slane %v3288_v24, 2  ;;  %v3297_v1 = vshll.u32 %v11078_v5, 16 }
 0x238   :  { %v1503_v3 = vpop.f32.mrf.mxu1  ;;  %v2047_v20 = vpop.f32.mrf.mxu0  ;;  %9912 = vmatmul.mubr.bf16.gmra.mxu1 %v2608_v12  ;;  %10088 = vmatmul.mubr.bf16.gmra.mxu0 %v3274_v51  ;;  %v3283_v51 = vsel %vm3230_vm3, %v3273_v0, %v3282_v46  ;;  %v3294_v0 = vshrl.u32 %v11078_v5, 16 }
 0x239   :  { %v12494_v33 = vadd.f32 %v2047_v20, %v1496_v29  ;;  %9915 = vmatprep.mubr.msk.bf16.mxu1 %vm11355_vm0, %v16651_v8  ;;  %10091 = vmatprep.mubr.msk.bf16.mxu0 %vm11355_vm0, %v16651_v8  ;;  %v1504_v30 = vadd.f32 %v1503_v3, %v11921_v25  ;;  %v3291_v52 = vor.u32 %v3290_v59, %v3287_v60  ;;  %v11100_v25 = vld [vmem:[%s16459_s1 + $0x158] sm:$0xff]   ;;  %v3299_v5 = vrot.slane %v3297_v1, 2 }
 0x23a   :  { %v9621_v16 = vpop.f32.mrf.mxu1  ;;  %v9797_v7 = vpop.f32.mrf.mxu0  ;;  %10248 = vmatpush3.bf16.msra.mxu1 %v11100_v25  ;;  %v3296_v59 = vrot.slane %v3294_v0, 1 }
 0x23b   :  { %v3292_v60 = vsel %vm3230_vm3, %v3282_v46, %v3291_v52  ;;  %10249 = vmatprep.subr.bf16.mxu1 %v16651_v8 }
 0x23c   :  { %v1506_v42 = vpop.f32.mrf.mxu1  ;;  %v2050_v54 = vpop.f32.mrf.mxu0  ;;  %v3300_v46 = vor.u32 %v3299_v5, %v3296_v59 }
 0x23d   :  { %v12502_v12 = vadd.f32 %v2050_v54, %v1499_v62  ;;  %v1507_v3 = vadd.f32 %v1506_v42, %v11929_v48  ;;  %v2612_v54 = vsel %vm1682_vm2, %v2609_v47, %v2611_v35 }
 0x23e   :  { %v9622_v29 = vpop.f32.mrf.mxu1  ;;  %v9798_v20 = vpop.f32.mrf.mxu0 }
 0x23f   :  { %v11101_v29 = vld [vmem:[%s16459_s1 + $0x198] sm:$0xff]  }
 0x240   :  { %v1511_v37 = vpop.f32.mrf.mxu1  ;;  %v2055_v58 = vpop.f32.mrf.mxu0  ;;  %9916 = vmatmul.mubr.bf16.gmra.mxu1 %v2610_v61  ;;  %10092 = vmatmul.mubr.bf16.gmra.mxu0 %v3283_v51  ;;  %v11081_v61 = vld [vmem:[#allocation2 + $0x48] sm:$0xff]  }
 0x241   :  { %v12506_v36 = vadd.f32 %v2055_v58, %v1504_v30  ;;  %9919 = vmatprep.mubr.msk.bf16.mxu1 %vm11355_vm0, %v16651_v8  ;;  %10095 = vmatprep.mubr.msk.bf16.mxu0 %vm11355_vm0, %v16651_v8  ;;  %v1512_v42 = vadd.f32 %v1511_v37, %v11934_v2  ;;  %v2613_v58 = vrot.slane %v11081_v61, 1  ;;  %v3303_v0 = vshrl.u32 %v11081_v61, 16  ;;  %v16674_v2 = vld [vmem:[#allocation8_spill] sm:$0xff] }
 0x242   :  { %v9625_v24 = vpop.f32.mrf.mxu1  ;;  %v9801_v16 = vpop.f32.mrf.mxu0  ;;  %10428 = vmatpush3.bf16.msra.mxu0 %v11101_v29  ;;  %v3306_v1 = vshll.u32 %v11081_v61, 16  ;;  %v16676_v61 = vld [vmem:[#allocation9_spill] sm:$0xff] }
 0x243   :  { %10429 = vmatprep.subr.bf16.mxu0 %v16651_v8 }
 0x244   :  { %v1514_v7 = vpop.f32.mrf.mxu1  ;;  %v2058_v62 = vpop.f32.mrf.mxu0 }
 0x245   :  { %v12517_v51 = vadd.f32 %v2058_v62, %v1507_v3  ;;  %v1515_v37 = vadd.f32 %v1514_v7, %v16674_v2 }
 0x246   :  { %v9626_v20 = vpop.f32.mrf.mxu1  ;;  %v9802_v48 = vpop.f32.mrf.mxu0 }
 0x247   :  { %16672 = vst [vmem:[#allocation50_spill] sm:$0xff] %v12517_v51  ;;  %v3301_v20 = vsel %vm3230_vm3, %v3291_v52, %v3300_v46  ;;  %v3305_v48 = vrot.slane %v3303_v0, 1  ;;  %v16743_v51 = vld [vmem:[#allocation43_spill] sm:$0xff] }
 0x248   :  { %v1519_v47 = vpop.f32.mrf.mxu1  ;;  %v2063_v30 = vpop.f32.mrf.mxu0  ;;  %9920 = vmatmul.mubr.bf16.gmra.mxu1 %v2612_v54  ;;  %10096 = vmatmul.mubr.bf16.gmra.mxu0 %v3292_v60  ;;  %v2614_v54 = vsel %vm1682_vm2, %v2611_v35, %v2613_v58  ;;  %v11082_v60 = vld [vmem:[#allocation2 + $0x50] sm:$0xff]  }
 0x249   :  { %v12525_v24 = vadd.f32 %v2063_v30, %v1512_v42  ;;  %9923 = vmatprep.mubr.msk.bf16.mxu1 %vm11355_vm0, %v16651_v8  ;;  %10099 = vmatprep.mubr.msk.bf16.mxu0 %vm11355_vm0, %v16651_v8  ;;  %v3308_v42 = vrot.slane %v3306_v1, 2  ;;  %v1520_v30 = vadd.f32 %v1519_v47, %v16676_v61  ;;  %v2615_v7 = vrot.slane %v11082_v60, 1 }
 0x24a   :  { %v9629_v16 = vpop.f32.mrf.mxu1  ;;  %v9805_v25 = vpop.f32.mrf.mxu0  ;;  %v3312_v52 = vshrl.u32 %v11082_v60, 16  ;;  %v3315_v0 = vshll.u32 %v11082_v60, 16 }
 0x24b   :  { %16673 = vst [vmem:[#allocation51_spill] sm:$0xff] %v12525_v24  ;;  %v3309_v35 = vor.u32 %v3308_v42, %v3305_v48  ;;  %v16680_v48 = vld [vmem:[#allocation11_spill] sm:$0xff] }
 0x24c   :  { %v1522_v3 = vpop.f32.mrf.mxu1  ;;  %v2066_v62 = vpop.f32.mrf.mxu0 }
 0x24d   :  { %v12534_v29 = vadd.f32 %v2066_v62, %v1515_v37  ;;  %v16678_v62 = vld [vmem:[#allocation10_spill] sm:$0xff] }
 0x24e   :  { %v9630_v59 = vpop.f32.mrf.mxu1  ;;  %v9806_v5 = vpop.f32.mrf.mxu0  ;;  %v1523_v47 = vadd.f32 %v1522_v3, %v16678_v62 }
 0x24f   :  { %16675 = vst [vmem:[#allocation8_spill] sm:$0xff] %v12534_v29 }
 0x250   :  { %v1527_v16 = vpop.f32.mrf.mxu1  ;;  %v2071_v25 = vpop.f32.mrf.mxu0  ;;  %9924 = vmatmul.mubr.bf16.gmra.mxu1 %v2614_v54  ;;  %10100 = vmatmul.mubr.bf16.gmra.mxu0 %v3301_v20  ;;  %v2616_v54 = vsel %vm1682_vm2, %v2613_v58, %v2615_v7  ;;  %v11083_v20 = vld [vmem:[#allocation2 + $0x58] sm:$0xff]  }
 0x251   :  { %v12538_v2 = vadd.f32 %v2071_v25, %v1520_v30  ;;  %9927 = vmatprep.mubr.msk.bf16.mxu1 %vm11355_vm0, %v16651_v8  ;;  %10103 = vmatprep.mubr.msk.bf16.mxu0 %vm11355_vm0, %v16651_v8  ;;  %v3310_v30 = vsel %vm3230_vm3, %v3300_v46, %v3309_v35  ;;  %v3314_v25 = vrot.slane %v3312_v52, 1  ;;  %v1528_v42 = vadd.f32 %v1527_v16, %v16680_v48 }
 0x252   :  { %v9633_v1 = vpop.f32.mrf.mxu1  ;;  %v9809_v37 = vpop.f32.mrf.mxu0  ;;  %v2617_v3 = vrot.slane %v11083_v20, 1  ;;  %v3321_v46 = vshrl.u32 %v11083_v20, 16  ;;  %v3324_v52 = vshll.u32 %v11083_v20, 16 }
 0x253   :  { %16677 = vst [vmem:[#allocation9_spill] sm:$0xff] %v12538_v2  ;;  %v3317_v2 = vrot.slane %v3315_v0, 2  ;;  %v16682_v0 = vld [vmem:[#allocation12_spill] sm:$0xff] }
 0x254   :  { %v1530_v59 = vpop.f32.mrf.mxu1  ;;  %v2074_v5 = vpop.f32.mrf.mxu0 }
 0x255   :  { %v12546_v61 = vadd.f32 %v2074_v5, %v1523_v47  ;;  %v3318_v58 = vor.u32 %v3317_v2, %v3314_v25  ;;  %v1531_v16 = vadd.f32 %v1530_v59, %v16682_v0  ;;  %v2618_v5 = vsel %vm1682_vm2, %v2615_v7, %v2617_v3  ;;  %v16684_v2 = vld [vmem:[#allocation13_spill] sm:$0xff] }
 0x256   :  { %v9634_v29 = vpop.f32.mrf.mxu1  ;;  %v9810_v24 = vpop.f32.mrf.mxu0 }
 0x257   :  { %16679 = vst [vmem:[#allocation10_spill] sm:$0xff] %v12546_v61  ;;  %v3319_v48 = vsel %vm3230_vm3, %v3309_v35, %v3318_v58 }
 0x258   :  { %v1535_v60 = vpop.f32.mrf.mxu1  ;;  %v2079_v1 = vpop.f32.mrf.mxu0  ;;  %9928 = vmatmul.mubr.bf16.gmra.mxu1 %v2616_v54  ;;  %10104 = vmatmul.mubr.bf16.gmra.mxu0 %v3310_v30  ;;  %v11084_v54 = vld [vmem:[#allocation2 + $0x60] sm:$0xff]  }
 0x259   :  { %v12550_v37 = vadd.f32 %v2079_v1, %v1528_v42  ;;  %9931 = vmatprep.mubr.msk.bf16.mxu1 %vm11355_vm0, %v16651_v8  ;;  %10107 = vmatprep.mubr.msk.bf16.mxu0 %vm11355_vm0, %v16651_v8  ;;  %v3323_v42 = vrot.slane %v3321_v46, 1  ;;  %v3326_v1 = vrot.slane %v3324_v52, 2  ;;  %v1536_v25 = vadd.f32 %v1535_v60, %v16684_v2  ;;  %v16686_v52 = vld [vmem:[#allocation14_spill] sm:$0xff] }
 0x25a   :  { %v9637_v29 = vpop.f32.mrf.mxu1  ;;  %v9813_v24 = vpop.f32.mrf.mxu0  ;;  %v2619_v59 = vrot.slane %v11084_v54, 1  ;;  %v3330_v35 = vshrl.u32 %v11084_v54, 16  ;;  %v3333_v46 = vshll.u32 %v11084_v54, 16 }
 0x25b   :  { %16681 = vst [vmem:[#allocation11_spill] sm:$0xff] %v12550_v37  ;;  %v3327_v7 = vor.u32 %v3326_v1, %v3323_v42  ;;  %v16688_v42 = vld [vmem:[#allocation15_spill] sm:$0xff] }
 0x25c   :  { %v1538_v62 = vpop.f32.mrf.mxu1  ;;  %v2082_v47 = vpop.f32.mrf.mxu0 }
 0x25d   :  { %v12558_v30 = vadd.f32 %v2082_v47, %v1531_v16  ;;  %v1539_v60 = vadd.f32 %v1538_v62, %v16686_v52  ;;  %v2620_v47 = vsel %vm1682_vm2, %v2617_v3, %v2619_v59  ;;  %v3328_v2 = vsel %vm3230_vm3, %v3318_v58, %v3327_v7 }
 0x25e   :  { %v9638_v37 = vpop.f32.mrf.mxu1  ;;  %v9814_v61 = vpop.f32.mrf.mxu0 }
 0x25f   :  { %16683 = vst [vmem:[#allocation12_spill] sm:$0xff] %v12558_v30 }
 0x260   :  { %v1543_v20 = vpop.f32.mrf.mxu1  ;;  %v2087_v29 = vpop.f32.mrf.mxu0  ;;  %9932 = vmatmul.mubr.bf16.gmra.mxu1 %v2618_v5  ;;  %10108 = vmatmul.mubr.bf16.gmra.mxu0 %v3319_v48  ;;  %v11085_v5 = vld [vmem:[#allocation2 + $0x68] sm:$0xff]  }
 0x261   :  { %v12562_v24 = vadd.f32 %v2087_v29, %v1536_v25  ;;  %9935 = vmatprep.mubr.msk.bf16.mxu1 %vm11355_vm0, %v16651_v8  ;;  %10111 = vmatprep.mubr.msk.bf16.mxu0 %vm11355_vm0, %v16651_v8  ;;  %v3332_v25 = vrot.slane %v3330_v35, 1  ;;  %v3335_v29 = vrot.slane %v3333_v46, 2  ;;  %v1544_v1 = vadd.f32 %v1543_v20, %v16688_v42  ;;  %v16690_v46 = vld [vmem:[#allocation16_spill] sm:$0xff] }
 0x262   :  { %v9641_v37 = vpop.f32.mrf.mxu1  ;;  %v9817_v61 = vpop.f32.mrf.mxu0  ;;  %v2621_v62 = vrot.slane %v11085_v5, 1  ;;  %v3339_v58 = vshrl.u32 %v11085_v5, 16  ;;  %v3342_v35 = vshll.u32 %v11085_v5, 16 }
 0x263   :  { %16685 = vst [vmem:[#allocation13_spill] sm:$0xff] %v12562_v24  ;;  %v3336_v3 = vor.u32 %v3335_v29, %v3332_v25  ;;  %v11107_v25 = vld [vmem:[%s16459_s1 + $0x150] sm:$0xff]  }
 0x264   :  { %v1546_v0 = vpop.f32.mrf.mxu1  ;;  %v2090_v16 = vpop.f32.mrf.mxu0  ;;  %10250 = vmatpush3.bf16.msra.mxu1 %v11107_v25 }
 0x265   :  { %v12570_v48 = vadd.f32 %v2090_v16, %v1539_v60  ;;  %v1547_v20 = vadd.f32 %v1546_v0, %v16690_v46  ;;  %v2622_v16 = vsel %vm1682_vm2, %v2619_v59, %v2621_v62  ;;  %v3337_v42 = vsel %vm3230_vm3, %v3327_v7, %v3336_v3  ;;  %v11108_v0 = vld [vmem:[%s16459_s1 + $0x190] sm:$0xff]   ;;  %10251 = vmatprep.subr.bf16.mxu1 %v16651_v8 }
 0x266   :  { %v9642_v24 = vpop.f32.mrf.mxu1  ;;  %v9818_v30 = vpop.f32.mrf.mxu0  ;;  %10430 = vmatpush3.bf16.msra.mxu0 %v11108_v0  ;;  %v16696_v0 = vld [vmem:[#allocation19_spill] sm:$0xff] }
 0x267   :  { %16687 = vst [vmem:[#allocation14_spill] sm:$0xff] %v12570_v48  ;;  %10431 = vmatprep.subr.bf16.mxu0 %v16651_v8 }
 0x268   :  { %v1551_v54 = vpop.f32.mrf.mxu1  ;;  %v2095_v37 = vpop.f32.mrf.mxu0  ;;  %9936 = vmatmul.mubr.bf16.gmra.mxu1 %v2620_v47  ;;  %10112 = vmatmul.mubr.bf16.gmra.mxu0 %v3328_v2  ;;  %v11088_v47 = vld [vmem:[#allocation2 + $0x70] sm:$0xff]  }
 0x269   :  { %v12574_v61 = vadd.f32 %v2095_v37, %v1544_v1  ;;  %9939 = vmatprep.mubr.msk.bf16.mxu1 %vm11355_vm0, %v16651_v8  ;;  %10115 = vmatprep.mubr.msk.bf16.mxu0 %vm11355_vm0, %v16651_v8  ;;  %v3341_v1 = vrot.slane %v3339_v58, 1  ;;  %v3344_v37 = vrot.slane %v3342_v35, 2  ;;  %v2623_v7 = vrot.slane %v11088_v47, 1 }
 0x26a   :  { %v9645_v24 = vpop.f32.mrf.mxu1  ;;  %v9821_v30 = vpop.f32.mrf.mxu0 }
 0x26b   :  { %16689 = vst [vmem:[#allocation15_spill] sm:$0xff] %v12574_v61  ;;  %v16692_v24 = vld [vmem:[#allocation17_spill] sm:$0xff]  ;;  %v3345_v35 = vor.u32 %v3344_v37, %v3341_v1 }
 0x26c   :  { %v1554_v52 = vpop.f32.mrf.mxu1  ;;  %v2098_v60 = vpop.f32.mrf.mxu0  ;;  %v1552_v30 = vadd.f32 %v1551_v54, %v16692_v24  ;;  %v16694_v54 = vld [vmem:[#allocation18_spill] sm:$0xff]  ;;  %v2624_v24 = vsel %vm1682_vm2, %v2621_v62, %v2623_v7 }
 0x26d   :  { %v12582_v2 = vadd.f32 %v2098_v60, %v1547_v20  ;;  %v3348_v20 = vshrl.u32 %v11088_v47, 16  ;;  %v3351_v60 = vshll.u32 %v11088_v47, 16  ;;  %v3346_v1 = vsel %vm3230_vm3, %v3336_v3, %v3345_v35 }
 0x26e   :  { %v9646_v5 = vpop.f32.mrf.mxu1  ;;  %v9822_v29 = vpop.f32.mrf.mxu0 }
 0x26f   :  { %16691 = vst [vmem:[#allocation16_spill] sm:$0xff] %v12582_v2  ;;  %v3350_v37 = vrot.slane %v3348_v20, 1  ;;  %v3353_v47 = vrot.slane %v3351_v60, 2 }
 0x270   :  { %v1559_v59 = vpop.f32.mrf.mxu1  ;;  %v2103_v46 = vpop.f32.mrf.mxu0  ;;  %9940 = vmatmul.mubr.bf16.gmra.mxu1 %v2622_v16  ;;  %10116 = vmatmul.mubr.bf16.gmra.mxu0 %v3337_v42  ;;  %v1555_v16 = vadd.f32 %v1554_v52, %v16694_v54 }
 0x271   :  { %v12592_v58 = vadd.f32 %v2103_v46, %v1552_v30  ;;  %9943 = vmatprep.mubr.msk.bf16.mxu1 %vm11355_vm0, %v16651_v8  ;;  %10119 = vmatprep.mubr.msk.bf16.mxu0 %vm11355_vm0, %v16651_v8  ;;  %v11089_v30 = vld [vmem:[#allocation2 + $0x78] sm:$0xff]   ;;  %v3354_v62 = vor.u32 %v3353_v47, %v3350_v37  ;;  %v16700_v37 = vld [vmem:[#allocation21_spill] sm:$0xff] }
 0x272   :  { %v9649_v5 = vpop.f32.mrf.mxu1  ;;  %v9825_v29 = vpop.f32.mrf.mxu0  ;;  %v2625_v52 = vrot.slane %v11089_v30, 1  ;;  %v3357_v3 = vshrl.u32 %v11089_v30, 16  ;;  %v3360_v20 = vshll.u32 %v11089_v30, 16 }
 0x273   :  { %16693 = vst [vmem:[#allocation17_spill] sm:$0xff] %v12592_v58  ;;  %v1560_v58 = vadd.f32 %v1559_v59, %v16696_v0 }
 0x274   :  { %v1562_v42 = vpop.f32.mrf.mxu1  ;;  %v2106_v25 = vpop.f32.mrf.mxu0  ;;  %v3359_v0 = vrot.slane %v3357_v3, 1 }
 0x275   :  { %v12602_v46 = vadd.f32 %v2106_v25, %v1555_v16  ;;  %v16698_v25 = vld [vmem:[#allocation20_spill] sm:$0xff] }
 0x276   :  { %v9650_v5 = vpop.f32.mrf.mxu1  ;;  %v9826_v29 = vpop.f32.mrf.mxu0  ;;  %v1563_v59 = vadd.f32 %v1562_v42, %v16698_v25 }
 0x277   :  { %16695 = vst [vmem:[#allocation18_spill] sm:$0xff] %v12602_v46 }
 0x278   :  { %v1567_v2 = vpop.f32.mrf.mxu1  ;;  %v2111_v61 = vpop.f32.mrf.mxu0  ;;  %9944 = vmatmul.mubr.bf16.gmra.mxu1 %v2624_v24  ;;  %10120 = vmatmul.mubr.bf16.gmra.mxu0 %v3346_v1  ;;  %v2626_v24 = vsel %vm1682_vm2, %v2623_v7, %v2625_v52  ;;  %v11090_v1 = vld [vmem:[#allocation2 + $0x80] sm:$0xff]  }
 0x279   :  { %v12606_v54 = vadd.f32 %v2111_v61, %v1560_v58  ;;  %9947 = vmatprep.mubr.msk.bf16.mxu1 %vm11355_vm0, %v16651_v8  ;;  %10123 = vmatprep.mubr.msk.bf16.mxu0 %vm11355_vm0, %v16651_v8  ;;  %v3355_v58 = vsel %vm3230_vm3, %v3345_v35, %v3354_v62  ;;  %v1568_v47 = vadd.f32 %v1567_v2, %v16700_v37  ;;  %v2627_v42 = vrot.slane %v11090_v1, 1 }
 0x27a   :  { %v9653_v60 = vpop.f32.mrf.mxu1  ;;  %v9829_v16 = vpop.f32.mrf.mxu0  ;;  %v3366_v35 = vshrl.u32 %v11090_v1, 16  ;;  %v3369_v3 = vshll.u32 %v11090_v1, 16 }
 0x27b   :  { %16697 = vst [vmem:[#allocation19_spill] sm:$0xff] %v12606_v54  ;;  %v3362_v54 = vrot.slane %v3360_v20, 2  ;;  %v16702_v20 = vld [vmem:[#allocation22_spill] sm:$0xff] }
 0x27c   :  { %v1570_v5 = vpop.f32.mrf.mxu1  ;;  %v2114_v29 = vpop.f32.mrf.mxu0 }
 0x27d   :  { %v12614_v61 = vadd.f32 %v2114_v29, %v1563_v59  ;;  %v3363_v7 = vor.u32 %v3362_v54, %v3359_v0  ;;  %v1571_v2 = vadd.f32 %v1570_v5, %v16702_v20  ;;  %v2628_v29 = vsel %vm1682_vm2, %v2625_v52, %v2627_v42  ;;  %v16704_v54 = vld [vmem:[#allocation23_spill] sm:$0xff] }
 0x27e   :  { %v9654_v46 = vpop.f32.mrf.mxu1  ;;  %v9830_v48 = vpop.f32.mrf.mxu0 }
 0x27f   :  { %16699 = vst [vmem:[#allocation20_spill] sm:$0xff] %v12614_v61  ;;  %v3364_v37 = vsel %vm3230_vm3, %v3354_v62, %v3363_v7 }
 0x280   :  { %v1575_v30 = vpop.f32.mrf.mxu1  ;;  %v2119_v60 = vpop.f32.mrf.mxu0  ;;  %9948 = vmatmul.mubr.bf16.gmra.mxu1 %v2626_v24  ;;  %10124 = vmatmul.mubr.bf16.gmra.mxu0 %v3355_v58  ;;  %v11091_v24 = vld [vmem:[#allocation2 + $0x88] sm:$0xff]  }
 0x281   :  { %v12618_v16 = vadd.f32 %v2119_v60, %v1568_v47  ;;  %9951 = vmatprep.mubr.msk.bf16.mxu1 %vm11355_vm0, %v16651_v8  ;;  %10127 = vmatprep.mubr.msk.bf16.mxu0 %vm11355_vm0, %v16651_v8  ;;  %v3368_v47 = vrot.slane %v3366_v35, 1  ;;  %v3371_v60 = vrot.slane %v3369_v3, 2  ;;  %v1576_v0 = vadd.f32 %v1575_v30, %v16704_v54  ;;  %v16706_v3 = vld [vmem:[#allocation24_spill] sm:$0xff] }
 0x282   :  { %v9657_v46 = vpop.f32.mrf.mxu1  ;;  %v9833_v48 = vpop.f32.mrf.mxu0  ;;  %v2629_v5 = vrot.slane %v11091_v24, 1  ;;  %v3375_v62 = vshrl.u32 %v11091_v24, 16  ;;  %v3378_v35 = vshll.u32 %v11091_v24, 16 }
 0x283   :  { %16701 = vst [vmem:[#allocation21_spill] sm:$0xff] %v12618_v16  ;;  %v3372_v52 = vor.u32 %v3371_v60, %v3368_v47  ;;  %v16708_v47 = vld [vmem:[#allocation25_spill] sm:$0xff] }
 0x284   :  { %v1578_v25 = vpop.f32.mrf.mxu1  ;;  %v2122_v59 = vpop.f32.mrf.mxu0 }
 0x285   :  { %v12626_v58 = vadd.f32 %v2122_v59, %v1571_v2  ;;  %v1579_v30 = vadd.f32 %v1578_v25, %v16706_v3  ;;  %v2630_v59 = vsel %vm1682_vm2, %v2627_v42, %v2629_v5  ;;  %v3373_v54 = vsel %vm3230_vm3, %v3363_v7, %v3372_v52 }
 0x286   :  { %v9658_v16 = vpop.f32.mrf.mxu1  ;;  %v9834_v61 = vpop.f32.mrf.mxu0 }
 0x287   :  { %16703 = vst [vmem:[#allocation22_spill] sm:$0xff] %v12626_v58 }
 0x288   :  { %v1583_v1 = vpop.f32.mrf.mxu1  ;;  %v2127_v46 = vpop.f32.mrf.mxu0  ;;  %9952 = vmatmul.mubr.bf16.gmra.mxu1 %v2628_v29  ;;  %10128 = vmatmul.mubr.bf16.gmra.mxu0 %v3364_v37  ;;  %v11092_v29 = vld [vmem:[#allocation2 + $0x90] sm:$0xff]  }
 0x289   :  { %v12630_v48 = vadd.f32 %v2127_v46, %v1576_v0  ;;  %9955 = vmatprep.mubr.msk.bf16.mxu1 %vm11355_vm0, %v16651_v8  ;;  %10131 = vmatprep.mubr.msk.bf16.mxu0 %vm11355_vm0, %v16651_v8  ;;  %v3377_v0 = vrot.slane %v3375_v62, 1  ;;  %v3380_v46 = vrot.slane %v3378_v35, 2  ;;  %v1584_v60 = vadd.f32 %v1583_v1, %v16708_v47  ;;  %v16710_v35 = vld [vmem:[#allocation26_spill] sm:$0xff] }
 0x28a   :  { %v9661_v16 = vpop.f32.mrf.mxu1  ;;  %v9837_v61 = vpop.f32.mrf.mxu0  ;;  %v2631_v25 = vrot.slane %v11092_v29, 1  ;;  %v3384_v7 = vshrl.u32 %v11092_v29, 16  ;;  %v3387_v62 = vshll.u32 %v11092_v29, 16 }
 0x28b   :  { %16705 = vst [vmem:[#allocation23_spill] sm:$0xff] %v12630_v48  ;;  %v3381_v42 = vor.u32 %v3380_v46, %v3377_v0  ;;  %v11114_v0 = vld [vmem:[%s16459_s1 + $0x148] sm:$0xff]  }
 0x28c   :  { %v1586_v20 = vpop.f32.mrf.mxu1  ;;  %v2130_v2 = vpop.f32.mrf.mxu0  ;;  %10252 = vmatpush3.bf16.msra.mxu1 %v11114_v0 }
 0x28d   :  { %v12638_v37 = vadd.f32 %v2130_v2, %v1579_v30  ;;  %v1587_v1 = vadd.f32 %v1586_v20, %v16710_v35  ;;  %v2632_v2 = vsel %vm1682_vm2, %v2629_v5, %v2631_v25  ;;  %v3382_v47 = vsel %vm3230_vm3, %v3372_v52, %v3381_v42  ;;  %v11115_v20 = vld [vmem:[%s16459_s1 + $0x188] sm:$0xff]   ;;  %10253 = vmatprep.subr.bf16.mxu1 %v16651_v8 }
 0x28e   :  { %v9662_v48 = vpop.f32.mrf.mxu1  ;;  %v9838_v58 = vpop.f32.mrf.mxu0  ;;  %10432 = vmatpush3.bf16.msra.mxu0 %v11115_v20  ;;  %v16716_v20 = vld [vmem:[#allocation29_spill] sm:$0xff] }
 0x28f   :  { %16707 = vst [vmem:[#allocation24_spill] sm:$0xff] %v12638_v37  ;;  %10433 = vmatprep.subr.bf16.mxu0 %v16651_v8 }
 0x290   :  { %v1591_v24 = vpop.f32.mrf.mxu1  ;;  %v2135_v16 = vpop.f32.mrf.mxu0  ;;  %9956 = vmatmul.mubr.bf16.gmra.mxu1 %v2630_v59  ;;  %10132 = vmatmul.mubr.bf16.gmra.mxu0 %v3373_v54  ;;  %v11095_v59 = vld [vmem:[#allocation2 + $0x98] sm:$0xff]  }
 0x291   :  { %v12642_v61 = vadd.f32 %v2135_v16, %v1584_v60  ;;  %9959 = vmatprep.mubr.msk.bf16.mxu1 %vm11355_vm0, %v16651_v8  ;;  %10135 = vmatprep.mubr.msk.bf16.mxu0 %vm11355_vm0, %v16651_v8  ;;  %v3386_v60 = vrot.slane %v3384_v7, 1  ;;  %v3389_v16 = vrot.slane %v3387_v62, 2  ;;  %v2633_v52 = vrot.slane %v11095_v59, 1 }
 0x292   :  { %v9665_v48 = vpop.f32.mrf.mxu1  ;;  %v9841_v58 = vpop.f32.mrf.mxu0 }
 0x293   :  { %16709 = vst [vmem:[#allocation25_spill] sm:$0xff] %v12642_v61  ;;  %v16712_v48 = vld [vmem:[#allocation27_spill] sm:$0xff]  ;;  %v3390_v62 = vor.u32 %v3389_v16, %v3386_v60 }
 0x294   :  { %v1594_v3 = vpop.f32.mrf.mxu1  ;;  %v2138_v30 = vpop.f32.mrf.mxu0  ;;  %v1592_v58 = vadd.f32 %v1591_v24, %v16712_v48  ;;  %v16714_v24 = vld [vmem:[#allocation28_spill] sm:$0xff]  ;;  %v2634_v48 = vsel %vm1682_vm2, %v2631_v25, %v2633_v52 }
 0x295   :  { %v12650_v54 = vadd.f32 %v2138_v30, %v1587_v1  ;;  %v3393_v1 = vshrl.u32 %v11095_v59, 16  ;;  %v3396_v30 = vshll.u32 %v11095_v59, 16  ;;  %v3391_v60 = vsel %vm3230_vm3, %v3381_v42, %v3390_v62 }
 0x296   :  { %v9666_v29 = vpop.f32.mrf.mxu1  ;;  %v9842_v46 = vpop.f32.mrf.mxu0 }
 0x297   :  { %16711 = vst [vmem:[#allocation26_spill] sm:$0xff] %v12650_v54  ;;  %v3395_v16 = vrot.slane %v3393_v1, 1  ;;  %v3398_v59 = vrot.slane %v3396_v30, 2 }
 0x298   :  { %v1599_v5 = vpop.f32.mrf.mxu1  ;;  %v2143_v35 = vpop.f32.mrf.mxu0  ;;  %9960 = vmatmul.mubr.bf16.gmra.mxu1 %v2632_v2  ;;  %10136 = vmatmul.mubr.bf16.gmra.mxu0 %v3382_v47  ;;  %v1595_v2 = vadd.f32 %v1594_v3, %v16714_v24 }
 0x299   :  { %v12660_v7 = vadd.f32 %v2143_v35, %v1592_v58  ;;  %9963 = vmatprep.mubr.msk.bf16.mxu1 %vm11355_vm0, %v16651_v8  ;;  %10139 = vmatprep.mubr.msk.bf16.mxu0 %vm11355_vm0, %v16651_v8  ;;  %v11096_v58 = vld [vmem:[#allocation2 + $0xa0] sm:$0xff]   ;;  %v3399_v25 = vor.u32 %v3398_v59, %v3395_v16  ;;  %v16720_v16 = vld [vmem:[#allocation31_spill] sm:$0xff] }
 0x29a   :  { %v9669_v29 = vpop.f32.mrf.mxu1  ;;  %v9845_v46 = vpop.f32.mrf.mxu0  ;;  %v2635_v3 = vrot.slane %v11096_v58, 1  ;;  %v3402_v42 = vshrl.u32 %v11096_v58, 16  ;;  %v3405_v1 = vshll.u32 %v11096_v58, 16 }
 0x29b   :  { %16713 = vst [vmem:[#allocation27_spill] sm:$0xff] %v12660_v7  ;;  %v1600_v7 = vadd.f32 %v1599_v5, %v16716_v20 }
 0x29c   :  { %v1602_v47 = vpop.f32.mrf.mxu1  ;;  %v2146_v0 = vpop.f32.mrf.mxu0  ;;  %v3404_v20 = vrot.slane %v3402_v42, 1 }
 0x29d   :  { %v12670_v35 = vadd.f32 %v2146_v0, %v1595_v2  ;;  %v16718_v0 = vld [vmem:[#allocation30_spill] sm:$0xff] }
 0x29e   :  { %v9670_v29 = vpop.f32.mrf.mxu1  ;;  %v9846_v46 = vpop.f32.mrf.mxu0  ;;  %v1603_v5 = vadd.f32 %v1602_v47, %v16718_v0 }
 0x29f   :  { %16715 = vst [vmem:[#allocation28_spill] sm:$0xff] %v12670_v35 }
 0x2a0   :  { %v1607_v54 = vpop.f32.mrf.mxu1  ;;  %v2151_v61 = vpop.f32.mrf.mxu0  ;;  %9964 = vmatmul.mubr.bf16.gmra.mxu1 %v2634_v48  ;;  %10140 = vmatmul.mubr.bf16.gmra.mxu0 %v3391_v60  ;;  %v2636_v48 = vsel %vm1682_vm2, %v2633_v52, %v2635_v3  ;;  %v11097_v60 = vld [vmem:[#allocation2 + $0xa8] sm:$0xff]  }
 0x2a1   :  { %v12674_v24 = vadd.f32 %v2151_v61, %v1600_v7  ;;  %9967 = vmatprep.mubr.msk.bf16.mxu1 %vm11355_vm0, %v16651_v8  ;;  %10143 = vmatprep.mubr.msk.bf16.mxu0 %vm11355_vm0, %v16651_v8  ;;  %v3400_v7 = vsel %vm3230_vm3, %v3390_v62, %v3399_v25  ;;  %v1608_v59 = vadd.f32 %v1607_v54, %v16720_v16  ;;  %v2637_v47 = vrot.slane %v11097_v60, 1 }
 0x2a2   :  { %v9673_v30 = vpop.f32.mrf.mxu1  ;;  %v9849_v2 = vpop.f32.mrf.mxu0  ;;  %v3411_v62 = vshrl.u32 %v11097_v60, 16  ;;  %v3414_v42 = vshll.u32 %v11097_v60, 16 }
 0x2a3   :  { %16717 = vst [vmem:[#allocation29_spill] sm:$0xff] %v12674_v24  ;;  %v3407_v24 = vrot.slane %v3405_v1, 2  ;;  %v16722_v1 = vld [vmem:[#allocation32_spill] sm:$0xff] }
 0x2a4   :  { %v1610_v29 = vpop.f32.mrf.mxu1  ;;  %v2154_v46 = vpop.f32.mrf.mxu0 }
 0x2a5   :  { %v12682_v61 = vadd.f32 %v2154_v46, %v1603_v5  ;;  %v3408_v52 = vor.u32 %v3407_v24, %v3404_v20  ;;  %v1611_v54 = vadd.f32 %v1610_v29, %v16722_v1  ;;  %v2638_v46 = vsel %vm1682_vm2, %v2635_v3, %v2637_v47  ;;  %v16724_v24 = vld [vmem:[#allocation33_spill] sm:$0xff] }
 0x2a6   :  { %v9674_v35 = vpop.f32.mrf.mxu1  ;;  %v9850_v37 = vpop.f32.mrf.mxu0 }
 0x2a7   :  { %16719 = vst [vmem:[#allocation30_spill] sm:$0xff] %v12682_v61  ;;  %v3409_v16 = vsel %vm3230_vm3, %v3399_v25, %v3408_v52 }
 0x2a8   :  { %v1615_v58 = vpop.f32.mrf.mxu1  ;;  %v2159_v30 = vpop.f32.mrf.mxu0  ;;  %9968 = vmatmul.mubr.bf16.gmra.mxu1 %v2636_v48  ;;  %10144 = vmatmul.mubr.bf16.gmra.mxu0 %v3400_v7  ;;  %v11098_v48 = vld [vmem:[#allocation2 + $0xb0] sm:$0xff]  }
 0x2a9   :  { %v12686_v2 = vadd.f32 %v2159_v30, %v1608_v59  ;;  %9971 = vmatprep.mubr.msk.bf16.mxu1 %vm11355_vm0, %v16651_v8  ;;  %10147 = vmatprep.mubr.msk.bf16.mxu0 %vm11355_vm0, %v16651_v8  ;;  %v3413_v59 = vrot.slane %v3411_v62, 1  ;;  %v3416_v30 = vrot.slane %v3414_v42, 2  ;;  %v1616_v20 = vadd.f32 %v1615_v58, %v16724_v24  ;;  %v16726_v42 = vld [vmem:[#allocation34_spill] sm:$0xff] }
 0x2aa   :  { %v9677_v35 = vpop.f32.mrf.mxu1  ;;  %v9853_v37 = vpop.f32.mrf.mxu0  ;;  %v2639_v29 = vrot.slane %v11098_v48, 1  ;;  %v3420_v25 = vshrl.u32 %v11098_v48, 16  ;;  %v3423_v62 = vshll.u32 %v11098_v48, 16 }
 0x2ab   :  { %16721 = vst [vmem:[#allocation31_spill] sm:$0xff] %v12686_v2  ;;  %v3417_v3 = vor.u32 %v3416_v30, %v3413_v59  ;;  %v16728_v59 = vld [vmem:[#allocation35_spill] sm:$0xff] }
 0x2ac   :  { %v1618_v0 = vpop.f32.mrf.mxu1  ;;  %v2162_v5 = vpop.f32.mrf.mxu0 }
 0x2ad   :  { %v12694_v7 = vadd.f32 %v2162_v5, %v1611_v54  ;;  %v1619_v58 = vadd.f32 %v1618_v0, %v16726_v42  ;;  %v2640_v5 = vsel %vm1682_vm2, %v2637_v47, %v2639_v29  ;;  %v3418_v24 = vsel %vm3230_vm3, %v3408_v52, %v3417_v3 }
 0x2ae   :  { %v9678_v2 = vpop.f32.mrf.mxu1  ;;  %v9854_v61 = vpop.f32.mrf.mxu0 }
 0x2af   :  { %16723 = vst [vmem:[#allocation32_spill] sm:$0xff] %v12694_v7 }
 0x2b0   :  { %v1623_v60 = vpop.f32.mrf.mxu1  ;;  %v2167_v35 = vpop.f32.mrf.mxu0  ;;  %9972 = vmatmul.mubr.bf16.gmra.mxu1 %v2638_v46  ;;  %10148 = vmatmul.mubr.bf16.gmra.mxu0 %v3409_v16  ;;  %v11099_v46 = vld [vmem:[#allocation2 + $0xb8] sm:$0xff]  }
 0x2b1   :  { %v12698_v37 = vadd.f32 %v2167_v35, %v1616_v20  ;;  %9975 = vmatprep.mubr.msk.bf16.mxu1 %vm11355_vm0, %v16651_v8  ;;  %10151 = vmatprep.mubr.msk.bf16.mxu0 %vm11355_vm0, %v16651_v8  ;;  %v3422_v20 = vrot.slane %v3420_v25, 1  ;;  %v3425_v35 = vrot.slane %v3423_v62, 2  ;;  %v1624_v30 = vadd.f32 %v1623_v60, %v16728_v59  ;;  %v16730_v62 = vld [vmem:[#allocation36_spill] sm:$0xff] }
 0x2b2   :  { %v9681_v2 = vpop.f32.mrf.mxu1  ;;  %v9857_v61 = vpop.f32.mrf.mxu0  ;;  %v2641_v0 = vrot.slane %v11099_v46, 1  ;;  %v3429_v52 = vshrl.u32 %v11099_v46, 16  ;;  %v3432_v25 = vshll.u32 %v11099_v46, 16  ;;  %v11121_v46 = vld [vmem:[%s16459_s1 + $0x140] sm:$0xff]  }
 0x2b3   :  { %16725 = vst [vmem:[#allocation33_spill] sm:$0xff] %v12698_v37  ;;  %v3426_v47 = vor.u32 %v3425_v35, %v3422_v20  ;;  %v16732_v20 = vld [vmem:[#allocation37_spill] sm:$0xff]  ;;  %10254 = vmatpush3.bf16.msra.mxu1 %v11121_v46 }
 0x2b4   :  { %v1626_v1 = vpop.f32.mrf.mxu1  ;;  %v2170_v54 = vpop.f32.mrf.mxu0  ;;  %10599 = vmatprep.subr.bf16.mxu1 %v16651_v8 }
 0x2b5   :  { %v12706_v16 = vadd.f32 %v2170_v54, %v1619_v58  ;;  %v1627_v60 = vadd.f32 %v1626_v1, %v16730_v62  ;;  %v2642_v54 = vsel %vm1682_vm2, %v2639_v29, %v2641_v0  ;;  %v3427_v59 = vsel %vm3230_vm3, %v3417_v3, %v3426_v47  ;;  %v16734_v62 = vld [vmem:[#allocation38_spill] sm:$0xff] }
 0x2b6   :  { %v9682_v37 = vpop.f32.mrf.mxu1  ;;  %v9858_v7 = vpop.f32.mrf.mxu0 }
 0x2b7   :  { %16727 = vst [vmem:[#allocation34_spill] sm:$0xff] %v12706_v16 }
 0x2b8   :  { %v1631_v48 = vpop.f32.mrf.mxu1  ;;  %v2175_v2 = vpop.f32.mrf.mxu0  ;;  %9976 = vmatmul.mubr.bf16.gmra.mxu1 %v2640_v5  ;;  %10152 = vmatmul.mubr.bf16.gmra.mxu0 %v3418_v24  ;;  %v11102_v5 = vld [vmem:[#allocation2 + $0xc0] sm:$0xff]  }
 0x2b9   :  { %v12710_v61 = vadd.f32 %v2175_v2, %v1624_v30  ;;  %9979 = vmatprep.mubr.msk.bf16.mxu1 %vm11355_vm0, %v16651_v8  ;;  %10155 = vmatprep.mubr.msk.bf16.mxu0 %vm11355_vm0, %v16651_v8  ;;  %v3431_v30 = vrot.slane %v3429_v52, 1  ;;  %v3434_v2 = vrot.slane %v3432_v25, 2  ;;  %v1632_v35 = vadd.f32 %v1631_v48, %v16732_v20  ;;  %v11123_v48 = vld [vmem:[%s16459_s1 + $0x180] sm:$0xff]   ;;  %v11103_v20 = vld [vmem:[#allocation2 + $0xc8] sm:$0xff]  }
 0x2ba   :  { %v9685_v37 = vpop.f32.mrf.mxu1  ;;  %v9861_v7 = vpop.f32.mrf.mxu0  ;;  %v2643_v29 = vrot.slane %v11102_v5, 1  ;;  %10434 = vmatpush3.bf16.msra.mxu0 %v11123_v48 }
 0x2bb   :  { %16729 = vst [vmem:[#allocation35_spill] sm:$0xff] %v12710_v61  ;;  %v3435_v3 = vor.u32 %v3434_v2, %v3431_v30  ;;  %10779 = vmatprep.subr.bf16.mxu0 %v16651_v8 }
 0x2bc   :  { %v1634_v42 = vpop.f32.mrf.mxu1  ;;  %v2178_v58 = vpop.f32.mrf.mxu0 }
 0x2bd   :  { %v12718_v24 = vadd.f32 %v2178_v58, %v1627_v60  ;;  %v1635_v60 = vadd.f32 %v1634_v42, %v16734_v62  ;;  %v3436_v30 = vsel %vm3230_vm3, %v3426_v47, %v3435_v3  ;;  %v2645_v62 = vrot.slane %v11103_v20, 1 }
 0x2be   :  { %v9686_v61 = vpop.f32.mrf.mxu1  ;;  %v9862_v16 = vpop.f32.mrf.mxu0  ;;  %v3447_v47 = vshrl.u32 %v11103_v20, 16 }
 0x2bf   :  { %16731 = vst [vmem:[#allocation36_spill] sm:$0xff] %v12718_v24  ;;  %v3438_v16 = vshrl.u32 %v11102_v5, 16  ;;  %v3441_v61 = vshll.u32 %v11102_v5, 16 }
 0x2c0   :  { %v1639_v1 = vpop.f32.mrf.mxu1  ;;  %v2183_v37 = vpop.f32.mrf.mxu0  ;;  %9980 = vmatmul.mubr.bf16.gmra.mxu1 %v2642_v54  ;;  %10156 = vmatmul.mubr.bf16.gmra.mxu0 %v3427_v59  ;;  %v2644_v59 = vsel %vm1682_vm2, %v2641_v0, %v2643_v29 }
 0x2c1   :  { %v12725_v7 = vadd.f32 %v2183_v37, %v1632_v35  ;;  %9983 = vmatprep.mubr.msk.bf16.mxu1 %vm11355_vm0, %v16651_v8  ;;  %10159 = vmatprep.mubr.msk.bf16.mxu0 %vm11355_vm0, %v16651_v8  ;;  %v3440_v2 = vrot.slane %v3438_v16, 1  ;;  %v3443_v35 = vrot.slane %v3441_v61, 2  ;;  %v3450_v16 = vshll.u32 %v11103_v20, 16 }
 0x2c2   :  { %v9689_v52 = vpop.f32.mrf.mxu1  ;;  %v9865_v25 = vpop.f32.mrf.mxu0 }
 0x2c3   :  { %16733 = vst [vmem:[#allocation37_spill] sm:$0xff] %v12725_v7  ;;  %v16736_v52 = vld [vmem:[#allocation39_spill] sm:$0xff]  ;;  %v3444_v0 = vor.u32 %v3443_v35, %v3440_v2  ;;  %v16740_v2 = vld [vmem:[#allocation41_spill] sm:$0xff] }
 0x2c4   :  { %v1642_v58 = vpop.f32.mrf.mxu1  ;;  %v2186_v54 = vpop.f32.mrf.mxu0  ;;  %v1640_v42 = vadd.f32 %v1639_v1, %v16736_v52 }
 0x2c5   :  { %v12738_v5 = vadd.f32 %v2186_v54, %v1635_v60  ;;  %v16738_v54 = vld [vmem:[#allocation40_spill] sm:$0xff]  ;;  %v3445_v52 = vsel %vm3230_vm3, %v3435_v3, %v3444_v0 }
 0x2c6   :  { %v9690_v37 = vpop.f32.mrf.mxu1  ;;  %v9866_v46 = vpop.f32.mrf.mxu0  ;;  %v1643_v1 = vadd.f32 %v1642_v58, %v16738_v54 }
 0x2c7   :  { %16735 = vst [vmem:[#allocation38_spill] sm:$0xff] %v12738_v5 }
 0x2c8   :  { %v1647_v48 = vpop.f32.mrf.mxu1  ;;  %v2191_v25 = vpop.f32.mrf.mxu0  ;;  %9984 = vmatmul.mubr.bf16.gmra.mxu1 %v2644_v59  ;;  %10160 = vmatmul.mubr.bf16.gmra.mxu0 %v3436_v30  ;;  %v2646_v59 = vsel %vm1682_vm2, %v2643_v29, %v2645_v62 }
 0x2c9   :  { %v12742_v7 = vadd.f32 %v2191_v25, %v1640_v42  ;;  %9987 = vmatprep.mubr.msk.bf16.mxu1 %vm11355_vm0, %v16651_v8  ;;  %10163 = vmatprep.mubr.msk.bf16.mxu0 %vm11355_vm0, %v16651_v8  ;;  %v11104_v42 = vld [vmem:[#allocation2 + $0xd0] sm:$0xff]   ;;  %v3449_v25 = vrot.slane %v3447_v47, 1  ;;  %v1648_v35 = vadd.f32 %v1647_v48, %v16740_v2 }
 0x2ca   :  { %v9693_v61 = vpop.f32.mrf.mxu1  ;;  %v9869_v60 = vpop.f32.mrf.mxu0  ;;  %v3456_v58 = vshrl.u32 %v11104_v42, 16  ;;  %v2647_v29 = vrot.slane %v11104_v42, 1  ;;  %v16742_v47 = vld [vmem:[#allocation42_spill] sm:$0xff] }
 0x2cb   :  { %16737 = vst [vmem:[#allocation39_spill] sm:$0xff] %v12742_v7  ;;  %v3452_v7 = vrot.slane %v3450_v16, 2  ;;  %v3459_v60 = vshll.u32 %v11104_v42, 16 }
 0x2cc   :  { %v1650_v37 = vpop.f32.mrf.mxu1  ;;  %v2194_v46 = vpop.f32.mrf.mxu0 }
 0x2cd   :  { %v12750_v30 = vadd.f32 %v2194_v46, %v1643_v1  ;;  %v3453_v3 = vor.u32 %v3452_v7, %v3449_v25  ;;  %v1651_v48 = vadd.f32 %v1650_v37, %v16742_v47  ;;  %v11105_v46 = vld [vmem:[#allocation2 + $0xd8] sm:$0xff]  }
 0x2ce   :  { %v9694_v5 = vpop.f32.mrf.mxu1  ;;  %v9870_v24 = vpop.f32.mrf.mxu0  ;;  %v2649_v37 = vrot.slane %v11105_v46, 1 }
 0x2cf   :  { %16739 = vst [vmem:[#allocation40_spill] sm:$0xff] %v12750_v30 }
 0x2d0   :  { %v1655_v20 = vpop.f32.mrf.mxu1  ;;  %v2199_v61 = vpop.f32.mrf.mxu0  ;;  %9988 = vmatmul.mubr.bf16.gmra.mxu1 %v2646_v59  ;;  %10164 = vmatmul.mubr.bf16.gmra.mxu0 %v3445_v52  ;;  %v3458_v59 = vrot.slane %v3456_v58, 1  ;;  %v3461_v52 = vrot.slane %v3459_v60, 2  ;;  %v16744_v58 = vld [vmem:[#allocation44_spill] sm:$0xff]  ;;  %v2650_v47 = vsel %vm1682_vm2, %v2647_v29, %v2649_v37 }
 0x2d1   :  { %v12754_v54 = vadd.f32 %v2199_v61, %v1648_v35  ;;  %9991 = vmatprep.mubr.msk.bf16.mxu1 %vm11355_vm0, %v16651_v8  ;;  %10167 = vmatprep.mubr.msk.bf16.mxu0 %vm11355_vm0, %v16651_v8  ;;  %v2648_v35 = vsel %vm1682_vm2, %v2645_v62, %v2647_v29  ;;  %v3454_v61 = vsel %vm3230_vm3, %v3444_v0, %v3453_v3  ;;  %v3465_v62 = vshrl.u32 %v11105_v46, 16 }
 0x2d2   :  { %v9697_v5 = vpop.f32.mrf.mxu1  ;;  %v9873_v24 = vpop.f32.mrf.mxu0  ;;  %v1656_v42 = vadd.f32 %v1655_v20, %v16743_v51  ;;  %v3468_v0 = vshll.u32 %v11105_v46, 16 }
 0x2d3   :  { %16741 = vst [vmem:[#allocation41_spill] sm:$0xff] %v12754_v54  ;;  %v3462_v5 = vor.u32 %v3461_v52, %v3458_v59  ;;  %v3467_v59 = vrot.slane %v3465_v62, 1 }
 0x2d4   :  { %v1658_v16 = vpop.f32.mrf.mxu1  ;;  %v2202_v1 = vpop.f32.mrf.mxu0  ;;  %v3470_v52 = vrot.slane %v3468_v0, 2 }
 0x2d5   :  { %v12761_v2 = vadd.f32 %v2202_v1, %v1651_v48  ;;  %v3463_v16 = vsel %vm3230_vm3, %v3453_v3, %v3462_v5  ;;  %v11106_v1 = vld [vmem:[#allocation2 + $0xe0] sm:$0xff]  }
 0x2d6   :  { %v9698_v54 = vpop.f32.mrf.mxu1  ;;  %v9874_v30 = vpop.f32.mrf.mxu0  ;;  %v3474_v46 = vshrl.u32 %v11106_v1, 16  ;;  %v3471_v29 = vor.u32 %v3470_v52, %v3467_v59 }
 0x2d8   :  { %v2207_v7 = vpop.f32.mrf.mxu0  ;;  %v2802_v25 = vpop.f32.mrf.mxu1  ;;  %9992 = vmatmul.mubr.bf16.gmra.mxu1 %v2648_v35  ;;  %10168 = vmatmul.mubr.bf16.gmra.mxu0 %v3454_v61 }
 0x2d9   :  { %v12766_v24 = vadd.f32 %v2207_v7, %v1656_v42  ;;  %v3128_v60 = vadd.f32 %v2802_v25, %v16744_v58  ;;  %9995 = vmatprep.mubr.msk.bf16.mxu1 %vm11355_vm0, %v16651_v8  ;;  %10171 = vmatprep.mubr.msk.bf16.mxu0 %vm11355_vm0, %v16651_v8  ;;  %v3477_v25 = vshll.u32 %v11106_v1, 16 }
 0x2da   :  { %v9877_v30 = vpop.f32.mrf.mxu0  ;;  %v9897_v51 = vpop.f32.mrf.mxu1 }
 0x2dc   :  { %v2210_v20 = vpop.f32.mrf.mxu0  ;;  %v2805_v54 = vpop.f32.mrf.mxu1 }
 0x2dd   :  { %v3129_v48 = vadd.f32 %v2805_v54, %v12234_v31  ;;  %v2651_v31 = vrot.slane %v11106_v1, 1  ;;  %v11109_v20 = vld [vmem:[#allocation2 + $0xe8] sm:$0xff]   ;;  %v3476_v54 = vrot.slane %v3474_v46, 1 }
 0x2de   :  { %v9878_v35 = vpop.f32.mrf.mxu0  ;;  %v9898_v61 = vpop.f32.mrf.mxu1  ;;  %v2653_v59 = vrot.slane %v11109_v20, 1 }
 0x2df   :  { %v3472_v35 = vsel %vm3230_vm3, %v3462_v5, %v3471_v29 }
 0x2e0   :  { %v2810_v42 = vpop.f32.mrf.mxu1  ;;  %9996 = vmatmul.mubr.bf16.gmra.mxu1 %v2650_v47  ;;  %v3722_v7 = vpop.f32.mrf.mxu0  ;;  %10172 = vmatmul.mubr.bf16.gmra.mxu0 %v3463_v16  ;;  %v3479_v47 = vrot.slane %v3477_v25, 2 }
 0x2e1   :  { %v3130_v58 = vadd.f32 %v2810_v42, %v12238_v11  ;;  %v12777_v30 = vadd.f32 %v3722_v7, %v3128_v60  ;;  %9999 = vmatprep.mubr.msk.bf16.mxu1 %vm11355_vm0, %v16651_v8  ;;  %10175 = vmatprep.mubr.msk.bf16.mxu0 %vm11355_vm0, %v16651_v8  ;;  %v2652_v60 = vsel %vm1682_vm2, %v2649_v37, %v2651_v31  ;;  %v3486_v37 = vshll.u32 %v11109_v20, 16 }
 0x2e2   :  { %v9901_v3 = vpop.f32.mrf.mxu1  ;;  %v10077_v62 = vpop.f32.mrf.mxu0  ;;  %v3480_v52 = vor.u32 %v3479_v47, %v3476_v54  ;;  %v11110_v54 = vld [vmem:[#allocation2 + $0xf0] sm:$0xff]  }
 0x2e4   :  { %v2813_v0 = vpop.f32.mrf.mxu1  ;;  %v3725_v51 = vpop.f32.mrf.mxu0 }
 0x2e5   :  { %v3131_v16 = vadd.f32 %v2813_v0, %v12245_v34  ;;  %v12784_v11 = vadd.f32 %v3725_v51, %v3129_v48  ;;  %v3483_v34 = vshrl.u32 %v11109_v20, 16  ;;  %v2654_v0 = vsel %vm1682_vm2, %v2651_v31, %v2653_v59 }
 0x2e6   :  { %v9902_v61 = vpop.f32.mrf.mxu1  ;;  %v10078_v42 = vpop.f32.mrf.mxu0  ;;  %v3481_v51 = vsel %vm3230_vm3, %v3471_v29, %v3480_v52 }
 0x2e7   :  { %v3485_v47 = vrot.slane %v3483_v34, 1 }
 0x2e8   :  { %v2818_v7 = vpop.f32.mrf.mxu1  ;;  %10000 = vmatmul.mubr.bf16.gmra.mxu1 %v2652_v60  ;;  %v3730_v1 = vpop.f32.mrf.mxu0  ;;  %10176 = vmatmul.mubr.bf16.gmra.mxu0 %v3472_v35  ;;  %v3488_v60 = vrot.slane %v3486_v37, 2 }
 0x2e9   :  { %v3132_v3 = vadd.f32 %v2818_v7, %v12249_v56  ;;  %v12789_v46 = vadd.f32 %v3730_v1, %v3130_v58  ;;  %10003 = vmatprep.mubr.msk.bf16.mxu1 %vm11355_vm0, %v16651_v8  ;;  %10179 = vmatprep.mubr.msk.bf16.mxu0 %vm11355_vm0, %v16651_v8  ;;  %v3492_v7 = vshrl.u32 %v11110_v54, 16  ;;  %v3495_v1 = vshll.u32 %v11110_v54, 16 }
 0x2ea   :  { %v9905_v5 = vpop.f32.mrf.mxu1  ;;  %v10081_v48 = vpop.f32.mrf.mxu0  ;;  %v3489_v29 = vor.u32 %v3488_v60, %v3485_v47 }
 0x2ec   :  { %v2821_v25 = vpop.f32.mrf.mxu1  ;;  %v3733_v62 = vpop.f32.mrf.mxu0 }
 0x2ed   :  { %v3133_v56 = vadd.f32 %v2821_v25, %v12256_v43  ;;  %v12798_v58 = vadd.f32 %v3733_v62, %v3131_v16  ;;  %v2655_v43 = vrot.slane %v11110_v54, 1  ;;  %v11111_v25 = vld [vmem:[#allocation2 + $0xf8] sm:$0xff]   ;;  %v3494_v62 = vrot.slane %v3492_v7, 1 }
 0x2ee   :  { %v9906_v35 = vpop.f32.mrf.mxu1  ;;  %v10082_v61 = vpop.f32.mrf.mxu0  ;;  %v2657_v47 = vrot.slane %v11111_v25, 1 }
 0x2ef   :  { %v3490_v35 = vsel %vm3230_vm3, %v3480_v52, %v3489_v29 }
 0x2f0   :  { %v2826_v42 = vpop.f32.mrf.mxu1  ;;  %10004 = vmatmul.mubr.bf16.gmra.mxu1 %v2654_v0  ;;  %v3738_v20 = vpop.f32.mrf.mxu0  ;;  %10180 = vmatmul.mubr.bf16.gmra.mxu0 %v3481_v51  ;;  %v3497_v0 = vrot.slane %v3495_v1, 2 }
 0x2f1   :  { %v3134_v5 = vadd.f32 %v2826_v42, %v12260_v27  ;;  %v12801_v31 = vadd.f32 %v3738_v20, %v3132_v3  ;;  %10007 = vmatprep.mubr.msk.bf16.mxu1 %vm11355_vm0, %v16651_v8  ;;  %10183 = vmatprep.mubr.msk.bf16.mxu0 %vm11355_vm0, %v16651_v8  ;;  %v2656_v3 = vsel %vm1682_vm2, %v2653_v59, %v2655_v43  ;;  %v3504_v59 = vshll.u32 %v11111_v25, 16 }
 0x2f2   :  { %v9909_v16 = vpop.f32.mrf.mxu1  ;;  %v10085_v34 = vpop.f32.mrf.mxu0  ;;  %v3498_v60 = vor.u32 %v3497_v0, %v3494_v62  ;;  %v11112_v62 = vld [vmem:[#allocation2 + $0x100] sm:$0xff]  }
 0x2f4   :  { %v2829_v37 = vpop.f32.mrf.mxu1  ;;  %v3741_v48 = vpop.f32.mrf.mxu0 }
 0x2f5   :  { %v3135_v51 = vadd.f32 %v2829_v37, %v12267_v50  ;;  %v12808_v27 = vadd.f32 %v3741_v48, %v3133_v56  ;;  %v3501_v50 = vshrl.u32 %v11111_v25, 16  ;;  %v2658_v37 = vsel %vm1682_vm2, %v2655_v43, %v2657_v47 }
 0x2f6   :  { %v9910_v61 = vpop.f32.mrf.mxu1  ;;  %v10086_v42 = vpop.f32.mrf.mxu0  ;;  %v3499_v48 = vsel %vm3230_vm3, %v3489_v29, %v3498_v60 }
 0x2f7   :  { %v3503_v0 = vrot.slane %v3501_v50, 1 }
 0x2f8   :  { %v2834_v20 = vpop.f32.mrf.mxu1  ;;  %10008 = vmatmul.mubr.bf16.gmra.mxu1 %v2656_v3  ;;  %v3746_v54 = vpop.f32.mrf.mxu0  ;;  %10184 = vmatmul.mubr.bf16.gmra.mxu0 %v3490_v35  ;;  %v3506_v3 = vrot.slane %v3504_v59, 2 }
 0x2f9   :  { %v3136_v16 = vadd.f32 %v2834_v20, %v12271_v6  ;;  %v12813_v7 = vadd.f32 %v3746_v54, %v3134_v5  ;;  %10011 = vmatprep.mubr.msk.bf16.mxu1 %vm11355_vm0, %v16651_v8  ;;  %10187 = vmatprep.mubr.msk.bf16.mxu0 %vm11355_vm0, %v16651_v8  ;;  %v3510_v20 = vshrl.u32 %v11112_v62, 16  ;;  %v3513_v54 = vshll.u32 %v11112_v62, 16 }
 0x2fa   :  { %v9913_v52 = vpop.f32.mrf.mxu1  ;;  %v10089_v56 = vpop.f32.mrf.mxu0  ;;  %v3507_v29 = vor.u32 %v3506_v3, %v3503_v0 }
 0x2fc   :  { %v2837_v1 = vpop.f32.mrf.mxu1  ;;  %v3749_v34 = vpop.f32.mrf.mxu0 }
 0x2fd   :  { %v3137_v6 = vadd.f32 %v2837_v1, %v12278_v18  ;;  %v12822_v5 = vadd.f32 %v3749_v34, %v3135_v51  ;;  %v2659_v18 = vrot.slane %v11112_v62, 1  ;;  %v11113_v1 = vld [vmem:[#allocation2 + $0x108] sm:$0xff]   ;;  %v3512_v34 = vrot.slane %v3510_v20, 1 }
 0x2fe   :  { %v9914_v35 = vpop.f32.mrf.mxu1  ;;  %v10090_v61 = vpop.f32.mrf.mxu0  ;;  %v2661_v0 = vrot.slane %v11113_v1, 1 }
 0x2ff   :  { %v3508_v35 = vsel %vm3230_vm3, %v3498_v60, %v3507_v29 }
 0x300   :  { %v2842_v42 = vpop.f32.mrf.mxu1  ;;  %10012 = vmatmul.mubr.bf16.gmra.mxu1 %v2658_v37  ;;  %v3754_v25 = vpop.f32.mrf.mxu0  ;;  %10188 = vmatmul.mubr.bf16.gmra.mxu0 %v3499_v48  ;;  %v3515_v37 = vrot.slane %v3513_v54, 2 }
 0x301   :  { %v3138_v52 = vadd.f32 %v2842_v42, %v12282_v23  ;;  %v12825_v43 = vadd.f32 %v3754_v25, %v3136_v16  ;;  %10015 = vmatprep.mubr.msk.bf16.mxu1 %vm11355_vm0, %v16651_v8  ;;  %10191 = vmatprep.mubr.msk.bf16.mxu0 %vm11355_vm0, %v16651_v8  ;;  %v2660_v16 = vsel %vm1682_vm2, %v2657_v47, %v2659_v18  ;;  %v3522_v47 = vshll.u32 %v11113_v1, 16 }
 0x302   :  { %v9917_v51 = vpop.f32.mrf.mxu1  ;;  %v10093_v50 = vpop.f32.mrf.mxu0  ;;  %v3516_v3 = vor.u32 %v3515_v37, %v3512_v34  ;;  %v11116_v34 = vld [vmem:[#allocation2 + $0x110] sm:$0xff]  }
 0x304   :  { %v2845_v59 = vpop.f32.mrf.mxu1  ;;  %v3757_v56 = vpop.f32.mrf.mxu0 }
 0x305   :  { %v3139_v48 = vadd.f32 %v2845_v59, %v12289_v26  ;;  %v12832_v23 = vadd.f32 %v3757_v56, %v3137_v6  ;;  %v3519_v26 = vshrl.u32 %v11113_v1, 16  ;;  %v2662_v59 = vsel %vm1682_vm2, %v2659_v18, %v2661_v0 }
 0x306   :  { %v9918_v61 = vpop.f32.mrf.mxu1  ;;  %v10094_v42 = vpop.f32.mrf.mxu0  ;;  %v3517_v56 = vsel %vm3230_vm3, %v3507_v29, %v3516_v3 }
 0x307   :  { %v3521_v37 = vrot.slane %v3519_v26, 1 }
 0x308   :  { %v2850_v25 = vpop.f32.mrf.mxu1  ;;  %10016 = vmatmul.mubr.bf16.gmra.mxu1 %v2660_v16  ;;  %v3762_v62 = vpop.f32.mrf.mxu0  ;;  %10192 = vmatmul.mubr.bf16.gmra.mxu0 %v3508_v35  ;;  %v3524_v16 = vrot.slane %v3522_v47, 2 }
 0x309   :  { %v3140_v51 = vadd.f32 %v2850_v25, %v12293_v55  ;;  %v12837_v20 = vadd.f32 %v3762_v62, %v3138_v52  ;;  %10019 = vmatprep.mubr.msk.bf16.mxu1 %vm11355_vm0, %v16651_v8  ;;  %10195 = vmatprep.mubr.msk.bf16.mxu0 %vm11355_vm0, %v16651_v8  ;;  %v3528_v25 = vshrl.u32 %v11116_v34, 16  ;;  %v3531_v62 = vshll.u32 %v11116_v34, 16 }
 0x30a   :  { %v9921_v60 = vpop.f32.mrf.mxu1  ;;  %v10097_v6 = vpop.f32.mrf.mxu0  ;;  %v3525_v29 = vor.u32 %v3524_v16, %v3521_v37 }
 0x30c   :  { %v2853_v54 = vpop.f32.mrf.mxu1  ;;  %v3765_v50 = vpop.f32.mrf.mxu0 }
 0x30d   :  { %v3141_v55 = vadd.f32 %v2853_v54, %v12300_v45  ;;  %v12846_v52 = vadd.f32 %v3765_v50, %v3139_v48  ;;  %v2663_v45 = vrot.slane %v11116_v34, 1  ;;  %v11117_v54 = vld [vmem:[#allocation2 + $0x118] sm:$0xff]   ;;  %v3530_v50 = vrot.slane %v3528_v25, 1 }
 0x30e   :  { %v9922_v35 = vpop.f32.mrf.mxu1  ;;  %v10098_v61 = vpop.f32.mrf.mxu0  ;;  %v2665_v37 = vrot.slane %v11117_v54, 1 }
 0x30f   :  { %v3526_v35 = vsel %vm3230_vm3, %v3516_v3, %v3525_v29 }
 0x310   :  { %v2858_v42 = vpop.f32.mrf.mxu1  ;;  %10020 = vmatmul.mubr.bf16.gmra.mxu1 %v2662_v59  ;;  %v3770_v1 = vpop.f32.mrf.mxu0  ;;  %10196 = vmatmul.mubr.bf16.gmra.mxu0 %v3517_v56  ;;  %v3533_v59 = vrot.slane %v3531_v62, 2 }
 0x311   :  { %v3142_v60 = vadd.f32 %v2858_v42, %v12304_v22  ;;  %v12849_v18 = vadd.f32 %v3770_v1, %v3140_v51  ;;  %10023 = vmatprep.mubr.msk.bf16.mxu1 %vm11355_vm0, %v16651_v8  ;;  %10199 = vmatprep.mubr.msk.bf16.mxu0 %vm11355_vm0, %v16651_v8  ;;  %v2664_v51 = vsel %vm1682_vm2, %v2661_v0, %v2663_v45  ;;  %v3540_v0 = vshll.u32 %v11117_v54, 16 }
 0x312   :  { %v9925_v48 = vpop.f32.mrf.mxu1  ;;  %v10101_v26 = vpop.f32.mrf.mxu0  ;;  %v3534_v16 = vor.u32 %v3533_v59, %v3530_v50  ;;  %v11118_v50 = vld [vmem:[#allocation2 + $0x120] sm:$0xff]  }
 0x314   :  { %v2861_v47 = vpop.f32.mrf.mxu1  ;;  %v3773_v6 = vpop.f32.mrf.mxu0 }
 0x315   :  { %v3143_v56 = vadd.f32 %v2861_v47, %v12311_v10  ;;  %v12856_v22 = vadd.f32 %v3773_v6, %v3141_v55  ;;  %v3537_v10 = vshrl.u32 %v11117_v54, 16  ;;  %v2666_v47 = vsel %vm1682_vm2, %v2663_v45, %v2665_v37 }
 0x316   :  { %v9926_v61 = vpop.f32.mrf.mxu1  ;;  %v10102_v42 = vpop.f32.mrf.mxu0  ;;  %v3535_v6 = vsel %vm3230_vm3, %v3525_v29, %v3534_v16 }
 0x317   :  { %v3539_v59 = vrot.slane %v3537_v10, 1 }
 0x318   :  { %v2866_v1 = vpop.f32.mrf.mxu1  ;;  %10024 = vmatmul.mubr.bf16.gmra.mxu1 %v2664_v51  ;;  %v3778_v34 = vpop.f32.mrf.mxu0  ;;  %10200 = vmatmul.mubr.bf16.gmra.mxu0 %v3526_v35  ;;  %v3542_v51 = vrot.slane %v3540_v0, 2 }
 0x319   :  { %v3144_v48 = vadd.f32 %v2866_v1, %v12315_v39  ;;  %v12861_v25 = vadd.f32 %v3778_v34, %v3142_v60  ;;  %10027 = vmatprep.mubr.msk.bf16.mxu1 %vm11355_vm0, %v16651_v8  ;;  %10203 = vmatprep.mubr.msk.bf16.mxu0 %vm11355_vm0, %v16651_v8  ;;  %v3546_v1 = vshrl.u32 %v11118_v50, 16  ;;  %v3549_v34 = vshll.u32 %v11118_v50, 16 }
 0x31a   :  { %v9929_v3 = vpop.f32.mrf.mxu1  ;;  %v10105_v55 = vpop.f32.mrf.mxu0  ;;  %v3543_v29 = vor.u32 %v3542_v51, %v3539_v59 }
 0x31c   :  { %v2869_v62 = vpop.f32.mrf.mxu1  ;;  %v3781_v26 = vpop.f32.mrf.mxu0 }
 0x31d   :  { %v3145_v39 = vadd.f32 %v2869_v62, %v12322_v57  ;;  %v12870_v60 = vadd.f32 %v3781_v26, %v3143_v56  ;;  %v2667_v57 = vrot.slane %v11118_v50, 1  ;;  %v11119_v62 = vld [vmem:[#allocation2 + $0x128] sm:$0xff]   ;;  %v3548_v26 = vrot.slane %v3546_v1, 1 }
 0x31e   :  { %v9930_v35 = vpop.f32.mrf.mxu1  ;;  %v10106_v61 = vpop.f32.mrf.mxu0  ;;  %v2669_v59 = vrot.slane %v11119_v62, 1 }
 0x31f   :  { %v3544_v35 = vsel %vm3230_vm3, %v3534_v16, %v3543_v29 }
 0x320   :  { %v2874_v42 = vpop.f32.mrf.mxu1  ;;  %10028 = vmatmul.mubr.bf16.gmra.mxu1 %v2666_v47  ;;  %v3786_v54 = vpop.f32.mrf.mxu0  ;;  %10204 = vmatmul.mubr.bf16.gmra.mxu0 %v3535_v6  ;;  %v3551_v47 = vrot.slane %v3549_v34, 2 }
 0x321   :  { %v3146_v3 = vadd.f32 %v2874_v42, %v12326_v13  ;;  %v12873_v45 = vadd.f32 %v3786_v54, %v3144_v48  ;;  %10031 = vmatprep.mubr.msk.bf16.mxu1 %vm11355_vm0, %v16651_v8  ;;  %10207 = vmatprep.mubr.msk.bf16.mxu0 %vm11355_vm0, %v16651_v8  ;;  %v2668_v48 = vsel %vm1682_vm2, %v2665_v37, %v2667_v57  ;;  %v3558_v37 = vshll.u32 %v11119_v62, 16 }
 0x322   :  { %v9933_v56 = vpop.f32.mrf.mxu1  ;;  %v10109_v10 = vpop.f32.mrf.mxu0  ;;  %v3552_v51 = vor.u32 %v3551_v47, %v3548_v26  ;;  %v11120_v26 = vld [vmem:[#allocation2 + $0x130] sm:$0xff]  }
 0x324   :  { %v2877_v0 = vpop.f32.mrf.mxu1  ;;  %v3789_v55 = vpop.f32.mrf.mxu0 }
 0x325   :  { %v3147_v6 = vadd.f32 %v2877_v0, %v12333_v19  ;;  %v12880_v13 = vadd.f32 %v3789_v55, %v3145_v39  ;;  %v3555_v19 = vshrl.u32 %v11119_v62, 16  ;;  %v2670_v0 = vsel %vm1682_vm2, %v2667_v57, %v2669_v59 }
 0x326   :  { %v9934_v61 = vpop.f32.mrf.mxu1  ;;  %v10110_v42 = vpop.f32.mrf.mxu0  ;;  %v3553_v55 = vsel %vm3230_vm3, %v3543_v29, %v3552_v51 }
 0x327   :  { %v3557_v47 = vrot.slane %v3555_v19, 1 }
 0x328   :  { %v2882_v54 = vpop.f32.mrf.mxu1  ;;  %10032 = vmatmul.mubr.bf16.gmra.mxu1 %v2668_v48  ;;  %v3794_v50 = vpop.f32.mrf.mxu0  ;;  %10208 = vmatmul.mubr.bf16.gmra.mxu0 %v3544_v35  ;;  %v3560_v48 = vrot.slane %v3558_v37, 2 }
 0x329   :  { %v3148_v56 = vadd.f32 %v2882_v54, %v12337_v17  ;;  %v12885_v1 = vadd.f32 %v3794_v50, %v3146_v3  ;;  %10035 = vmatprep.mubr.msk.bf16.mxu1 %vm11355_vm0, %v16651_v8  ;;  %10211 = vmatprep.mubr.msk.bf16.mxu0 %vm11355_vm0, %v16651_v8  ;;  %v3564_v54 = vshrl.u32 %v11120_v26, 16  ;;  %v3567_v50 = vshll.u32 %v11120_v26, 16 }
 0x32a   :  { %v9937_v16 = vpop.f32.mrf.mxu1  ;;  %v10113_v39 = vpop.f32.mrf.mxu0  ;;  %v3561_v29 = vor.u32 %v3560_v48, %v3557_v47 }
 0x32c   :  { %v2885_v34 = vpop.f32.mrf.mxu1  ;;  %v3797_v10 = vpop.f32.mrf.mxu0 }
 0x32d   :  { %v3149_v17 = vadd.f32 %v2885_v34, %v12344_v9  ;;  %v12894_v3 = vadd.f32 %v3797_v10, %v3147_v6  ;;  %v2671_v9 = vrot.slane %v11120_v26, 1  ;;  %v11122_v34 = vld [vmem:[#allocation2 + $0x138] sm:$0xff]   ;;  %v3566_v10 = vrot.slane %v3564_v54, 1 }
 0x32e   :  { %v9938_v35 = vpop.f32.mrf.mxu1  ;;  %v10114_v61 = vpop.f32.mrf.mxu0  ;;  %v2673_v47 = vrot.slane %v11122_v34, 1 }
 0x32f   :  { %v3562_v35 = vsel %vm3230_vm3, %v3552_v51, %v3561_v29 }
 0x330   :  { %v2890_v42 = vpop.f32.mrf.mxu1  ;;  %10036 = vmatmul.mubr.bf16.gmra.mxu1 %v2670_v0  ;;  %v3802_v62 = vpop.f32.mrf.mxu0  ;;  %10212 = vmatmul.mubr.bf16.gmra.mxu0 %v3553_v55  ;;  %v3569_v0 = vrot.slane %v3567_v50, 2 }
 0x331   :  { %v3150_v16 = vadd.f32 %v2890_v42, %v12348_v49  ;;  %v12897_v57 = vadd.f32 %v3802_v62, %v3148_v56  ;;  %10039 = vmatprep.mubr.msk.bf16.mxu1 %vm11355_vm0, %v16651_v8  ;;  %10215 = vmatprep.mubr.msk.bf16.mxu0 %vm11355_vm0, %v16651_v8  ;;  %v2672_v56 = vsel %vm1682_vm2, %v2669_v59, %v2671_v9  ;;  %v3576_v59 = vshll.u32 %v11122_v34, 16 }
 0x332   :  { %v9941_v6 = vpop.f32.mrf.mxu1  ;;  %v10117_v19 = vpop.f32.mrf.mxu0  ;;  %v3570_v48 = vor.u32 %v3569_v0, %v3566_v10  ;;  %v11124_v10 = vld [vmem:[#allocation2 + $0x140] sm:$0xff]  }
 0x334   :  { %v2893_v37 = vpop.f32.mrf.mxu1  ;;  %v3805_v39 = vpop.f32.mrf.mxu0 }
 0x335   :  { %v3151_v55 = vadd.f32 %v2893_v37, %v12355_v40  ;;  %v12904_v49 = vadd.f32 %v3805_v39, %v3149_v17  ;;  %v3573_v40 = vshrl.u32 %v11122_v34, 16  ;;  %v2674_v37 = vsel %vm1682_vm2, %v2671_v9, %v2673_v47 }
 0x336   :  { %v9942_v61 = vpop.f32.mrf.mxu1  ;;  %v10118_v42 = vpop.f32.mrf.mxu0  ;;  %v3571_v39 = vsel %vm3230_vm3, %v3561_v29, %v3570_v48  ;;  %v2374_v29 = vld [vmem:[#allocation2 + $0x148] sm:$0xf] }
 0x337   :  { %16745 = vst [vmem:[#allocation42_spill] sm:$0xff] %v12904_v49  ;;  %v3575_v0 = vrot.slane %v3573_v40, 1 }
 0x338   :  { %v2898_v62 = vpop.f32.mrf.mxu1  ;;  %10040 = vmatmul.mubr.bf16.gmra.mxu1 %v2672_v56  ;;  %v3810_v26 = vpop.f32.mrf.mxu0  ;;  %10216 = vmatmul.mubr.bf16.gmra.mxu0 %v3562_v35  ;;  %v3578_v56 = vrot.slane %v3576_v59, 2 }
 0x339   :  { %v3152_v6 = vadd.f32 %v2898_v62, %v12359_v63  ;;  %v12909_v54 = vadd.f32 %v3810_v26, %v3150_v16  ;;  %10043 = vmatprep.mubr.msk.bf16.mxu1 %vm11355_vm0, %v16651_v8  ;;  %10219 = vmatprep.mubr.msk.bf16.mxu0 %vm11355_vm0, %v16651_v8  ;;  %v2675_v62 = vrot.slane %v11124_v10, 1  ;;  %v3582_v26 = vshrl.u32 %v11124_v10, 16 }
 0x33a   :  { %v9945_v51 = vpop.f32.mrf.mxu1  ;;  %v10121_v17 = vpop.f32.mrf.mxu0 }
 0x33b   :  { %16746 = vst [vmem:[#allocation43_spill] sm:$0xff] %v12909_v54  ;;  %v3585_v51 = vshll.u32 %v11124_v10, 16  ;;  %v16748_v17 = vld [vmem:[#allocation45_spill] sm:$0xff] }
 0x33c   :  { %v2901_v50 = vpop.f32.mrf.mxu1  ;;  %v3813_v19 = vpop.f32.mrf.mxu0 }
 0x33d   :  { %v3153_v63 = vadd.f32 %v2901_v50, %v12366_v32  ;;  %v12918_v16 = vadd.f32 %v3813_v19, %v3151_v55  ;;  %v3579_v32 = vor.u32 %v3578_v56, %v3575_v0  ;;  %v2375_v55 = vld [vmem:[#allocation2 + $0x14c] sm:$0x1] }
 0x33e   :  { %v9946_v35 = vpop.f32.mrf.mxu1  ;;  %v10122_v61 = vpop.f32.mrf.mxu0  ;;  %v3209_v50 = vld [vmem:[#allocation2 + $0x14c] sm:$0x3]  ;;  %v8722_v10 = vcombine.low %v2374_v29, %v2375_v55 }
 0x33f   :  { %16747 = vst [vmem:[#allocation44_spill] sm:$0xff] %v12918_v16  ;;  %v3584_v35 = vrot.slane %v3582_v26, 1  ;;  %v16750_v61 = vld [vmem:[#allocation46_spill] sm:$0xff] }
 0x340   :  { %v2906_v42 = vpop.f32.mrf.mxu1  ;;  %10044 = vmatmul.mubr.bf16.gmra.mxu1 %v2674_v37  ;;  %v3818_v34 = vpop.f32.mrf.mxu0  ;;  %10220 = vmatmul.mubr.bf16.gmra.mxu0 %v3571_v39  ;;  %v2676_v39 = vsel %vm1682_vm2, %v2673_v47, %v2675_v62  ;;  %v2677_v16 = vrot.slane %v8722_v10, 1  ;;  %v16751_v47 = vld [vmem:[#allocation47_spill] sm:$0xff] }
 0x341   :  { %v3154_v9 = vadd.f32 %v2906_v42, %v16748_v17  ;;  %v12921_v54 = vadd.f32 %v3818_v34, %v3152_v6  ;;  %10047 = vmatprep.mubr.msk.bf16.mxu1 %vm11355_vm0, %v16651_v8  ;;  %10223 = vmatprep.mubr.msk.bf16.mxu0 %vm11355_vm0, %v16651_v8  ;;  %v3587_v6 = vrot.slane %v3585_v51, 2  ;;  %v3580_v17 = vsel %vm3230_vm3, %v3570_v48, %v3579_v32 }
 0x342   :  { %v9949_v40 = vpop.f32.mrf.mxu1  ;;  %v10125_v59 = vpop.f32.mrf.mxu0 }
 0x343   :  { %16749 = vst [vmem:[#allocation45_spill] sm:$0xff] %v12921_v54  ;;  %v12932_v54 = vcombine.low %v2374_v29, %v3209_v50  ;;  %v3588_v49 = vor.u32 %v3587_v6, %v3584_v35 }
 0x344   :  { %v2909_v19 = vpop.f32.mrf.mxu1  ;;  %v3821_v37 = vpop.f32.mrf.mxu0 }
 0x345   :  { %v3155_v42 = vadd.f32 %v2909_v19, %v16750_v61  ;;  %v12929_v34 = vadd.f32 %v3821_v37, %v3153_v63  ;;  %v3591_v48 = vshrl.u32 %v12932_v54, 16  ;;  %v3594_v63 = vshll.u32 %v12932_v54, 16 }
 0x346   :  { %v9950_v0 = vpop.f32.mrf.mxu1  ;;  %v10126_v56 = vpop.f32.mrf.mxu0  ;;  %v2678_v37 = vsel %vm1682_vm2, %v2675_v62, %v2677_v16 }
 0x347   :  { %v3593_v6 = vrot.slane %v3591_v48, 1  ;;  %v3596_v61 = vrot.slane %v3594_v63, 2  ;;  %v4129_v48 = vld [vmem:[#allocation2 + $0x8] sm:$0xc] }
 0x348   :  { %v2914_v40 = vpop.f32.mrf.mxu1  ;;  %10048 = vmatmul.mubr.bf16.gmra.mxu1 %v2676_v39  ;;  %v3826_v59 = vpop.f32.mrf.mxu0  ;;  %10224 = vmatmul.mubr.bf16.gmra.mxu0 %v3580_v17  ;;  %v3589_v39 = vsel %vm3230_vm3, %v3579_v32, %v3588_v49 }
 0x349   :  { %v3156_v55 = vadd.f32 %v2914_v40, %v16751_v47  ;;  %v12935_v26 = vadd.f32 %v3826_v59, %v3154_v9  ;;  %10051 = vmatprep.mubr.msk.bf16.mxu1 %vm11355_vm0, %v16651_v8  ;;  %10227 = vmatprep.mubr.msk.bf16.mxu0 %vm11355_vm0, %v16651_v8  ;;  %v16752_v9 = vld [vmem:[#allocation48_spill] sm:$0xff]  ;;  %v16753_v59 = vld [vmem:[#allocation49_spill] sm:$0xff]  ;;  %v3597_v62 = vor.u32 %v3596_v61, %v3593_v6 }
 0x34a   :  { %v9953_v51 = vpop.f32.mrf.mxu1  ;;  %v10129_v29 = vpop.f32.mrf.mxu0 }
 0x34c   :  { %v2917_v50 = vpop.f32.mrf.mxu1  ;;  %v3829_v19 = vpop.f32.mrf.mxu0 }
 0x34d   :  { %v3157_v10 = vadd.f32 %v2917_v50, %v16752_v9  ;;  %v12946_v35 = vadd.f32 %v3829_v19, %v3155_v42 }
 0x34e   :  { %v9954_v17 = vpop.f32.mrf.mxu1  ;;  %v10130_v0 = vpop.f32.mrf.mxu0 }
 0x350   :  { %v2922_v56 = vpop.f32.mrf.mxu1  ;;  %10052 = vmatmul.mubr.bf16.gmra.mxu1 %v2678_v37  ;;  %v3834_v40 = vpop.f32.mrf.mxu0  ;;  %10228 = vmatmul.mubr.bf16.gmra.mxu0 %v3589_v39  ;;  %v3598_v37 = vsel %vm3230_vm3, %v3588_v49, %v3597_v62  ;;  %v11227_v49 = vld [vmem:[#allocation2 + $0x10] sm:$0xff]  }
 0x351   :  { %v3158_v47 = vadd.f32 %v2922_v56, %v16753_v59  ;;  %v12949_v51 = vadd.f32 %v3834_v40, %v3156_v55  ;;  %10055 = vmatprep.mubr.msk.bf16.mxu1 %vm11355_vm0, %v16651_v8  ;;  %10231 = vmatprep.mubr.msk.bf16.mxu0 %vm11355_vm0, %v16651_v8  ;;  %v11226_v55 = vld [vmem:[#allocation2 + $0xc] sm:$0xf] }
 0x352   :  { %v9957_v32 = vpop.f32.mrf.mxu1  ;;  %v10133_v42 = vpop.f32.mrf.mxu0  ;;  %v8772_v39 = vcombine.low %v4129_v48, %v11226_v55 }
 0x353   :  { %v4762_v32 = vld [vmem:[#allocation2 + $0x10] sm:$0xc] }
 0x354   :  { %v2925_v63 = vpop.f32.mrf.mxu1  ;;  %v3837_v29 = vpop.f32.mrf.mxu0 }
 0x355   :  { %v3159_v50 = vadd.f32 %v2925_v63, %v12402_v44  ;;  %v12956_v19 = vadd.f32 %v3837_v29, %v3157_v10  ;;  %v4151_v44 = vrot.slane %v8772_v39, 2  ;;  %v4152_v10 = vrot.slane %v11227_v49, 2 }
 0x356   :  { %v9958_v9 = vpop.f32.mrf.mxu1  ;;  %v10134_v17 = vpop.f32.mrf.mxu0 }
 0x357   :  { %v4153_v63 = vsel %vm4150_vm4, %v4151_v44, %v4152_v10  ;;  %v11128_v9 = vld [vmem:[%s16459_s1 + $0x1f8] sm:$0xff]  }
 0x358   :  { %v2930_v0 = vpop.f32.mrf.mxu1  ;;  %10056 = vmatmul.mubr.bf16.gmra.mxu1 %v2677_v16  ;;  %v3842_v56 = vpop.f32.mrf.mxu0  ;;  %10232 = vmatmul.mubr.bf16.gmra.mxu0 %v3598_v37  ;;  %v4763_v16 = vld [vmem:[#allocation2 + $0x14] sm:$0xf]  ;;  %v11130_v37 = vld [vmem:[#allocation2 + $0x18] sm:$0xff]  }
 0x359   :  { %v3160_v6 = vadd.f32 %v2930_v0, %v12410_v4  ;;  %v12960_v61 = vadd.f32 %v3842_v56, %v3158_v47  ;;  %10235 = vmatprep.mubr.msk.bf16.mxu0 %vm11355_vm0, %v16651_v8  ;;  %10255 = vmatprep.mubr.msk.bf16.mxu1 %vm11355_vm0, %v16651_v8  ;;  %v12970_v29 = vcombine.low %v4762_v32, %v4763_v16  ;;  %v11228_v56 = vld [vmem:[#allocation2 + $0x18] sm:$0xff]  }
 0x35a   :  { %v9961_v40 = vpop.f32.mrf.mxu1  ;;  %v10137_v59 = vpop.f32.mrf.mxu0  ;;  %v4154_v49 = vrot.slane %v11228_v56, 2  ;;  %v11229_v56 = vld [vmem:[#allocation2 + $0x20] sm:$0xff]  }
 0x35b   :  { %v5066_v44 = vrot.slane %v12970_v29, 2  ;;  %v5067_v40 = vrot.slane %v11130_v37, 2  ;;  %v11131_v37 = vld [vmem:[%s16459_s1 + $0x238] sm:$0xff]  }
 0x35c   :  { %v2933_v42 = vpop.f32.mrf.mxu1  ;;  %v3845_v48 = vpop.f32.mrf.mxu0 }
 0x35d   :  { %v3161_v4 = vadd.f32 %v2933_v42, %v12426_v14  ;;  %v12967_v47 = vadd.f32 %v3845_v48, %v3159_v50  ;;  %v4155_v48 = vsel %vm4150_vm4, %v4152_v10, %v4154_v49 }
 0x35e   :  { %v9962_v55 = vpop.f32.mrf.mxu1  ;;  %v10138_v39 = vpop.f32.mrf.mxu0 }
 0x35f   :  { %v11132_v55 = vld [vmem:[#allocation2 + $0x20] sm:$0xff]  }
 0x360   :  { %v2938_v17 = vpop.f32.mrf.mxu1  ;;  %v3850_v0 = vpop.f32.mrf.mxu0  ;;  %10236 = vmatmul.mubr.bf16.gmra.mxu0 %v3597_v62  ;;  %10256 = vmatmul.mubr.bf16.vlgmr.msra.gmra.mxu1 %v4153_v63  ;;  %v11137_v62 = vld [vmem:[%s16459_s1 + $0x1f0] sm:$0xff]   ;;  %v5068_v63 = vsel %vm4150_vm4, %v5066_v44, %v5067_v40  ;;  %v4156_v44 = vrot.slane %v11229_v56, 2 }
 0x361   :  { %v3162_v14 = vadd.f32 %v2938_v17, %v12438_v53  ;;  %v12976_v50 = vadd.f32 %v3850_v0, %v3160_v6  ;;  %10259 = vmatprep.mubr.msk.bf16.mxu1 %vm11355_vm0, %v16651_v8  ;;  %10435 = vmatprep.mubr.msk.bf16.mxu0 %vm11355_vm0, %v16651_v8 }
 0x362   :  { %v9965_v59 = vpop.f32.mrf.mxu1  ;;  %v10141_v32 = vpop.f32.mrf.mxu0  ;;  %10600 = vmatpush3.bf16.msra.mxu1 %v11128_v9 }
 0x363   :  { %10601 = vmatprep.subr.bf16.mxu1 %v16651_v8  ;;  %v5069_v59 = vrot.slane %v11132_v55, 2  ;;  %v11138_v32 = vld [vmem:[%s16459_s1 + $0x230] sm:$0xff]  }
 0x364   :  { %v2941_v53 = vpop.f32.mrf.mxu1  ;;  %v3853_v6 = vpop.f32.mrf.mxu0 }
 0x365   :  { %v3163_v16 = vadd.f32 %v2941_v53, %v12456_v28  ;;  %v12988_v42 = vadd.f32 %v3853_v6, %v3161_v4  ;;  %v11144_v28 = vld [vmem:[%s16459_s1 + $0x1e8] sm:$0xff]   ;;  %v5070_v55 = vsel %vm4150_vm4, %v5067_v40, %v5069_v59 }
 0x366   :  { %v9966_v39 = vpop.f32.mrf.mxu1  ;;  %v10142_v9 = vpop.f32.mrf.mxu0  ;;  %10602 = vmatpush3.bf16.msra.mxu1 %v11137_v62  ;;  %v11230_v40 = vld [vmem:[#allocation2 + $0x28] sm:$0xff]  }
 0x367   :  { %10603 = vmatprep.subr.bf16.mxu1 %v16651_v8  ;;  %v11133_v39 = vld [vmem:[#allocation2 + $0x28] sm:$0xff]  }
 0x368   :  { %v2946_v4 = vpop.f32.mrf.mxu1  ;;  %v3858_v17 = vpop.f32.mrf.mxu0  ;;  %10260 = vmatmul.mubr.bf16.gmra.mxu1 %v4155_v48  ;;  %10436 = vmatmul.mubr.bf16.vlgmr.msra.gmra.mxu0 %v5068_v63 }
 0x369   :  { %v3164_v10 = vadd.f32 %v2946_v4, %v12464_v38  ;;  %v13000_v0 = vadd.f32 %v3858_v17, %v3162_v14  ;;  %10780 = vmatpush3.bf16.msra.mxu0 %v11131_v37  ;;  %10263 = vmatprep.mubr.msk.bf16.mxu1 %vm11355_vm0, %v16651_v8  ;;  %v11151_v38 = vld [vmem:[%s16459_s1 + $0x1e0] sm:$0xff]   ;;  %v4157_v37 = vsel %vm4150_vm4, %v4154_v49, %v4156_v44  ;;  %v11145_v4 = vld [vmem:[%s16459_s1 + $0x228] sm:$0xff]  }
 0x36a   :  { %v9969_v62 = vpop.f32.mrf.mxu1  ;;  %v10145_v53 = vpop.f32.mrf.mxu0  ;;  %10439 = vmatprep.mubr.msk.bf16.mxu0 %vm11355_vm0, %v16651_v8  ;;  %10781 = vmatprep.subr.bf16.mxu0 %v16651_v8 }
 0x36b   :  { %10604 = vmatpush3.bf16.msra.mxu1 %v11144_v28 }
 0x36c   :  { %v2949_v14 = vpop.f32.mrf.mxu1  ;;  %v3861_v6 = vpop.f32.mrf.mxu0  ;;  %10605 = vmatprep.subr.bf16.mxu1 %v16651_v8 }
 0x36d   :  { %v3165_v48 = vadd.f32 %v2949_v14, %v12477_v15  ;;  %v13015_v63 = vadd.f32 %v3861_v6, %v3163_v16  ;;  %10782 = vmatpush3.bf16.msra.mxu0 %v11138_v32  ;;  %v4158_v16 = vrot.slane %v11230_v40, 2  ;;  %v5071_v32 = vrot.slane %v11133_v39, 2  ;;  %v11134_v39 = vld [vmem:[#allocation2 + $0x30] sm:$0xff]  }
 0x36e   :  { %v9970_v9 = vpop.f32.mrf.mxu1  ;;  %v10146_v28 = vpop.f32.mrf.mxu0  ;;  %10783 = vmatprep.subr.bf16.mxu0 %v16651_v8 }
 0x36f   :  { %10606 = vmatpush3.bf16.msra.mxu1 %v11151_v38  ;;  %v11152_v38 = vld [vmem:[%s16459_s1 + $0x220] sm:$0xff]  }
 0x370   :  { %v2954_v17 = vpop.f32.mrf.mxu1  ;;  %v3866_v56 = vpop.f32.mrf.mxu0  ;;  %10264 = vmatmul.mubr.bf16.gmra.mxu1 %v4157_v37  ;;  %10440 = vmatmul.mubr.bf16.gmra.mxu0 %v5070_v55  ;;  %v4159_v37 = vsel %vm4150_vm4, %v4156_v44, %v4158_v16  ;;  %v5072_v55 = vsel %vm4150_vm4, %v5069_v59, %v5071_v32  ;;  %v5073_v59 = vrot.slane %v11134_v39, 2 }
 0x371   :  { %v3166_v15 = vadd.f32 %v2954_v17, %v12482_v21  ;;  %v13024_v49 = vadd.f32 %v3866_v56, %v3164_v10  ;;  %10267 = vmatprep.mubr.msk.bf16.mxu1 %vm11355_vm0, %v16651_v8  ;;  %10443 = vmatprep.mubr.msk.bf16.mxu0 %vm11355_vm0, %v16651_v8 }
 0x372   :  { %v9973_v62 = vpop.f32.mrf.mxu1  ;;  %v10149_v53 = vpop.f32.mrf.mxu0  ;;  %10784 = vmatpush3.bf16.msra.mxu0 %v11145_v4  ;;  %10607 = vmatprep.subr.bf16.mxu1 %v16651_v8 }
 0x373   :  { %10785 = vmatprep.subr.bf16.mxu0 %v16651_v8 }
 0x374   :  { %v2957_v21 = vpop.f32.mrf.mxu1  ;;  %v3869_v10 = vpop.f32.mrf.mxu0 }
 0x375   :  { %v3167_v14 = vadd.f32 %v2957_v21, %v12490_v41  ;;  %v13036_v6 = vadd.f32 %v3869_v10, %v3165_v48  ;;  %v11231_v41 = vld [vmem:[#allocation2 + $0x30] sm:$0xff]  }
 0x376   :  { %v9974_v9 = vpop.f32.mrf.mxu1  ;;  %v10150_v28 = vpop.f32.mrf.mxu0  ;;  %10786 = vmatpush3.bf16.msra.mxu0 %v11152_v38  ;;  %v4160_v44 = vrot.slane %v11231_v41, 2 }
 0x377   :  { %10787 = vmatprep.subr.bf16.mxu0 %v16651_v8 }
 0x378   :  { %v2962_v4 = vpop.f32.mrf.mxu1  ;;  %v3874_v17 = vpop.f32.mrf.mxu0  ;;  %10268 = vmatmul.mubr.bf16.gmra.mxu1 %v4159_v37  ;;  %10444 = vmatmul.mubr.bf16.gmra.mxu0 %v5072_v55  ;;  %v11135_v37 = vld [vmem:[#allocation2 + $0x38] sm:$0xff]  }
 0x379   :  { %v3168_v56 = vadd.f32 %v2962_v4, %v12494_v33  ;;  %v13042_v40 = vadd.f32 %v3874_v17, %v3166_v15  ;;  %10271 = vmatprep.mubr.msk.bf16.mxu1 %vm11355_vm0, %v16651_v8  ;;  %10447 = vmatprep.mubr.msk.bf16.mxu0 %vm11355_vm0, %v16651_v8  ;;  %v4161_v33 = vsel %vm4150_vm4, %v4158_v16, %v4160_v44 }
 0x37a   :  { %v9977_v48 = vpop.f32.mrf.mxu1  ;;  %v10153_v62 = vpop.f32.mrf.mxu0  ;;  %v5074_v15 = vsel %vm4150_vm4, %v5071_v32, %v5073_v59  ;;  %v5075_v32 = vrot.slane %v11135_v37, 2  ;;  %v16756_v37 = vld [vmem:[#allocation51_spill] sm:$0xff] }
 0x37c   :  { %v2965_v53 = vpop.f32.mrf.mxu1  ;;  %v3877_v38 = vpop.f32.mrf.mxu0 }
 0x37d   :  { %v3169_v21 = vadd.f32 %v2965_v53, %v12502_v12  ;;  %v13049_v10 = vadd.f32 %v3877_v38, %v3167_v14  ;;  %v11232_v12 = vld [vmem:[#allocation2 + $0x38] sm:$0xff]   ;;  %v16754_v53 = vld [vmem:[#allocation50_spill] sm:$0xff] }
 0x37e   :  { %v9978_v55 = vpop.f32.mrf.mxu1  ;;  %v10154_v9 = vpop.f32.mrf.mxu0  ;;  %v4162_v16 = vrot.slane %v11232_v12, 2 }
 0x380   :  { %v2970_v28 = vpop.f32.mrf.mxu1  ;;  %v3882_v4 = vpop.f32.mrf.mxu0  ;;  %10272 = vmatmul.mubr.bf16.gmra.mxu1 %v4161_v33  ;;  %10448 = vmatmul.mubr.bf16.gmra.mxu0 %v5074_v15  ;;  %v11136_v15 = vld [vmem:[#allocation2 + $0x40] sm:$0xff]  }
 0x381   :  { %v3170_v39 = vadd.f32 %v2970_v28, %v12506_v36  ;;  %v13054_v17 = vadd.f32 %v3882_v4, %v3168_v56  ;;  %10275 = vmatprep.mubr.msk.bf16.mxu1 %vm11355_vm0, %v16651_v8  ;;  %10451 = vmatprep.mubr.msk.bf16.mxu0 %vm11355_vm0, %v16651_v8  ;;  %v4163_v36 = vsel %vm4150_vm4, %v4160_v44, %v4162_v16  ;;  %v11233_v44 = vld [vmem:[#allocation2 + $0x40] sm:$0xff]  }
 0x382   :  { %v9981_v14 = vpop.f32.mrf.mxu1  ;;  %v10157_v41 = vpop.f32.mrf.mxu0  ;;  %v5076_v56 = vsel %vm4150_vm4, %v5073_v59, %v5075_v32  ;;  %v5077_v59 = vrot.slane %v11136_v15, 2  ;;  %v11159_v15 = vld [vmem:[%s16459_s1 + $0x218] sm:$0xff]  }
 0x383   :  { %10788 = vmatpush3.bf16.msra.mxu0 %v11159_v15 }
 0x384   :  { %v2973_v48 = vpop.f32.mrf.mxu1  ;;  %v3885_v62 = vpop.f32.mrf.mxu0  ;;  %10789 = vmatprep.subr.bf16.mxu0 %v16651_v8 }
 0x385   :  { %v3171_v38 = vadd.f32 %v2973_v48, %v16754_v53  ;;  %v13061_v33 = vadd.f32 %v3885_v62, %v3169_v21  ;;  %v4164_v21 = vrot.slane %v11233_v44, 2  ;;  %v11158_v62 = vld [vmem:[%s16459_s1 + $0x1d8] sm:$0xff]  }
 0x386   :  { %v9982_v55 = vpop.f32.mrf.mxu1  ;;  %v10158_v9 = vpop.f32.mrf.mxu0  ;;  %10608 = vmatpush3.bf16.msra.mxu1 %v11158_v62 }
 0x387   :  { %16755 = vst [vmem:[#allocation46_spill] sm:$0xff] %v13061_v33  ;;  %v4165_v9 = vsel %vm4150_vm4, %v4162_v16, %v4164_v21  ;;  %10609 = vmatprep.subr.bf16.mxu1 %v16651_v8  ;;  %v11234_v16 = vld [vmem:[#allocation2 + $0x48] sm:$0xff]  }
 0x388   :  { %v2978_v28 = vpop.f32.mrf.mxu1  ;;  %v3890_v4 = vpop.f32.mrf.mxu0  ;;  %10276 = vmatmul.mubr.bf16.gmra.mxu1 %v4163_v36  ;;  %10452 = vmatmul.mubr.bf16.gmra.mxu0 %v5076_v56 }
 0x389   :  { %v3172_v12 = vadd.f32 %v2978_v28, %v16756_v37  ;;  %v13066_v14 = vadd.f32 %v3890_v4, %v3170_v39  ;;  %10279 = vmatprep.mubr.msk.bf16.mxu1 %vm11355_vm0, %v16651_v8  ;;  %10455 = vmatprep.mubr.msk.bf16.mxu0 %vm11355_vm0, %v16651_v8  ;;  %v16758_v39 = vld [vmem:[#allocation8_spill] sm:$0xff]  ;;  %v5078_v28 = vsel %vm4150_vm4, %v5075_v32, %v5077_v59  ;;  %v11139_v4 = vld [vmem:[#allocation2 + $0x48] sm:$0xff]   ;;  %v4166_v32 = vrot.slane %v11234_v16, 2 }
 0x38a   :  { %v9985_v41 = vpop.f32.mrf.mxu1  ;;  %v10161_v48 = vpop.f32.mrf.mxu0 }
 0x38b   :  { %16757 = vst [vmem:[#allocation47_spill] sm:$0xff] %v13066_v14 }
 0x38c   :  { %v2981_v53 = vpop.f32.mrf.mxu1  ;;  %v3893_v36 = vpop.f32.mrf.mxu0 }
 0x38d   :  { %v3173_v56 = vadd.f32 %v2981_v53, %v16758_v39  ;;  %v13076_v55 = vadd.f32 %v3893_v36, %v3171_v38  ;;  %v16760_v38 = vld [vmem:[#allocation9_spill] sm:$0xff]  ;;  %v5079_v36 = vrot.slane %v11139_v4, 2  ;;  %v16764_v4 = vld [vmem:[#allocation11_spill] sm:$0xff] }
 0x38e   :  { %v9986_v37 = vpop.f32.mrf.mxu1  ;;  %v10162_v44 = vpop.f32.mrf.mxu0 }
 0x38f   :  { %16759 = vst [vmem:[#allocation48_spill] sm:$0xff] %v13076_v55 }
 0x390   :  { %v2986_v41 = vpop.f32.mrf.mxu1  ;;  %v3898_v48 = vpop.f32.mrf.mxu0  ;;  %10280 = vmatmul.mubr.bf16.gmra.mxu1 %v4165_v9  ;;  %10456 = vmatmul.mubr.bf16.gmra.mxu0 %v5078_v28  ;;  %v16762_v28 = vld [vmem:[#allocation10_spill] sm:$0xff] }
 0x391   :  { %v3174_v62 = vadd.f32 %v2986_v41, %v16760_v38  ;;  %v13085_v53 = vadd.f32 %v3898_v48, %v3172_v12  ;;  %10283 = vmatprep.mubr.msk.bf16.mxu1 %vm11355_vm0, %v16651_v8  ;;  %10459 = vmatprep.mubr.msk.bf16.mxu0 %vm11355_vm0, %v16651_v8  ;;  %v4167_v12 = vsel %vm4150_vm4, %v4164_v21, %v4166_v32  ;;  %v11140_v38 = vld [vmem:[#allocation2 + $0x50] sm:$0xff]  }
 0x392   :  { %v9989_v39 = vpop.f32.mrf.mxu1  ;;  %v10165_v37 = vpop.f32.mrf.mxu0  ;;  %v5080_v48 = vsel %vm4150_vm4, %v5077_v59, %v5079_v36  ;;  %v11235_v21 = vld [vmem:[#allocation2 + $0x50] sm:$0xff]   ;;  %v5081_v59 = vrot.slane %v11140_v38, 2  ;;  %v16768_v38 = vld [vmem:[#allocation13_spill] sm:$0xff] }
 0x393   :  { %16761 = vst [vmem:[#allocation49_spill] sm:$0xff] %v13085_v53 }
 0x394   :  { %v2989_v15 = vpop.f32.mrf.mxu1  ;;  %v3901_v9 = vpop.f32.mrf.mxu0 }
 0x395   :  { %v3175_v44 = vadd.f32 %v2989_v15, %v16762_v28  ;;  %v13093_v41 = vadd.f32 %v3901_v9, %v3173_v56  ;;  %v4168_v56 = vrot.slane %v11235_v21, 2  ;;  %v16766_v28 = vld [vmem:[#allocation12_spill] sm:$0xff] }
 0x396   :  { %v9990_v53 = vpop.f32.mrf.mxu1  ;;  %v10166_v55 = vpop.f32.mrf.mxu0 }
 0x397   :  { %16763 = vst [vmem:[#allocation50_spill] sm:$0xff] %v13093_v41 }
 0x398   :  { %v2994_v14 = vpop.f32.mrf.mxu1  ;;  %v3906_v16 = vpop.f32.mrf.mxu0  ;;  %10284 = vmatmul.mubr.bf16.gmra.mxu1 %v4167_v12  ;;  %10460 = vmatmul.mubr.bf16.gmra.mxu0 %v5080_v48 }
 0x399   :  { %v3176_v39 = vadd.f32 %v2994_v14, %v16764_v4  ;;  %v13098_v37 = vadd.f32 %v3906_v16, %v3174_v62  ;;  %10287 = vmatprep.mubr.msk.bf16.mxu1 %vm11355_vm0, %v16651_v8  ;;  %10463 = vmatprep.mubr.msk.bf16.mxu0 %vm11355_vm0, %v16651_v8  ;;  %v4169_v14 = vsel %vm4150_vm4, %v4166_v32, %v4168_v56  ;;  %v11141_v16 = vld [vmem:[#allocation2 + $0x58] sm:$0xff]  }
 0x39a   :  { %v9993_v15 = vpop.f32.mrf.mxu1  ;;  %v10169_v53 = vpop.f32.mrf.mxu0  ;;  %v5082_v62 = vsel %vm4150_vm4, %v5079_v36, %v5081_v59  ;;  %v11236_v32 = vld [vmem:[#allocation2 + $0x58] sm:$0xff]   ;;  %v5083_v36 = vrot.slane %v11141_v16, 2 }
 0x39b   :  { %16765 = vst [vmem:[#allocation51_spill] sm:$0xff] %v13098_v37  ;;  %v16772_v16 = vld [vmem:[#allocation15_spill] sm:$0xff] }
 0x39c   :  { %v2997_v55 = vpop.f32.mrf.mxu1  ;;  %v3909_v9 = vpop.f32.mrf.mxu0 }
 0x39d   :  { %v3177_v12 = vadd.f32 %v2997_v55, %v16766_v28  ;;  %v13105_v48 = vadd.f32 %v3909_v9, %v3175_v44  ;;  %v4170_v44 = vrot.slane %v11236_v32, 2  ;;  %v16770_v28 = vld [vmem:[#allocation14_spill] sm:$0xff] }
 0x39e   :  { %v9994_v4 = vpop.f32.mrf.mxu1  ;;  %v10170_v37 = vpop.f32.mrf.mxu0 }
 0x39f   :  { %16767 = vst [vmem:[#allocation8_spill] sm:$0xff] %v13105_v48 }
 0x3a0   :  { %v3002_v41 = vpop.f32.mrf.mxu1  ;;  %v3914_v33 = vpop.f32.mrf.mxu0  ;;  %10288 = vmatmul.mubr.bf16.gmra.mxu1 %v4169_v14  ;;  %10464 = vmatmul.mubr.bf16.gmra.mxu0 %v5082_v62 }
 0x3a1   :  { %v3178_v21 = vadd.f32 %v3002_v41, %v16768_v38  ;;  %v13110_v15 = vadd.f32 %v3914_v33, %v3176_v39  ;;  %10291 = vmatprep.mubr.msk.bf16.mxu1 %vm11355_vm0, %v16651_v8  ;;  %10467 = vmatprep.mubr.msk.bf16.mxu0 %vm11355_vm0, %v16651_v8  ;;  %v4171_v33 = vsel %vm4150_vm4, %v4168_v56, %v4170_v44  ;;  %v11142_v39 = vld [vmem:[#allocation2 + $0x60] sm:$0xff]  }
 0x3a2   :  { %v9997_v53 = vpop.f32.mrf.mxu1  ;;  %v10173_v55 = vpop.f32.mrf.mxu0  ;;  %v5084_v41 = vsel %vm4150_vm4, %v5081_v59, %v5083_v36  ;;  %v11237_v56 = vld [vmem:[#allocation2 + $0x60] sm:$0xff]   ;;  %v5085_v59 = vrot.slane %v11142_v39, 2  ;;  %v16776_v39 = vld [vmem:[#allocation17_spill] sm:$0xff] }
 0x3a3   :  { %16769 = vst [vmem:[#allocation9_spill] sm:$0xff] %v13110_v15 }
 0x3a4   :  { %v3005_v37 = vpop.f32.mrf.mxu1  ;;  %v3917_v9 = vpop.f32.mrf.mxu0 }
 0x3a5   :  { %v3179_v14 = vadd.f32 %v3005_v37, %v16770_v28  ;;  %v13117_v62 = vadd.f32 %v3917_v9, %v3177_v12  ;;  %v4172_v12 = vrot.slane %v11237_v56, 2 }
 0x3a6   :  { %v9998_v4 = vpop.f32.mrf.mxu1  ;;  %v10174_v38 = vpop.f32.mrf.mxu0 }
 0x3a7   :  { %16771 = vst [vmem:[#allocation10_spill] sm:$0xff] %v13117_v62  ;;  %v16774_v4 = vld [vmem:[#allocation16_spill] sm:$0xff] }
 0x3a8   :  { %v3010_v15 = vpop.f32.mrf.mxu1  ;;  %v3922_v48 = vpop.f32.mrf.mxu0  ;;  %10292 = vmatmul.mubr.bf16.gmra.mxu1 %v4171_v33  ;;  %10468 = vmatmul.mubr.bf16.gmra.mxu0 %v5084_v41 }
 0x3a9   :  { %v3180_v32 = vadd.f32 %v3010_v15, %v16772_v16  ;;  %v13122_v53 = vadd.f32 %v3922_v48, %v3178_v21  ;;  %10295 = vmatprep.mubr.msk.bf16.mxu1 %vm11355_vm0, %v16651_v8  ;;  %10471 = vmatprep.mubr.msk.bf16.mxu0 %vm11355_vm0, %v16651_v8  ;;  %v4173_v48 = vsel %vm4150_vm4, %v4170_v44, %v4172_v12  ;;  %v11143_v15 = vld [vmem:[#allocation2 + $0x68] sm:$0xff]  }
 0x3aa   :  { %v10001_v55 = vpop.f32.mrf.mxu1  ;;  %v10177_v37 = vpop.f32.mrf.mxu0  ;;  %v5086_v21 = vsel %vm4150_vm4, %v5083_v36, %v5085_v59  ;;  %v11238_v44 = vld [vmem:[#allocation2 + $0x68] sm:$0xff]   ;;  %v5087_v36 = vrot.slane %v11143_v15, 2  ;;  %v11166_v15 = vld [vmem:[%s16459_s1 + $0x210] sm:$0xff]  }
 0x3ab   :  { %16773 = vst [vmem:[#allocation11_spill] sm:$0xff] %v13122_v53  ;;  %10790 = vmatpush3.bf16.msra.mxu0 %v11166_v15  ;;  %v16784_v15 = vld [vmem:[#allocation21_spill] sm:$0xff] }
 0x3ac   :  { %v3013_v9 = vpop.f32.mrf.mxu1  ;;  %v3925_v28 = vpop.f32.mrf.mxu0  ;;  %10791 = vmatprep.subr.bf16.mxu0 %v16651_v8 }
 0x3ad   :  { %v3181_v33 = vadd.f32 %v3013_v9, %v16774_v4  ;;  %v13129_v41 = vadd.f32 %v3925_v28, %v3179_v14  ;;  %v4174_v14 = vrot.slane %v11238_v44, 2 }
 0x3ae   :  { %v10002_v38 = vpop.f32.mrf.mxu1  ;;  %v10178_v16 = vpop.f32.mrf.mxu0 }
 0x3af   :  { %16775 = vst [vmem:[#allocation12_spill] sm:$0xff] %v13129_v41  ;;  %v16778_v38 = vld [vmem:[#allocation18_spill] sm:$0xff] }
 0x3b0   :  { %v3018_v53 = vpop.f32.mrf.mxu1  ;;  %v3930_v62 = vpop.f32.mrf.mxu0  ;;  %10296 = vmatmul.mubr.bf16.gmra.mxu1 %v4173_v48  ;;  %10472 = vmatmul.mubr.bf16.gmra.mxu0 %v5086_v21  ;;  %v11165_v16 = vld [vmem:[%s16459_s1 + $0x1d0] sm:$0xff]  }
 0x3b1   :  { %v3182_v56 = vadd.f32 %v3018_v53, %v16776_v39  ;;  %v13134_v55 = vadd.f32 %v3930_v62, %v3180_v32  ;;  %10299 = vmatprep.mubr.msk.bf16.mxu1 %vm11355_vm0, %v16651_v8  ;;  %10475 = vmatprep.mubr.msk.bf16.mxu0 %vm11355_vm0, %v16651_v8  ;;  %v4175_v62 = vsel %vm4150_vm4, %v4172_v12, %v4174_v14  ;;  %v11146_v53 = vld [vmem:[#allocation2 + $0x70] sm:$0xff]  }
 0x3b2   :  { %v10005_v37 = vpop.f32.mrf.mxu1  ;;  %v10181_v9 = vpop.f32.mrf.mxu0  ;;  %v5088_v32 = vsel %vm4150_vm4, %v5085_v59, %v5087_v36  ;;  %10610 = vmatpush3.bf16.msra.mxu1 %v11165_v16  ;;  %v11239_v59 = vld [vmem:[#allocation2 + $0x70] sm:$0xff]  }
 0x3b3   :  { %16777 = vst [vmem:[#allocation13_spill] sm:$0xff] %v13134_v55  ;;  %10611 = vmatprep.subr.bf16.mxu1 %v16651_v8 }
 0x3b4   :  { %v3021_v28 = vpop.f32.mrf.mxu1  ;;  %v3933_v4 = vpop.f32.mrf.mxu0 }
 0x3b5   :  { %v3183_v48 = vadd.f32 %v3021_v28, %v16778_v38  ;;  %v13141_v21 = vadd.f32 %v3933_v4, %v3181_v33  ;;  %v16780_v33 = vld [vmem:[#allocation19_spill] sm:$0xff]  ;;  %v4176_v4 = vrot.slane %v11239_v59, 2  ;;  %v5089_v38 = vrot.slane %v11146_v53, 2 }
 0x3b6   :  { %v10006_v39 = vpop.f32.mrf.mxu1  ;;  %v10182_v44 = vpop.f32.mrf.mxu0 }
 0x3b7   :  { %16779 = vst [vmem:[#allocation14_spill] sm:$0xff] %v13141_v21 }
 0x3b8   :  { %v3026_v37 = vpop.f32.mrf.mxu1  ;;  %v3938_v9 = vpop.f32.mrf.mxu0  ;;  %10300 = vmatmul.mubr.bf16.gmra.mxu1 %v4175_v62  ;;  %10476 = vmatmul.mubr.bf16.gmra.mxu0 %v5088_v32 }
 0x3b9   :  { %v3184_v12 = vadd.f32 %v3026_v37, %v16780_v33  ;;  %v13152_v28 = vadd.f32 %v3938_v9, %v3182_v56  ;;  %10303 = vmatprep.mubr.msk.bf16.mxu1 %vm11355_vm0, %v16651_v8  ;;  %10479 = vmatprep.mubr.msk.bf16.mxu0 %vm11355_vm0, %v16651_v8  ;;  %v16782_v56 = vld [vmem:[#allocation20_spill] sm:$0xff]  ;;  %v4177_v9 = vsel %vm4150_vm4, %v4174_v14, %v4176_v4  ;;  %v11240_v14 = vld [vmem:[#allocation2 + $0x78] sm:$0xff]  }
 0x3ba   :  { %v10009_v39 = vpop.f32.mrf.mxu1  ;;  %v10185_v44 = vpop.f32.mrf.mxu0  ;;  %v5090_v33 = vsel %vm4150_vm4, %v5087_v36, %v5089_v38 }
 0x3bb   :  { %16781 = vst [vmem:[#allocation15_spill] sm:$0xff] %v13152_v28  ;;  %v11147_v28 = vld [vmem:[#allocation2 + $0x78] sm:$0xff]  }
 0x3bc   :  { %v3029_v62 = vpop.f32.mrf.mxu1  ;;  %v3941_v32 = vpop.f32.mrf.mxu0  ;;  %v5091_v36 = vrot.slane %v11147_v28, 2  ;;  %v16788_v28 = vld [vmem:[#allocation23_spill] sm:$0xff] }
 0x3bd   :  { %v3185_v16 = vadd.f32 %v3029_v62, %v16782_v56  ;;  %v13161_v37 = vadd.f32 %v3941_v32, %v3183_v48  ;;  %v4178_v48 = vrot.slane %v11240_v14, 2 }
 0x3be   :  { %v10010_v59 = vpop.f32.mrf.mxu1  ;;  %v10186_v53 = vpop.f32.mrf.mxu0 }
 0x3bf   :  { %16783 = vst [vmem:[#allocation16_spill] sm:$0xff] %v13161_v37  ;;  %v16786_v53 = vld [vmem:[#allocation22_spill] sm:$0xff] }
 0x3c0   :  { %v3034_v39 = vpop.f32.mrf.mxu1  ;;  %v3946_v44 = vpop.f32.mrf.mxu0  ;;  %10304 = vmatmul.mubr.bf16.gmra.mxu1 %v4177_v9  ;;  %10480 = vmatmul.mubr.bf16.gmra.mxu0 %v5090_v33 }
 0x3c1   :  { %v3186_v21 = vadd.f32 %v3034_v39, %v16784_v15  ;;  %v13166_v55 = vadd.f32 %v3946_v44, %v3184_v12  ;;  %10307 = vmatprep.mubr.msk.bf16.mxu1 %vm11355_vm0, %v16651_v8  ;;  %10483 = vmatprep.mubr.msk.bf16.mxu0 %vm11355_vm0, %v16651_v8  ;;  %v4179_v12 = vsel %vm4150_vm4, %v4176_v4, %v4178_v48  ;;  %v11148_v44 = vld [vmem:[#allocation2 + $0x80] sm:$0xff]  }
 0x3c2   :  { %v10013_v62 = vpop.f32.mrf.mxu1  ;;  %v10189_v32 = vpop.f32.mrf.mxu0  ;;  %v5092_v39 = vsel %vm4150_vm4, %v5089_v38, %v5091_v36  ;;  %v11241_v4 = vld [vmem:[#allocation2 + $0x80] sm:$0xff]   ;;  %v5093_v38 = vrot.slane %v11148_v44, 2  ;;  %v16792_v44 = vld [vmem:[#allocation25_spill] sm:$0xff] }
 0x3c3   :  { %16785 = vst [vmem:[#allocation17_spill] sm:$0xff] %v13166_v55 }
 0x3c4   :  { %v3037_v56 = vpop.f32.mrf.mxu1  ;;  %v3949_v59 = vpop.f32.mrf.mxu0 }
 0x3c5   :  { %v3187_v9 = vadd.f32 %v3037_v56, %v16786_v53  ;;  %v13173_v33 = vadd.f32 %v3949_v59, %v3185_v16  ;;  %v4180_v16 = vrot.slane %v11241_v4, 2  ;;  %v16790_v53 = vld [vmem:[#allocation24_spill] sm:$0xff] }
 0x3c6   :  { %v10014_v15 = vpop.f32.mrf.mxu1  ;;  %v10190_v55 = vpop.f32.mrf.mxu0 }
 0x3c7   :  { %16787 = vst [vmem:[#allocation18_spill] sm:$0xff] %v13173_v33 }
 0x3c8   :  { %v3042_v37 = vpop.f32.mrf.mxu1  ;;  %v3954_v41 = vpop.f32.mrf.mxu0  ;;  %10308 = vmatmul.mubr.bf16.gmra.mxu1 %v4179_v12  ;;  %10484 = vmatmul.mubr.bf16.gmra.mxu0 %v5092_v39 }
 0x3c9   :  { %v3188_v14 = vadd.f32 %v3042_v37, %v16788_v28  ;;  %v13178_v62 = vadd.f32 %v3954_v41, %v3186_v21  ;;  %10311 = vmatprep.mubr.msk.bf16.mxu1 %vm11355_vm0, %v16651_v8  ;;  %10487 = vmatprep.mubr.msk.bf16.mxu0 %vm11355_vm0, %v16651_v8  ;;  %v4181_v41 = vsel %vm4150_vm4, %v4178_v48, %v4180_v16  ;;  %v11149_v37 = vld [vmem:[#allocation2 + $0x88] sm:$0xff]  }
 0x3ca   :  { %v10017_v32 = vpop.f32.mrf.mxu1  ;;  %v10193_v56 = vpop.f32.mrf.mxu0  ;;  %v5094_v21 = vsel %vm4150_vm4, %v5091_v36, %v5093_v38  ;;  %v11242_v48 = vld [vmem:[#allocation2 + $0x88] sm:$0xff]   ;;  %v5095_v36 = vrot.slane %v11149_v37, 2  ;;  %v16796_v37 = vld [vmem:[#allocation27_spill] sm:$0xff] }
 0x3cb   :  { %16789 = vst [vmem:[#allocation19_spill] sm:$0xff] %v13178_v62 }
 0x3cc   :  { %v3045_v55 = vpop.f32.mrf.mxu1  ;;  %v3957_v59 = vpop.f32.mrf.mxu0 }
 0x3cd   :  { %v3189_v12 = vadd.f32 %v3045_v55, %v16790_v53  ;;  %v13185_v39 = vadd.f32 %v3957_v59, %v3187_v9  ;;  %v4182_v9 = vrot.slane %v11242_v48, 2 }
 0x3ce   :  { %v10018_v15 = vpop.f32.mrf.mxu1  ;;  %v10194_v28 = vpop.f32.mrf.mxu0 }
 0x3cf   :  { %16791 = vst [vmem:[#allocation20_spill] sm:$0xff] %v13185_v39  ;;  %v16794_v15 = vld [vmem:[#allocation26_spill] sm:$0xff] }
 0x3d0   :  { %v3050_v62 = vpop.f32.mrf.mxu1  ;;  %v3962_v33 = vpop.f32.mrf.mxu0  ;;  %10312 = vmatmul.mubr.bf16.gmra.mxu1 %v4181_v41  ;;  %10488 = vmatmul.mubr.bf16.gmra.mxu0 %v5094_v21 }
 0x3d1   :  { %v3190_v4 = vadd.f32 %v3050_v62, %v16792_v44  ;;  %v13190_v32 = vadd.f32 %v3962_v33, %v3188_v14  ;;  %10315 = vmatprep.mubr.msk.bf16.mxu1 %vm11355_vm0, %v16651_v8  ;;  %10491 = vmatprep.mubr.msk.bf16.mxu0 %vm11355_vm0, %v16651_v8  ;;  %v4183_v33 = vsel %vm4150_vm4, %v4180_v16, %v4182_v9  ;;  %v11150_v62 = vld [vmem:[#allocation2 + $0x90] sm:$0xff]  }
 0x3d2   :  { %v10021_v56 = vpop.f32.mrf.mxu1  ;;  %v10197_v55 = vpop.f32.mrf.mxu0  ;;  %v5096_v14 = vsel %vm4150_vm4, %v5093_v38, %v5095_v36  ;;  %v11243_v16 = vld [vmem:[#allocation2 + $0x90] sm:$0xff]   ;;  %v5097_v38 = vrot.slane %v11150_v62, 2  ;;  %v11173_v62 = vld [vmem:[%s16459_s1 + $0x208] sm:$0xff]  }
 0x3d3   :  { %16793 = vst [vmem:[#allocation21_spill] sm:$0xff] %v13190_v32  ;;  %10792 = vmatpush3.bf16.msra.mxu0 %v11173_v62  ;;  %v16804_v62 = vld [vmem:[#allocation31_spill] sm:$0xff] }
 0x3d4   :  { %v3053_v59 = vpop.f32.mrf.mxu1  ;;  %v3965_v53 = vpop.f32.mrf.mxu0  ;;  %10793 = vmatprep.subr.bf16.mxu0 %v16651_v8 }
 0x3d5   :  { %v3191_v41 = vadd.f32 %v3053_v59, %v16794_v15  ;;  %v13197_v21 = vadd.f32 %v3965_v53, %v3189_v12  ;;  %v4184_v12 = vrot.slane %v11243_v16, 2 }
 0x3d6   :  { %v10022_v28 = vpop.f32.mrf.mxu1  ;;  %v10198_v44 = vpop.f32.mrf.mxu0 }
 0x3d7   :  { %16795 = vst [vmem:[#allocation22_spill] sm:$0xff] %v13197_v21  ;;  %v16798_v28 = vld [vmem:[#allocation28_spill] sm:$0xff]  ;;  %v11172_v44 = vld [vmem:[%s16459_s1 + $0x1c8] sm:$0xff]  }
 0x3d8   :  { %v3058_v32 = vpop.f32.mrf.mxu1  ;;  %v3970_v39 = vpop.f32.mrf.mxu0  ;;  %10316 = vmatmul.mubr.bf16.gmra.mxu1 %v4183_v33  ;;  %10492 = vmatmul.mubr.bf16.gmra.mxu0 %v5096_v14 }
 0x3d9   :  { %v3192_v48 = vadd.f32 %v3058_v32, %v16796_v37  ;;  %v13202_v56 = vadd.f32 %v3970_v39, %v3190_v4  ;;  %10319 = vmatprep.mubr.msk.bf16.mxu1 %vm11355_vm0, %v16651_v8  ;;  %10495 = vmatprep.mubr.msk.bf16.mxu0 %vm11355_vm0, %v16651_v8  ;;  %v4185_v39 = vsel %vm4150_vm4, %v4182_v9, %v4184_v12  ;;  %v11153_v32 = vld [vmem:[#allocation2 + $0x98] sm:$0xff]  }
 0x3da   :  { %v10025_v55 = vpop.f32.mrf.mxu1  ;;  %v10201_v59 = vpop.f32.mrf.mxu0  ;;  %v5098_v4 = vsel %vm4150_vm4, %v5095_v36, %v5097_v38  ;;  %10612 = vmatpush3.bf16.msra.mxu1 %v11172_v44  ;;  %v11244_v36 = vld [vmem:[#allocation2 + $0x98] sm:$0xff]  }
 0x3db   :  { %16797 = vst [vmem:[#allocation23_spill] sm:$0xff] %v13202_v56  ;;  %10613 = vmatprep.subr.bf16.mxu1 %v16651_v8 }
 0x3dc   :  { %v3061_v53 = vpop.f32.mrf.mxu1  ;;  %v3973_v15 = vpop.f32.mrf.mxu0 }
 0x3dd   :  { %v3193_v33 = vadd.f32 %v3061_v53, %v16798_v28  ;;  %v13209_v14 = vadd.f32 %v3973_v15, %v3191_v41  ;;  %v16800_v41 = vld [vmem:[#allocation29_spill] sm:$0xff]  ;;  %v4186_v15 = vrot.slane %v11244_v36, 2  ;;  %v5099_v28 = vrot.slane %v11153_v32, 2 }
 0x3de   :  { %v10026_v37 = vpop.f32.mrf.mxu1  ;;  %v10202_v16 = vpop.f32.mrf.mxu0 }
 0x3df   :  { %16799 = vst [vmem:[#allocation24_spill] sm:$0xff] %v13209_v14 }
 0x3e0   :  { %v3066_v55 = vpop.f32.mrf.mxu1  ;;  %v3978_v59 = vpop.f32.mrf.mxu0  ;;  %10320 = vmatmul.mubr.bf16.gmra.mxu1 %v4185_v39  ;;  %10496 = vmatmul.mubr.bf16.gmra.mxu0 %v5098_v4 }
 0x3e1   :  { %v3194_v9 = vadd.f32 %v3066_v55, %v16800_v41  ;;  %v13220_v53 = vadd.f32 %v3978_v59, %v3192_v48  ;;  %10323 = vmatprep.mubr.msk.bf16.mxu1 %vm11355_vm0, %v16651_v8  ;;  %10499 = vmatprep.mubr.msk.bf16.mxu0 %vm11355_vm0, %v16651_v8  ;;  %v16802_v48 = vld [vmem:[#allocation30_spill] sm:$0xff]  ;;  %v4187_v59 = vsel %vm4150_vm4, %v4184_v12, %v4186_v15  ;;  %v11245_v12 = vld [vmem:[#allocation2 + $0xa0] sm:$0xff]  }
 0x3e2   :  { %v10029_v37 = vpop.f32.mrf.mxu1  ;;  %v10205_v16 = vpop.f32.mrf.mxu0  ;;  %v5100_v41 = vsel %vm4150_vm4, %v5097_v38, %v5099_v28 }
 0x3e3   :  { %16801 = vst [vmem:[#allocation25_spill] sm:$0xff] %v13220_v53  ;;  %v11154_v53 = vld [vmem:[#allocation2 + $0xa0] sm:$0xff]  }
 0x3e4   :  { %v3069_v39 = vpop.f32.mrf.mxu1  ;;  %v3981_v4 = vpop.f32.mrf.mxu0  ;;  %v5101_v38 = vrot.slane %v11154_v53, 2  ;;  %v16808_v53 = vld [vmem:[#allocation33_spill] sm:$0xff] }
 0x3e5   :  { %v3195_v44 = vadd.f32 %v3069_v39, %v16802_v48  ;;  %v13229_v55 = vadd.f32 %v3981_v4, %v3193_v33  ;;  %v4188_v33 = vrot.slane %v11245_v12, 2 }
 0x3e6   :  { %v10030_v36 = vpop.f32.mrf.mxu1  ;;  %v10206_v32 = vpop.f32.mrf.mxu0 }
 0x3e7   :  { %16803 = vst [vmem:[#allocation26_spill] sm:$0xff] %v13229_v55  ;;  %v16806_v32 = vld [vmem:[#allocation32_spill] sm:$0xff] }
 0x3e8   :  { %v3074_v37 = vpop.f32.mrf.mxu1  ;;  %v3986_v16 = vpop.f32.mrf.mxu0  ;;  %10324 = vmatmul.mubr.bf16.gmra.mxu1 %v4187_v59  ;;  %10500 = vmatmul.mubr.bf16.gmra.mxu0 %v5100_v41 }
 0x3e9   :  { %v3196_v14 = vadd.f32 %v3074_v37, %v16804_v62  ;;  %v13234_v56 = vadd.f32 %v3986_v16, %v3194_v9  ;;  %10327 = vmatprep.mubr.msk.bf16.mxu1 %vm11355_vm0, %v16651_v8  ;;  %10503 = vmatprep.mubr.msk.bf16.mxu0 %vm11355_vm0, %v16651_v8  ;;  %v4189_v9 = vsel %vm4150_vm4, %v4186_v15, %v4188_v33  ;;  %v11155_v16 = vld [vmem:[#allocation2 + $0xa8] sm:$0xff]  }
 0x3ea   :  { %v10033_v39 = vpop.f32.mrf.mxu1  ;;  %v10209_v4 = vpop.f32.mrf.mxu0  ;;  %v5102_v37 = vsel %vm4150_vm4, %v5099_v28, %v5101_v38  ;;  %v11246_v15 = vld [vmem:[#allocation2 + $0xa8] sm:$0xff]   ;;  %v5103_v28 = vrot.slane %v11155_v16, 2  ;;  %v16812_v16 = vld [vmem:[#allocation35_spill] sm:$0xff] }
 0x3eb   :  { %16805 = vst [vmem:[#allocation27_spill] sm:$0xff] %v13234_v56 }
 0x3ec   :  { %v3077_v48 = vpop.f32.mrf.mxu1  ;;  %v3989_v36 = vpop.f32.mrf.mxu0 }
 0x3ed   :  { %v3197_v59 = vadd.f32 %v3077_v48, %v16806_v32  ;;  %v13241_v41 = vadd.f32 %v3989_v36, %v3195_v44  ;;  %v4190_v44 = vrot.slane %v11246_v15, 2  ;;  %v16810_v32 = vld [vmem:[#allocation34_spill] sm:$0xff] }
 0x3ee   :  { %v10034_v62 = vpop.f32.mrf.mxu1  ;;  %v10210_v56 = vpop.f32.mrf.mxu0 }
 0x3ef   :  { %16807 = vst [vmem:[#allocation28_spill] sm:$0xff] %v13241_v41 }
 0x3f0   :  { %v3082_v55 = vpop.f32.mrf.mxu1  ;;  %v3994_v21 = vpop.f32.mrf.mxu0  ;;  %10328 = vmatmul.mubr.bf16.gmra.mxu1 %v4189_v9  ;;  %10504 = vmatmul.mubr.bf16.gmra.mxu0 %v5102_v37 }
 0x3f1   :  { %v3198_v12 = vadd.f32 %v3082_v55, %v16808_v53  ;;  %v13246_v39 = vadd.f32 %v3994_v21, %v3196_v14  ;;  %10331 = vmatprep.mubr.msk.bf16.mxu1 %vm11355_vm0, %v16651_v8  ;;  %10507 = vmatprep.mubr.msk.bf16.mxu0 %vm11355_vm0, %v16651_v8  ;;  %v4191_v21 = vsel %vm4150_vm4, %v4188_v33, %v4190_v44  ;;  %v11156_v55 = vld [vmem:[#allocation2 + $0xb0] sm:$0xff]  }
 0x3f2   :  { %v10037_v4 = vpop.f32.mrf.mxu1  ;;  %v10213_v48 = vpop.f32.mrf.mxu0  ;;  %v5104_v14 = vsel %vm4150_vm4, %v5101_v38, %v5103_v28  ;;  %v11247_v33 = vld [vmem:[#allocation2 + $0xb0] sm:$0xff]   ;;  %v5105_v38 = vrot.slane %v11156_v55, 2  ;;  %v16816_v55 = vld [vmem:[#allocation37_spill] sm:$0xff] }
 0x3f3   :  { %16809 = vst [vmem:[#allocation29_spill] sm:$0xff] %v13246_v39 }
 0x3f4   :  { %v3085_v56 = vpop.f32.mrf.mxu1  ;;  %v3997_v36 = vpop.f32.mrf.mxu0 }
 0x3f5   :  { %v3199_v9 = vadd.f32 %v3085_v56, %v16810_v32  ;;  %v13253_v37 = vadd.f32 %v3997_v36, %v3197_v59  ;;  %v4192_v59 = vrot.slane %v11247_v33, 2 }
 0x3f6   :  { %v10038_v62 = vpop.f32.mrf.mxu1  ;;  %v10214_v53 = vpop.f32.mrf.mxu0 }
 0x3f7   :  { %16811 = vst [vmem:[#allocation30_spill] sm:$0xff] %v13253_v37  ;;  %v16814_v62 = vld [vmem:[#allocation36_spill] sm:$0xff] }
 0x3f8   :  { %v3090_v39 = vpop.f32.mrf.mxu1  ;;  %v4002_v41 = vpop.f32.mrf.mxu0  ;;  %10332 = vmatmul.mubr.bf16.gmra.mxu1 %v4191_v21  ;;  %10508 = vmatmul.mubr.bf16.gmra.mxu0 %v5104_v14 }
 0x3f9   :  { %v3200_v15 = vadd.f32 %v3090_v39, %v16812_v16  ;;  %v13258_v4 = vadd.f32 %v4002_v41, %v3198_v12  ;;  %10335 = vmatprep.mubr.msk.bf16.mxu1 %vm11355_vm0, %v16651_v8  ;;  %10511 = vmatprep.mubr.msk.bf16.mxu0 %vm11355_vm0, %v16651_v8  ;;  %v4193_v41 = vsel %vm4150_vm4, %v4190_v44, %v4192_v59  ;;  %v11157_v39 = vld [vmem:[#allocation2 + $0xb8] sm:$0xff]  }
 0x3fa   :  { %v10041_v48 = vpop.f32.mrf.mxu1  ;;  %v10217_v56 = vpop.f32.mrf.mxu0  ;;  %v5106_v12 = vsel %vm4150_vm4, %v5103_v28, %v5105_v38  ;;  %v11248_v44 = vld [vmem:[#allocation2 + $0xb8] sm:$0xff]   ;;  %v5107_v28 = vrot.slane %v11157_v39, 2 }
 0x3fb   :  { %16813 = vst [vmem:[#allocation31_spill] sm:$0xff] %v13258_v4 }
 0x3fc   :  { %v3093_v36 = vpop.f32.mrf.mxu1  ;;  %v4005_v32 = vpop.f32.mrf.mxu0 }
 0x3fd   :  { %v3201_v21 = vadd.f32 %v3093_v36, %v16814_v62  ;;  %v13265_v14 = vadd.f32 %v4005_v32, %v3199_v9  ;;  %v4194_v9 = vrot.slane %v11248_v44, 2  ;;  %v11179_v44 = vld [vmem:[%s16459_s1 + $0x1c0] sm:$0xff]  }
 0x3fe   :  { %v10042_v53 = vpop.f32.mrf.mxu1  ;;  %v10218_v16 = vpop.f32.mrf.mxu0  ;;  %10614 = vmatpush3.bf16.msra.mxu1 %v11179_v44 }
 0x3ff   :  { %16815 = vst [vmem:[#allocation32_spill] sm:$0xff] %v13265_v14  ;;  %v16818_v53 = vld [vmem:[#allocation38_spill] sm:$0xff] }
 0x400   :  { %v3098_v4 = vpop.f32.mrf.mxu1  ;;  %v4010_v37 = vpop.f32.mrf.mxu0  ;;  %10336 = vmatmul.mubr.bf16.gmra.mxu1 %v4193_v41  ;;  %10512 = vmatmul.mubr.bf16.gmra.mxu0 %v5106_v12 }
 0x401   :  { %v3202_v33 = vadd.f32 %v3098_v4, %v16816_v55  ;;  %v13270_v48 = vadd.f32 %v4010_v37, %v3200_v15  ;;  %10339 = vmatprep.mubr.msk.bf16.mxu1 %vm11355_vm0, %v16651_v8  ;;  %10515 = vmatprep.mubr.msk.bf16.mxu0 %vm11355_vm0, %v16651_v8  ;;  %v4195_v37 = vsel %vm4150_vm4, %v4192_v59, %v4194_v9  ;;  %v11160_v4 = vld [vmem:[#allocation2 + $0xc0] sm:$0xff]  }
 0x402   :  { %v10045_v56 = vpop.f32.mrf.mxu1  ;;  %v10221_v36 = vpop.f32.mrf.mxu0  ;;  %v5108_v15 = vsel %vm4150_vm4, %v5105_v38, %v5107_v28  ;;  %v11249_v59 = vld [vmem:[#allocation2 + $0xc0] sm:$0xff]  }
 0x403   :  { %16817 = vst [vmem:[#allocation33_spill] sm:$0xff] %v13270_v48  ;;  %v16820_v36 = vld [vmem:[#allocation39_spill] sm:$0xff]  ;;  %v4196_v38 = vrot.slane %v11249_v59, 2  ;;  %v11161_v59 = vld [vmem:[#allocation2 + $0xc8] sm:$0xff]  }
 0x404   :  { %v3101_v32 = vpop.f32.mrf.mxu1  ;;  %v4013_v62 = vpop.f32.mrf.mxu0 }
 0x405   :  { %v3203_v41 = vadd.f32 %v3101_v32, %v16818_v53  ;;  %v13277_v12 = vadd.f32 %v4013_v62, %v3201_v21  ;;  %v5109_v21 = vrot.slane %v11160_v4, 2  ;;  %v11181_v62 = vld [vmem:[%s16459_s1 + $0x200] sm:$0xff]  }
 0x406   :  { %v10046_v16 = vpop.f32.mrf.mxu1  ;;  %v10222_v55 = vpop.f32.mrf.mxu0  ;;  %10794 = vmatpush3.bf16.msra.mxu0 %v11181_v62 }
 0x407   :  { %16819 = vst [vmem:[#allocation34_spill] sm:$0xff] %v13277_v12  ;;  %v16822_v16 = vld [vmem:[#allocation40_spill] sm:$0xff] }
 0x408   :  { %v3106_v39 = vpop.f32.mrf.mxu1  ;;  %v4018_v56 = vpop.f32.mrf.mxu0  ;;  %10340 = vmatmul.mubr.bf16.gmra.mxu1 %v4195_v37  ;;  %10516 = vmatmul.mubr.bf16.gmra.mxu0 %v5108_v15 }
 0x409   :  { %v3204_v48 = vadd.f32 %v3106_v39, %v16820_v36  ;;  %v13285_v32 = vadd.f32 %v4018_v56, %v3202_v33  ;;  %10343 = vmatprep.mubr.msk.bf16.mxu1 %vm11355_vm0, %v16651_v8  ;;  %10519 = vmatprep.mubr.msk.bf16.mxu0 %vm11355_vm0, %v16651_v8  ;;  %v4197_v56 = vsel %vm4150_vm4, %v4194_v9, %v4196_v38  ;;  %v11250_v9 = vld [vmem:[#allocation2 + $0xc8] sm:$0xff]  }
 0x40a   :  { %v10049_v53 = vpop.f32.mrf.mxu1  ;;  %v10225_v37 = vpop.f32.mrf.mxu0  ;;  %v5110_v36 = vsel %vm4150_vm4, %v5107_v28, %v5109_v21  ;;  %v5111_v28 = vrot.slane %v11161_v59, 2 }
 0x40b   :  { %16821 = vst [vmem:[#allocation35_spill] sm:$0xff] %v13285_v32  ;;  %v16823_v53 = vld [vmem:[#allocation41_spill] sm:$0xff] }
 0x40c   :  { %v3109_v15 = vpop.f32.mrf.mxu1  ;;  %v4021_v33 = vpop.f32.mrf.mxu0 }
 0x40d   :  { %v3205_v55 = vadd.f32 %v3109_v15, %v16822_v16  ;;  %v13295_v39 = vadd.f32 %v4021_v33, %v3203_v41  ;;  %v4198_v41 = vrot.slane %v11250_v9, 2 }
 0x40e   :  { %v10050_v4 = vpop.f32.mrf.mxu1  ;;  %v10226_v32 = vpop.f32.mrf.mxu0 }
 0x410   :  { %v3114_v12 = vpop.f32.mrf.mxu1  ;;  %v4026_v14 = vpop.f32.mrf.mxu0  ;;  %10344 = vmatmul.mubr.bf16.gmra.mxu1 %v4197_v56  ;;  %10520 = vmatmul.mubr.bf16.gmra.mxu0 %v5110_v36 }
 0x411   :  { %v3206_v44 = vadd.f32 %v3114_v12, %v16823_v53  ;;  %v13300_v62 = vadd.f32 %v4026_v14, %v3204_v48  ;;  %10347 = vmatprep.mubr.msk.bf16.mxu1 %vm11355_vm0, %v16651_v8  ;;  %10523 = vmatprep.mubr.msk.bf16.mxu0 %vm11355_vm0, %v16651_v8  ;;  %v4199_v14 = vsel %vm4150_vm4, %v4196_v38, %v4198_v41  ;;  %v11162_v12 = vld [vmem:[#allocation2 + $0xd0] sm:$0xff]  }
 0x412   :  { %v10053_v37 = vpop.f32.mrf.mxu1  ;;  %v10229_v15 = vpop.f32.mrf.mxu0  ;;  %v5112_v48 = vsel %vm4150_vm4, %v5109_v21, %v5111_v28  ;;  %v5113_v21 = vrot.slane %v11162_v12, 2 }
 0x413   :  { %16824 = vst [vmem:[#allocation36_spill] sm:$0xff] %v13300_v62 }
 0x414   :  { %v3117_v32 = vpop.f32.mrf.mxu1  ;;  %v4029_v33 = vpop.f32.mrf.mxu0 }
 0x415   :  { %v3207_v16 = vadd.f32 %v3117_v32, %v12761_v2  ;;  %v13307_v56 = vadd.f32 %v4029_v33, %v3205_v55  ;;  %v11251_v2 = vld [vmem:[#allocation2 + $0xd0] sm:$0xff]  }
 0x416   :  { %v10054_v36 = vpop.f32.mrf.mxu1  ;;  %v10230_v4 = vpop.f32.mrf.mxu0  ;;  %v4200_v38 = vrot.slane %v11251_v2, 2 }
 0x418   :  { %v3122_v53 = vpop.f32.mrf.mxu1  ;;  %v4034_v62 = vpop.f32.mrf.mxu0  ;;  %10348 = vmatmul.mubr.bf16.gmra.mxu1 %v4199_v14  ;;  %10524 = vmatmul.mubr.bf16.gmra.mxu0 %v5112_v48  ;;  %v4201_v14 = vsel %vm4150_vm4, %v4198_v41, %v4200_v38  ;;  %v11252_v41 = vld [vmem:[#allocation2 + $0xd8] sm:$0xff]  }
 0x419   :  { %v3208_v59 = vadd.f32 %v3122_v53, %v12766_v24  ;;  %v13312_v9 = vadd.f32 %v4034_v62, %v3206_v44  ;;  %10351 = vmatprep.mubr.msk.bf16.mxu1 %vm11355_vm0, %v16651_v8  ;;  %10527 = vmatprep.mubr.msk.bf16.mxu0 %vm11355_vm0, %v16651_v8  ;;  %v5114_v24 = vsel %vm4150_vm4, %v5111_v28, %v5113_v21  ;;  %v11163_v44 = vld [vmem:[#allocation2 + $0xd8] sm:$0xff]  }
 0x41a   :  { %v10057_v55 = vpop.f32.mrf.mxu1  ;;  %v10233_v37 = vpop.f32.mrf.mxu0  ;;  %v5115_v28 = vrot.slane %v11163_v44, 2 }
 0x41c   :  { %v3125_v15 = vpop.f32.mrf.mxu1  ;;  %v4037_v32 = vpop.f32.mrf.mxu0 }
 0x41d   :  { %v13318_v33 = vadd.f32 %v4037_v32, %v3207_v16  ;;  %v4202_v16 = vrot.slane %v11252_v41, 2 }
 0x41e   :  { %v10058_v62 = vpop.f32.mrf.mxu1  ;;  %v10234_v48 = vpop.f32.mrf.mxu0 }
 0x420   :  { %v4042_v36 = vpop.f32.mrf.mxu0  ;;  %v4355_v4 = vpop.f32.mrf.mxu1  ;;  %10352 = vmatmul.mubr.bf16.gmra.mxu1 %v4201_v14  ;;  %10528 = vmatmul.mubr.bf16.gmra.mxu0 %v5114_v24  ;;  %v5116_v14 = vsel %vm4150_vm4, %v5113_v21, %v5115_v28 }
 0x421   :  { %v13322_v53 = vadd.f32 %v4042_v36, %v3208_v59  ;;  %v4681_v12 = vadd.f32 %v4355_v4, %v12777_v30  ;;  %10355 = vmatprep.mubr.msk.bf16.mxu1 %vm11355_vm0, %v16651_v8  ;;  %10531 = vmatprep.mubr.msk.bf16.mxu0 %vm11355_vm0, %v16651_v8  ;;  %v4203_v59 = vsel %vm4150_vm4, %v4200_v38, %v4202_v16  ;;  %v11164_v30 = vld [vmem:[#allocation2 + $0xe0] sm:$0xff]  }
 0x422   :  { %v10237_v2 = vpop.f32.mrf.mxu0  ;;  %v10257_v55 = vpop.f32.mrf.mxu1  ;;  %v5117_v21 = vrot.slane %v11164_v30, 2 }
 0x424   :  { %v4045_v37 = vpop.f32.mrf.mxu0  ;;  %v4358_v15 = vpop.f32.mrf.mxu1 }
 0x425   :  { %v4682_v32 = vadd.f32 %v4358_v15, %v12784_v11  ;;  %v11253_v11 = vld [vmem:[#allocation2 + $0xe0] sm:$0xff]  }
 0x426   :  { %v10238_v24 = vpop.f32.mrf.mxu0  ;;  %v10258_v62 = vpop.f32.mrf.mxu1  ;;  %v4204_v38 = vrot.slane %v11253_v11, 2 }
 0x428   :  { %v4363_v48 = vpop.f32.mrf.mxu1  ;;  %10356 = vmatmul.mubr.bf16.gmra.mxu1 %v4203_v59  ;;  %v5270_v36 = vpop.f32.mrf.mxu0  ;;  %10532 = vmatmul.mubr.bf16.gmra.mxu0 %v5116_v14  ;;  %v11167_v14 = vld [vmem:[#allocation2 + $0xe8] sm:$0xff]  }
 0x429   :  { %v4683_v4 = vadd.f32 %v4363_v48, %v12789_v46  ;;  %v13333_v44 = vadd.f32 %v5270_v36, %v4681_v12  ;;  %10359 = vmatprep.mubr.msk.bf16.mxu1 %vm11355_vm0, %v16651_v8  ;;  %10535 = vmatprep.mubr.msk.bf16.mxu0 %vm11355_vm0, %v16651_v8  ;;  %v4205_v46 = vsel %vm4150_vm4, %v4202_v16, %v4204_v38 }
 0x42a   :  { %v10261_v41 = vpop.f32.mrf.mxu1  ;;  %v10437_v2 = vpop.f32.mrf.mxu0  ;;  %v5118_v12 = vsel %vm4150_vm4, %v5115_v28, %v5117_v21  ;;  %v5119_v28 = vrot.slane %v11167_v14, 2 }
 0x42c   :  { %v4366_v55 = vpop.f32.mrf.mxu1  ;;  %v5273_v37 = vpop.f32.mrf.mxu0 }
 0x42d   :  { %v4684_v15 = vadd.f32 %v4366_v55, %v12798_v58  ;;  %v13340_v59 = vadd.f32 %v5273_v37, %v4682_v32  ;;  %v11254_v58 = vld [vmem:[#allocation2 + $0xe8] sm:$0xff]  }
 0x42e   :  { %v10262_v24 = vpop.f32.mrf.mxu1  ;;  %v10438_v62 = vpop.f32.mrf.mxu0  ;;  %v4206_v16 = vrot.slane %v11254_v58, 2 }
 0x430   :  { %v4371_v48 = vpop.f32.mrf.mxu1  ;;  %10360 = vmatmul.mubr.bf16.gmra.mxu1 %v4205_v46  ;;  %v5278_v36 = vpop.f32.mrf.mxu0  ;;  %10536 = vmatmul.mubr.bf16.gmra.mxu0 %v5118_v12  ;;  %v11168_v12 = vld [vmem:[#allocation2 + $0xf0] sm:$0xff]  }
 0x431   :  { %v4685_v30 = vadd.f32 %v4371_v48, %v12801_v31  ;;  %v13345_v11 = vadd.f32 %v5278_v36, %v4683_v4  ;;  %10363 = vmatprep.mubr.msk.bf16.mxu1 %vm11355_vm0, %v16651_v8  ;;  %10539 = vmatprep.mubr.msk.bf16.mxu0 %vm11355_vm0, %v16651_v8  ;;  %v4207_v31 = vsel %vm4150_vm4, %v4204_v38, %v4206_v16 }
 0x432   :  { %v10265_v32 = vpop.f32.mrf.mxu1  ;;  %v10441_v41 = vpop.f32.mrf.mxu0  ;;  %v5120_v4 = vsel %vm4150_vm4, %v5117_v21, %v5119_v28  ;;  %v5121_v21 = vrot.slane %v11168_v12, 2 }
 0x434   :  { %v4374_v2 = vpop.f32.mrf.mxu1  ;;  %v5281_v55 = vpop.f32.mrf.mxu0 }
 0x435   :  { %v4686_v37 = vadd.f32 %v4374_v2, %v12808_v27  ;;  %v13352_v46 = vadd.f32 %v5281_v55, %v4684_v15  ;;  %v11255_v27 = vld [vmem:[#allocation2 + $0xf0] sm:$0xff]  }
 0x436   :  { %v10266_v24 = vpop.f32.mrf.mxu1  ;;  %v10442_v62 = vpop.f32.mrf.mxu0  ;;  %v4208_v38 = vrot.slane %v11255_v27, 2 }
 0x438   :  { %v4379_v48 = vpop.f32.mrf.mxu1  ;;  %10364 = vmatmul.mubr.bf16.gmra.mxu1 %v4207_v31  ;;  %v5286_v36 = vpop.f32.mrf.mxu0  ;;  %10540 = vmatmul.mubr.bf16.gmra.mxu0 %v5120_v4  ;;  %v11169_v4 = vld [vmem:[#allocation2 + $0xf8] sm:$0xff]  }
 0x439   :  { %v4687_v14 = vadd.f32 %v4379_v48, %v12813_v7  ;;  %v13357_v58 = vadd.f32 %v5286_v36, %v4685_v30  ;;  %10367 = vmatprep.mubr.msk.bf16.mxu1 %vm11355_vm0, %v16651_v8  ;;  %10543 = vmatprep.mubr.msk.bf16.mxu0 %vm11355_vm0, %v16651_v8  ;;  %v4209_v7 = vsel %vm4150_vm4, %v4206_v16, %v4208_v38 }
 0x43a   :  { %v10269_v15 = vpop.f32.mrf.mxu1  ;;  %v10445_v32 = vpop.f32.mrf.mxu0  ;;  %v5122_v30 = vsel %vm4150_vm4, %v5119_v28, %v5121_v21  ;;  %v5123_v28 = vrot.slane %v11169_v4, 2 }
 0x43c   :  { %v4382_v41 = vpop.f32.mrf.mxu1  ;;  %v5289_v2 = vpop.f32.mrf.mxu0 }
 0x43d   :  { %v4688_v55 = vadd.f32 %v4382_v41, %v12822_v5  ;;  %v13364_v31 = vadd.f32 %v5289_v2, %v4686_v37  ;;  %v11256_v5 = vld [vmem:[#allocation2 + $0xf8] sm:$0xff]  }
 0x43e   :  { %v10270_v24 = vpop.f32.mrf.mxu1  ;;  %v10446_v62 = vpop.f32.mrf.mxu0  ;;  %v4210_v16 = vrot.slane %v11256_v5, 2 }
 0x440   :  { %v4387_v48 = vpop.f32.mrf.mxu1  ;;  %10368 = vmatmul.mubr.bf16.gmra.mxu1 %v4209_v7  ;;  %v5294_v36 = vpop.f32.mrf.mxu0  ;;  %10544 = vmatmul.mubr.bf16.gmra.mxu0 %v5122_v30  ;;  %v11170_v30 = vld [vmem:[#allocation2 + $0x100] sm:$0xff]  }
 0x441   :  { %v4689_v12 = vadd.f32 %v4387_v48, %v12825_v43  ;;  %v13369_v27 = vadd.f32 %v5294_v36, %v4687_v14  ;;  %10371 = vmatprep.mubr.msk.bf16.mxu1 %vm11355_vm0, %v16651_v8  ;;  %10547 = vmatprep.mubr.msk.bf16.mxu0 %vm11355_vm0, %v16651_v8  ;;  %v4211_v43 = vsel %vm4150_vm4, %v4208_v38, %v4210_v16 }
 0x442   :  { %v10273_v37 = vpop.f32.mrf.mxu1  ;;  %v10449_v15 = vpop.f32.mrf.mxu0  ;;  %v5124_v14 = vsel %vm4150_vm4, %v5121_v21, %v5123_v28  ;;  %v5125_v21 = vrot.slane %v11170_v30, 2 }
 0x444   :  { %v4390_v32 = vpop.f32.mrf.mxu1  ;;  %v5297_v41 = vpop.f32.mrf.mxu0 }
 0x445   :  { %v4690_v2 = vadd.f32 %v4390_v32, %v12832_v23  ;;  %v13376_v7 = vadd.f32 %v5297_v41, %v4688_v55  ;;  %v11257_v23 = vld [vmem:[#allocation2 + $0x100] sm:$0xff]  }
 0x446   :  { %v10274_v24 = vpop.f32.mrf.mxu1  ;;  %v10450_v62 = vpop.f32.mrf.mxu0  ;;  %v4212_v38 = vrot.slane %v11257_v23, 2 }
 0x448   :  { %v4395_v48 = vpop.f32.mrf.mxu1  ;;  %10372 = vmatmul.mubr.bf16.gmra.mxu1 %v4211_v43  ;;  %v5302_v36 = vpop.f32.mrf.mxu0  ;;  %10548 = vmatmul.mubr.bf16.gmra.mxu0 %v5124_v14  ;;  %v11171_v14 = vld [vmem:[#allocation2 + $0x108] sm:$0xff]  }
 0x449   :  { %v4691_v4 = vadd.f32 %v4395_v48, %v12837_v20  ;;  %v13381_v5 = vadd.f32 %v5302_v36, %v4689_v12  ;;  %10375 = vmatprep.mubr.msk.bf16.mxu1 %vm11355_vm0, %v16651_v8  ;;  %10551 = vmatprep.mubr.msk.bf16.mxu0 %vm11355_vm0, %v16651_v8  ;;  %v4213_v20 = vsel %vm4150_vm4, %v4210_v16, %v4212_v38 }
 0x44a   :  { %v10277_v55 = vpop.f32.mrf.mxu1  ;;  %v10453_v37 = vpop.f32.mrf.mxu0  ;;  %v5126_v12 = vsel %vm4150_vm4, %v5123_v28, %v5125_v21  ;;  %v5127_v28 = vrot.slane %v11171_v14, 2 }
 0x44c   :  { %v4398_v15 = vpop.f32.mrf.mxu1  ;;  %v5305_v32 = vpop.f32.mrf.mxu0 }
 0x44d   :  { %v4692_v41 = vadd.f32 %v4398_v15, %v12846_v52  ;;  %v13388_v43 = vadd.f32 %v5305_v32, %v4690_v2  ;;  %v11258_v52 = vld [vmem:[#allocation2 + $0x108] sm:$0xff]  }
 0x44e   :  { %v10278_v24 = vpop.f32.mrf.mxu1  ;;  %v10454_v62 = vpop.f32.mrf.mxu0  ;;  %v4214_v16 = vrot.slane %v11258_v52, 2 }
 0x450   :  { %v4403_v48 = vpop.f32.mrf.mxu1  ;;  %10376 = vmatmul.mubr.bf16.gmra.mxu1 %v4213_v20  ;;  %v5310_v36 = vpop.f32.mrf.mxu0  ;;  %10552 = vmatmul.mubr.bf16.gmra.mxu0 %v5126_v12  ;;  %v11174_v12 = vld [vmem:[#allocation2 + $0x110] sm:$0xff]  }
 0x451   :  { %v4693_v30 = vadd.f32 %v4403_v48, %v12849_v18  ;;  %v13393_v23 = vadd.f32 %v5310_v36, %v4691_v4  ;;  %10379 = vmatprep.mubr.msk.bf16.mxu1 %vm11355_vm0, %v16651_v8  ;;  %10555 = vmatprep.mubr.msk.bf16.mxu0 %vm11355_vm0, %v16651_v8  ;;  %v4215_v18 = vsel %vm4150_vm4, %v4212_v38, %v4214_v16 }
 0x452   :  { %v10281_v2 = vpop.f32.mrf.mxu1  ;;  %v10457_v55 = vpop.f32.mrf.mxu0  ;;  %v5128_v4 = vsel %vm4150_vm4, %v5125_v21, %v5127_v28  ;;  %v5129_v21 = vrot.slane %v11174_v12, 2 }
 0x454   :  { %v4406_v37 = vpop.f32.mrf.mxu1  ;;  %v5313_v15 = vpop.f32.mrf.mxu0 }
 0x455   :  { %v4694_v32 = vadd.f32 %v4406_v37, %v12856_v22  ;;  %v13400_v20 = vadd.f32 %v5313_v15, %v4692_v41  ;;  %v11259_v22 = vld [vmem:[#allocation2 + $0x110] sm:$0xff]  }
 0x456   :  { %v10282_v24 = vpop.f32.mrf.mxu1  ;;  %v10458_v62 = vpop.f32.mrf.mxu0  ;;  %v4216_v38 = vrot.slane %v11259_v22, 2 }
 0x458   :  { %v4411_v48 = vpop.f32.mrf.mxu1  ;;  %10380 = vmatmul.mubr.bf16.gmra.mxu1 %v4215_v18  ;;  %v5318_v36 = vpop.f32.mrf.mxu0  ;;  %10556 = vmatmul.mubr.bf16.gmra.mxu0 %v5128_v4  ;;  %v11175_v4 = vld [vmem:[#allocation2 + $0x118] sm:$0xff]  }
 0x459   :  { %v4695_v14 = vadd.f32 %v4411_v48, %v12861_v25  ;;  %v13405_v52 = vadd.f32 %v5318_v36, %v4693_v30  ;;  %10383 = vmatprep.mubr.msk.bf16.mxu1 %vm11355_vm0, %v16651_v8  ;;  %10559 = vmatprep.mubr.msk.bf16.mxu0 %vm11355_vm0, %v16651_v8  ;;  %v4217_v25 = vsel %vm4150_vm4, %v4214_v16, %v4216_v38 }
 0x45a   :  { %v10285_v41 = vpop.f32.mrf.mxu1  ;;  %v10461_v2 = vpop.f32.mrf.mxu0  ;;  %v5130_v30 = vsel %vm4150_vm4, %v5127_v28, %v5129_v21  ;;  %v5131_v28 = vrot.slane %v11175_v4, 2 }
 0x45c   :  { %v4414_v55 = vpop.f32.mrf.mxu1  ;;  %v5321_v37 = vpop.f32.mrf.mxu0 }
 0x45d   :  { %v4696_v15 = vadd.f32 %v4414_v55, %v12870_v60  ;;  %v13412_v18 = vadd.f32 %v5321_v37, %v4694_v32  ;;  %v11260_v60 = vld [vmem:[#allocation2 + $0x118] sm:$0xff]  }
 0x45e   :  { %v10286_v24 = vpop.f32.mrf.mxu1  ;;  %v10462_v62 = vpop.f32.mrf.mxu0  ;;  %v4218_v16 = vrot.slane %v11260_v60, 2 }
 0x460   :  { %v4419_v48 = vpop.f32.mrf.mxu1  ;;  %10384 = vmatmul.mubr.bf16.gmra.mxu1 %v4217_v25  ;;  %v5326_v36 = vpop.f32.mrf.mxu0  ;;  %10560 = vmatmul.mubr.bf16.gmra.mxu0 %v5130_v30  ;;  %v11176_v30 = vld [vmem:[#allocation2 + $0x120] sm:$0xff]  }
 0x461   :  { %v4697_v12 = vadd.f32 %v4419_v48, %v12873_v45  ;;  %v13417_v22 = vadd.f32 %v5326_v36, %v4695_v14  ;;  %10387 = vmatprep.mubr.msk.bf16.mxu1 %vm11355_vm0, %v16651_v8  ;;  %10563 = vmatprep.mubr.msk.bf16.mxu0 %vm11355_vm0, %v16651_v8  ;;  %v4219_v45 = vsel %vm4150_vm4, %v4216_v38, %v4218_v16 }
 0x462   :  { %v10289_v32 = vpop.f32.mrf.mxu1  ;;  %v10465_v41 = vpop.f32.mrf.mxu0  ;;  %v5132_v14 = vsel %vm4150_vm4, %v5129_v21, %v5131_v28  ;;  %v5133_v21 = vrot.slane %v11176_v30, 2 }
 0x464   :  { %v4422_v2 = vpop.f32.mrf.mxu1  ;;  %v5329_v55 = vpop.f32.mrf.mxu0 }
 0x465   :  { %v4698_v37 = vadd.f32 %v4422_v2, %v12880_v13  ;;  %v13424_v25 = vadd.f32 %v5329_v55, %v4696_v15  ;;  %v11261_v13 = vld [vmem:[#allocation2 + $0x120] sm:$0xff]  }
 0x466   :  { %v10290_v24 = vpop.f32.mrf.mxu1  ;;  %v10466_v62 = vpop.f32.mrf.mxu0  ;;  %v4220_v38 = vrot.slane %v11261_v13, 2 }
 0x468   :  { %v4427_v48 = vpop.f32.mrf.mxu1  ;;  %10388 = vmatmul.mubr.bf16.gmra.mxu1 %v4219_v45  ;;  %v5334_v36 = vpop.f32.mrf.mxu0  ;;  %10564 = vmatmul.mubr.bf16.gmra.mxu0 %v5132_v14  ;;  %v11177_v14 = vld [vmem:[#allocation2 + $0x128] sm:$0xff]  }
 0x469   :  { %v4699_v4 = vadd.f32 %v4427_v48, %v12885_v1  ;;  %v13429_v60 = vadd.f32 %v5334_v36, %v4697_v12  ;;  %10391 = vmatprep.mubr.msk.bf16.mxu1 %vm11355_vm0, %v16651_v8  ;;  %10567 = vmatprep.mubr.msk.bf16.mxu0 %vm11355_vm0, %v16651_v8  ;;  %v4221_v1 = vsel %vm4150_vm4, %v4218_v16, %v4220_v38 }
 0x46a   :  { %v10293_v15 = vpop.f32.mrf.mxu1  ;;  %v10469_v32 = vpop.f32.mrf.mxu0  ;;  %v5134_v12 = vsel %vm4150_vm4, %v5131_v28, %v5133_v21  ;;  %v5135_v28 = vrot.slane %v11177_v14, 2  ;;  %v11178_v14 = vld [vmem:[#allocation2 + $0x130] sm:$0xff]  }
 0x46c   :  { %v4430_v41 = vpop.f32.mrf.mxu1  ;;  %v5337_v2 = vpop.f32.mrf.mxu0 }
 0x46d   :  { %v4700_v55 = vadd.f32 %v4430_v41, %v12894_v3  ;;  %v13436_v45 = vadd.f32 %v5337_v2, %v4698_v37  ;;  %v11262_v3 = vld [vmem:[#allocation2 + $0x128] sm:$0xff]   ;;  %v11356_v2 = vmov 0  }
 0x46e   :  { %v10294_v24 = vpop.f32.mrf.mxu1  ;;  %v10470_v62 = vpop.f32.mrf.mxu0  ;;  %v4222_v16 = vrot.slane %v11262_v3, 2  ;;  %10984 = vset.pattern.permute.xlu0 %v11356_v2  ;;  %10985 = vset.pattern.permute.xlu1 %v11356_v2  ;;  %v16827_v2 = vld [vmem:[#allocation43_spill] sm:$0xff] }
 0x46f   :  { %v5136_v62 = vsel %vm4150_vm4, %v5133_v21, %v5135_v28 }
 0x470   :  { %v4435_v48 = vpop.f32.mrf.mxu1  ;;  %10392 = vmatmul.mubr.bf16.gmra.mxu1 %v4221_v1  ;;  %v5342_v36 = vpop.f32.mrf.mxu0  ;;  %10568 = vmatmul.mubr.bf16.gmra.mxu0 %v5134_v12  ;;  %v4223_v24 = vsel %vm4150_vm4, %v4220_v38, %v4222_v16  ;;  %v11263_v38 = vld [vmem:[#allocation2 + $0x130] sm:$0xff]  }
 0x471   :  { %v4701_v30 = vadd.f32 %v4435_v48, %v12897_v57  ;;  %v13441_v13 = vadd.f32 %v5342_v36, %v4699_v4  ;;  %10395 = vmatprep.mubr.msk.bf16.mxu1 %vm11355_vm0, %v16651_v8  ;;  %10571 = vmatprep.mubr.msk.bf16.mxu0 %vm11355_vm0, %v16651_v8  ;;  %v33_v57 = vld [vmem:[%s16461_s3] sm:$0xff]  ;;  %v16825_v4 = vld [vmem:[#allocation42_spill] sm:$0xff]  ;;  %v4224_v21 = vrot.slane %v11263_v38, 2  ;;  %v11180_v38 = vld [vmem:[#allocation2 + $0x138] sm:$0xff]  }
 0x472   :  { %v10297_v37 = vpop.f32.mrf.mxu1  ;;  %v10473_v15 = vpop.f32.mrf.mxu0  ;;  %7232 = vperm.xlu0 %10984, %v33_v57  }
 0x473   :  { %v34_v15 = vld [vmem:[%s16461_s3 + $0x8] sm:$0xff] }
 0x474   :  { %v4438_v32 = vpop.f32.mrf.mxu1  ;;  %v5345_v41 = vpop.f32.mrf.mxu0 }
 0x475   :  { %v4702_v1 = vadd.f32 %v4438_v32, %v16825_v4  ;;  %v13451_v12 = vadd.f32 %v5345_v41, %v4700_v55  ;;  %v5137_v41 = vrot.slane %v11178_v14, 2 }
 0x476   :  { %v10298_v48 = vpop.f32.mrf.mxu1  ;;  %v10474_v36 = vpop.f32.mrf.mxu0  ;;  %7237 = vperm.xlu0 %10984, %v34_v15  }
 0x477   :  { %16826 = vst [vmem:[#allocation37_spill] sm:$0xff] %v13451_v12  ;;  %v35_v48 = vld [vmem:[%s16461_s3 + $0x10] sm:$0xff]  ;;  %v16829_v36 = vld [vmem:[#allocation44_spill] sm:$0xff]  ;;  %v5138_v14 = vsel %vm4150_vm4, %v5135_v28, %v5137_v41  ;;  %v36_v12 = vld [vmem:[%s16461_s3 + $0x18] sm:$0xff] }
 0x478   :  { %v4443_v3 = vpop.f32.mrf.mxu1  ;;  %10396 = vmatmul.mubr.bf16.gmra.mxu1 %v4223_v24  ;;  %v5350_v37 = vpop.f32.mrf.mxu0  ;;  %10572 = vmatmul.mubr.bf16.gmra.mxu0 %v5136_v62 }
 0x479   :  { %v4703_v32 = vadd.f32 %v4443_v3, %v16827_v2  ;;  %v13459_v55 = vadd.f32 %v5350_v37, %v4701_v30  ;;  %10399 = vmatprep.mubr.msk.bf16.mxu1 %vm11355_vm0, %v16651_v8  ;;  %10575 = vmatprep.mubr.msk.bf16.mxu0 %vm11355_vm0, %v16651_v8  ;;  %v37_v30 = vld [vmem:[%s16461_s3 + $0x20] sm:$0xff]  ;;  %v4225_v2 = vsel %vm4150_vm4, %v4222_v16, %v4224_v21  ;;  %v16830_v16 = vld [vmem:[#allocation45_spill] sm:$0xff] }
 0x47a   :  { %v10301_v57 = vpop.f32.mrf.mxu1  ;;  %v10477_v4 = vpop.f32.mrf.mxu0  ;;  %7242 = vperm.xlu1 %10985, %v35_v48   ;;  %7252 = vperm.xlu0 %10984, %v37_v30   ;;  %v5139_v30 = vrot.slane %v11180_v38, 2 }
 0x47b   :  { %16828 = vst [vmem:[#allocation38_spill] sm:$0xff] %v13459_v55 }
 0x47c   :  { %v4446_v24 = vpop.f32.mrf.mxu1  ;;  %v5353_v62 = vpop.f32.mrf.mxu0 }
 0x47d   :  { %v4704_v3 = vadd.f32 %v4446_v24, %v16829_v36  ;;  %v13472_v37 = vadd.f32 %v5353_v62, %v4702_v1  ;;  %v39_v1 = vld [vmem:[%s16461_s3 + $0x30] sm:$0xff]  ;;  %v11264_v62 = vld [vmem:[#allocation2 + $0x138] sm:$0xff]  }
 0x47e   :  { %v10302_v15 = vpop.f32.mrf.mxu1  ;;  %v10478_v57 = vpop.f32.mrf.mxu0  ;;  %v4226_v48 = vrot.slane %v11264_v62, 2  ;;  %7247 = vperm.xlu1 %10985, %v36_v12   ;;  %7262 = vperm.xlu0 %10984, %v39_v1   ;;  %v13500_v12 = vld [vmem:[#allocation2 + $0x140] sm:$0xff]  }
 0x480   :  { %v4451_v4 = vpop.f32.mrf.mxu1  ;;  %10400 = vmatmul.mubr.bf16.gmra.mxu1 %v4225_v2  ;;  %v5358_v55 = vpop.f32.mrf.mxu0  ;;  %10576 = vmatmul.mubr.bf16.gmra.mxu0 %v5138_v14  ;;  %v4227_v38 = vsel %vm4150_vm4, %v4224_v21, %v4226_v48  ;;  %v43_v21 = vld [vmem:[%s16461_s3 + $0x50] sm:$0xff] }
 0x481   :  { %v4705_v24 = vadd.f32 %v4451_v4, %v16830_v16  ;;  %v13483_v28 = vadd.f32 %v5358_v55, %v4703_v32  ;;  %10403 = vmatprep.mubr.msk.bf16.mxu1 %vm11355_vm0, %v16651_v8  ;;  %10579 = vmatprep.mubr.msk.bf16.mxu0 %vm11355_vm0, %v16651_v8  ;;  %v38_v32 = vld [vmem:[%s16461_s3 + $0x28] sm:$0xff]  ;;  %v41_v55 = vld [vmem:[%s16461_s3 + $0x40] sm:$0xff]  ;;  %v5140_v16 = vsel %vm4150_vm4, %v5137_v41, %v5139_v30 }
 0x482   :  { %v10305_v36 = vpop.f32.mrf.mxu1  ;;  %v10481_v2 = vpop.f32.mrf.mxu0  ;;  %7257 = vperm.xlu1 %10985, %v38_v32   ;;  %7272 = vperm.xlu0 %10984, %v41_v55   ;;  %v5141_v32 = vrot.slane %v13500_v12, 2 }
 0x484   :  { %v4454_v14 = vpop.f32.mrf.mxu1  ;;  %v5361_v15 = vpop.f32.mrf.mxu0 }
 0x485   :  { %v4706_v57 = vadd.f32 %v4454_v14, %v12929_v34  ;;  %v13496_v4 = vadd.f32 %v5361_v15, %v4704_v3  ;;  %v40_v34 = vld [vmem:[%s16461_s3 + $0x38] sm:$0xff]  ;;  %v11265_v14 = vld [vmem:[#allocation2 + $0x140] sm:$0xff]  }
 0x486   :  { %v10306_v1 = vpop.f32.mrf.mxu1  ;;  %v10482_v62 = vpop.f32.mrf.mxu0  ;;  %v4228_v15 = vrot.slane %v11265_v14, 2  ;;  %7267 = vperm.xlu1 %10985, %v40_v34   ;;  %7282 = vperm.xlu0 %10984, %v43_v21   ;;  %v11183_v34 = vld [vmem:[#allocation2 + $0x148] sm:$0xff]  }
 0x488   :  { %v4459_v36 = vpop.f32.mrf.mxu1  ;;  %10404 = vmatmul.mubr.bf16.gmra.mxu1 %v4227_v38  ;;  %v5366_v2 = vpop.f32.mrf.mxu0  ;;  %10580 = vmatmul.mubr.bf16.gmra.mxu0 %v5140_v16  ;;  %v4229_v12 = vsel %vm4150_vm4, %v4226_v48, %v4228_v15 }
 0x489   :  { %v4707_v41 = vadd.f32 %v4459_v36, %v12935_v26  ;;  %v13509_v3 = vadd.f32 %v5366_v2, %v4705_v24  ;;  %10407 = vmatprep.mubr.msk.bf16.mxu1 %vm11355_vm0, %v16651_v8  ;;  %10583 = vmatprep.mubr.msk.bf16.mxu0 %vm11355_vm0, %v16651_v8  ;;  %v42_v26 = vld [vmem:[%s16461_s3 + $0x48] sm:$0xff]  ;;  %v45_v24 = vld [vmem:[%s16461_s3 + $0x60] sm:$0xff]  ;;  %v5142_v2 = vsel %vm4150_vm4, %v5139_v30, %v5141_v32 }
 0x48a   :  { %v10309_v55 = vpop.f32.mrf.mxu1  ;;  %v10485_v38 = vpop.f32.mrf.mxu0  ;;  %7277 = vperm.xlu1 %10985, %v42_v26   ;;  %7292 = vperm.xlu0 %10984, %v45_v24   ;;  %v4843_v26 = vld [vmem:[#allocation2 + $0x154] sm:$0x3] }
 0x48b   :  { %16831 = vst [vmem:[#allocation39_spill] sm:$0xff] %v13509_v3  ;;  %v44_v3 = vld [vmem:[%s16461_s3 + $0x58] sm:$0xff] }
 0x48c   :  { %v4462_v16 = vpop.f32.mrf.mxu1  ;;  %v5369_v1 = vpop.f32.mrf.mxu0 }
 0x48d   :  { %v4708_v62 = vadd.f32 %v4462_v16, %v12946_v35  ;;  %v13523_v36 = vadd.f32 %v5369_v1, %v4706_v57  ;;  %v47_v35 = vld [vmem:[%s16461_s3 + $0x70] sm:$0xff]  ;;  %v4230_v57 = vrot.slane %v12932_v54, 2  ;;  %v5143_v16 = vrot.slane %v11183_v34, 2 }
 0x48e   :  { %v10310_v21 = vpop.f32.mrf.mxu1  ;;  %v10486_v14 = vpop.f32.mrf.mxu0  ;;  %v4842_v1 = vld [vmem:[#allocation2 + $0x150] sm:$0xf]  ;;  %7287 = vperm.xlu1 %10985, %v44_v3   ;;  %7302 = vperm.xlu0 %10984, %v47_v35  }
 0x48f   :  { %16832 = vst [vmem:[#allocation40_spill] sm:$0xff] %v13523_v36  ;;  %v49_v14 = vld [vmem:[%s16461_s3 + $0x80] sm:$0xff]  ;;  %v5144_v3 = vsel %vm4150_vm4, %v5141_v32, %v5143_v16  ;;  %v51_v32 = vld [vmem:[%s16461_s3 + $0x90] sm:$0xff] }
 0x490   :  { %v4467_v55 = vpop.f32.mrf.mxu1  ;;  %10408 = vmatmul.mubr.bf16.gmra.mxu1 %v4229_v12  ;;  %v5374_v38 = vpop.f32.mrf.mxu0  ;;  %10584 = vmatmul.mubr.bf16.gmra.mxu0 %v5142_v2 }
 0x491   :  { %v4709_v48 = vadd.f32 %v4467_v55, %v12949_v51  ;;  %v13534_v30 = vadd.f32 %v5374_v38, %v4707_v41  ;;  %10411 = vmatprep.mubr.msk.bf16.mxu1 %vm11355_vm0, %v16651_v8  ;;  %10587 = vmatprep.mubr.msk.bf16.mxu0 %vm11355_vm0, %v16651_v8  ;;  %v8837_v51 = vcombine.low %v4842_v1, %v4843_v26  ;;  %v46_v41 = vld [vmem:[%s16461_s3 + $0x68] sm:$0xff] }
 0x492   :  { %v10313_v24 = vpop.f32.mrf.mxu1  ;;  %v10489_v12 = vpop.f32.mrf.mxu0  ;;  %v4231_v55 = vsel %vm4150_vm4, %v4228_v15, %v4230_v57  ;;  %7297 = vperm.xlu1 %10985, %v46_v41   ;;  %7312 = vperm.xlu0 %10984, %v49_v14   ;;  %v48_v15 = vld [vmem:[%s16461_s3 + $0x78] sm:$0xff] }
 0x493   :  { %16833 = vst [vmem:[#allocation41_spill] sm:$0xff] %v13534_v30  ;;  %v13552_v24 = vrot.slane %v8837_v51, 2  ;;  %v5700_v12 = vshrl.u32 %v12970_v29, 16 }
 0x494   :  { %v4470_v2 = vpop.f32.mrf.mxu1  ;;  %v5377_v21 = vpop.f32.mrf.mxu0 }
 0x495   :  { %v4710_v54 = vadd.f32 %v4470_v2, %v12956_v19  ;;  %v13548_v34 = vadd.f32 %v5377_v21, %v4708_v62  ;;  %v5703_v19 = vshll.u32 %v12970_v29, 16  ;;  %v13569_v21 = vld [vmem:[#allocation2 + $0x18] sm:$0xff]  }
 0x496   :  { %v10314_v38 = vpop.f32.mrf.mxu1  ;;  %v10490_v35 = vpop.f32.mrf.mxu0  ;;  %v5708_v29 = vshrl.u32 %v13569_v21, 16  ;;  %v5711_v51 = vshll.u32 %v13569_v21, 16  ;;  %7307 = vperm.xlu1 %10985, %v48_v15   ;;  %7322 = vperm.xlu0 %10984, %v51_v32  }
 0x497   :  { %16834 = vst [vmem:[#allocation42_spill] sm:$0xff] %v13548_v34  ;;  %v5705_v38 = vrot.slane %v5703_v19, 3  ;;  %v50_v35 = vld [vmem:[%s16461_s3 + $0x88] sm:$0xff]  ;;  %v13584_v34 = vld [vmem:[#allocation2 + $0x20] sm:$0xff]  }
 0x498   :  { %v4475_v1 = vpop.f32.mrf.mxu1  ;;  %10412 = vmatmul.mubr.bf16.gmra.mxu1 %v4231_v55  ;;  %v5382_v26 = vpop.f32.mrf.mxu0  ;;  %10588 = vmatmul.mubr.bf16.gmra.mxu0 %v5144_v3  ;;  %v5702_v3 = vrot.slane %v5700_v12, 2  ;;  %v5710_v15 = vrot.slane %v5708_v29, 2  ;;  %v5713_v32 = vrot.slane %v5711_v51, 3  ;;  %v5717_v30 = vshrl.u32 %v13584_v34, 16 }
 0x499   :  { %v4711_v62 = vadd.f32 %v4475_v1, %v12960_v61  ;;  %v13563_v2 = vadd.f32 %v5382_v26, %v4709_v48  ;;  %10415 = vmatprep.mubr.msk.bf16.mxu1 %vm11355_vm0, %v16651_v8  ;;  %10591 = vmatprep.mubr.msk.bf16.mxu0 %vm11355_vm0, %v16651_v8  ;;  %v5146_v48 = vsel %vm4150_vm4, %v5143_v16, %v13552_v24  ;;  %v53_v1 = vld [vmem:[%s16461_s3 + $0xa0] sm:$0xff]  ;;  %v5720_v36 = vshll.u32 %v13584_v34, 16 }
 0x49a   :  { %v10317_v41 = vpop.f32.mrf.mxu1  ;;  %v10493_v14 = vpop.f32.mrf.mxu0  ;;  %7317 = vperm.xlu1 %10985, %v50_v35   ;;  %7332 = vperm.xlu0 %10984, %v53_v1   ;;  %v5706_v19 = vor.u32 %v5705_v38, %v5702_v3  ;;  %v5714_v29 = vor.u32 %v5713_v32, %v5710_v15  ;;  %v5719_v38 = vrot.slane %v5717_v30, 2 }
 0x49b   :  { %16835 = vst [vmem:[#allocation43_spill] sm:$0xff] %v13563_v2  ;;  %v5722_v35 = vrot.slane %v5720_v36, 3 }
 0x49c   :  { %v4478_v55 = vpop.f32.mrf.mxu1  ;;  %v5385_v61 = vpop.f32.mrf.mxu0  ;;  %v5715_v32 = vsel %vm5698_vm5, %v5706_v19, %v5714_v29  ;;  %v56_v19 = vld [vmem:[%s16461_s3 + $0xb8] sm:$0xff] }
 0x49d   :  { %v4712_v26 = vadd.f32 %v4478_v55, %v12967_v47  ;;  %v13582_v41 = vadd.f32 %v5385_v61, %v4710_v54  ;;  %v52_v47 = vld [vmem:[%s16461_s3 + $0x98] sm:$0xff]  ;;  %v55_v54 = vld [vmem:[%s16461_s3 + $0xb0] sm:$0xff] }
 0x49e   :  { %v10318_v14 = vpop.f32.mrf.mxu1  ;;  %v10494_v2 = vpop.f32.mrf.mxu0  ;;  %v6597_v61 = vld [vmem:[#allocation2 + $0x10] sm:$0x8]  ;;  %7327 = vperm.xlu1 %10985, %v52_v47   ;;  %7342 = vperm.xlu0 %10984, %v55_v54   ;;  %v5723_v54 = vor.u32 %v5722_v35, %v5719_v38 }
 0x49f   :  { %v11268_v14 = vld [vmem:[#allocation2 + $0x14] sm:$0xf] }
 0x4a0   :  { %v4483_v16 = vpop.f32.mrf.mxu1  ;;  %10416 = vmatmul.mubr.bf16.gmra.mxu1 %v4230_v57  ;;  %v5390_v12 = vpop.f32.mrf.mxu0  ;;  %10592 = vmatmul.mubr.bf16.gmra.mxu0 %v5146_v48 }
 0x4a1   :  { %v4713_v2 = vadd.f32 %v4483_v16, %v12976_v50  ;;  %v13595_v57 = vadd.f32 %v5390_v12, %v4711_v62  ;;  %10595 = vmatprep.mubr.msk.bf16.mxu0 %vm11355_vm0, %v16651_v8  ;;  %10615 = vmatprep.mubr.msk.bf16.mxu1 %vm11355_vm0, %v16651_v8  ;;  %v54_v50 = vld [vmem:[%s16461_s3 + $0xa8] sm:$0xff]  ;;  %v57_v62 = vld [vmem:[%s16461_s3 + $0xc0] sm:$0xff]  ;;  %v8887_v16 = vcombine.low %v6597_v61, %v11268_v14 }
 0x4a2   :  { %v10321_v51 = vpop.f32.mrf.mxu1  ;;  %v10497_v55 = vpop.f32.mrf.mxu0  ;;  %7337 = vperm.xlu1 %10985, %v54_v50   ;;  %7352 = vperm.xlu0 %10984, %v57_v62   ;;  %v61_v14 = vld [vmem:[%s16461_s3 + $0xe0] sm:$0xff] }
 0x4a3   :  { %v13612_v51 = vld [vmem:[#allocation2 + $0x28] sm:$0xff]   ;;  %v59_v55 = vld [vmem:[%s16461_s3 + $0xd0] sm:$0xff] }
 0x4a4   :  { %v4486_v48 = vpop.f32.mrf.mxu1  ;;  %v5393_v3 = vpop.f32.mrf.mxu0 }
 0x4a5   :  { %v4714_v1 = vadd.f32 %v4486_v48, %v12988_v42  ;;  %v13608_v15 = vadd.f32 %v5393_v3, %v4712_v26  ;;  %v5726_v42 = vshrl.u32 %v13612_v51, 16  ;;  %v5729_v26 = vshll.u32 %v13612_v51, 16 }
 0x4a6   :  { %v10322_v12 = vpop.f32.mrf.mxu1  ;;  %v10498_v47 = vpop.f32.mrf.mxu0  ;;  %v6620_v3 = vrot.slane %v13569_v21, 3  ;;  %7347 = vperm.xlu1 %10985, %v56_v19   ;;  %7362 = vperm.xlu0 %10984, %v59_v55   ;;  %v6622_v55 = vrot.slane %v13584_v34, 3 }
 0x4a7   :  { %v5724_v12 = vsel %vm5698_vm5, %v5714_v29, %v5723_v54  ;;  %v63_v29 = vld [vmem:[%s16461_s3 + $0xf0] sm:$0xff] }
 0x4a8   :  { %v4491_v36 = vpop.f32.mrf.mxu1  ;;  %v5398_v30 = vpop.f32.mrf.mxu0  ;;  %10596 = vmatmul.mubr.bf16.gmra.mxu0 %v13552_v24  ;;  %10616 = vmatmul.mubr.bf16.vlgmr.msra.gmra.mxu1 %v5715_v32  ;;  %v6619_v24 = vrot.slane %v8887_v16, 3  ;;  %v5728_v32 = vrot.slane %v5726_v42, 2 }
 0x4a9   :  { %v4715_v61 = vadd.f32 %v4491_v36, %v13000_v0  ;;  %v13623_v48 = vadd.f32 %v5398_v30, %v4713_v2  ;;  %10619 = vmatprep.mubr.msk.bf16.mxu1 %vm11355_vm0, %v16651_v8  ;;  %10795 = vmatprep.mubr.msk.bf16.mxu0 %vm11355_vm0, %v16651_v8  ;;  %v5731_v0 = vrot.slane %v5729_v26, 3  ;;  %v58_v2 = vld [vmem:[%s16461_s3 + $0xc8] sm:$0xff] }
 0x4aa   :  { %v10325_v38 = vpop.f32.mrf.mxu1  ;;  %v10501_v35 = vpop.f32.mrf.mxu0  ;;  %v6621_v47 = vsel %vm6618_vm6, %v6619_v24, %v6620_v3  ;;  %7357 = vperm.xlu1 %10985, %v58_v2   ;;  %7372 = vperm.xlu0 %10984, %v61_v14   ;;  %v62_v2 = vld [vmem:[%s16461_s3 + $0xe8] sm:$0xff]  ;;  %v65_v14 = vld [vmem:[%s16461_s3 + $0x100] sm:$0xff] }
 0x4ab   :  { %v5732_v19 = vor.u32 %v5731_v0, %v5728_v32  ;;  %v13655_v38 = vld [vmem:[#allocation2 + $0x30] sm:$0xff]   ;;  %v6623_v0 = vsel %vm6618_vm6, %v6620_v3, %v6622_v55 }
 0x4ac   :  { %v4494_v50 = vpop.f32.mrf.mxu1  ;;  %v5401_v62 = vpop.f32.mrf.mxu0  ;;  %v5735_v34 = vshrl.u32 %v13655_v38, 16  ;;  %v5738_v35 = vshll.u32 %v13655_v38, 16 }
 0x4ad   :  { %v4716_v16 = vadd.f32 %v4494_v50, %v13015_v63  ;;  %v13637_v21 = vadd.f32 %v5401_v62, %v4714_v1  ;;  %v60_v63 = vld [vmem:[%s16461_s3 + $0xd8] sm:$0xff] }
 0x4ae   :  { %v10326_v36 = vpop.f32.mrf.mxu1  ;;  %v10502_v30 = vpop.f32.mrf.mxu0  ;;  %7367 = vperm.xlu1 %10985, %v60_v63   ;;  %7382 = vperm.xlu0 %10984, %v63_v29   ;;  %v13670_v63 = vld [vmem:[#allocation2 + $0x38] sm:$0xff]  }
 0x4af   :  { %v5737_v36 = vrot.slane %v5735_v34, 2  ;;  %v5740_v30 = vrot.slane %v5738_v35, 3  ;;  %v5744_v29 = vshrl.u32 %v13670_v63, 16 }
 0x4b0   :  { %v4499_v42 = vpop.f32.mrf.mxu1  ;;  %v5406_v26 = vpop.f32.mrf.mxu0  ;;  %10620 = vmatmul.mubr.bf16.gmra.mxu1 %v5724_v12  ;;  %10796 = vmatmul.mubr.bf16.vlgmr.msra.gmra.mxu0 %v6621_v47 }
 0x4b1   :  { %v4717_v1 = vadd.f32 %v4499_v42, %v13024_v49  ;;  %v13649_v24 = vadd.f32 %v5406_v26, %v4715_v61  ;;  %10623 = vmatprep.mubr.msk.bf16.mxu1 %vm11355_vm0, %v16651_v8  ;;  %10799 = vmatprep.mubr.msk.bf16.mxu0 %vm11355_vm0, %v16651_v8  ;;  %v5733_v61 = vsel %vm5698_vm5, %v5723_v54, %v5732_v19 }
 0x4b2   :  { %v10329_v50 = vpop.f32.mrf.mxu1  ;;  %v10505_v62 = vpop.f32.mrf.mxu0  ;;  %7377 = vperm.xlu1 %10985, %v62_v2   ;;  %7392 = vperm.xlu0 %10984, %v65_v14   ;;  %v5746_v14 = vrot.slane %v5744_v29, 2 }
 0x4b3   :  { %v5747_v50 = vshll.u32 %v13670_v63, 16  ;;  %v5741_v62 = vor.u32 %v5740_v30, %v5737_v36 }
 0x4b4   :  { %v4502_v32 = vpop.f32.mrf.mxu1  ;;  %v5409_v49 = vpop.f32.mrf.mxu0 }
 0x4b5   :  { %v4718_v12 = vadd.f32 %v4502_v32, %v13036_v6  ;;  %v13668_v47 = vadd.f32 %v5409_v49, %v4716_v16  ;;  %v64_v6 = vld [vmem:[%s16461_s3 + $0xf8] sm:$0xff]  ;;  %v67_v16 = vld [vmem:[%s16461_s3 + $0x110] sm:$0xff]  ;;  %v6624_v32 = vrot.slane %v13612_v51, 3  ;;  %v5742_v51 = vsel %vm5698_vm5, %v5732_v19, %v5741_v62 }
 0x4b6   :  { %v10330_v42 = vpop.f32.mrf.mxu1  ;;  %v10506_v26 = vpop.f32.mrf.mxu0  ;;  %7387 = vperm.xlu1 %10985, %v64_v6   ;;  %7402 = vperm.xlu0 %10984, %v67_v16   ;;  %v6626_v16 = vrot.slane %v13655_v38, 3  ;;  %v71_v19 = vld [vmem:[%s16461_s3 + $0x130] sm:$0xff] }
 0x4b7   :  { %v5749_v42 = vrot.slane %v5747_v50, 3  ;;  %v6625_v26 = vsel %vm6618_vm6, %v6622_v55, %v6624_v32 }
 0x4b8   :  { %v4507_v54 = vpop.f32.mrf.mxu1  ;;  %v5414_v3 = vpop.f32.mrf.mxu0  ;;  %10624 = vmatmul.mubr.bf16.gmra.mxu1 %v5733_v61  ;;  %10800 = vmatmul.mubr.bf16.gmra.mxu0 %v6623_v0 }
 0x4b9   :  { %v4719_v34 = vadd.f32 %v4507_v54, %v13042_v40  ;;  %v13681_v35 = vadd.f32 %v5414_v3, %v4717_v1  ;;  %10627 = vmatprep.mubr.msk.bf16.mxu1 %vm11355_vm0, %v16651_v8  ;;  %10803 = vmatprep.mubr.msk.bf16.mxu0 %vm11355_vm0, %v16651_v8  ;;  %v66_v40 = vld [vmem:[%s16461_s3 + $0x108] sm:$0xff]  ;;  %v69_v1 = vld [vmem:[%s16461_s3 + $0x120] sm:$0xff]  ;;  %v5750_v6 = vor.u32 %v5749_v42, %v5746_v14 }
 0x4ba   :  { %v10333_v49 = vpop.f32.mrf.mxu1  ;;  %v10509_v61 = vpop.f32.mrf.mxu0  ;;  %7397 = vperm.xlu1 %10985, %v66_v40   ;;  %7412 = vperm.xlu0 %10984, %v69_v1   ;;  %v6627_v42 = vsel %vm6618_vm6, %v6624_v32, %v6626_v16  ;;  %v70_v40 = vld [vmem:[%s16461_s3 + $0x128] sm:$0xff]  ;;  %v73_v1 = vld [vmem:[%s16461_s3 + $0x140] sm:$0xff] }
 0x4bb   :  { %v13713_v49 = vld [vmem:[#allocation2 + $0x40] sm:$0xff]  }
 0x4bc   :  { %v4510_v0 = vpop.f32.mrf.mxu1  ;;  %v5417_v2 = vpop.f32.mrf.mxu0  ;;  %v5753_v38 = vshrl.u32 %v13713_v49, 16  ;;  %v5756_v61 = vshll.u32 %v13713_v49, 16 }
 0x4bd   :  { %v4720_v36 = vadd.f32 %v4510_v0, %v13049_v10  ;;  %v13695_v30 = vadd.f32 %v5417_v2, %v4718_v12  ;;  %v68_v10 = vld [vmem:[%s16461_s3 + $0x118] sm:$0xff] }
 0x4be   :  { %v10334_v54 = vpop.f32.mrf.mxu1  ;;  %v10510_v3 = vpop.f32.mrf.mxu0  ;;  %7407 = vperm.xlu1 %10985, %v68_v10   ;;  %7422 = vperm.xlu0 %10984, %v71_v19   ;;  %v13728_v19 = vld [vmem:[#allocation2 + $0x48] sm:$0xff]  }
 0x4bf   :  { %v5755_v3 = vrot.slane %v5753_v38, 2  ;;  %v75_v38 = vld [vmem:[%s16461_s3 + $0x150] sm:$0xff] }
 0x4c0   :  { %v4515_v29 = vpop.f32.mrf.mxu1  ;;  %v5422_v50 = vpop.f32.mrf.mxu0  ;;  %10628 = vmatmul.mubr.bf16.gmra.mxu1 %v5742_v51  ;;  %10804 = vmatmul.mubr.bf16.gmra.mxu0 %v6625_v26  ;;  %v16837_v51 = vld [vmem:[#allocation46_spill] sm:$0xff] }
 0x4c1   :  { %v4721_v55 = vadd.f32 %v4515_v29, %v13054_v17  ;;  %v13707_v12 = vadd.f32 %v5422_v50, %v4719_v34  ;;  %10631 = vmatprep.mubr.msk.bf16.mxu1 %vm11355_vm0, %v16651_v8  ;;  %10807 = vmatprep.mubr.msk.bf16.mxu0 %vm11355_vm0, %v16651_v8  ;;  %v5751_v34 = vsel %vm5698_vm5, %v5741_v62, %v5750_v6  ;;  %v5758_v29 = vrot.slane %v5756_v61, 3  ;;  %v16839_v61 = vld [vmem:[#allocation47_spill] sm:$0xff] }
 0x4c2   :  { %v10337_v0 = vpop.f32.mrf.mxu1  ;;  %v10513_v2 = vpop.f32.mrf.mxu0  ;;  %7417 = vperm.xlu1 %10985, %v70_v40   ;;  %7432 = vperm.xlu0 %10984, %v73_v1  }
 0x4c3   :  { %16836 = vst [vmem:[#allocation44_spill] sm:$0xff] %v13707_v12  ;;  %v5762_v0 = vshrl.u32 %v13728_v19, 16  ;;  %v5765_v2 = vshll.u32 %v13728_v19, 16 }
 0x4c4   :  { %v4518_v14 = vpop.f32.mrf.mxu1  ;;  %v5425_v17 = vpop.f32.mrf.mxu0 }
 0x4c5   :  { %v4722_v26 = vadd.f32 %v4518_v14, %v16837_v51  ;;  %v13726_v54 = vadd.f32 %v5425_v17, %v4720_v36  ;;  %v72_v36 = vld [vmem:[%s16461_s3 + $0x138] sm:$0xff] }
 0x4c6   :  { %v10338_v50 = vpop.f32.mrf.mxu1  ;;  %v10514_v10 = vpop.f32.mrf.mxu0  ;;  %7427 = vperm.xlu1 %10985, %v72_v36   ;;  %7442 = vperm.xlu0 %10984, %v75_v38  }
 0x4c7   :  { %16838 = vst [vmem:[#allocation45_spill] sm:$0xff] %v13726_v54  ;;  %v5764_v10 = vrot.slane %v5762_v0, 2  ;;  %v5767_v54 = vrot.slane %v5765_v2, 3 }
 0x4c8   :  { %v4523_v62 = vpop.f32.mrf.mxu1  ;;  %v5430_v32 = vpop.f32.mrf.mxu0  ;;  %10632 = vmatmul.mubr.bf16.gmra.mxu1 %v5751_v34  ;;  %10808 = vmatmul.mubr.bf16.gmra.mxu0 %v6627_v42  ;;  %v5759_v34 = vor.u32 %v5758_v29, %v5755_v3  ;;  %v6628_v42 = vrot.slane %v13670_v63, 3 }
 0x4c9   :  { %v4723_v14 = vadd.f32 %v4523_v62, %v16839_v61  ;;  %v13739_v17 = vadd.f32 %v5430_v32, %v4721_v55  ;;  %10635 = vmatprep.mubr.msk.bf16.mxu1 %vm11355_vm0, %v16651_v8  ;;  %10811 = vmatprep.mubr.msk.bf16.mxu0 %vm11355_vm0, %v16651_v8  ;;  %v74_v55 = vld [vmem:[%s16461_s3 + $0x148] sm:$0xff]  ;;  %v77_v62 = vld [vmem:[%s16461_s3 + $0x160] sm:$0xff] }
 0x4ca   :  { %v10341_v40 = vpop.f32.mrf.mxu1  ;;  %v10517_v1 = vpop.f32.mrf.mxu0  ;;  %v16841_v32 = vld [vmem:[#allocation48_spill] sm:$0xff]  ;;  %v5760_v63 = vsel %vm5698_vm5, %v5750_v6, %v5759_v34  ;;  %v6629_v36 = vsel %vm6618_vm6, %v6626_v16, %v6628_v42  ;;  %7437 = vperm.xlu1 %10985, %v74_v55   ;;  %7452 = vperm.xlu0 %10984, %v77_v62   ;;  %v79_v6 = vld [vmem:[%s16461_s3 + $0x170] sm:$0xff]  ;;  %v16843_v16 = vld [vmem:[#allocation49_spill] sm:$0xff] }
 0x4cb   :  { %16840 = vst [vmem:[#allocation46_spill] sm:$0xff] %v13739_v17  ;;  %v5768_v40 = vor.u32 %v5767_v54, %v5764_v10  ;;  %v6630_v1 = vrot.slane %v13713_v49, 3  ;;  %v13771_v54 = vld [vmem:[#allocation2 + $0x50] sm:$0xff]  }
 0x4cc   :  { %v4526_v51 = vpop.f32.mrf.mxu1  ;;  %v5433_v50 = vpop.f32.mrf.mxu0  ;;  %v5771_v49 = vshrl.u32 %v13771_v54, 16  ;;  %v5774_v10 = vshll.u32 %v13771_v54, 16 }
 0x4cd   :  { %v4724_v3 = vadd.f32 %v4526_v51, %v16841_v32  ;;  %v13753_v29 = vadd.f32 %v5433_v50, %v4722_v26  ;;  %v76_v26 = vld [vmem:[%s16461_s3 + $0x158] sm:$0xff] }
 0x4ce   :  { %v10342_v38 = vpop.f32.mrf.mxu1  ;;  %v10518_v61 = vpop.f32.mrf.mxu0  ;;  %7447 = vperm.xlu1 %10985, %v76_v26   ;;  %7462 = vperm.xlu0 %10984, %v79_v6   ;;  %v5773_v26 = vrot.slane %v5771_v49, 2  ;;  %v5776_v6 = vrot.slane %v5774_v10, 3  ;;  %v83_v49 = vld [vmem:[%s16461_s3 + $0x190] sm:$0xff]  ;;  %v16847_v10 = vld [vmem:[#allocation51_spill] sm:$0xff] }
 0x4cf   :  { %16842 = vst [vmem:[#allocation47_spill] sm:$0xff] %v13753_v29  ;;  %v78_v38 = vld [vmem:[%s16461_s3 + $0x168] sm:$0xff]  ;;  %v81_v61 = vld [vmem:[%s16461_s3 + $0x180] sm:$0xff] }
 0x4d0   :  { %v4531_v0 = vpop.f32.mrf.mxu1  ;;  %v5438_v2 = vpop.f32.mrf.mxu0  ;;  %10636 = vmatmul.mubr.bf16.gmra.mxu1 %v5760_v63  ;;  %10812 = vmatmul.mubr.bf16.gmra.mxu0 %v6629_v36  ;;  %v6631_v36 = vsel %vm6618_vm6, %v6628_v42, %v6630_v1 }
 0x4d1   :  { %v4725_v51 = vadd.f32 %v4531_v0, %v16843_v16  ;;  %v13765_v50 = vadd.f32 %v5438_v2, %v4723_v14  ;;  %10639 = vmatprep.mubr.msk.bf16.mxu1 %vm11355_vm0, %v16651_v8  ;;  %10815 = vmatprep.mubr.msk.bf16.mxu0 %vm11355_vm0, %v16651_v8  ;;  %v5769_v14 = vsel %vm5698_vm5, %v5759_v34, %v5768_v40  ;;  %v16845_v0 = vld [vmem:[#allocation50_spill] sm:$0xff] }
 0x4d2   :  { %v10345_v55 = vpop.f32.mrf.mxu1  ;;  %v10521_v62 = vpop.f32.mrf.mxu0  ;;  %7457 = vperm.xlu1 %10985, %v78_v38   ;;  %7472 = vperm.xlu0 %10984, %v81_v61  }
 0x4d3   :  { %16844 = vst [vmem:[#allocation48_spill] sm:$0xff] %v13765_v50  ;;  %v13786_v50 = vld [vmem:[#allocation2 + $0x58] sm:$0xff]  }
 0x4d4   :  { %v4534_v32 = vpop.f32.mrf.mxu1  ;;  %v5441_v63 = vpop.f32.mrf.mxu0  ;;  %v5780_v29 = vshrl.u32 %v13786_v50, 16  ;;  %v5783_v17 = vshll.u32 %v13786_v50, 16 }
 0x4d5   :  { %v4726_v2 = vadd.f32 %v4534_v32, %v16845_v0  ;;  %v13784_v16 = vadd.f32 %v5441_v63, %v4724_v3  ;;  %v80_v3 = vld [vmem:[%s16461_s3 + $0x178] sm:$0xff] }
 0x4d6   :  { %v10346_v55 = vpop.f32.mrf.mxu1  ;;  %v10522_v62 = vpop.f32.mrf.mxu0  ;;  %7467 = vperm.xlu1 %10985, %v80_v3   ;;  %7482 = vperm.xlu0 %10984, %v83_v49  }
 0x4d7   :  { %16846 = vst [vmem:[#allocation49_spill] sm:$0xff] %v13784_v16  ;;  %v5782_v62 = vrot.slane %v5780_v29, 2  ;;  %v5785_v16 = vrot.slane %v5783_v17, 3 }
 0x4d8   :  { %v4539_v34 = vpop.f32.mrf.mxu1  ;;  %v5446_v42 = vpop.f32.mrf.mxu0  ;;  %10640 = vmatmul.mubr.bf16.gmra.mxu1 %v5769_v14  ;;  %10816 = vmatmul.mubr.bf16.gmra.mxu0 %v6631_v36  ;;  %v5777_v14 = vor.u32 %v5776_v6, %v5773_v26  ;;  %v6632_v36 = vrot.slane %v13728_v19, 3 }
 0x4d9   :  { %v4727_v32 = vadd.f32 %v4539_v34, %v16847_v10  ;;  %v13797_v63 = vadd.f32 %v5446_v42, %v4725_v51  ;;  %10643 = vmatprep.mubr.msk.bf16.mxu1 %vm11355_vm0, %v16651_v8  ;;  %10819 = vmatprep.mubr.msk.bf16.mxu0 %vm11355_vm0, %v16651_v8  ;;  %v82_v51 = vld [vmem:[%s16461_s3 + $0x188] sm:$0xff]  ;;  %v85_v34 = vld [vmem:[%s16461_s3 + $0x1a0] sm:$0xff] }
 0x4da   :  { %v10349_v38 = vpop.f32.mrf.mxu1  ;;  %v10525_v61 = vpop.f32.mrf.mxu0  ;;  %v16849_v42 = vld [vmem:[#allocation8_spill] sm:$0xff]  ;;  %v5778_v19 = vsel %vm5698_vm5, %v5768_v40, %v5777_v14  ;;  %v6633_v3 = vsel %vm6618_vm6, %v6630_v1, %v6632_v36  ;;  %7477 = vperm.xlu1 %10985, %v82_v51   ;;  %7492 = vperm.xlu0 %10984, %v85_v34   ;;  %v87_v40 = vld [vmem:[%s16461_s3 + $0x1b0] sm:$0xff]  ;;  %v16851_v1 = vld [vmem:[#allocation9_spill] sm:$0xff] }
 0x4db   :  { %16848 = vst [vmem:[#allocation50_spill] sm:$0xff] %v13797_v63  ;;  %v5786_v38 = vor.u32 %v5785_v16, %v5782_v62  ;;  %v6634_v61 = vrot.slane %v13771_v54, 3  ;;  %v13829_v16 = vld [vmem:[#allocation2 + $0x60] sm:$0xff]  }
 0x4dc   :  { %v4542_v0 = vpop.f32.mrf.mxu1  ;;  %v5449_v55 = vpop.f32.mrf.mxu0  ;;  %v5789_v54 = vshrl.u32 %v13829_v16, 16  ;;  %v5792_v62 = vshll.u32 %v13829_v16, 16 }
 0x4dd   :  { %v4728_v26 = vadd.f32 %v4542_v0, %v16849_v42  ;;  %v13811_v6 = vadd.f32 %v5449_v55, %v4726_v2  ;;  %v84_v2 = vld [vmem:[%s16461_s3 + $0x198] sm:$0xff] }
 0x4de   :  { %v10350_v49 = vpop.f32.mrf.mxu1  ;;  %v10526_v10 = vpop.f32.mrf.mxu0  ;;  %7487 = vperm.xlu1 %10985, %v84_v2   ;;  %7502 = vperm.xlu0 %10984, %v87_v40   ;;  %v5791_v2 = vrot.slane %v5789_v54, 2  ;;  %v5794_v40 = vrot.slane %v5792_v62, 3  ;;  %v91_v54 = vld [vmem:[%s16461_s3 + $0x1d0] sm:$0xff]  ;;  %v16855_v62 = vld [vmem:[#allocation11_spill] sm:$0xff] }
 0x4df   :  { %16850 = vst [vmem:[#allocation51_spill] sm:$0xff] %v13811_v6  ;;  %v86_v49 = vld [vmem:[%s16461_s3 + $0x1a8] sm:$0xff]  ;;  %v89_v10 = vld [vmem:[%s16461_s3 + $0x1c0] sm:$0xff] }
 0x4e0   :  { %v4547_v17 = vpop.f32.mrf.mxu1  ;;  %v5454_v29 = vpop.f32.mrf.mxu0  ;;  %10644 = vmatmul.mubr.bf16.gmra.mxu1 %v5778_v19  ;;  %10820 = vmatmul.mubr.bf16.gmra.mxu0 %v6633_v3  ;;  %v6635_v3 = vsel %vm6618_vm6, %v6632_v36, %v6634_v61 }
 0x4e1   :  { %v4729_v0 = vadd.f32 %v4547_v17, %v16851_v1  ;;  %v13823_v55 = vadd.f32 %v5454_v29, %v4727_v32  ;;  %10647 = vmatprep.mubr.msk.bf16.mxu1 %vm11355_vm0, %v16651_v8  ;;  %10823 = vmatprep.mubr.msk.bf16.mxu0 %vm11355_vm0, %v16651_v8  ;;  %v5787_v32 = vsel %vm5698_vm5, %v5777_v14, %v5786_v38  ;;  %v16853_v17 = vld [vmem:[#allocation10_spill] sm:$0xff] }
 0x4e2   :  { %v10353_v51 = vpop.f32.mrf.mxu1  ;;  %v10529_v34 = vpop.f32.mrf.mxu0  ;;  %7497 = vperm.xlu1 %10985, %v86_v49   ;;  %7512 = vperm.xlu0 %10984, %v89_v10  }
 0x4e3   :  { %16852 = vst [vmem:[#allocation8_spill] sm:$0xff] %v13823_v55  ;;  %v13844_v55 = vld [vmem:[#allocation2 + $0x68] sm:$0xff]  }
 0x4e4   :  { %v4550_v42 = vpop.f32.mrf.mxu1  ;;  %v5457_v19 = vpop.f32.mrf.mxu0  ;;  %v5798_v6 = vshrl.u32 %v13844_v55, 16  ;;  %v5801_v63 = vshll.u32 %v13844_v55, 16 }
 0x4e5   :  { %v4730_v29 = vadd.f32 %v4550_v42, %v16853_v17  ;;  %v13842_v1 = vadd.f32 %v5457_v19, %v4728_v26  ;;  %v88_v26 = vld [vmem:[%s16461_s3 + $0x1b8] sm:$0xff] }
 0x4e6   :  { %v10354_v51 = vpop.f32.mrf.mxu1  ;;  %v10530_v34 = vpop.f32.mrf.mxu0  ;;  %7507 = vperm.xlu1 %10985, %v88_v26   ;;  %7522 = vperm.xlu0 %10984, %v91_v54  }
 0x4e7   :  { %16854 = vst [vmem:[#allocation9_spill] sm:$0xff] %v13842_v1  ;;  %v5800_v34 = vrot.slane %v5798_v6, 2  ;;  %v5803_v1 = vrot.slane %v5801_v63, 3 }
 0x4e8   :  { %v4555_v14 = vpop.f32.mrf.mxu1  ;;  %v5462_v36 = vpop.f32.mrf.mxu0  ;;  %10648 = vmatmul.mubr.bf16.gmra.mxu1 %v5787_v32  ;;  %10824 = vmatmul.mubr.bf16.gmra.mxu0 %v6635_v3  ;;  %v5795_v32 = vor.u32 %v5794_v40, %v5791_v2  ;;  %v6636_v3 = vrot.slane %v13786_v50, 3 }
 0x4e9   :  { %v4731_v42 = vadd.f32 %v4555_v14, %v16855_v62  ;;  %v13855_v19 = vadd.f32 %v5462_v36, %v4729_v0  ;;  %10651 = vmatprep.mubr.msk.bf16.mxu1 %vm11355_vm0, %v16651_v8  ;;  %10827 = vmatprep.mubr.msk.bf16.mxu0 %vm11355_vm0, %v16651_v8  ;;  %v90_v0 = vld [vmem:[%s16461_s3 + $0x1c8] sm:$0xff]  ;;  %v93_v14 = vld [vmem:[%s16461_s3 + $0x1e0] sm:$0xff] }
 0x4ea   :  { %v10357_v49 = vpop.f32.mrf.mxu1  ;;  %v10533_v10 = vpop.f32.mrf.mxu0  ;;  %v16857_v36 = vld [vmem:[#allocation12_spill] sm:$0xff]  ;;  %v5796_v50 = vsel %vm5698_vm5, %v5786_v38, %v5795_v32  ;;  %v6637_v26 = vsel %vm6618_vm6, %v6634_v61, %v6636_v3  ;;  %7517 = vperm.xlu1 %10985, %v90_v0   ;;  %7532 = vperm.xlu0 %10984, %v93_v14   ;;  %v95_v38 = vld [vmem:[%s16461_s3 + $0x1f0] sm:$0xff]  ;;  %v16859_v61 = vld [vmem:[#allocation13_spill] sm:$0xff] }
 0x4eb   :  { %16856 = vst [vmem:[#allocation10_spill] sm:$0xff] %v13855_v19  ;;  %v5804_v49 = vor.u32 %v5803_v1, %v5800_v34  ;;  %v6638_v10 = vrot.slane %v13829_v16, 3  ;;  %v13887_v1 = vld [vmem:[#allocation2 + $0x70] sm:$0xff]  }
 0x4ec   :  { %v4558_v17 = vpop.f32.mrf.mxu1  ;;  %v5465_v51 = vpop.f32.mrf.mxu0  ;;  %v5807_v16 = vshrl.u32 %v13887_v1, 16  ;;  %v5810_v34 = vshll.u32 %v13887_v1, 16 }
 0x4ed   :  { %v4732_v2 = vadd.f32 %v4558_v17, %v16857_v36  ;;  %v13869_v40 = vadd.f32 %v5465_v51, %v4730_v29  ;;  %v92_v29 = vld [vmem:[%s16461_s3 + $0x1d8] sm:$0xff] }
 0x4ee   :  { %v10358_v54 = vpop.f32.mrf.mxu1  ;;  %v10534_v62 = vpop.f32.mrf.mxu0  ;;  %7527 = vperm.xlu1 %10985, %v92_v29   ;;  %7542 = vperm.xlu0 %10984, %v95_v38   ;;  %v5809_v29 = vrot.slane %v5807_v16, 2  ;;  %v5812_v38 = vrot.slane %v5810_v34, 3  ;;  %v99_v16 = vld [vmem:[%s16461_s3 + $0x210] sm:$0xff]  ;;  %v16863_v34 = vld [vmem:[#allocation15_spill] sm:$0xff] }
 0x4ef   :  { %16858 = vst [vmem:[#allocation11_spill] sm:$0xff] %v13869_v40  ;;  %v94_v54 = vld [vmem:[%s16461_s3 + $0x1e8] sm:$0xff]  ;;  %v97_v62 = vld [vmem:[%s16461_s3 + $0x200] sm:$0xff] }
 0x4f0   :  { %v4563_v63 = vpop.f32.mrf.mxu1  ;;  %v5470_v6 = vpop.f32.mrf.mxu0  ;;  %10652 = vmatmul.mubr.bf16.gmra.mxu1 %v5796_v50  ;;  %10828 = vmatmul.mubr.bf16.gmra.mxu0 %v6637_v26  ;;  %v6639_v26 = vsel %vm6618_vm6, %v6636_v3, %v6638_v10 }
 0x4f1   :  { %v4733_v17 = vadd.f32 %v4563_v63, %v16859_v61  ;;  %v13881_v51 = vadd.f32 %v5470_v6, %v4731_v42  ;;  %10655 = vmatprep.mubr.msk.bf16.mxu1 %vm11355_vm0, %v16651_v8  ;;  %10831 = vmatprep.mubr.msk.bf16.mxu0 %vm11355_vm0, %v16651_v8  ;;  %v5805_v42 = vsel %vm5698_vm5, %v5795_v32, %v5804_v49  ;;  %v16861_v63 = vld [vmem:[#allocation14_spill] sm:$0xff] }
 0x4f2   :  { %v10361_v0 = vpop.f32.mrf.mxu1  ;;  %v10537_v14 = vpop.f32.mrf.mxu0  ;;  %7537 = vperm.xlu1 %10985, %v94_v54   ;;  %7552 = vperm.xlu0 %10984, %v97_v62  }
 0x4f3   :  { %16860 = vst [vmem:[#allocation12_spill] sm:$0xff] %v13881_v51  ;;  %v13902_v51 = vld [vmem:[#allocation2 + $0x78] sm:$0xff]  }
 0x4f4   :  { %v4566_v36 = vpop.f32.mrf.mxu1  ;;  %v5473_v50 = vpop.f32.mrf.mxu0  ;;  %v5816_v40 = vshrl.u32 %v13902_v51, 16  ;;  %v5819_v19 = vshll.u32 %v13902_v51, 16 }
 0x4f5   :  { %v4734_v6 = vadd.f32 %v4566_v36, %v16861_v63  ;;  %v13900_v61 = vadd.f32 %v5473_v50, %v4732_v2  ;;  %v96_v2 = vld [vmem:[%s16461_s3 + $0x1f8] sm:$0xff] }
 0x4f6   :  { %v10362_v0 = vpop.f32.mrf.mxu1  ;;  %v10538_v14 = vpop.f32.mrf.mxu0  ;;  %7547 = vperm.xlu1 %10985, %v96_v2   ;;  %7562 = vperm.xlu0 %10984, %v99_v16  }
 0x4f7   :  { %16862 = vst [vmem:[#allocation13_spill] sm:$0xff] %v13900_v61  ;;  %v5818_v14 = vrot.slane %v5816_v40, 2  ;;  %v5821_v61 = vrot.slane %v5819_v19, 3 }
 0x4f8   :  { %v4571_v32 = vpop.f32.mrf.mxu1  ;;  %v5478_v3 = vpop.f32.mrf.mxu0  ;;  %10656 = vmatmul.mubr.bf16.gmra.mxu1 %v5805_v42  ;;  %10832 = vmatmul.mubr.bf16.gmra.mxu0 %v6639_v26  ;;  %v5813_v42 = vor.u32 %v5812_v38, %v5809_v29  ;;  %v6640_v26 = vrot.slane %v13844_v55, 3 }
 0x4f9   :  { %v4735_v36 = vadd.f32 %v4571_v32, %v16863_v34  ;;  %v13913_v50 = vadd.f32 %v5478_v3, %v4733_v17  ;;  %10659 = vmatprep.mubr.msk.bf16.mxu1 %vm11355_vm0, %v16651_v8  ;;  %10835 = vmatprep.mubr.msk.bf16.mxu0 %vm11355_vm0, %v16651_v8  ;;  %v98_v17 = vld [vmem:[%s16461_s3 + $0x208] sm:$0xff]  ;;  %v101_v32 = vld [vmem:[%s16461_s3 + $0x220] sm:$0xff] }
 0x4fa   :  { %v10365_v54 = vpop.f32.mrf.mxu1  ;;  %v10541_v62 = vpop.f32.mrf.mxu0  ;;  %v16865_v3 = vld [vmem:[#allocation16_spill] sm:$0xff]  ;;  %v5814_v55 = vsel %vm5698_vm5, %v5804_v49, %v5813_v42  ;;  %v6641_v2 = vsel %vm6618_vm6, %v6638_v10, %v6640_v26  ;;  %7557 = vperm.xlu1 %10985, %v98_v17   ;;  %7572 = vperm.xlu0 %10984, %v101_v32   ;;  %v103_v49 = vld [vmem:[%s16461_s3 + $0x230] sm:$0xff]  ;;  %v16867_v10 = vld [vmem:[#allocation17_spill] sm:$0xff] }
 0x4fb   :  { %16864 = vst [vmem:[#allocation14_spill] sm:$0xff] %v13913_v50  ;;  %v5822_v54 = vor.u32 %v5821_v61, %v5818_v14  ;;  %v6642_v62 = vrot.slane %v13887_v1, 3  ;;  %v13945_v61 = vld [vmem:[#allocation2 + $0x80] sm:$0xff]  }
 0x4fc   :  { %v4574_v63 = vpop.f32.mrf.mxu1  ;;  %v5481_v0 = vpop.f32.mrf.mxu0  ;;  %v5825_v1 = vshrl.u32 %v13945_v61, 16  ;;  %v5828_v14 = vshll.u32 %v13945_v61, 16 }
 0x4fd   :  { %v4736_v29 = vadd.f32 %v4574_v63, %v16865_v3  ;;  %v13927_v38 = vadd.f32 %v5481_v0, %v4734_v6  ;;  %v100_v6 = vld [vmem:[%s16461_s3 + $0x218] sm:$0xff] }
 0x4fe   :  { %v10366_v16 = vpop.f32.mrf.mxu1  ;;  %v10542_v34 = vpop.f32.mrf.mxu0  ;;  %7567 = vperm.xlu1 %10985, %v100_v6   ;;  %7582 = vperm.xlu0 %10984, %v103_v49   ;;  %v5827_v6 = vrot.slane %v5825_v1, 2  ;;  %v5830_v49 = vrot.slane %v5828_v14, 3  ;;  %v107_v1 = vld [vmem:[%s16461_s3 + $0x250] sm:$0xff]  ;;  %v16871_v14 = vld [vmem:[#allocation19_spill] sm:$0xff] }
 0x4ff   :  { %16866 = vst [vmem:[#allocation15_spill] sm:$0xff] %v13927_v38  ;;  %v102_v16 = vld [vmem:[%s16461_s3 + $0x228] sm:$0xff]  ;;  %v105_v34 = vld [vmem:[%s16461_s3 + $0x240] sm:$0xff] }
 0x500   :  { %v4579_v19 = vpop.f32.mrf.mxu1  ;;  %v5486_v40 = vpop.f32.mrf.mxu0  ;;  %10660 = vmatmul.mubr.bf16.gmra.mxu1 %v5814_v55  ;;  %10836 = vmatmul.mubr.bf16.gmra.mxu0 %v6641_v2  ;;  %v6643_v2 = vsel %vm6618_vm6, %v6640_v26, %v6642_v62 }
 0x501   :  { %v4737_v63 = vadd.f32 %v4579_v19, %v16867_v10  ;;  %v13939_v0 = vadd.f32 %v5486_v40, %v4735_v36  ;;  %10663 = vmatprep.mubr.msk.bf16.mxu1 %vm11355_vm0, %v16651_v8  ;;  %10839 = vmatprep.mubr.msk.bf16.mxu0 %vm11355_vm0, %v16651_v8  ;;  %v5823_v36 = vsel %vm5698_vm5, %v5813_v42, %v5822_v54  ;;  %v16869_v19 = vld [vmem:[#allocation18_spill] sm:$0xff] }
 0x502   :  { %v10369_v17 = vpop.f32.mrf.mxu1  ;;  %v10545_v32 = vpop.f32.mrf.mxu0  ;;  %7577 = vperm.xlu1 %10985, %v102_v16   ;;  %7592 = vperm.xlu0 %10984, %v105_v34  }
 0x503   :  { %16868 = vst [vmem:[#allocation16_spill] sm:$0xff] %v13939_v0  ;;  %v13960_v0 = vld [vmem:[#allocation2 + $0x88] sm:$0xff]  }
 0x504   :  { %v4582_v3 = vpop.f32.mrf.mxu1  ;;  %v5489_v55 = vpop.f32.mrf.mxu0  ;;  %v5834_v38 = vshrl.u32 %v13960_v0, 16  ;;  %v5837_v50 = vshll.u32 %v13960_v0, 16 }
 0x505   :  { %v4738_v40 = vadd.f32 %v4582_v3, %v16869_v19  ;;  %v13958_v10 = vadd.f32 %v5489_v55, %v4736_v29  ;;  %v104_v29 = vld [vmem:[%s16461_s3 + $0x238] sm:$0xff] }
 0x506   :  { %v10370_v17 = vpop.f32.mrf.mxu1  ;;  %v10546_v32 = vpop.f32.mrf.mxu0  ;;  %7587 = vperm.xlu1 %10985, %v104_v29   ;;  %7602 = vperm.xlu0 %10984, %v107_v1  }
 0x507   :  { %16870 = vst [vmem:[#allocation17_spill] sm:$0xff] %v13958_v10  ;;  %v5836_v32 = vrot.slane %v5834_v38, 2  ;;  %v5839_v10 = vrot.slane %v5837_v50, 3 }
 0x508   :  { %v4587_v42 = vpop.f32.mrf.mxu1  ;;  %v5494_v26 = vpop.f32.mrf.mxu0  ;;  %10664 = vmatmul.mubr.bf16.gmra.mxu1 %v5823_v36  ;;  %10840 = vmatmul.mubr.bf16.gmra.mxu0 %v6643_v2  ;;  %v5831_v36 = vor.u32 %v5830_v49, %v5827_v6  ;;  %v6644_v2 = vrot.slane %v13902_v51, 3 }
 0x509   :  { %v4739_v3 = vadd.f32 %v4587_v42, %v16871_v14  ;;  %v13971_v55 = vadd.f32 %v5494_v26, %v4737_v63  ;;  %10667 = vmatprep.mubr.msk.bf16.mxu1 %vm11355_vm0, %v16651_v8  ;;  %10843 = vmatprep.mubr.msk.bf16.mxu0 %vm11355_vm0, %v16651_v8  ;;  %v106_v63 = vld [vmem:[%s16461_s3 + $0x248] sm:$0xff]  ;;  %v109_v42 = vld [vmem:[%s16461_s3 + $0x260] sm:$0xff] }
 0x50a   :  { %v10373_v16 = vpop.f32.mrf.mxu1  ;;  %v10549_v34 = vpop.f32.mrf.mxu0  ;;  %v16873_v26 = vld [vmem:[#allocation20_spill] sm:$0xff]  ;;  %v5832_v51 = vsel %vm5698_vm5, %v5822_v54, %v5831_v36  ;;  %v6645_v29 = vsel %vm6618_vm6, %v6642_v62, %v6644_v2  ;;  %7597 = vperm.xlu1 %10985, %v106_v63   ;;  %7612 = vperm.xlu0 %10984, %v109_v42   ;;  %v111_v54 = vld [vmem:[%s16461_s3 + $0x270] sm:$0xff]  ;;  %v16875_v62 = vld [vmem:[#allocation21_spill] sm:$0xff] }
 0x50b   :  { %16872 = vst [vmem:[#allocation18_spill] sm:$0xff] %v13971_v55  ;;  %v5840_v16 = vor.u32 %v5839_v10, %v5836_v32  ;;  %v6646_v34 = vrot.slane %v13945_v61, 3  ;;  %v14003_v10 = vld [vmem:[#allocation2 + $0x90] sm:$0xff]  }
 0x50c   :  { %v4590_v19 = vpop.f32.mrf.mxu1  ;;  %v5497_v17 = vpop.f32.mrf.mxu0  ;;  %v5843_v61 = vshrl.u32 %v14003_v10, 16  ;;  %v5846_v32 = vshll.u32 %v14003_v10, 16 }
 0x50d   :  { %v4740_v6 = vadd.f32 %v4590_v19, %v16873_v26  ;;  %v13985_v49 = vadd.f32 %v5497_v17, %v4738_v40  ;;  %v108_v40 = vld [vmem:[%s16461_s3 + $0x258] sm:$0xff] }
 0x50e   :  { %v10374_v1 = vpop.f32.mrf.mxu1  ;;  %v10550_v14 = vpop.f32.mrf.mxu0  ;;  %7607 = vperm.xlu1 %10985, %v108_v40   ;;  %7622 = vperm.xlu0 %10984, %v111_v54   ;;  %v5845_v40 = vrot.slane %v5843_v61, 2  ;;  %v5848_v54 = vrot.slane %v5846_v32, 3  ;;  %v16879_v61 = vld [vmem:[#allocation23_spill] sm:$0xff] }
 0x50f   :  { %16874 = vst [vmem:[#allocation19_spill] sm:$0xff] %v13985_v49  ;;  %v110_v1 = vld [vmem:[%s16461_s3 + $0x268] sm:$0xff]  ;;  %v113_v14 = vld [vmem:[%s16461_s3 + $0x280] sm:$0xff] }
 0x510   :  { %v4595_v50 = vpop.f32.mrf.mxu1  ;;  %v5502_v38 = vpop.f32.mrf.mxu0  ;;  %10668 = vmatmul.mubr.bf16.gmra.mxu1 %v5832_v51  ;;  %10844 = vmatmul.mubr.bf16.gmra.mxu0 %v6645_v29  ;;  %v6647_v29 = vsel %vm6618_vm6, %v6644_v2, %v6646_v34 }
 0x511   :  { %v4741_v19 = vadd.f32 %v4595_v50, %v16875_v62  ;;  %v13997_v17 = vadd.f32 %v5502_v38, %v4739_v3  ;;  %10671 = vmatprep.mubr.msk.bf16.mxu1 %vm11355_vm0, %v16651_v8  ;;  %10847 = vmatprep.mubr.msk.bf16.mxu0 %vm11355_vm0, %v16651_v8  ;;  %v5841_v3 = vsel %vm5698_vm5, %v5831_v36, %v5840_v16  ;;  %v16877_v50 = vld [vmem:[#allocation22_spill] sm:$0xff] }
 0x512   :  { %v10377_v63 = vpop.f32.mrf.mxu1  ;;  %v10553_v42 = vpop.f32.mrf.mxu0  ;;  %7617 = vperm.xlu1 %10985, %v110_v1   ;;  %7632 = vperm.xlu0 %10984, %v113_v14  }
 0x513   :  { %16876 = vst [vmem:[#allocation20_spill] sm:$0xff] %v13997_v17  ;;  %v14018_v17 = vld [vmem:[#allocation2 + $0x98] sm:$0xff]  }
 0x514   :  { %v4598_v26 = vpop.f32.mrf.mxu1  ;;  %v5505_v51 = vpop.f32.mrf.mxu0  ;;  %v5852_v49 = vshrl.u32 %v14018_v17, 16  ;;  %v5855_v55 = vshll.u32 %v14018_v17, 16 }
 0x515   :  { %v4742_v38 = vadd.f32 %v4598_v26, %v16877_v50  ;;  %v14016_v62 = vadd.f32 %v5505_v51, %v4740_v6  ;;  %v112_v6 = vld [vmem:[%s16461_s3 + $0x278] sm:$0xff]  ;;  %v5849_v51 = vor.u32 %v5848_v54, %v5845_v40 }
 0x516   :  { %v10378_v63 = vpop.f32.mrf.mxu1  ;;  %v10554_v42 = vpop.f32.mrf.mxu0  ;;  %7627 = vperm.xlu1 %10985, %v112_v6   ;;  %v6650_v6 = vrot.slane %v14003_v10, 3 }
 0x517   :  { %16878 = vst [vmem:[#allocation21_spill] sm:$0xff] %v14016_v62  ;;  %v5854_v63 = vrot.slane %v5852_v49, 2  ;;  %v5857_v42 = vrot.slane %v5855_v55, 3  ;;  %v16881_v62 = vld [vmem:[#allocation24_spill] sm:$0xff] }
 0x518   :  { %v4603_v36 = vpop.f32.mrf.mxu1  ;;  %v5510_v2 = vpop.f32.mrf.mxu0  ;;  %10672 = vmatmul.mubr.bf16.gmra.mxu1 %v5841_v3  ;;  %10848 = vmatmul.mubr.bf16.gmra.mxu0 %v6647_v29  ;;  %v6648_v3 = vrot.slane %v13960_v0, 3 }
 0x519   :  { %v4743_v32 = vadd.f32 %v4603_v36, %v16879_v61  ;;  %v14026_v26 = vadd.f32 %v5510_v2, %v4741_v19  ;;  %10675 = vmatprep.mubr.msk.bf16.mxu1 %vm11355_vm0, %v16651_v8  ;;  %10851 = vmatprep.mubr.msk.bf16.mxu0 %vm11355_vm0, %v16651_v8  ;;  %v5850_v2 = vsel %vm5698_vm5, %v5840_v16, %v5849_v51  ;;  %v14046_v16 = vld [vmem:[#allocation2 + $0xa0] sm:$0xff]  }
 0x51a   :  { %v10381_v29 = vpop.f32.mrf.mxu1  ;;  %v10557_v1 = vpop.f32.mrf.mxu0  ;;  %v6649_v61 = vsel %vm6618_vm6, %v6646_v34, %v6648_v3  ;;  %v5858_v0 = vor.u32 %v5857_v42, %v5854_v63  ;;  %v5864_v34 = vshll.u32 %v14046_v16, 16 }
 0x51b   :  { %16880 = vst [vmem:[#allocation22_spill] sm:$0xff] %v14026_v26  ;;  %v16883_v29 = vld [vmem:[#allocation25_spill] sm:$0xff] }
 0x51c   :  { %v4606_v14 = vpop.f32.mrf.mxu1  ;;  %v5513_v50 = vpop.f32.mrf.mxu0  ;;  %v5859_v1 = vsel %vm5698_vm5, %v5849_v51, %v5858_v0 }
 0x51d   :  { %v4744_v36 = vadd.f32 %v4606_v14, %v16881_v62  ;;  %v14034_v19 = vadd.f32 %v5513_v50, %v4742_v38  ;;  %v16885_v14 = vld [vmem:[#allocation26_spill] sm:$0xff] }
 0x51e   :  { %v10382_v26 = vpop.f32.mrf.mxu1  ;;  %v10558_v12 = vpop.f32.mrf.mxu0 }
 0x51f   :  { %16882 = vst [vmem:[#allocation23_spill] sm:$0xff] %v14034_v19  ;;  %v5861_v12 = vshrl.u32 %v14046_v16, 16 }
 0x520   :  { %v4611_v40 = vpop.f32.mrf.mxu1  ;;  %v5518_v54 = vpop.f32.mrf.mxu0  ;;  %10676 = vmatmul.mubr.bf16.gmra.mxu1 %v5850_v2  ;;  %10852 = vmatmul.mubr.bf16.gmra.mxu0 %v6649_v61  ;;  %v5866_v2 = vrot.slane %v5864_v34, 3 }
 0x521   :  { %v4745_v49 = vadd.f32 %v4611_v40, %v16883_v29  ;;  %v14040_v55 = vadd.f32 %v5518_v54, %v4743_v32  ;;  %10679 = vmatprep.mubr.msk.bf16.mxu1 %vm11355_vm0, %v16651_v8  ;;  %10855 = vmatprep.mubr.msk.bf16.mxu0 %vm11355_vm0, %v16651_v8  ;;  %v6651_v32 = vsel %vm6618_vm6, %v6648_v3, %v6650_v6  ;;  %v5863_v42 = vrot.slane %v5861_v12, 2 }
 0x522   :  { %v10385_v38 = vpop.f32.mrf.mxu1  ;;  %v10561_v62 = vpop.f32.mrf.mxu0  ;;  %v6652_v12 = vrot.slane %v14018_v17, 3 }
 0x523   :  { %16884 = vst [vmem:[#allocation24_spill] sm:$0xff] %v14040_v55  ;;  %v14055_v38 = vld [vmem:[#allocation2 + $0xa8] sm:$0xff]   ;;  %v16887_v55 = vld [vmem:[#allocation27_spill] sm:$0xff] }
 0x524   :  { %v4614_v26 = vpop.f32.mrf.mxu1  ;;  %v5521_v10 = vpop.f32.mrf.mxu0  ;;  %v5870_v62 = vshrl.u32 %v14055_v38, 16  ;;  %v5873_v51 = vshll.u32 %v14055_v38, 16 }
 0x525   :  { %v4746_v50 = vadd.f32 %v4614_v26, %v16885_v14  ;;  %v14053_v63 = vadd.f32 %v5521_v10, %v4744_v36  ;;  %v5867_v36 = vor.u32 %v5866_v2, %v5863_v42  ;;  %v6654_v2 = vrot.slane %v14046_v16, 3 }
 0x526   :  { %v10386_v61 = vpop.f32.mrf.mxu1  ;;  %v10562_v40 = vpop.f32.mrf.mxu0  ;;  %v5875_v14 = vrot.slane %v5873_v51, 3 }
 0x527   :  { %16886 = vst [vmem:[#allocation25_spill] sm:$0xff] %v14053_v63  ;;  %v16889_v61 = vld [vmem:[#allocation28_spill] sm:$0xff] }
 0x528   :  { %v4619_v54 = vpop.f32.mrf.mxu1  ;;  %v5526_v29 = vpop.f32.mrf.mxu0  ;;  %10680 = vmatmul.mubr.bf16.gmra.mxu1 %v5859_v1  ;;  %10856 = vmatmul.mubr.bf16.gmra.mxu0 %v6651_v32  ;;  %v5872_v32 = vrot.slane %v5870_v62, 2 }
 0x529   :  { %v4747_v3 = vadd.f32 %v4619_v54, %v16887_v55  ;;  %v14060_v19 = vadd.f32 %v5526_v29, %v4745_v49  ;;  %10683 = vmatprep.mubr.msk.bf16.mxu1 %vm11355_vm0, %v16651_v8  ;;  %10859 = vmatprep.mubr.msk.bf16.mxu0 %vm11355_vm0, %v16651_v8  ;;  %v5868_v49 = vsel %vm5698_vm5, %v5858_v0, %v5867_v36  ;;  %v14080_v0 = vld [vmem:[#allocation2 + $0xb0] sm:$0xff]  }
 0x52a   :  { %v10389_v34 = vpop.f32.mrf.mxu1  ;;  %v10565_v26 = vpop.f32.mrf.mxu0  ;;  %v6653_v54 = vsel %vm6618_vm6, %v6650_v6, %v6652_v12  ;;  %v5876_v17 = vor.u32 %v5875_v14, %v5872_v32  ;;  %v5882_v6 = vshll.u32 %v14080_v0, 16 }
 0x52b   :  { %16888 = vst [vmem:[#allocation26_spill] sm:$0xff] %v14060_v19  ;;  %v16891_v34 = vld [vmem:[#allocation29_spill] sm:$0xff] }
 0x52c   :  { %v4622_v10 = vpop.f32.mrf.mxu1  ;;  %v5529_v1 = vpop.f32.mrf.mxu0 }
 0x52d   :  { %v4748_v40 = vadd.f32 %v4622_v10, %v16889_v61  ;;  %v14068_v55 = vadd.f32 %v5529_v1, %v4746_v50  ;;  %v16893_v1 = vld [vmem:[#allocation30_spill] sm:$0xff] }
 0x52e   :  { %v10390_v29 = vpop.f32.mrf.mxu1  ;;  %v10566_v19 = vpop.f32.mrf.mxu0 }
 0x52f   :  { %16890 = vst [vmem:[#allocation27_spill] sm:$0xff] %v14068_v55  ;;  %v5879_v19 = vshrl.u32 %v14080_v0, 16 }
 0x530   :  { %v4627_v63 = vpop.f32.mrf.mxu1  ;;  %v5534_v42 = vpop.f32.mrf.mxu0  ;;  %10684 = vmatmul.mubr.bf16.gmra.mxu1 %v5868_v49  ;;  %10860 = vmatmul.mubr.bf16.gmra.mxu0 %v6653_v54  ;;  %v5884_v49 = vrot.slane %v5882_v6, 3 }
 0x531   :  { %v4749_v62 = vadd.f32 %v4627_v63, %v16891_v34  ;;  %v14074_v51 = vadd.f32 %v5534_v42, %v4747_v3  ;;  %10687 = vmatprep.mubr.msk.bf16.mxu1 %vm11355_vm0, %v16651_v8  ;;  %10863 = vmatprep.mubr.msk.bf16.mxu0 %vm11355_vm0, %v16651_v8  ;;  %v5877_v63 = vsel %vm5698_vm5, %v5867_v36, %v5876_v17  ;;  %v5881_v61 = vrot.slane %v5879_v19, 2 }
 0x532   :  { %v10393_v50 = vpop.f32.mrf.mxu1  ;;  %v10569_v26 = vpop.f32.mrf.mxu0  ;;  %v6655_v3 = vsel %vm6618_vm6, %v6652_v12, %v6654_v2  ;;  %v6656_v19 = vrot.slane %v14055_v38, 3 }
 0x533   :  { %16892 = vst [vmem:[#allocation28_spill] sm:$0xff] %v14074_v51  ;;  %v14089_v50 = vld [vmem:[#allocation2 + $0xb8] sm:$0xff]  }
 0x534   :  { %v4630_v10 = vpop.f32.mrf.mxu1  ;;  %v5537_v16 = vpop.f32.mrf.mxu0  ;;  %v5888_v26 = vshrl.u32 %v14089_v50, 16  ;;  %v5891_v36 = vshll.u32 %v14089_v50, 16  ;;  %v16895_v51 = vld [vmem:[#allocation31_spill] sm:$0xff] }
 0x535   :  { %v4750_v32 = vadd.f32 %v4630_v10, %v16893_v1  ;;  %v14087_v14 = vadd.f32 %v5537_v16, %v4748_v40  ;;  %v5885_v40 = vor.u32 %v5884_v49, %v5881_v61  ;;  %v6658_v49 = vrot.slane %v14080_v0, 3 }
 0x536   :  { %v10394_v54 = vpop.f32.mrf.mxu1  ;;  %v10570_v29 = vpop.f32.mrf.mxu0  ;;  %v5893_v1 = vrot.slane %v5891_v36, 3 }
 0x537   :  { %16894 = vst [vmem:[#allocation29_spill] sm:$0xff] %v14087_v14  ;;  %v16897_v54 = vld [vmem:[#allocation32_spill] sm:$0xff] }
 0x538   :  { %v4635_v42 = vpop.f32.mrf.mxu1  ;;  %v5542_v34 = vpop.f32.mrf.mxu0  ;;  %10688 = vmatmul.mubr.bf16.gmra.mxu1 %v5877_v63  ;;  %10864 = vmatmul.mubr.bf16.gmra.mxu0 %v6655_v3  ;;  %v5890_v3 = vrot.slane %v5888_v26, 2 }
 0x539   :  { %v4751_v12 = vadd.f32 %v4635_v42, %v16895_v51  ;;  %v14094_v55 = vadd.f32 %v5542_v34, %v4749_v62  ;;  %10691 = vmatprep.mubr.msk.bf16.mxu1 %vm11355_vm0, %v16651_v8  ;;  %10867 = vmatprep.mubr.msk.bf16.mxu0 %vm11355_vm0, %v16651_v8  ;;  %v5886_v62 = vsel %vm5698_vm5, %v5876_v17, %v5885_v40  ;;  %v14114_v17 = vld [vmem:[#allocation2 + $0xc0] sm:$0xff]  }
 0x53a   :  { %v10397_v6 = vpop.f32.mrf.mxu1  ;;  %v10573_v10 = vpop.f32.mrf.mxu0  ;;  %v6657_v42 = vsel %vm6618_vm6, %v6654_v2, %v6656_v19  ;;  %v5894_v38 = vor.u32 %v5893_v1, %v5890_v3  ;;  %v5900_v2 = vshll.u32 %v14114_v17, 16 }
 0x53b   :  { %16896 = vst [vmem:[#allocation30_spill] sm:$0xff] %v14094_v55  ;;  %v16899_v6 = vld [vmem:[#allocation33_spill] sm:$0xff] }
 0x53c   :  { %v4638_v16 = vpop.f32.mrf.mxu1  ;;  %v5545_v63 = vpop.f32.mrf.mxu0 }
 0x53d   :  { %v4752_v29 = vadd.f32 %v4638_v16, %v16897_v54  ;;  %v14102_v51 = vadd.f32 %v5545_v63, %v4750_v32  ;;  %v16901_v63 = vld [vmem:[#allocation34_spill] sm:$0xff] }
 0x53e   :  { %v10398_v34 = vpop.f32.mrf.mxu1  ;;  %v10574_v55 = vpop.f32.mrf.mxu0 }
 0x53f   :  { %16898 = vst [vmem:[#allocation31_spill] sm:$0xff] %v14102_v51  ;;  %v5897_v55 = vshrl.u32 %v14114_v17, 16 }
 0x540   :  { %v4643_v14 = vpop.f32.mrf.mxu1  ;;  %v5550_v61 = vpop.f32.mrf.mxu0  ;;  %10692 = vmatmul.mubr.bf16.gmra.mxu1 %v5886_v62  ;;  %10868 = vmatmul.mubr.bf16.gmra.mxu0 %v6657_v42  ;;  %v5902_v62 = vrot.slane %v5900_v2, 3 }
 0x541   :  { %v4753_v26 = vadd.f32 %v4643_v14, %v16899_v6  ;;  %v14108_v36 = vadd.f32 %v5550_v61, %v4751_v12  ;;  %10695 = vmatprep.mubr.msk.bf16.mxu1 %vm11355_vm0, %v16651_v8  ;;  %10871 = vmatprep.mubr.msk.bf16.mxu0 %vm11355_vm0, %v16651_v8  ;;  %v5895_v14 = vsel %vm5698_vm5, %v5885_v40, %v5894_v38  ;;  %v5899_v54 = vrot.slane %v5897_v55, 2 }
 0x542   :  { %v10401_v32 = vpop.f32.mrf.mxu1  ;;  %v10577_v10 = vpop.f32.mrf.mxu0  ;;  %v6659_v12 = vsel %vm6618_vm6, %v6656_v19, %v6658_v49  ;;  %v6660_v55 = vrot.slane %v14089_v50, 3 }
 0x543   :  { %16900 = vst [vmem:[#allocation32_spill] sm:$0xff] %v14108_v36  ;;  %v14123_v32 = vld [vmem:[#allocation2 + $0xc8] sm:$0xff]   ;;  %v16903_v36 = vld [vmem:[#allocation35_spill] sm:$0xff] }
 0x544   :  { %v4646_v16 = vpop.f32.mrf.mxu1  ;;  %v5553_v0 = vpop.f32.mrf.mxu0  ;;  %v5906_v10 = vshrl.u32 %v14123_v32, 16  ;;  %v5909_v40 = vshll.u32 %v14123_v32, 16 }
 0x545   :  { %v4754_v3 = vadd.f32 %v4646_v16, %v16901_v63  ;;  %v14121_v1 = vadd.f32 %v5553_v0, %v4752_v29  ;;  %v5903_v29 = vor.u32 %v5902_v62, %v5899_v54  ;;  %v6662_v62 = vrot.slane %v14114_v17, 3 }
 0x546   :  { %v10402_v42 = vpop.f32.mrf.mxu1  ;;  %v10578_v34 = vpop.f32.mrf.mxu0  ;;  %v5911_v63 = vrot.slane %v5909_v40, 3 }
 0x547   :  { %16902 = vst [vmem:[#allocation33_spill] sm:$0xff] %v14121_v1  ;;  %v6661_v34 = vsel %vm6618_vm6, %v6658_v49, %v6660_v55 }
 0x548   :  { %v4651_v61 = vpop.f32.mrf.mxu1  ;;  %v5558_v6 = vpop.f32.mrf.mxu0  ;;  %10696 = vmatmul.mubr.bf16.gmra.mxu1 %v5895_v14  ;;  %10872 = vmatmul.mubr.bf16.gmra.mxu0 %v6659_v12  ;;  %v5908_v12 = vrot.slane %v5906_v10, 2 }
 0x549   :  { %v4755_v19 = vadd.f32 %v4651_v61, %v16903_v36  ;;  %v14128_v51 = vadd.f32 %v5558_v6, %v4753_v26  ;;  %10699 = vmatprep.mubr.msk.bf16.mxu1 %vm11355_vm0, %v16651_v8  ;;  %10875 = vmatprep.mubr.msk.bf16.mxu0 %vm11355_vm0, %v16651_v8  ;;  %v5904_v26 = vsel %vm5698_vm5, %v5894_v38, %v5903_v29 }
 0x54a   :  { %v10405_v2 = vpop.f32.mrf.mxu1  ;;  %v10581_v16 = vpop.f32.mrf.mxu0  ;;  %v5912_v50 = vor.u32 %v5911_v63, %v5908_v12 }
 0x54b   :  { %16904 = vst [vmem:[#allocation34_spill] sm:$0xff] %v14128_v51  ;;  %v16906_v2 = vld [vmem:[#allocation36_spill] sm:$0xff] }
 0x54c   :  { %v4654_v0 = vpop.f32.mrf.mxu1  ;;  %v5561_v14 = vpop.f32.mrf.mxu0 }
 0x54d   :  { %v4756_v42 = vadd.f32 %v4654_v0, %v13295_v39  ;;  %v14136_v36 = vadd.f32 %v5561_v14, %v4754_v3  ;;  %v14148_v39 = vld [vmem:[#allocation2 + $0xd0] sm:$0xff]  }
 0x54e   :  { %v10406_v61 = vpop.f32.mrf.mxu1  ;;  %v10582_v6 = vpop.f32.mrf.mxu0  ;;  %v5915_v38 = vshrl.u32 %v14148_v39, 16  ;;  %v5918_v49 = vshll.u32 %v14148_v39, 16 }
 0x54f   :  { %16905 = vst [vmem:[#allocation35_spill] sm:$0xff] %v14136_v36 }
 0x550   :  { %v4659_v51 = vpop.f32.mrf.mxu1  ;;  %v5566_v54 = vpop.f32.mrf.mxu0  ;;  %10700 = vmatmul.mubr.bf16.gmra.mxu1 %v5904_v26  ;;  %10876 = vmatmul.mubr.bf16.gmra.mxu0 %v6661_v34  ;;  %v5917_v63 = vrot.slane %v5915_v38, 2  ;;  %v5920_v26 = vrot.slane %v5918_v49, 3 }
 0x551   :  { %v4757_v10 = vadd.f32 %v4659_v51, %v16906_v2  ;;  %v14142_v40 = vadd.f32 %v5566_v54, %v4755_v19  ;;  %10703 = vmatprep.mubr.msk.bf16.mxu1 %vm11355_vm0, %v16651_v8  ;;  %10879 = vmatprep.mubr.msk.bf16.mxu0 %vm11355_vm0, %v16651_v8  ;;  %v5913_v51 = vsel %vm5698_vm5, %v5903_v29, %v5912_v50  ;;  %v14157_v2 = vld [vmem:[#allocation2 + $0xd8] sm:$0xff]  }
 0x552   :  { %v10409_v3 = vpop.f32.mrf.mxu1  ;;  %v10585_v16 = vpop.f32.mrf.mxu0  ;;  %v6663_v19 = vsel %vm6618_vm6, %v6660_v55, %v6662_v62  ;;  %v5927_v29 = vshll.u32 %v14157_v2, 16 }
 0x553   :  { %16907 = vst [vmem:[#allocation36_spill] sm:$0xff] %v14142_v40  ;;  %v5924_v3 = vshrl.u32 %v14157_v2, 16 }
 0x554   :  { %v4662_v0 = vpop.f32.mrf.mxu1  ;;  %v5569_v17 = vpop.f32.mrf.mxu0 }
 0x555   :  { %v4758_v14 = vadd.f32 %v4662_v0, %v13307_v56  ;;  %v14155_v12 = vadd.f32 %v5569_v17, %v4756_v42  ;;  %v5921_v56 = vor.u32 %v5920_v26, %v5917_v63  ;;  %v6664_v42 = vrot.slane %v14123_v32, 3 }
 0x556   :  { %v10410_v34 = vpop.f32.mrf.mxu1  ;;  %v10586_v61 = vpop.f32.mrf.mxu0  ;;  %v6666_v26 = vrot.slane %v14148_v39, 3 }
 0x557   :  { %16908 = vst [vmem:[#allocation52_spill] sm:$0xff] %v14155_v12  ;;  %v6665_v61 = vsel %vm6618_vm6, %v6662_v62, %v6664_v42  ;;  %v5677_v12 = vld [vmem:[#allocation2 + $0x154] sm:$0x7] }
 0x558   :  { %v4667_v6 = vpop.f32.mrf.mxu1  ;;  %v5574_v54 = vpop.f32.mrf.mxu0  ;;  %10704 = vmatmul.mubr.bf16.gmra.mxu1 %v5913_v51  ;;  %10880 = vmatmul.mubr.bf16.gmra.mxu0 %v6663_v19  ;;  %v5926_v51 = vrot.slane %v5924_v3, 2  ;;  %v5929_v19 = vrot.slane %v5927_v29, 3 }
 0x559   :  { %v4759_v55 = vadd.f32 %v4667_v6, %v13312_v9  ;;  %v14162_v16 = vadd.f32 %v5574_v54, %v4757_v10  ;;  %10707 = vmatprep.mubr.msk.bf16.mxu1 %vm11355_vm0, %v16651_v8  ;;  %10883 = vmatprep.mubr.msk.bf16.mxu0 %vm11355_vm0, %v16651_v8  ;;  %v5922_v10 = vsel %vm5698_vm5, %v5912_v50, %v5921_v56 }
 0x55a   :  { %v10413_v38 = vpop.f32.mrf.mxu1  ;;  %v10589_v49 = vpop.f32.mrf.mxu0  ;;  %v5930_v32 = vor.u32 %v5929_v19, %v5926_v51 }
 0x55b   :  { %16909 = vst [vmem:[#allocation53_spill] sm:$0xff] %v14162_v16 }
 0x55c   :  { %v4670_v0 = vpop.f32.mrf.mxu1  ;;  %v5577_v17 = vpop.f32.mrf.mxu0 }
 0x55d   :  { %v4760_v34 = vadd.f32 %v4670_v0, %v13318_v33  ;;  %v14170_v9 = vadd.f32 %v5577_v17, %v4758_v14  ;;  %v14182_v33 = vld [vmem:[#allocation2 + $0xe0] sm:$0xff]  }
 0x55e   :  { %v10414_v6 = vpop.f32.mrf.mxu1  ;;  %v10590_v54 = vpop.f32.mrf.mxu0  ;;  %v5933_v50 = vshrl.u32 %v14182_v33, 16  ;;  %v5936_v62 = vshll.u32 %v14182_v33, 16 }
 0x55f   :  { %16910 = vst [vmem:[#allocation54_spill] sm:$0xff] %v14170_v9  ;;  %v14190_v6 = vld [vmem:[#allocation2 + $0xe8] sm:$0xff]  }
 0x560   :  { %v4675_v16 = vpop.f32.mrf.mxu1  ;;  %v5582_v63 = vpop.f32.mrf.mxu0  ;;  %10708 = vmatmul.mubr.bf16.gmra.mxu1 %v5922_v10  ;;  %10884 = vmatmul.mubr.bf16.gmra.mxu0 %v6665_v61  ;;  %v5935_v0 = vrot.slane %v5933_v50, 2  ;;  %v5938_v17 = vrot.slane %v5936_v62, 3  ;;  %v5942_v54 = vshrl.u32 %v14190_v6, 16  ;;  %v14402_v9 = vld [vmem:[#allocation2 + $0x148] sm:$0xff]  }
 0x561   :  { %v4761_v3 = vadd.f32 %v4675_v16, %v13322_v53  ;;  %v14176_v29 = vadd.f32 %v5582_v63, %v4759_v55  ;;  %10711 = vmatprep.mubr.msk.bf16.mxu1 %vm11355_vm0, %v16651_v8  ;;  %10887 = vmatprep.mubr.msk.bf16.mxu0 %vm11355_vm0, %v16651_v8  ;;  %v5931_v53 = vsel %vm5698_vm5, %v5921_v56, %v5930_v32  ;;  %v5945_v63 = vshll.u32 %v14190_v6, 16 }
 0x562   :  { %v10417_v14 = vpop.f32.mrf.mxu1  ;;  %v10593_v38 = vpop.f32.mrf.mxu0  ;;  %v6667_v16 = vsel %vm6618_vm6, %v6664_v42, %v6666_v26  ;;  %v5939_v42 = vor.u32 %v5938_v17, %v5935_v0 }
 0x563   :  { %16911 = vst [vmem:[#allocation55_spill] sm:$0xff] %v14176_v29 }
 0x564   :  { %v4678_v49 = vpop.f32.mrf.mxu1  ;;  %v5585_v39 = vpop.f32.mrf.mxu0 }
 0x565   :  { %v14187_v55 = vadd.f32 %v5585_v39, %v4760_v34  ;;  %v6668_v34 = vrot.slane %v14157_v2, 3  ;;  %v5944_v39 = vrot.slane %v5942_v54, 2  ;;  %v6670_v2 = vrot.slane %v14182_v33, 3 }
 0x566   :  { %v10418_v51 = vpop.f32.mrf.mxu1  ;;  %v10594_v19 = vpop.f32.mrf.mxu0 }
 0x567   :  { %16912 = vst [vmem:[#allocation56_spill] sm:$0xff] %v14187_v55 }
 0x568   :  { %v5590_v10 = vpop.f32.mrf.mxu0  ;;  %v6190_v61 = vpop.f32.mrf.mxu1  ;;  %10712 = vmatmul.mubr.bf16.gmra.mxu1 %v5931_v53  ;;  %10888 = vmatmul.mubr.bf16.gmra.mxu0 %v6667_v16  ;;  %v5947_v53 = vrot.slane %v5945_v63, 3  ;;  %v5940_v16 = vsel %vm5698_vm5, %v5930_v32, %v5939_v42 }
 0x569   :  { %v14194_v14 = vadd.f32 %v5590_v10, %v4761_v3  ;;  %v6516_v56 = vadd.f32 %v6190_v61, %v13333_v44  ;;  %10715 = vmatprep.mubr.msk.bf16.mxu1 %vm11355_vm0, %v16651_v8  ;;  %10891 = vmatprep.mubr.msk.bf16.mxu0 %vm11355_vm0, %v16651_v8  ;;  %v6669_v44 = vsel %vm6618_vm6, %v6666_v26, %v6668_v34 }
 0x56a   :  { %v10597_v50 = vpop.f32.mrf.mxu0  ;;  %v10617_v62 = vpop.f32.mrf.mxu1  ;;  %v5948_v0 = vor.u32 %v5947_v53, %v5944_v39 }
 0x56b   :  { %16913 = vst [vmem:[#allocation57_spill] sm:$0xff] %v14194_v14 }
 0x56c   :  { %v5593_v38 = vpop.f32.mrf.mxu0  ;;  %v6193_v49 = vpop.f32.mrf.mxu1 }
 0x56d   :  { %v6517_v3 = vadd.f32 %v6193_v49, %v13340_v59  ;;  %v14213_v59 = vld [vmem:[#allocation2 + $0xf0] sm:$0xff]  }
 0x56e   :  { %v10598_v51 = vpop.f32.mrf.mxu0  ;;  %v10618_v19 = vpop.f32.mrf.mxu1  ;;  %v5951_v32 = vshrl.u32 %v14213_v59, 16  ;;  %v5954_v26 = vshll.u32 %v14213_v59, 16 }
 0x570   :  { %v6198_v10 = vpop.f32.mrf.mxu1  ;;  %10716 = vmatmul.mubr.bf16.gmra.mxu1 %v5940_v16  ;;  %v6823_v61 = vpop.f32.mrf.mxu0  ;;  %10892 = vmatmul.mubr.bf16.gmra.mxu0 %v6669_v44  ;;  %v5953_v39 = vrot.slane %v5951_v32, 2  ;;  %v5956_v53 = vrot.slane %v5954_v26, 3 }
 0x571   :  { %v6518_v17 = vadd.f32 %v6198_v10, %v13345_v11  ;;  %v14207_v50 = vadd.f32 %v6823_v61, %v6516_v56  ;;  %10719 = vmatprep.mubr.msk.bf16.mxu1 %vm11355_vm0, %v16651_v8  ;;  %10895 = vmatprep.mubr.msk.bf16.mxu0 %vm11355_vm0, %v16651_v8  ;;  %v5949_v11 = vsel %vm5698_vm5, %v5939_v42, %v5948_v0  ;;  %v14222_v10 = vld [vmem:[#allocation2 + $0xf8] sm:$0xff]  }
 0x572   :  { %v10621_v54 = vpop.f32.mrf.mxu1  ;;  %v10797_v63 = vpop.f32.mrf.mxu0  ;;  %v6671_v56 = vsel %vm6618_vm6, %v6668_v34, %v6670_v2  ;;  %v5960_v61 = vshrl.u32 %v14222_v10, 16  ;;  %v5963_v42 = vshll.u32 %v14222_v10, 16 }
 0x573   :  { %16914 = vst [vmem:[#allocation58_spill] sm:$0xff] %v14207_v50 }
 0x574   :  { %v6201_v62 = vpop.f32.mrf.mxu1  ;;  %v6826_v33 = vpop.f32.mrf.mxu0 }
 0x575   :  { %v6519_v38 = vadd.f32 %v6201_v62, %v13352_v46  ;;  %v14220_v49 = vadd.f32 %v6826_v33, %v6517_v3  ;;  %v5957_v46 = vor.u32 %v5956_v53, %v5953_v39  ;;  %v6672_v3 = vrot.slane %v14190_v6, 3 }
 0x576   :  { %v10622_v16 = vpop.f32.mrf.mxu1  ;;  %v10798_v44 = vpop.f32.mrf.mxu0  ;;  %v5962_v33 = vrot.slane %v5960_v61, 2  ;;  %v6674_v53 = vrot.slane %v14213_v59, 3 }
 0x577   :  { %16915 = vst [vmem:[#allocation59_spill] sm:$0xff] %v14220_v49  ;;  %v6673_v16 = vsel %vm6618_vm6, %v6670_v2, %v6672_v3 }
 0x578   :  { %v6206_v51 = vpop.f32.mrf.mxu1  ;;  %10720 = vmatmul.mubr.bf16.gmra.mxu1 %v5949_v11  ;;  %v6831_v19 = vpop.f32.mrf.mxu0  ;;  %10896 = vmatmul.mubr.bf16.gmra.mxu0 %v6671_v56  ;;  %v5965_v11 = vrot.slane %v5963_v42, 3 }
 0x579   :  { %v6520_v34 = vadd.f32 %v6206_v51, %v13357_v58  ;;  %v14227_v54 = vadd.f32 %v6831_v19, %v6518_v17  ;;  %10723 = vmatprep.mubr.msk.bf16.mxu1 %vm11355_vm0, %v16651_v8  ;;  %10899 = vmatprep.mubr.msk.bf16.mxu0 %vm11355_vm0, %v16651_v8  ;;  %v5958_v17 = vsel %vm5698_vm5, %v5948_v0, %v5957_v46 }
 0x57a   :  { %v10625_v32 = vpop.f32.mrf.mxu1  ;;  %v10801_v26 = vpop.f32.mrf.mxu0  ;;  %v5966_v6 = vor.u32 %v5965_v11, %v5962_v33 }
 0x57b   :  { %16916 = vst [vmem:[#allocation60_spill] sm:$0xff] %v14227_v54 }
 0x57c   :  { %v6209_v63 = vpop.f32.mrf.mxu1  ;;  %v6834_v62 = vpop.f32.mrf.mxu0 }
 0x57d   :  { %v6521_v56 = vadd.f32 %v6209_v63, %v13364_v31  ;;  %v14235_v58 = vadd.f32 %v6834_v62, %v6519_v38  ;;  %v14247_v31 = vld [vmem:[#allocation2 + $0x100] sm:$0xff]  }
 0x57e   :  { %v10626_v44 = vpop.f32.mrf.mxu1  ;;  %v10802_v51 = vpop.f32.mrf.mxu0  ;;  %v5969_v0 = vshrl.u32 %v14247_v31, 16  ;;  %v5972_v2 = vshll.u32 %v14247_v31, 16 }
 0x580   :  { %v6214_v19 = vpop.f32.mrf.mxu1  ;;  %10724 = vmatmul.mubr.bf16.gmra.mxu1 %v5958_v17  ;;  %v6839_v39 = vpop.f32.mrf.mxu0  ;;  %10900 = vmatmul.mubr.bf16.gmra.mxu0 %v6673_v16  ;;  %v5971_v33 = vrot.slane %v5969_v0, 2  ;;  %v5974_v11 = vrot.slane %v5972_v2, 3 }
 0x581   :  { %v6522_v61 = vadd.f32 %v6214_v19, %v13369_v27  ;;  %v14241_v42 = vadd.f32 %v6839_v39, %v6520_v34  ;;  %10727 = vmatprep.mubr.msk.bf16.mxu1 %vm11355_vm0, %v16651_v8  ;;  %10903 = vmatprep.mubr.msk.bf16.mxu0 %vm11355_vm0, %v16651_v8  ;;  %v5967_v27 = vsel %vm5698_vm5, %v5957_v46, %v5966_v6  ;;  %v14256_v19 = vld [vmem:[#allocation2 + $0x108] sm:$0xff]  }
 0x582   :  { %v10629_v38 = vpop.f32.mrf.mxu1  ;;  %v10805_v32 = vpop.f32.mrf.mxu0  ;;  %v6675_v34 = vsel %vm6618_vm6, %v6672_v3, %v6674_v53  ;;  %v5978_v39 = vshrl.u32 %v14256_v19, 16  ;;  %v5981_v46 = vshll.u32 %v14256_v19, 16 }
 0x584   :  { %v6217_v26 = vpop.f32.mrf.mxu1  ;;  %v6842_v59 = vpop.f32.mrf.mxu0 }
 0x585   :  { %v6523_v63 = vadd.f32 %v6217_v26, %v13376_v7  ;;  %v14254_v62 = vadd.f32 %v6842_v59, %v6521_v56  ;;  %v5975_v7 = vor.u32 %v5974_v11, %v5971_v33  ;;  %v6676_v56 = vrot.slane %v14222_v10, 3 }
 0x586   :  { %v10630_v17 = vpop.f32.mrf.mxu1  ;;  %v10806_v16 = vpop.f32.mrf.mxu0  ;;  %v5980_v59 = vrot.slane %v5978_v39, 2  ;;  %v6678_v11 = vrot.slane %v14247_v31, 3 }
 0x587   :  { %v6677_v17 = vsel %vm6618_vm6, %v6674_v53, %v6676_v56 }
 0x588   :  { %v6222_v44 = vpop.f32.mrf.mxu1  ;;  %10728 = vmatmul.mubr.bf16.gmra.mxu1 %v5967_v27  ;;  %v6847_v51 = vpop.f32.mrf.mxu0  ;;  %10904 = vmatmul.mubr.bf16.gmra.mxu0 %v6675_v34  ;;  %v5983_v27 = vrot.slane %v5981_v46, 3 }
 0x589   :  { %v6524_v3 = vadd.f32 %v6222_v44, %v13381_v5  ;;  %v14261_v38 = vadd.f32 %v6847_v51, %v6522_v61  ;;  %10731 = vmatprep.mubr.msk.bf16.mxu1 %vm11355_vm0, %v16651_v8  ;;  %10907 = vmatprep.mubr.msk.bf16.mxu0 %vm11355_vm0, %v16651_v8  ;;  %v5976_v61 = vsel %vm5698_vm5, %v5966_v6, %v5975_v7 }
 0x58a   :  { %v10633_v0 = vpop.f32.mrf.mxu1  ;;  %v10809_v2 = vpop.f32.mrf.mxu0  ;;  %v5984_v10 = vor.u32 %v5983_v27, %v5980_v59 }
 0x58b   :  { %16917 = vst [vmem:[#allocation61_spill] sm:$0xff] %v14261_v38 }
 0x58c   :  { %v6225_v32 = vpop.f32.mrf.mxu1  ;;  %v6850_v26 = vpop.f32.mrf.mxu0 }
 0x58d   :  { %v6525_v34 = vadd.f32 %v6225_v32, %v13388_v43  ;;  %v14269_v5 = vadd.f32 %v6850_v26, %v6523_v63  ;;  %v14281_v43 = vld [vmem:[#allocation2 + $0x110] sm:$0xff]  }
 0x58e   :  { %v10634_v16 = vpop.f32.mrf.mxu1  ;;  %v10810_v44 = vpop.f32.mrf.mxu0  ;;  %v5987_v6 = vshrl.u32 %v14281_v43, 16  ;;  %v5990_v53 = vshll.u32 %v14281_v43, 16 }
 0x590   :  { %v6230_v51 = vpop.f32.mrf.mxu1  ;;  %10732 = vmatmul.mubr.bf16.gmra.mxu1 %v5976_v61  ;;  %v6855_v33 = vpop.f32.mrf.mxu0  ;;  %10908 = vmatmul.mubr.bf16.gmra.mxu0 %v6677_v17  ;;  %v5989_v59 = vrot.slane %v5987_v6, 2  ;;  %v5992_v27 = vrot.slane %v5990_v53, 3 }
 0x591   :  { %v6526_v39 = vadd.f32 %v6230_v51, %v13393_v23  ;;  %v14275_v46 = vadd.f32 %v6855_v33, %v6524_v3  ;;  %10735 = vmatprep.mubr.msk.bf16.mxu1 %vm11355_vm0, %v16651_v8  ;;  %10911 = vmatprep.mubr.msk.bf16.mxu0 %vm11355_vm0, %v16651_v8  ;;  %v5985_v23 = vsel %vm5698_vm5, %v5975_v7, %v5984_v10  ;;  %v14290_v51 = vld [vmem:[#allocation2 + $0x118] sm:$0xff]  }
 0x592   :  { %v10637_v63 = vpop.f32.mrf.mxu1  ;;  %v10813_v0 = vpop.f32.mrf.mxu0  ;;  %v6679_v3 = vsel %vm6618_vm6, %v6676_v56, %v6678_v11  ;;  %v5996_v33 = vshrl.u32 %v14290_v51, 16  ;;  %v5999_v7 = vshll.u32 %v14290_v51, 16 }
 0x594   :  { %v6233_v2 = vpop.f32.mrf.mxu1  ;;  %v6858_v31 = vpop.f32.mrf.mxu0 }
 0x595   :  { %v6527_v32 = vadd.f32 %v6233_v2, %v13400_v20  ;;  %v14288_v26 = vadd.f32 %v6858_v31, %v6525_v34  ;;  %v5993_v20 = vor.u32 %v5992_v27, %v5989_v59  ;;  %v6680_v34 = vrot.slane %v14256_v19, 3 }
 0x596   :  { %v10638_v61 = vpop.f32.mrf.mxu1  ;;  %v10814_v17 = vpop.f32.mrf.mxu0  ;;  %v5998_v31 = vrot.slane %v5996_v33, 2  ;;  %v6682_v27 = vrot.slane %v14281_v43, 3 }
 0x597   :  { %v6681_v61 = vsel %vm6618_vm6, %v6678_v11, %v6680_v34 }
 0x598   :  { %v6238_v16 = vpop.f32.mrf.mxu1  ;;  %10736 = vmatmul.mubr.bf16.gmra.mxu1 %v5985_v23  ;;  %v6863_v44 = vpop.f32.mrf.mxu0  ;;  %10912 = vmatmul.mubr.bf16.gmra.mxu0 %v6679_v3  ;;  %v6001_v23 = vrot.slane %v5999_v7, 3 }
 0x599   :  { %v6528_v56 = vadd.f32 %v6238_v16, %v13405_v52  ;;  %v14295_v63 = vadd.f32 %v6863_v44, %v6526_v39  ;;  %10739 = vmatprep.mubr.msk.bf16.mxu1 %vm11355_vm0, %v16651_v8  ;;  %10915 = vmatprep.mubr.msk.bf16.mxu0 %vm11355_vm0, %v16651_v8  ;;  %v5994_v39 = vsel %vm5698_vm5, %v5984_v10, %v5993_v20 }
 0x59a   :  { %v10641_v6 = vpop.f32.mrf.mxu1  ;;  %v10817_v53 = vpop.f32.mrf.mxu0  ;;  %v6002_v19 = vor.u32 %v6001_v23, %v5998_v31 }
 0x59c   :  { %v6241_v0 = vpop.f32.mrf.mxu1  ;;  %v6866_v2 = vpop.f32.mrf.mxu0 }
 0x59d   :  { %v6529_v3 = vadd.f32 %v6241_v0, %v13412_v18  ;;  %v14303_v52 = vadd.f32 %v6866_v2, %v6527_v32  ;;  %v14315_v18 = vld [vmem:[#allocation2 + $0x120] sm:$0xff]  }
 0x59e   :  { %v10642_v17 = vpop.f32.mrf.mxu1  ;;  %v10818_v16 = vpop.f32.mrf.mxu0  ;;  %v6005_v10 = vshrl.u32 %v14315_v18, 16  ;;  %v6008_v11 = vshll.u32 %v14315_v18, 16 }
 0x5a0   :  { %v6246_v44 = vpop.f32.mrf.mxu1  ;;  %10740 = vmatmul.mubr.bf16.gmra.mxu1 %v5994_v39  ;;  %v6871_v59 = vpop.f32.mrf.mxu0  ;;  %10916 = vmatmul.mubr.bf16.gmra.mxu0 %v6681_v61  ;;  %v6007_v31 = vrot.slane %v6005_v10, 2  ;;  %v6010_v23 = vrot.slane %v6008_v11, 3 }
 0x5a1   :  { %v6530_v33 = vadd.f32 %v6246_v44, %v13417_v22  ;;  %v14309_v7 = vadd.f32 %v6871_v59, %v6528_v56  ;;  %10743 = vmatprep.mubr.msk.bf16.mxu1 %vm11355_vm0, %v16651_v8  ;;  %10919 = vmatprep.mubr.msk.bf16.mxu0 %vm11355_vm0, %v16651_v8  ;;  %v6003_v22 = vsel %vm5698_vm5, %v5993_v20, %v6002_v19  ;;  %v14324_v44 = vld [vmem:[#allocation2 + $0x128] sm:$0xff]  }
 0x5a2   :  { %v10645_v32 = vpop.f32.mrf.mxu1  ;;  %v10821_v6 = vpop.f32.mrf.mxu0  ;;  %v6683_v56 = vsel %vm6618_vm6, %v6680_v34, %v6682_v27  ;;  %v6014_v59 = vshrl.u32 %v14324_v44, 16  ;;  %v6017_v20 = vshll.u32 %v14324_v44, 16 }
 0x5a3   :  { %16918 = vst [vmem:[#allocation62_spill] sm:$0xff] %v14309_v7 }
 0x5a4   :  { %v6249_v53 = vpop.f32.mrf.mxu1  ;;  %v6874_v43 = vpop.f32.mrf.mxu0 }
 0x5a5   :  { %v6531_v0 = vadd.f32 %v6249_v53, %v13424_v25  ;;  %v14322_v2 = vadd.f32 %v6874_v43, %v6529_v3  ;;  %v6011_v25 = vor.u32 %v6010_v23, %v6007_v31  ;;  %v6684_v3 = vrot.slane %v14290_v51, 3 }
 0x5a6   :  { %v10646_v39 = vpop.f32.mrf.mxu1  ;;  %v10822_v61 = vpop.f32.mrf.mxu0  ;;  %v6016_v43 = vrot.slane %v6014_v59, 2  ;;  %v6686_v23 = vrot.slane %v14315_v18, 3 }
 0x5a7   :  { %v6685_v39 = vsel %vm6618_vm6, %v6682_v27, %v6684_v3 }
 0x5a8   :  { %v6254_v17 = vpop.f32.mrf.mxu1  ;;  %10744 = vmatmul.mubr.bf16.gmra.mxu1 %v6003_v22  ;;  %v6879_v16 = vpop.f32.mrf.mxu0  ;;  %10920 = vmatmul.mubr.bf16.gmra.mxu0 %v6683_v56  ;;  %v6019_v22 = vrot.slane %v6017_v20, 3 }
 0x5a9   :  { %v6532_v34 = vadd.f32 %v6254_v17, %v13429_v60  ;;  %v14329_v32 = vadd.f32 %v6879_v16, %v6530_v33  ;;  %10747 = vmatprep.mubr.msk.bf16.mxu1 %vm11355_vm0, %v16651_v8  ;;  %10923 = vmatprep.mubr.msk.bf16.mxu0 %vm11355_vm0, %v16651_v8  ;;  %v6012_v33 = vsel %vm5698_vm5, %v6002_v19, %v6011_v25 }
 0x5aa   :  { %v10649_v10 = vpop.f32.mrf.mxu1  ;;  %v10825_v11 = vpop.f32.mrf.mxu0  ;;  %v6020_v51 = vor.u32 %v6019_v22, %v6016_v43 }
 0x5ac   :  { %v6257_v6 = vpop.f32.mrf.mxu1  ;;  %v6882_v53 = vpop.f32.mrf.mxu0 }
 0x5ad   :  { %v6533_v56 = vadd.f32 %v6257_v6, %v13436_v45  ;;  %v14337_v60 = vadd.f32 %v6882_v53, %v6531_v0  ;;  %v14349_v45 = vld [vmem:[#allocation2 + $0x130] sm:$0xff]   ;;  %v16921_v6 = vld [vmem:[#allocation37_spill] sm:$0xff] }
 0x5ae   :  { %v10650_v61 = vpop.f32.mrf.mxu1  ;;  %v10826_v17 = vpop.f32.mrf.mxu0  ;;  %v6023_v19 = vshrl.u32 %v14349_v45, 16  ;;  %v6026_v27 = vshll.u32 %v14349_v45, 16 }
 0x5af   :  { %16919 = vst [vmem:[#allocation63_spill] sm:$0xff] %v14337_v60 }
 0x5b0   :  { %v6262_v16 = vpop.f32.mrf.mxu1  ;;  %10748 = vmatmul.mubr.bf16.gmra.mxu1 %v6012_v33  ;;  %v6887_v31 = vpop.f32.mrf.mxu0  ;;  %10924 = vmatmul.mubr.bf16.gmra.mxu0 %v6685_v39  ;;  %v6025_v22 = vrot.slane %v6023_v19, 2  ;;  %v6028_v33 = vrot.slane %v6026_v27, 3  ;;  %v6688_v19 = vrot.slane %v14324_v44, 3 }
 0x5b1   :  { %v6534_v59 = vadd.f32 %v6262_v16, %v13441_v13  ;;  %v14343_v20 = vadd.f32 %v6887_v31, %v6532_v34  ;;  %10751 = vmatprep.mubr.msk.bf16.mxu1 %vm11355_vm0, %v16651_v8  ;;  %10927 = vmatprep.mubr.msk.bf16.mxu0 %vm11355_vm0, %v16651_v8  ;;  %v6021_v13 = vsel %vm5698_vm5, %v6011_v25, %v6020_v51  ;;  %v14358_v31 = vld [vmem:[#allocation2 + $0x138] sm:$0xff]  }
 0x5b2   :  { %v10653_v0 = vpop.f32.mrf.mxu1  ;;  %v10829_v10 = vpop.f32.mrf.mxu0  ;;  %v6687_v34 = vsel %vm6618_vm6, %v6684_v3, %v6686_v23  ;;  %v6035_v25 = vshll.u32 %v14358_v31, 16 }
 0x5b3   :  { %16920 = vst [vmem:[#allocation64_spill] sm:$0xff] %v14343_v20  ;;  %v6032_v0 = vshrl.u32 %v14358_v31, 16  ;;  %v16923_v10 = vld [vmem:[#allocation38_spill] sm:$0xff] }
 0x5b4   :  { %v6265_v11 = vpop.f32.mrf.mxu1  ;;  %v6890_v18 = vpop.f32.mrf.mxu0 }
 0x5b5   :  { %v6535_v53 = vadd.f32 %v6265_v11, %v16921_v6  ;;  %v14356_v43 = vadd.f32 %v6890_v18, %v6533_v56  ;;  %v6029_v56 = vor.u32 %v6028_v33, %v6025_v22  ;;  %v14370_v18 = vpop.permute.xlu0 %7232  ;;  %v6034_v6 = vrot.slane %v6032_v0, 2 }
 0x5b6   :  { %v10654_v39 = vpop.f32.mrf.mxu1  ;;  %v10830_v61 = vpop.f32.mrf.mxu0  ;;  %16925 = vst [vmem:[#allocation65_spill] sm:$0xff] %v14370_v18  ;;  %v6689_v22 = vsel %vm6618_vm6, %v6686_v23, %v6688_v19  ;;  %v6690_v0 = vrot.slane %v14349_v45, 3 }
 0x5b7   :  { %16922 = vst [vmem:[#allocation37_spill] sm:$0xff] %v14356_v43  ;;  %v6037_v39 = vrot.slane %v6035_v25, 3  ;;  %v14372_v61 = vpop.permute.xlu1 %7242 }
 0x5b8   :  { %v6270_v17 = vpop.f32.mrf.mxu1  ;;  %10752 = vmatmul.mubr.bf16.gmra.mxu1 %v6021_v13  ;;  %v6895_v16 = vpop.f32.mrf.mxu0  ;;  %10928 = vmatmul.mubr.bf16.gmra.mxu0 %v6687_v34  ;;  %16926 = vst [vmem:[#allocation66_spill] sm:$0xff] %v14372_v61 }
 0x5b9   :  { %v6536_v3 = vadd.f32 %v6270_v17, %v16923_v10  ;;  %v14363_v14 = vadd.f32 %v6895_v16, %v6534_v59  ;;  %10755 = vmatprep.mubr.msk.bf16.mxu1 %vm11355_vm0, %v16651_v8  ;;  %10931 = vmatprep.mubr.msk.bf16.mxu0 %vm11355_vm0, %v16651_v8  ;;  %v6030_v16 = vsel %vm5698_vm5, %v6020_v51, %v6029_v56  ;;  %v14380_v25 = vpop.permute.xlu0 %7237  ;;  %v14389_v51 = vld [vmem:[#allocation2 + $0x140] sm:$0xff]  }
 0x5ba   :  { %v10657_v27 = vpop.f32.mrf.mxu1  ;;  %v10833_v11 = vpop.f32.mrf.mxu0  ;;  %16928 = vst [vmem:[#allocation68_spill] sm:$0xff] %v14380_v25  ;;  %v6041_v23 = vshrl.u32 %v14389_v51, 16 }
 0x5bb   :  { %16924 = vst [vmem:[#allocation38_spill] sm:$0xff] %v14363_v14  ;;  %v6038_v11 = vor.u32 %v6037_v39, %v6034_v6  ;;  %v6691_v39 = vsel %vm6618_vm6, %v6688_v19, %v6690_v0  ;;  %v6053_v19 = vshll.u32 %v14402_v9, 16 }
 0x5bc   :  { %v6273_v13 = vpop.f32.mrf.mxu1  ;;  %v6898_v34 = vpop.f32.mrf.mxu0 }
 0x5bd   :  { %v6537_v59 = vadd.f32 %v6273_v13, %v13472_v37  ;;  %v14375_v17 = vadd.f32 %v6898_v34, %v6535_v53  ;;  %v6044_v53 = vshll.u32 %v14389_v51, 16  ;;  %v14393_v34 = vpop.permute.xlu1 %7247  ;;  %v14400_v29 = vpop.permute.xlu0 %7252 }
 0x5be   :  { %v10658_v33 = vpop.f32.mrf.mxu1  ;;  %v10834_v44 = vpop.f32.mrf.mxu0  ;;  %16930 = vst [vmem:[#allocation70_spill] sm:$0xff] %v14393_v34  ;;  %16932 = vst [vmem:[#allocation72_spill] sm:$0xff] %v14400_v29 }
 0x5bf   :  { %16927 = vst [vmem:[#allocation67_spill] sm:$0xff] %v14375_v17  ;;  %v6043_v33 = vrot.slane %v6041_v23, 2  ;;  %v6046_v44 = vrot.slane %v6044_v53, 3  ;;  %v16947_v17 = vld [vmem:[#allocation43_spill] sm:$0xff] }
 0x5c0   :  { %v6278_v10 = vpop.f32.mrf.mxu1  ;;  %10756 = vmatmul.mubr.bf16.gmra.mxu1 %v6030_v16  ;;  %v6903_v27 = vpop.f32.mrf.mxu0  ;;  %10932 = vmatmul.mubr.bf16.gmra.mxu0 %v6689_v22 }
 0x5c1   :  { %v6538_v55 = vadd.f32 %v6278_v10, %v13483_v28  ;;  %v14383_v37 = vadd.f32 %v6903_v27, %v6536_v3  ;;  %10759 = vmatprep.mubr.msk.bf16.mxu1 %vm11355_vm0, %v16651_v8  ;;  %10935 = vmatprep.mubr.msk.bf16.mxu0 %vm11355_vm0, %v16651_v8  ;;  %v6039_v3 = vsel %vm5698_vm5, %v6029_v56, %v6038_v11  ;;  %v6050_v56 = vshrl.u32 %v14402_v9, 16 }
 0x5c2   :  { %v10661_v13 = vpop.f32.mrf.mxu1  ;;  %v10837_v45 = vpop.f32.mrf.mxu0 }
 0x5c3   :  { %16929 = vst [vmem:[#allocation69_spill] sm:$0xff] %v14383_v37  ;;  %v6052_v1 = vrot.slane %v6050_v56, 2 }
 0x5c4   :  { %v6281_v6 = vpop.f32.mrf.mxu1  ;;  %v6906_v28 = vpop.f32.mrf.mxu0 }
 0x5c5   :  { %v6539_v16 = vadd.f32 %v6281_v6, %v13496_v4  ;;  %v14398_v22 = vadd.f32 %v6906_v28, %v6537_v59  ;;  %v14406_v4 = vpop.permute.xlu1 %7257  ;;  %v16934_v59 = vld [vmem:[#allocation39_spill] sm:$0xff]  ;;  %v6047_v6 = vor.u32 %v6046_v44, %v6043_v33  ;;  %v6692_v28 = vrot.slane %v14358_v31, 3 }
 0x5c6   :  { %v10662_v10 = vpop.f32.mrf.mxu1  ;;  %v10838_v27 = vpop.f32.mrf.mxu0  ;;  %16933 = vst [vmem:[#allocation73_spill] sm:$0xff] %v14406_v4 }
 0x5c7   :  { %16931 = vst [vmem:[#allocation71_spill] sm:$0xff] %v14398_v22  ;;  %v11306_v10 = vld [vmem:[#allocation2 + $0x150] sm:$0xf]  ;;  %v6048_v22 = vsel %vm5698_vm5, %v6038_v11, %v6047_v6  ;;  %v6693_v33 = vsel %vm6618_vm6, %v6690_v0, %v6692_v28 }
 0x5c8   :  { %v6286_v13 = vpop.f32.mrf.mxu1  ;;  %10760 = vmatmul.mubr.bf16.gmra.mxu1 %v6039_v3  ;;  %v6911_v45 = vpop.f32.mrf.mxu0  ;;  %10936 = vmatmul.mubr.bf16.gmra.mxu0 %v6691_v39  ;;  %v14416_v27 = vcombine.low %v11306_v10, %v5677_v12  ;;  %v16940_v10 = vld [vmem:[#allocation41_spill] sm:$0xff] }
 0x5c9   :  { %v6540_v23 = vadd.f32 %v6286_v13, %v16934_v59  ;;  %v14409_v53 = vadd.f32 %v6911_v45, %v6538_v55  ;;  %10763 = vmatprep.mubr.msk.bf16.mxu1 %vm11355_vm0, %v16651_v8  ;;  %10939 = vmatprep.mubr.msk.bf16.mxu0 %vm11355_vm0, %v16651_v8  ;;  %v6055_v13 = vrot.slane %v6053_v19, 3  ;;  %v14418_v55 = vpop.permute.xlu0 %7262  ;;  %v16937_v45 = vld [vmem:[#allocation40_spill] sm:$0xff]  ;;  %v6694_v19 = vrot.slane %v14389_v51, 3 }
 0x5ca   :  { %v10665_v3 = vpop.f32.mrf.mxu1  ;;  %v10841_v39 = vpop.f32.mrf.mxu0  ;;  %16936 = vst [vmem:[#allocation74_spill] sm:$0xff] %v14418_v55  ;;  %v6062_v11 = vshll.u32 %v14416_v27, 16 }
 0x5cb   :  { %16935 = vst [vmem:[#allocation39_spill] sm:$0xff] %v14409_v53  ;;  %v14425_v3 = vpop.permute.xlu1 %7267  ;;  %v6056_v56 = vor.u32 %v6055_v13, %v6052_v1 }
 0x5cc   :  { %v6289_v40 = vpop.f32.mrf.mxu1  ;;  %v6914_v36 = vpop.f32.mrf.mxu0  ;;  %16939 = vst [vmem:[#allocation75_spill] sm:$0xff] %v14425_v3 }
 0x5cd   :  { %v6541_v59 = vadd.f32 %v6289_v40, %v16937_v45  ;;  %v14421_v53 = vadd.f32 %v6914_v36, %v6539_v16  ;;  %v6059_v36 = vshrl.u32 %v14416_v27, 16  ;;  %v6057_v13 = vsel %vm5698_vm5, %v6047_v6, %v6056_v56 }
 0x5ce   :  { %v10666_v31 = vpop.f32.mrf.mxu1  ;;  %v10842_v44 = vpop.f32.mrf.mxu0 }
 0x5cf   :  { %16938 = vst [vmem:[#allocation40_spill] sm:$0xff] %v14421_v53  ;;  %v14441_v45 = vpop.permute.xlu1 %7277 }
 0x5d0   :  { %v6294_v12 = vpop.f32.mrf.mxu1  ;;  %10764 = vmatmul.mubr.bf16.gmra.mxu1 %v6048_v22  ;;  %v6919_v39 = vpop.f32.mrf.mxu0  ;;  %10940 = vmatmul.mubr.bf16.gmra.mxu0 %v6693_v33  ;;  %16943 = vst [vmem:[#allocation77_spill] sm:$0xff] %v14441_v45  ;;  %v16944_v33 = vld [vmem:[#allocation42_spill] sm:$0xff] }
 0x5d1   :  { %v6542_v37 = vadd.f32 %v6294_v12, %v16940_v10  ;;  %v14429_v40 = vadd.f32 %v6919_v39, %v6540_v23  ;;  %10767 = vmatprep.mubr.msk.bf16.mxu1 %vm11355_vm0, %v16651_v8  ;;  %10943 = vmatprep.mubr.msk.bf16.mxu0 %vm11355_vm0, %v16651_v8  ;;  %v14437_v22 = vpop.permute.xlu0 %7272  ;;  %v6695_v23 = vsel %vm6618_vm6, %v6692_v28, %v6694_v19  ;;  %v6061_v12 = vrot.slane %v6059_v36, 2 }
 0x5d2   :  { %v10669_v0 = vpop.f32.mrf.mxu1  ;;  %v10845_v16 = vpop.f32.mrf.mxu0  ;;  %16942 = vst [vmem:[#allocation76_spill] sm:$0xff] %v14437_v22  ;;  %v6064_v39 = vrot.slane %v6062_v11, 3 }
 0x5d3   :  { %16941 = vst [vmem:[#allocation41_spill] sm:$0xff] %v14429_v40  ;;  %v14456_v11 = vpop.permute.xlu1 %7287 }
 0x5d4   :  { %v6297_v1 = vpop.f32.mrf.mxu1  ;;  %v6922_v51 = vpop.f32.mrf.mxu0  ;;  %v6065_v28 = vor.u32 %v6064_v39, %v6061_v12  ;;  %16949 = vst [vmem:[#allocation79_spill] sm:$0xff] %v14456_v11 }
 0x5d5   :  { %v6543_v31 = vadd.f32 %v6297_v1, %v16944_v33  ;;  %v14444_v44 = vadd.f32 %v6922_v51, %v6541_v59  ;;  %v14446_v53 = vpop.permute.xlu0 %7282  ;;  %v6696_v59 = vrot.slane %v14402_v9, 3 }
 0x5d6   :  { %v10670_v10 = vpop.f32.mrf.mxu1  ;;  %v10846_v40 = vpop.f32.mrf.mxu0  ;;  %16946 = vst [vmem:[#allocation78_spill] sm:$0xff] %v14446_v53 }
 0x5d7   :  { %16945 = vst [vmem:[#allocation42_spill] sm:$0xff] %v14444_v44  ;;  %v14465_v39 = vpop.permute.xlu1 %7297 }
 0x5d8   :  { %v6302_v0 = vpop.f32.mrf.mxu1  ;;  %10768 = vmatmul.mubr.bf16.gmra.mxu1 %v6057_v13  ;;  %v6927_v16 = vpop.f32.mrf.mxu0  ;;  %10944 = vmatmul.mubr.bf16.gmra.mxu0 %v6695_v23  ;;  %v6697_v23 = vsel %vm6618_vm6, %v6694_v19, %v6696_v59  ;;  %16952 = vst [vmem:[#allocation82_spill] sm:$0xff] %v14465_v39 }
 0x5d9   :  { %v6544_v6 = vadd.f32 %v6302_v0, %v16947_v17  ;;  %v14449_v14 = vadd.f32 %v6927_v16, %v6542_v37  ;;  %10771 = vmatprep.mubr.msk.bf16.mxu1 %vm11355_vm0, %v16651_v8  ;;  %10947 = vmatprep.mubr.msk.bf16.mxu0 %vm11355_vm0, %v16651_v8  ;;  %v6066_v37 = vsel %vm5698_vm5, %v6056_v56, %v6065_v28  ;;  %v14463_v0 = vpop.permute.xlu0 %7292 }
 0x5da   :  { %v10673_v40 = vpop.f32.mrf.mxu1  ;;  %v10849_v36 = vpop.f32.mrf.mxu0  ;;  %16951 = vst [vmem:[#allocation81_spill] sm:$0xff] %v14463_v0 }
 0x5db   :  { %16948 = vst [vmem:[#allocation43_spill] sm:$0xff] %v14449_v14 }
 0x5dc   :  { %v6305_v1 = vpop.f32.mrf.mxu1  ;;  %v6930_v51 = vpop.f32.mrf.mxu0 }
 0x5dd   :  { %v6545_v13 = vadd.f32 %v6305_v1, %v13582_v41  ;;  %v14459_v17 = vadd.f32 %v6930_v51, %v6543_v31  ;;  %v6698_v41 = vrot.slane %v14416_v27, 3  ;;  %v14475_v1 = vpop.permute.xlu0 %7302 }
 0x5de   :  { %v10674_v33 = vpop.f32.mrf.mxu1  ;;  %v10850_v10 = vpop.f32.mrf.mxu0  ;;  %16954 = vst [vmem:[#allocation84_spill] sm:$0xff] %v14475_v1 }
 0x5df   :  { %16950 = vst [vmem:[#allocation80_spill] sm:$0xff] %v14459_v17  ;;  %v14481_v33 = vpop.permute.xlu1 %7307 }
 0x5e0   :  { %v6310_v12 = vpop.f32.mrf.mxu1  ;;  %10772 = vmatmul.mubr.bf16.gmra.mxu1 %v6066_v37  ;;  %v6935_v9 = vpop.f32.mrf.mxu0  ;;  %10948 = vmatmul.mubr.bf16.gmra.mxu0 %v6697_v23  ;;  %16956 = vst [vmem:[#allocation86_spill] sm:$0xff] %v14481_v33 }
 0x5e1   :  { %v6546_v16 = vadd.f32 %v6310_v12, %v13595_v57  ;;  %v14468_v40 = vadd.f32 %v6935_v9, %v6544_v6  ;;  %10775 = vmatprep.mubr.msk.bf16.mxu1 %vm11355_vm0, %v16651_v8  ;;  %10951 = vmatprep.mubr.msk.bf16.mxu0 %vm11355_vm0, %v16651_v8  ;;  %v6699_v57 = vsel %vm6618_vm6, %v6696_v59, %v6698_v41 }
 0x5e2   :  { %v10677_v56 = vpop.f32.mrf.mxu1  ;;  %v10853_v19 = vpop.f32.mrf.mxu0 }
 0x5e3   :  { %16953 = vst [vmem:[#allocation83_spill] sm:$0xff] %v14468_v40  ;;  %v14488_v56 = vpop.permute.xlu0 %7312  ;;  %v16971_v40 = vld [vmem:[#allocation44_spill] sm:$0xff] }
 0x5e4   :  { %v6313_v31 = vpop.f32.mrf.mxu1  ;;  %v6938_v36 = vpop.f32.mrf.mxu0  ;;  %16958 = vst [vmem:[#allocation88_spill] sm:$0xff] %v14488_v56 }
 0x5e5   :  { %v6547_v51 = vadd.f32 %v6313_v31, %v13608_v15  ;;  %v14478_v37 = vadd.f32 %v6938_v36, %v6545_v13  ;;  %v14490_v31 = vpop.permute.xlu1 %7317 }
 0x5e6   :  { %v10678_v6 = vpop.f32.mrf.mxu1  ;;  %v10854_v23 = vpop.f32.mrf.mxu0  ;;  %16959 = vst [vmem:[#allocation89_spill] sm:$0xff] %v14490_v31 }
 0x5e7   :  { %16955 = vst [vmem:[#allocation85_spill] sm:$0xff] %v14478_v37  ;;  %v14495_v23 = vpop.permute.xlu0 %7322 }
 0x5e8   :  { %v6318_v10 = vpop.f32.mrf.mxu1  ;;  %10776 = vmatmul.mubr.bf16.gmra.mxu1 %v6065_v28  ;;  %v6943_v12 = vpop.f32.mrf.mxu0  ;;  %10952 = vmatmul.mubr.bf16.gmra.mxu0 %v6699_v57  ;;  %16961 = vst [vmem:[#allocation91_spill] sm:$0xff] %v14495_v23 }
 0x5e9   :  { %v6548_v27 = vadd.f32 %v6318_v10, %v13623_v48  ;;  %v14484_v9 = vadd.f32 %v6943_v12, %v6546_v16  ;;  %10955 = vmatprep.mubr.msk.bf16.mxu0 %vm11355_vm0, %v16651_v8 }
 0x5ea   :  { %v10681_v15 = vpop.f32.mrf.mxu1  ;;  %v10857_v13 = vpop.f32.mrf.mxu0 }
 0x5eb   :  { %16957 = vst [vmem:[#allocation87_spill] sm:$0xff] %v14484_v9  ;;  %v14500_v13 = vpop.permute.xlu1 %7327 }
 0x5ec   :  { %v6321_v59 = vpop.f32.mrf.mxu1  ;;  %v6946_v19 = vpop.f32.mrf.mxu0  ;;  %16963 = vst [vmem:[#allocation93_spill] sm:$0xff] %v14500_v13 }
 0x5ed   :  { %v6549_v36 = vadd.f32 %v6321_v59, %v13637_v21  ;;  %v14493_v28 = vadd.f32 %v6946_v19, %v6547_v51 }
 0x5ee   :  { %v10682_v57 = vpop.f32.mrf.mxu1  ;;  %v10858_v6 = vpop.f32.mrf.mxu0 }
 0x5ef   :  { %16960 = vst [vmem:[#allocation90_spill] sm:$0xff] %v14493_v28  ;;  %v14505_v57 = vpop.permute.xlu0 %7332  ;;  %v14507_v28 = vpop.permute.xlu1 %7337 }
 0x5f0   :  { %v6326_v48 = vpop.f32.mrf.mxu1  ;;  %v6951_v16 = vpop.f32.mrf.mxu0  ;;  %10956 = vmatmul.mubr.bf16.gmra.mxu0 %v6698_v41  ;;  %16965 = vst [vmem:[#allocation95_spill] sm:$0xff] %v14505_v57  ;;  %16966 = vst [vmem:[#allocation96_spill] sm:$0xff] %v14507_v28 }
 0x5f1   :  { %v6550_v8 = vadd.f32 %v6326_v48, %v13649_v24  ;;  %v14498_v10 = vadd.f32 %v6951_v16, %v6548_v27 }
 0x5f2   :  { %v10685_v12 = vpop.f32.mrf.mxu1  ;;  %v10861_v15 = vpop.f32.mrf.mxu0 }
 0x5f3   :  { %16962 = vst [vmem:[#allocation92_spill] sm:$0xff] %v14498_v10  ;;  %v14512_v10 = vpop.permute.xlu0 %7342 }
 0x5f4   :  { %v6329_v9 = vpop.f32.mrf.mxu1  ;;  %v6954_v37 = vpop.f32.mrf.mxu0  ;;  %16968 = vst [vmem:[#allocation98_spill] sm:$0xff] %v14512_v10 }
 0x5f5   :  { %v6551_v21 = vadd.f32 %v6329_v9, %v13668_v47  ;;  %v14503_v51 = vadd.f32 %v6954_v37, %v6549_v36 }
 0x5f6   :  { %v10686_v59 = vpop.f32.mrf.mxu1  ;;  %v10862_v19 = vpop.f32.mrf.mxu0 }
 0x5f7   :  { %16964 = vst [vmem:[#allocation94_spill] sm:$0xff] %v14503_v51  ;;  %v14517_v59 = vpop.permute.xlu1 %7347 }
 0x5f8   :  { %v6334_v41 = vpop.f32.mrf.mxu1  ;;  %v6959_v6 = vpop.f32.mrf.mxu0  ;;  %16970 = vst [vmem:[#allocation100_spill] sm:$0xff] %v14517_v59 }
 0x5f9   :  { %v6552_v24 = vadd.f32 %v6334_v41, %v13681_v35  ;;  %v14510_v27 = vadd.f32 %v6959_v6, %v6550_v8 }
 0x5fa   :  { %v10689_v48 = vpop.f32.mrf.mxu1  ;;  %v10865_v16 = vpop.f32.mrf.mxu0 }
 0x5fb   :  { %16967 = vst [vmem:[#allocation97_spill] sm:$0xff] %v14510_v27  ;;  %v14522_v48 = vpop.permute.xlu0 %7352  ;;  %v14524_v17 = vpop.permute.xlu1 %7357 }
 0x5fc   :  { %v6337_v12 = vpop.f32.mrf.mxu1  ;;  %v6962_v15 = vpop.f32.mrf.mxu0  ;;  %16973 = vst [vmem:[#allocation101_spill] sm:$0xff] %v14522_v48  ;;  %16974 = vst [vmem:[#allocation102_spill] sm:$0xff] %v14524_v17 }
 0x5fd   :  { %v6553_v47 = vadd.f32 %v6337_v12, %v13695_v30  ;;  %v14515_v37 = vadd.f32 %v6962_v15, %v6551_v21  ;;  %v16975_v30 = vld [vmem:[#allocation45_spill] sm:$0xff] }
 0x5fe   :  { %v10690_v9 = vpop.f32.mrf.mxu1  ;;  %v10866_v36 = vpop.f32.mrf.mxu0 }
 0x5ff   :  { %16969 = vst [vmem:[#allocation99_spill] sm:$0xff] %v14515_v37  ;;  %v7636_v36 = vmul.f32 %v14380_v25, %v14220_v49 }
 0x600   :  { %v6342_v19 = vpop.f32.mrf.mxu1  ;;  %v6967_v51 = vpop.f32.mrf.mxu0 }
 0x601   :  { %v6554_v35 = vadd.f32 %v6342_v19, %v16971_v40  ;;  %v14520_v8 = vadd.f32 %v6967_v51, %v6552_v24  ;;  %v7635_v24 = vmul.f32 %v14370_v18, %v14207_v50  ;;  %v7637_v19 = vmul.f32 %v14372_v61, %v14227_v54  ;;  %v16980_v54 = vld [vmem:[#allocation47_spill] sm:$0xff] }
 0x602   :  { %v10693_v41 = vpop.f32.mrf.mxu1  ;;  %v10869_v6 = vpop.f32.mrf.mxu0  ;;  %v7639_v61 = vmul.f32 %v14400_v29, %v14241_v42  ;;  %v16983_v29 = vld [vmem:[#allocation48_spill] sm:$0xff] }
 0x603   :  { %16972 = vst [vmem:[#allocation44_spill] sm:$0xff] %v14520_v8  ;;  %v14535_v41 = vpop.permute.xlu0 %7362  ;;  %v16978_v6 = vld [vmem:[#allocation46_spill] sm:$0xff] }
 0x604   :  { %v6345_v16 = vpop.f32.mrf.mxu1  ;;  %v6970_v27 = vpop.f32.mrf.mxu0  ;;  %16977 = vst [vmem:[#allocation103_spill] sm:$0xff] %v14535_v41 }
 0x605   :  { %v6555_v21 = vadd.f32 %v6345_v16, %v16975_v30  ;;  %v14527_v12 = vadd.f32 %v6970_v27, %v6553_v47  ;;  %v7716_v30 = vadd.f32 %v7636_v36, %v7635_v24  ;;  %v7640_v36 = vmul.f32 %v14406_v4, %v14254_v62 }
 0x606   :  { %v10694_v15 = vpop.f32.mrf.mxu1  ;;  %v10870_v9 = vpop.f32.mrf.mxu0 }
 0x607   :  { %16976 = vst [vmem:[#allocation45_spill] sm:$0xff] %v14527_v12  ;;  %v7638_v15 = vmul.f32 %v14393_v34, %v14235_v58  ;;  %v14542_v9 = vpop.permute.xlu1 %7367  ;;  %v7717_v18 = vadd.f32 %v7716_v30, %v7637_v19  ;;  %v14551_v24 = vpop.permute.xlu0 %7372  ;;  %v7641_v19 = vmul.f32 %v14418_v55, %v14261_v38  ;;  %v16985_v55 = vld [vmem:[#allocation49_spill] sm:$0xff] }
 0x608   :  { %v6350_v40 = vpop.f32.mrf.mxu1  ;;  %v6975_v51 = vpop.f32.mrf.mxu0  ;;  %16979 = vst [vmem:[#allocation46_spill] sm:$0xff] %v14542_v9  ;;  %16981 = vst [vmem:[#allocation47_spill] sm:$0xff] %v14551_v24 }
 0x609   :  { %v6556_v8 = vadd.f32 %v6350_v40, %v16978_v6  ;;  %v14538_v16 = vadd.f32 %v6975_v51, %v6554_v35  ;;  %v7718_v51 = vadd.f32 %v7717_v18, %v7638_v15  ;;  %v7642_v15 = vmul.f32 %v14425_v3, %v14269_v5 }
 0x60a   :  { %v10697_v27 = vpop.f32.mrf.mxu1  ;;  %v10873_v47 = vpop.f32.mrf.mxu0 }
 0x60b   :  { %v7719_v47 = vadd.f32 %v7718_v51, %v7639_v61  ;;  %v14555_v30 = vpop.permute.xlu1 %7377  ;;  %v7643_v61 = vmul.f32 %v14437_v22, %v14275_v46  ;;  %v14564_v51 = vpop.permute.xlu0 %7382 }
 0x60c   :  { %v6353_v25 = vpop.f32.mrf.mxu1  ;;  %v6978_v49 = vpop.f32.mrf.mxu0  ;;  %16982 = vst [vmem:[#allocation104_spill] sm:$0xff] %v14555_v30  ;;  %16984 = vst [vmem:[#allocation48_spill] sm:$0xff] %v14564_v51 }
 0x60d   :  { %v6557_v50 = vadd.f32 %v6353_v25, %v16980_v54  ;;  %v14547_v12 = vadd.f32 %v6978_v49, %v6555_v21  ;;  %v7720_v18 = vadd.f32 %v7719_v47, %v7640_v36  ;;  %v7644_v36 = vmul.f32 %v14441_v45, %v14288_v26 }
 0x60e   :  { %v10698_v35 = vpop.f32.mrf.mxu1  ;;  %v10874_v40 = vpop.f32.mrf.mxu0 }
 0x60f   :  { %v7721_v4 = vadd.f32 %v7720_v18, %v7641_v19  ;;  %v16987_v18 = vld [vmem:[#allocation50_spill] sm:$0xff] }
 0x610   :  { %v6358_v6 = vpop.f32.mrf.mxu1  ;;  %v6983_v27 = vpop.f32.mrf.mxu0 }
 0x611   :  { %v6558_v54 = vadd.f32 %v6358_v6, %v16983_v29  ;;  %v14558_v49 = vadd.f32 %v6983_v27, %v6556_v8  ;;  %v7722_v6 = vadd.f32 %v7721_v4, %v7642_v15  ;;  %v14571_v27 = vpop.permute.xlu1 %7387  ;;  %v7646_v4 = vmul.f32 %v14456_v11, %v14303_v52  ;;  %v14580_v15 = vpop.permute.xlu0 %7392 }
 0x612   :  { %v10701_v25 = vpop.f32.mrf.mxu1  ;;  %v10877_v21 = vpop.f32.mrf.mxu0  ;;  %16986 = vst [vmem:[#allocation49_spill] sm:$0xff] %v14571_v27  ;;  %16989 = vst [vmem:[#allocation105_spill] sm:$0xff] %v14580_v15 }
 0x613   :  { %v7723_v19 = vadd.f32 %v7722_v6, %v7643_v61  ;;  %v7645_v21 = vmul.f32 %v14446_v53, %v14295_v63  ;;  %v7647_v61 = vmul.f32 %v14463_v0, %v14309_v7  ;;  %v16991_v53 = vld [vmem:[#allocation51_spill] sm:$0xff]  ;;  %v16993_v0 = vld [vmem:[#allocation8_spill] sm:$0xff] }
 0x614   :  { %v6361_v35 = vpop.f32.mrf.mxu1  ;;  %v6986_v40 = vpop.f32.mrf.mxu0 }
 0x615   :  { %v6559_v38 = vadd.f32 %v6361_v35, %v16985_v55  ;;  %v14567_v34 = vadd.f32 %v6986_v40, %v6557_v50  ;;  %v7724_v35 = vadd.f32 %v7723_v19, %v7644_v36  ;;  %v14584_v6 = vpop.permute.xlu1 %7397  ;;  %v7648_v19 = vmul.f32 %v14465_v39, %v14322_v2 }
 0x616   :  { %v10702_v29 = vpop.f32.mrf.mxu1  ;;  %v10878_v8 = vpop.f32.mrf.mxu0  ;;  %16990 = vst [vmem:[#allocation106_spill] sm:$0xff] %v14584_v6 }
 0x617   :  { %v7725_v8 = vadd.f32 %v7724_v35, %v7645_v21  ;;  %v7649_v21 = vmul.f32 %v14475_v1, %v14329_v32  ;;  %v14593_v35 = vpop.permute.xlu0 %7402 }
 0x618   :  { %v6366_v47 = vpop.f32.mrf.mxu1  ;;  %v6991_v25 = vpop.f32.mrf.mxu0  ;;  %16992 = vst [vmem:[#allocation51_spill] sm:$0xff] %v14593_v35 }
 0x619   :  { %v6560_v22 = vadd.f32 %v6366_v47, %v16987_v18  ;;  %v14576_v3 = vadd.f32 %v6991_v25, %v6558_v54  ;;  %v7726_v36 = vadd.f32 %v7725_v8, %v7646_v4  ;;  %v7650_v4 = vmul.f32 %v14481_v33, %v14337_v60  ;;  %v16997_v33 = vld [vmem:[#allocation38_spill] sm:$0xff] }
 0x61a   :  { %v10705_v50 = vpop.f32.mrf.mxu1  ;;  %v10881_v55 = vpop.f32.mrf.mxu0 }
 0x61b   :  { %16988 = vst [vmem:[#allocation50_spill] sm:$0xff] %v14576_v3  ;;  %v7727_v11 = vadd.f32 %v7726_v36, %v7647_v61  ;;  %v16995_v36 = vld [vmem:[#allocation9_spill] sm:$0xff] }
 0x61c   :  { %v6369_v40 = vpop.f32.mrf.mxu1  ;;  %v6994_v29 = vpop.f32.mrf.mxu0 }
 0x61d   :  { %v6561_v47 = vadd.f32 %v6369_v40, %v16991_v53  ;;  %v14587_v54 = vadd.f32 %v6994_v29, %v6559_v38  ;;  %v7728_v40 = vadd.f32 %v7727_v11, %v7648_v19  ;;  %v14600_v29 = vpop.permute.xlu1 %7407  ;;  %v7652_v11 = vmul.f32 %v14490_v31, %v14356_v43  ;;  %v14609_v19 = vpop.permute.xlu0 %7412 }
 0x61e   :  { %v10706_v25 = vpop.f32.mrf.mxu1  ;;  %v10882_v18 = vpop.f32.mrf.mxu0  ;;  %16994 = vst [vmem:[#allocation8_spill] sm:$0xff] %v14600_v29  ;;  %16996 = vst [vmem:[#allocation9_spill] sm:$0xff] %v14609_v19 }
 0x61f   :  { %v7729_v61 = vadd.f32 %v7728_v40, %v7649_v21  ;;  %v7651_v18 = vmul.f32 %v14488_v56, %v14343_v20  ;;  %v7653_v21 = vmul.f32 %v14495_v23, %v16997_v33  ;;  %v16999_v56 = vld [vmem:[#allocation10_spill] sm:$0xff]  ;;  %v17003_v23 = vld [vmem:[#allocation11_spill] sm:$0xff] }
 0x620   :  { %v6374_v50 = vpop.f32.mrf.mxu1  ;;  %v6999_v55 = vpop.f32.mrf.mxu0 }
 0x621   :  { %v6562_v7 = vadd.f32 %v6374_v50, %v16993_v0  ;;  %v14596_v45 = vadd.f32 %v6999_v55, %v6560_v22  ;;  %v7730_v50 = vadd.f32 %v7729_v61, %v7650_v4  ;;  %v14613_v40 = vpop.permute.xlu1 %7417  ;;  %v17000_v61 = vld [vmem:[#allocation67_spill] sm:$0xff]  ;;  %v14620_v20 = vpop.permute.xlu0 %7422 }
 0x622   :  { %v10709_v38 = vpop.f32.mrf.mxu1  ;;  %v10885_v53 = vpop.f32.mrf.mxu0  ;;  %16998 = vst [vmem:[#allocation107_spill] sm:$0xff] %v14613_v40  ;;  %17001 = vst [vmem:[#allocation10_spill] sm:$0xff] %v14620_v20 }
 0x623   :  { %v7731_v53 = vadd.f32 %v7730_v50, %v7651_v18  ;;  %v17002_v18 = vld [vmem:[#allocation69_spill] sm:$0xff] }
 0x624   :  { %v6377_v8 = vpop.f32.mrf.mxu1  ;;  %v7002_v25 = vpop.f32.mrf.mxu0  ;;  %v7655_v50 = vmul.f32 %v14505_v57, %v17002_v18 }
 0x625   :  { %v6563_v1 = vadd.f32 %v6377_v8, %v16995_v36  ;;  %v14605_v39 = vadd.f32 %v7002_v25, %v6561_v47  ;;  %v7732_v4 = vadd.f32 %v7731_v53, %v7652_v11  ;;  %v14629_v53 = vpop.permute.xlu1 %7427 }
 0x626   :  { %v10710_v22 = vpop.f32.mrf.mxu1  ;;  %v10886_v0 = vpop.f32.mrf.mxu0  ;;  %17005 = vst [vmem:[#allocation11_spill] sm:$0xff] %v14629_v53 }
 0x627   :  { %v7654_v22 = vmul.f32 %v14500_v13, %v17000_v61  ;;  %v7733_v43 = vadd.f32 %v7732_v4, %v7653_v21  ;;  %v17006_v4 = vld [vmem:[#allocation39_spill] sm:$0xff]  ;;  %v17007_v61 = vld [vmem:[#allocation12_spill] sm:$0xff] }
 0x628   :  { %v6382_v55 = vpop.f32.mrf.mxu1  ;;  %v7007_v38 = vpop.f32.mrf.mxu0  ;;  %v7657_v13 = vmul.f32 %v14512_v10, %v17006_v4  ;;  %v17013_v10 = vld [vmem:[#allocation13_spill] sm:$0xff]  ;;  %v17027_v4 = vld [vmem:[#allocation92_spill] sm:$0xff] }
 0x629   :  { %v6564_v8 = vadd.f32 %v6382_v55, %v16999_v56  ;;  %v14616_v47 = vadd.f32 %v7007_v38, %v6562_v7  ;;  %v7734_v55 = vadd.f32 %v7733_v43, %v7654_v22  ;;  %v17004_v38 = vld [vmem:[#allocation71_spill] sm:$0xff]  ;;  %v17010_v22 = vld [vmem:[#allocation40_spill] sm:$0xff] }
 0x62a   :  { %v10713_v25 = vpop.f32.mrf.mxu1  ;;  %v10889_v36 = vpop.f32.mrf.mxu0  ;;  %v7656_v11 = vmul.f32 %v14507_v28, %v17004_v38 }
 0x62b   :  { %v7735_v21 = vadd.f32 %v7734_v55, %v7655_v50  ;;  %v14640_v38 = vpop.permute.xlu1 %7437  ;;  %v17012_v50 = vld [vmem:[#allocation41_spill] sm:$0xff] }
 0x62c   :  { %v6385_v0 = vpop.f32.mrf.mxu1  ;;  %v7010_v31 = vpop.f32.mrf.mxu0  ;;  %17011 = vst [vmem:[#allocation109_spill] sm:$0xff] %v14640_v38  ;;  %v7659_v55 = vmul.f32 %v14522_v48, %v17012_v50 }
 0x62d   :  { %v6565_v33 = vadd.f32 %v6385_v0, %v17003_v23  ;;  %v14625_v60 = vadd.f32 %v7010_v31, %v6563_v1  ;;  %v14636_v23 = vpop.permute.xlu0 %7432  ;;  %v7736_v43 = vadd.f32 %v7735_v21, %v7656_v11  ;;  %v7658_v0 = vmul.f32 %v14517_v59, %v17010_v22  ;;  %v17015_v22 = vld [vmem:[#allocation14_spill] sm:$0xff] }
 0x62e   :  { %v10714_v7 = vpop.f32.mrf.mxu1  ;;  %v10890_v56 = vpop.f32.mrf.mxu0  ;;  %17009 = vst [vmem:[#allocation108_spill] sm:$0xff] %v14636_v23  ;;  %v7660_v11 = vmul.f32 %v14524_v17, %v14444_v44  ;;  %v17018_v44 = vld [vmem:[#allocation83_spill] sm:$0xff] }
 0x62f   :  { %v7737_v28 = vadd.f32 %v7736_v43, %v7657_v13  ;;  %v7661_v43 = vmul.f32 %v14535_v41, %v14449_v14 }
 0x630   :  { %v6390_v25 = vpop.f32.mrf.mxu1  ;;  %v7015_v36 = vpop.f32.mrf.mxu0 }
 0x631   :  { %v6566_v57 = vadd.f32 %v6390_v25, %v17007_v61  ;;  %v14634_v18 = vadd.f32 %v7015_v36, %v6564_v8  ;;  %v14649_v59 = vpop.permute.xlu0 %7442 }
 0x632   :  { %v10717_v1 = vpop.f32.mrf.mxu1  ;;  %v10893_v31 = vpop.f32.mrf.mxu0  ;;  %17014 = vst [vmem:[#allocation13_spill] sm:$0xff] %v14649_v59 }
 0x633   :  { %17008 = vst [vmem:[#allocation12_spill] sm:$0xff] %v14634_v18  ;;  %v7738_v1 = vadd.f32 %v7737_v28, %v7658_v0  ;;  %v17017_v0 = vld [vmem:[#allocation80_spill] sm:$0xff] }
 0x634   :  { %v6393_v7 = vpop.f32.mrf.mxu1  ;;  %v7018_v56 = vpop.f32.mrf.mxu0 }
 0x635   :  { %v6567_v61 = vadd.f32 %v6393_v7, %v17013_v10  ;;  %v14645_v8 = vadd.f32 %v7018_v56, %v6565_v33  ;;  %v7739_v13 = vadd.f32 %v7738_v1, %v7659_v55  ;;  %v14656_v7 = vpop.permute.xlu1 %7447  ;;  %v7662_v56 = vmul.f32 %v14542_v9, %v17017_v0  ;;  %v17019_v1 = vld [vmem:[#allocation15_spill] sm:$0xff] }
 0x636   :  { %v10718_v25 = vpop.f32.mrf.mxu1  ;;  %v10894_v36 = vpop.f32.mrf.mxu0  ;;  %17016 = vst [vmem:[#allocation14_spill] sm:$0xff] %v14656_v7  ;;  %v7663_v55 = vmul.f32 %v14551_v24, %v17018_v44  ;;  %v17024_v44 = vld [vmem:[#allocation16_spill] sm:$0xff] }
 0x637   :  { %v7740_v28 = vadd.f32 %v7739_v13, %v7660_v11 }
 0x638   :  { %v6398_v21 = vpop.f32.mrf.mxu1  ;;  %v7023_v31 = vpop.f32.mrf.mxu0 }
 0x639   :  { %v6568_v48 = vadd.f32 %v6398_v21, %v17015_v22  ;;  %v14654_v50 = vadd.f32 %v7023_v31, %v6566_v57  ;;  %v7741_v17 = vadd.f32 %v7740_v28, %v7661_v43  ;;  %v14665_v21 = vpop.permute.xlu0 %7452  ;;  %v14669_v9 = vpop.permute.xlu1 %7457  ;;  %v17023_v28 = vld [vmem:[#allocation87_spill] sm:$0xff] }
 0x63a   :  { %v10721_v33 = vpop.f32.mrf.mxu1  ;;  %v10897_v10 = vpop.f32.mrf.mxu0  ;;  %17020 = vst [vmem:[#allocation15_spill] sm:$0xff] %v14665_v21  ;;  %17022 = vst [vmem:[#allocation110_spill] sm:$0xff] %v14669_v9  ;;  %v7665_v24 = vmul.f32 %v14564_v51, %v17023_v28 }
 0x63b   :  { %v7742_v31 = vadd.f32 %v7741_v17, %v7662_v56  ;;  %v17021_v33 = vld [vmem:[#allocation85_spill] sm:$0xff] }
 0x63c   :  { %v6401_v25 = vpop.f32.mrf.mxu1  ;;  %v7026_v36 = vpop.f32.mrf.mxu0  ;;  %v7664_v11 = vmul.f32 %v14555_v30, %v17021_v33 }
 0x63d   :  { %v6569_v41 = vadd.f32 %v6401_v25, %v17019_v1  ;;  %v14663_v14 = vadd.f32 %v7026_v36, %v6567_v61  ;;  %v7743_v43 = vadd.f32 %v7742_v31, %v7663_v55  ;;  %v14678_v33 = vpop.permute.xlu0 %7462  ;;  %v7667_v55 = vmul.f32 %v14580_v15, %v17027_v4  ;;  %v17028_v31 = vld [vmem:[#allocation17_spill] sm:$0xff] }
 0x63e   :  { %v10722_v57 = vpop.f32.mrf.mxu1  ;;  %v10898_v22 = vpop.f32.mrf.mxu0  ;;  %17026 = vst [vmem:[#allocation16_spill] sm:$0xff] %v14678_v33 }
 0x63f   :  { %v7744_v57 = vadd.f32 %v7743_v43, %v7664_v11  ;;  %v17025_v22 = vld [vmem:[#allocation90_spill] sm:$0xff] }
 0x640   :  { %v6406_v13 = vpop.f32.mrf.mxu1  ;;  %v7031_v10 = vpop.f32.mrf.mxu0  ;;  %v7666_v17 = vmul.f32 %v14571_v27, %v17025_v22  ;;  %v17031_v22 = vld [vmem:[#allocation97_spill] sm:$0xff] }
 0x641   :  { %v6570_v25 = vadd.f32 %v6406_v13, %v17024_v44  ;;  %v14674_v61 = vadd.f32 %v7031_v10, %v6568_v48  ;;  %v7745_v0 = vadd.f32 %v7744_v57, %v7665_v24  ;;  %v14685_v13 = vpop.permute.xlu1 %7467  ;;  %v17030_v10 = vld [vmem:[#allocation94_spill] sm:$0xff]  ;;  %v7669_v24 = vmul.f32 %v14593_v35, %v17031_v22 }
 0x642   :  { %v10725_v36 = vpop.f32.mrf.mxu1  ;;  %v10901_v1 = vpop.f32.mrf.mxu0  ;;  %17029 = vst [vmem:[#allocation17_spill] sm:$0xff] %v14685_v13  ;;  %v7668_v43 = vmul.f32 %v14584_v6, %v17030_v10  ;;  %v17032_v57 = vld [vmem:[#allocation18_spill] sm:$0xff]  ;;  %v17037_v6 = vld [vmem:[#allocation19_spill] sm:$0xff] }
 0x643   :  { %v7746_v11 = vadd.f32 %v7745_v0, %v7666_v17  ;;  %v7670_v0 = vmul.f32 %v14600_v29, %v14515_v37 }
 0x644   :  { %v6409_v56 = vpop.f32.mrf.mxu1  ;;  %v7034_v30 = vpop.f32.mrf.mxu0 }
 0x645   :  { %v6571_v51 = vadd.f32 %v6409_v56, %v17028_v31  ;;  %v14683_v28 = vadd.f32 %v7034_v30, %v6569_v41  ;;  %v7747_v27 = vadd.f32 %v7746_v11, %v7667_v55  ;;  %v14694_v56 = vpop.permute.xlu0 %7472  ;;  %v17036_v11 = vld [vmem:[#allocation44_spill] sm:$0xff] }
 0x646   :  { %v10726_v44 = vpop.f32.mrf.mxu1  ;;  %v10902_v48 = vpop.f32.mrf.mxu0  ;;  %17034 = vst [vmem:[#allocation18_spill] sm:$0xff] %v14694_v56  ;;  %v7671_v35 = vmul.f32 %v14609_v19, %v17036_v11 }
 0x647   :  { %v7748_v31 = vadd.f32 %v7747_v27, %v7668_v43  ;;  %v14698_v48 = vpop.permute.xlu1 %7477 }
 0x648   :  { %v6414_v36 = vpop.f32.mrf.mxu1  ;;  %v7039_v1 = vpop.f32.mrf.mxu0  ;;  %17035 = vst [vmem:[#allocation111_spill] sm:$0xff] %v14698_v48 }
 0x649   :  { %v6572_v15 = vadd.f32 %v6414_v36, %v17032_v57  ;;  %v14692_v4 = vadd.f32 %v7039_v1, %v6570_v25  ;;  %v7749_v55 = vadd.f32 %v7748_v31, %v7669_v24  ;;  %v14707_v37 = vpop.permute.xlu0 %7482  ;;  %v7673_v24 = vmul.f32 %v14620_v20, %v14538_v16  ;;  %v17040_v31 = vld [vmem:[#allocation20_spill] sm:$0xff] }
 0x64a   :  { %v10729_v41 = vpop.f32.mrf.mxu1  ;;  %v10905_v30 = vpop.f32.mrf.mxu0  ;;  %17039 = vst [vmem:[#allocation19_spill] sm:$0xff] %v14707_v37 }
 0x64b   :  { %17033 = vst [vmem:[#allocation94_spill] sm:$0xff] %v14692_v4  ;;  %v7750_v41 = vadd.f32 %v7749_v55, %v7670_v0  ;;  %v17038_v30 = vld [vmem:[#allocation45_spill] sm:$0xff] }
 0x64c   :  { %v6417_v17 = vpop.f32.mrf.mxu1  ;;  %v7042_v44 = vpop.f32.mrf.mxu0  ;;  %v7672_v27 = vmul.f32 %v14613_v40, %v17038_v30 }
 0x64d   :  { %v6573_v36 = vadd.f32 %v6417_v17, %v17037_v6  ;;  %v14703_v25 = vadd.f32 %v7042_v44, %v6571_v51  ;;  %v7751_v22 = vadd.f32 %v7750_v41, %v7671_v35  ;;  %v14714_v17 = vpop.permute.xlu1 %7487  ;;  %v7674_v44 = vmul.f32 %v14629_v53, %v14547_v12  ;;  %v17042_v41 = vld [vmem:[#allocation21_spill] sm:$0xff] }
 0x64e   :  { %v10730_v1 = vpop.f32.mrf.mxu1  ;;  %v10906_v57 = vpop.f32.mrf.mxu0  ;;  %17041 = vst [vmem:[#allocation45_spill] sm:$0xff] %v14714_v17  ;;  %v7675_v35 = vmul.f32 %v14636_v23, %v14558_v49  ;;  %v17045_v23 = vld [vmem:[#allocation22_spill] sm:$0xff] }
 0x64f   :  { %v7752_v0 = vadd.f32 %v7751_v22, %v7672_v27  ;;  %v7676_v22 = vmul.f32 %v14640_v38, %v14567_v34 }
 0x650   :  { %v6422_v43 = vpop.f32.mrf.mxu1  ;;  %v7047_v29 = vpop.f32.mrf.mxu0 }
 0x651   :  { %v6574_v19 = vadd.f32 %v6422_v43, %v17040_v31  ;;  %v14712_v11 = vadd.f32 %v7047_v29, %v6572_v15  ;;  %v7753_v57 = vadd.f32 %v7752_v0, %v7673_v24  ;;  %v14723_v43 = vpop.permute.xlu0 %7492  ;;  %v7677_v0 = vmul.f32 %v14649_v59, %v14576_v3 }
 0x652   :  { %v10733_v51 = vpop.f32.mrf.mxu1  ;;  %v10909_v6 = vpop.f32.mrf.mxu0  ;;  %17043 = vst [vmem:[#allocation20_spill] sm:$0xff] %v14723_v43 }
 0x653   :  { %v7754_v31 = vadd.f32 %v7753_v57, %v7674_v44  ;;  %v14727_v6 = vpop.permute.xlu1 %7497  ;;  %v7678_v44 = vmul.f32 %v14656_v7, %v14587_v54 }
 0x654   :  { %v6425_v55 = vpop.f32.mrf.mxu1  ;;  %v7050_v1 = vpop.f32.mrf.mxu0  ;;  %17044 = vst [vmem:[#allocation21_spill] sm:$0xff] %v14727_v6 }
 0x655   :  { %v6575_v20 = vadd.f32 %v6425_v55, %v17042_v41  ;;  %v14721_v40 = vadd.f32 %v7050_v1, %v6573_v36  ;;  %v7755_v24 = vadd.f32 %v7754_v31, %v7675_v35  ;;  %v14736_v38 = vpop.permute.xlu0 %7502  ;;  %v7679_v35 = vmul.f32 %v14665_v21, %v14596_v45  ;;  %v17047_v31 = vld [vmem:[#allocation23_spill] sm:$0xff] }
 0x656   :  { %v10734_v15 = vpop.f32.mrf.mxu1  ;;  %v10910_v29 = vpop.f32.mrf.mxu0  ;;  %17046 = vst [vmem:[#allocation22_spill] sm:$0xff] %v14736_v38 }
 0x657   :  { %v7756_v15 = vadd.f32 %v7755_v24, %v7676_v22 }
 0x658   :  { %v6430_v27 = vpop.f32.mrf.mxu1  ;;  %v7055_v51 = vpop.f32.mrf.mxu0 }
 0x659   :  { %v6576_v55 = vadd.f32 %v6430_v27, %v17045_v23  ;;  %v14732_v36 = vadd.f32 %v7055_v51, %v6574_v19  ;;  %v7757_v53 = vadd.f32 %v7756_v15, %v7677_v0  ;;  %v14743_v27 = vpop.permute.xlu1 %7507  ;;  %v7680_v51 = vmul.f32 %v14669_v9, %v14605_v39  ;;  %v17049_v15 = vld [vmem:[#allocation24_spill] sm:$0xff] }
 0x65a   :  { %v10737_v1 = vpop.f32.mrf.mxu1  ;;  %v10913_v41 = vpop.f32.mrf.mxu0  ;;  %17048 = vst [vmem:[#allocation23_spill] sm:$0xff] %v14743_v27  ;;  %v7681_v0 = vmul.f32 %v14678_v33, %v14616_v47  ;;  %v17053_v33 = vld [vmem:[#allocation25_spill] sm:$0xff] }
 0x65b   :  { %v7758_v22 = vadd.f32 %v7757_v53, %v7678_v44  ;;  %v7682_v53 = vmul.f32 %v14685_v13, %v14625_v60 }
 0x65c   :  { %v6433_v57 = vpop.f32.mrf.mxu1  ;;  %v7058_v29 = vpop.f32.mrf.mxu0 }
 0x65d   :  { %v6577_v59 = vadd.f32 %v6433_v57, %v17047_v31  ;;  %v14741_v3 = vadd.f32 %v7058_v29, %v6575_v20  ;;  %v7759_v41 = vadd.f32 %v7758_v22, %v7679_v35  ;;  %v14752_v29 = vpop.permute.xlu0 %7512  ;;  %v7683_v22 = vmul.f32 %v14694_v56, %v14634_v18 }
 0x65e   :  { %v10738_v19 = vpop.f32.mrf.mxu1  ;;  %v10914_v23 = vpop.f32.mrf.mxu0  ;;  %17051 = vst [vmem:[#allocation112_spill] sm:$0xff] %v14752_v29 }
 0x65f   :  { %v7760_v31 = vadd.f32 %v7759_v41, %v7680_v51  ;;  %v14756_v23 = vpop.permute.xlu1 %7517  ;;  %v7684_v51 = vmul.f32 %v14698_v48, %v14645_v8 }
 0x660   :  { %v6438_v24 = vpop.f32.mrf.mxu1  ;;  %v7063_v1 = vpop.f32.mrf.mxu0  ;;  %17052 = vst [vmem:[#allocation113_spill] sm:$0xff] %v14756_v23 }
 0x661   :  { %v6578_v21 = vadd.f32 %v6438_v24, %v17049_v15  ;;  %v14750_v7 = vadd.f32 %v7063_v1, %v6576_v55  ;;  %v7761_v35 = vadd.f32 %v7760_v31, %v7681_v0  ;;  %v14765_v13 = vpop.permute.xlu0 %7522  ;;  %v7685_v0 = vmul.f32 %v14707_v37, %v14654_v50  ;;  %v17055_v31 = vld [vmem:[#allocation26_spill] sm:$0xff] }
 0x662   :  { %v10741_v20 = vpop.f32.mrf.mxu1  ;;  %v10917_v57 = vpop.f32.mrf.mxu0  ;;  %17054 = vst [vmem:[#allocation25_spill] sm:$0xff] %v14765_v13 }
 0x663   :  { %17050 = vst [vmem:[#allocation24_spill] sm:$0xff] %v14750_v7  ;;  %v7762_v20 = vadd.f32 %v7761_v35, %v7682_v53 }
 0x664   :  { %v6441_v44 = vpop.f32.mrf.mxu1  ;;  %v7066_v19 = vpop.f32.mrf.mxu0 }
 0x665   :  { %v6579_v24 = vadd.f32 %v6441_v44, %v17053_v33  ;;  %v14761_v55 = vadd.f32 %v7066_v19, %v6577_v59  ;;  %v7763_v9 = vadd.f32 %v7762_v20, %v7683_v22  ;;  %v14772_v44 = vpop.permute.xlu1 %7527  ;;  %v7686_v19 = vmul.f32 %v14714_v17, %v14663_v14  ;;  %v17057_v20 = vld [vmem:[#allocation27_spill] sm:$0xff] }
 0x666   :  { %v10742_v1 = vpop.f32.mrf.mxu1  ;;  %v10918_v15 = vpop.f32.mrf.mxu0  ;;  %17056 = vst [vmem:[#allocation26_spill] sm:$0xff] %v14772_v44  ;;  %v7687_v22 = vmul.f32 %v14723_v43, %v14674_v61  ;;  %v17061_v43 = vld [vmem:[#allocation28_spill] sm:$0xff] }
 0x667   :  { %v7764_v53 = vadd.f32 %v7763_v9, %v7684_v51  ;;  %v7688_v9 = vmul.f32 %v14727_v6, %v14683_v28 }
 0x668   :  { %v6446_v41 = vpop.f32.mrf.mxu1  ;;  %v7071_v57 = vpop.f32.mrf.mxu0 }
 0x669   :  { %v6580_v56 = vadd.f32 %v6446_v41, %v17055_v31  ;;  %v14770_v18 = vadd.f32 %v7071_v57, %v6578_v21  ;;  %v7765_v15 = vadd.f32 %v7764_v53, %v7685_v0  ;;  %v14781_v57 = vpop.permute.xlu0 %7532  ;;  %v7689_v53 = vmul.f32 %v14736_v38, %v14692_v4 }
 0x66a   :  { %v10745_v59 = vpop.f32.mrf.mxu1  ;;  %v10921_v33 = vpop.f32.mrf.mxu0  ;;  %17059 = vst [vmem:[#allocation114_spill] sm:$0xff] %v14781_v57 }
 0x66b   :  { %v7766_v31 = vadd.f32 %v7765_v15, %v7686_v19  ;;  %v14785_v33 = vpop.permute.xlu1 %7537  ;;  %v7690_v19 = vmul.f32 %v14743_v27, %v14703_v25 }
 0x66c   :  { %v6449_v35 = vpop.f32.mrf.mxu1  ;;  %v7074_v1 = vpop.f32.mrf.mxu0  ;;  %17060 = vst [vmem:[#allocation115_spill] sm:$0xff] %v14785_v33 }
 0x66d   :  { %v6581_v37 = vadd.f32 %v6449_v35, %v17057_v20  ;;  %v14779_v48 = vadd.f32 %v7074_v1, %v6579_v24  ;;  %v7767_v0 = vadd.f32 %v7766_v31, %v7687_v22  ;;  %v14794_v6 = vpop.permute.xlu0 %7542  ;;  %v7691_v22 = vmul.f32 %v14752_v29, %v14712_v11  ;;  %v17064_v31 = vld [vmem:[#allocation29_spill] sm:$0xff] }
 0x66e   :  { %v10746_v21 = vpop.f32.mrf.mxu1  ;;  %v10922_v41 = vpop.f32.mrf.mxu0  ;;  %17063 = vst [vmem:[#allocation116_spill] sm:$0xff] %v14794_v6 }
 0x66f   :  { %17058 = vst [vmem:[#allocation27_spill] sm:$0xff] %v14779_v48  ;;  %v7768_v21 = vadd.f32 %v7767_v0, %v7688_v9 }
 0x670   :  { %v6454_v51 = vpop.f32.mrf.mxu1  ;;  %v7079_v59 = vpop.f32.mrf.mxu0 }
 0x671   :  { %v6582_v35 = vadd.f32 %v6454_v51, %v17061_v43  ;;  %v14790_v24 = vadd.f32 %v7079_v59, %v6580_v56  ;;  %v7769_v17 = vadd.f32 %v7768_v21, %v7689_v53  ;;  %v14801_v51 = vpop.permute.xlu1 %7547  ;;  %v7692_v59 = vmul.f32 %v14756_v23, %v14721_v40  ;;  %v17067_v21 = vld [vmem:[#allocation30_spill] sm:$0xff] }
 0x672   :  { %v10749_v1 = vpop.f32.mrf.mxu1  ;;  %v10925_v20 = vpop.f32.mrf.mxu0  ;;  %17066 = vst [vmem:[#allocation117_spill] sm:$0xff] %v14801_v51  ;;  %v7693_v53 = vmul.f32 %v14765_v13, %v14732_v36  ;;  %v17071_v13 = vld [vmem:[#allocation31_spill] sm:$0xff] }
 0x673   :  { %17062 = vst [vmem:[#allocation28_spill] sm:$0xff] %v14790_v24  ;;  %v7770_v9 = vadd.f32 %v7769_v17, %v7690_v19  ;;  %v7694_v17 = vmul.f32 %v14772_v44, %v14741_v3 }
 0x674   :  { %v6457_v15 = vpop.f32.mrf.mxu1  ;;  %v7082_v41 = vpop.f32.mrf.mxu0 }
 0x675   :  { %v6583_v38 = vadd.f32 %v6457_v15, %v17064_v31  ;;  %v14799_v4 = vadd.f32 %v7082_v41, %v6581_v37  ;;  %v7771_v20 = vadd.f32 %v7770_v9, %v7691_v22  ;;  %v14810_v41 = vpop.permute.xlu0 %7552  ;;  %v7695_v9 = vmul.f32 %v14781_v57, %v14750_v7 }
 0x676   :  { %v10750_v56 = vpop.f32.mrf.mxu1  ;;  %v10926_v43 = vpop.f32.mrf.mxu0  ;;  %17069 = vst [vmem:[#allocation118_spill] sm:$0xff] %v14810_v41 }
 0x677   :  { %17065 = vst [vmem:[#allocation29_spill] sm:$0xff] %v14799_v4  ;;  %v7772_v31 = vadd.f32 %v7771_v20, %v7692_v59  ;;  %v14814_v43 = vpop.permute.xlu1 %7557  ;;  %v7696_v59 = vmul.f32 %v14785_v33, %v14761_v55 }
 0x678   :  { %v6462_v0 = vpop.f32.mrf.mxu1  ;;  %v7087_v1 = vpop.f32.mrf.mxu0  ;;  %17070 = vst [vmem:[#allocation119_spill] sm:$0xff] %v14814_v43 }
 0x679   :  { %v6584_v29 = vadd.f32 %v6462_v0, %v17067_v21  ;;  %v14808_v27 = vadd.f32 %v7087_v1, %v6582_v35  ;;  %v7773_v22 = vadd.f32 %v7772_v31, %v7693_v53  ;;  %v14823_v44 = vpop.permute.xlu0 %7562  ;;  %v7697_v53 = vmul.f32 %v14794_v6, %v14770_v18  ;;  %v17074_v31 = vld [vmem:[#allocation32_spill] sm:$0xff] }
 0x67a   :  { %v10753_v37 = vpop.f32.mrf.mxu1  ;;  %v10929_v15 = vpop.f32.mrf.mxu0  ;;  %17073 = vst [vmem:[#allocation120_spill] sm:$0xff] %v14823_v44 }
 0x67b   :  { %17068 = vst [vmem:[#allocation30_spill] sm:$0xff] %v14808_v27  ;;  %v7774_v37 = vadd.f32 %v7773_v22, %v7694_v17 }
 0x67c   :  { %v6465_v19 = vpop.f32.mrf.mxu1  ;;  %v7090_v56 = vpop.f32.mrf.mxu0 }
 0x67d   :  { %v6585_v0 = vadd.f32 %v6465_v19, %v17071_v13  ;;  %v14819_v35 = vadd.f32 %v7090_v56, %v6583_v38  ;;  %v7775_v23 = vadd.f32 %v7774_v37, %v7695_v9  ;;  %v14830_v19 = vpop.permute.xlu1 %7567  ;;  %v7698_v56 = vmul.f32 %v14801_v51, %v14779_v48  ;;  %v17077_v37 = vld [vmem:[#allocation33_spill] sm:$0xff] }
 0x67e   :  { %v10754_v1 = vpop.f32.mrf.mxu1  ;;  %v10930_v21 = vpop.f32.mrf.mxu0  ;;  %17076 = vst [vmem:[#allocation121_spill] sm:$0xff] %v14830_v19  ;;  %v7699_v9 = vmul.f32 %v14810_v41, %v14790_v24  ;;  %v17081_v41 = vld [vmem:[#allocation34_spill] sm:$0xff] }
 0x67f   :  { %17072 = vst [vmem:[#allocation31_spill] sm:$0xff] %v14819_v35  ;;  %v7776_v17 = vadd.f32 %v7775_v23, %v7696_v59  ;;  %v7700_v23 = vmul.f32 %v14814_v43, %v14799_v4 }
 0x680   :  { %v6470_v20 = vpop.f32.mrf.mxu1  ;;  %v7095_v15 = vpop.f32.mrf.mxu0 }
 0x681   :  { %v6586_v57 = vadd.f32 %v6470_v20, %v17074_v31  ;;  %v14828_v7 = vadd.f32 %v7095_v15, %v6584_v29  ;;  %v7777_v21 = vadd.f32 %v7776_v17, %v7697_v53  ;;  %v14839_v15 = vpop.permute.xlu0 %7572  ;;  %v7701_v17 = vmul.f32 %v14823_v44, %v14808_v27 }
 0x682   :  { %v10757_v38 = vpop.f32.mrf.mxu1  ;;  %v10933_v13 = vpop.f32.mrf.mxu0  ;;  %17079 = vst [vmem:[#allocation122_spill] sm:$0xff] %v14839_v15 }
 0x683   :  { %17075 = vst [vmem:[#allocation32_spill] sm:$0xff] %v14828_v7  ;;  %v7778_v31 = vadd.f32 %v7777_v21, %v7698_v56  ;;  %v14843_v13 = vpop.permute.xlu1 %7577  ;;  %v7702_v56 = vmul.f32 %v14830_v19, %v14819_v35 }
 0x684   :  { %v6473_v22 = vpop.f32.mrf.mxu1  ;;  %v7098_v1 = vpop.f32.mrf.mxu0  ;;  %17080 = vst [vmem:[#allocation123_spill] sm:$0xff] %v14843_v13 }
 0x685   :  { %v6587_v6 = vadd.f32 %v6473_v22, %v17077_v37  ;;  %v14837_v33 = vadd.f32 %v7098_v1, %v6585_v0  ;;  %v7779_v53 = vadd.f32 %v7778_v31, %v7699_v9  ;;  %v14852_v43 = vpop.permute.xlu0 %7582  ;;  %v7703_v9 = vmul.f32 %v14839_v15, %v14828_v7  ;;  %v17084_v31 = vld [vmem:[#allocation35_spill] sm:$0xff] }
 0x686   :  { %v10758_v29 = vpop.f32.mrf.mxu1  ;;  %v10934_v20 = vpop.f32.mrf.mxu0  ;;  %17083 = vst [vmem:[#allocation124_spill] sm:$0xff] %v14852_v43 }
 0x687   :  { %17078 = vst [vmem:[#allocation33_spill] sm:$0xff] %v14837_v33  ;;  %v7780_v29 = vadd.f32 %v7779_v53, %v7700_v23 }
 0x688   :  { %v6478_v59 = vpop.f32.mrf.mxu1  ;;  %v7103_v38 = vpop.f32.mrf.mxu0 }
 0x689   :  { %v6588_v22 = vadd.f32 %v6478_v59, %v17081_v41  ;;  %v14848_v0 = vadd.f32 %v7103_v38, %v6586_v57  ;;  %v7781_v51 = vadd.f32 %v7780_v29, %v7701_v17  ;;  %v14859_v59 = vpop.permute.xlu1 %7587  ;;  %v7704_v38 = vmul.f32 %v14843_v13, %v14837_v33  ;;  %v17087_v29 = vld [vmem:[#allocation36_spill] sm:$0xff] }
 0x68a   :  { %v10761_v1 = vpop.f32.mrf.mxu1  ;;  %v10937_v37 = vpop.f32.mrf.mxu0  ;;  %17086 = vst [vmem:[#allocation125_spill] sm:$0xff] %v14859_v59 }
 0x68b   :  { %17082 = vst [vmem:[#allocation34_spill] sm:$0xff] %v14848_v0  ;;  %v7782_v23 = vadd.f32 %v7781_v51, %v7702_v56  ;;  %v7705_v17 = vmul.f32 %v14852_v43, %v14848_v0  ;;  %v17091_v43 = vld [vmem:[#allocation52_spill] sm:$0xff] }
 0x68c   :  { %v6481_v21 = vpop.f32.mrf.mxu1  ;;  %v7106_v20 = vpop.f32.mrf.mxu0 }
 0x68d   :  { %v6589_v44 = vadd.f32 %v6481_v21, %v17084_v31  ;;  %v14857_v27 = vadd.f32 %v7106_v20, %v6587_v6  ;;  %v7783_v37 = vadd.f32 %v7782_v23, %v7703_v9  ;;  %v14868_v20 = vpop.permute.xlu0 %7592 }
 0x68e   :  { %v10762_v57 = vpop.f32.mrf.mxu1  ;;  %v10938_v41 = vpop.f32.mrf.mxu0  ;;  %17089 = vst [vmem:[#allocation126_spill] sm:$0xff] %v14868_v20 }
 0x68f   :  { %17085 = vst [vmem:[#allocation35_spill] sm:$0xff] %v14857_v27  ;;  %v7784_v31 = vadd.f32 %v7783_v37, %v7704_v38  ;;  %v7706_v51 = vmul.f32 %v14859_v59, %v14857_v27  ;;  %v14872_v41 = vpop.permute.xlu1 %7597  ;;  %v17093_v27 = vld [vmem:[#allocation53_spill] sm:$0xff] }
 0x690   :  { %v6486_v53 = vpop.f32.mrf.mxu1  ;;  %v7111_v1 = vpop.f32.mrf.mxu0  ;;  %17090 = vst [vmem:[#allocation127_spill] sm:$0xff] %v14872_v41 }
 0x691   :  { %v6590_v15 = vadd.f32 %v6486_v53, %v17087_v29  ;;  %v14866_v19 = vadd.f32 %v7111_v1, %v6588_v22  ;;  %v7785_v9 = vadd.f32 %v7784_v31, %v7705_v17  ;;  %v14881_v59 = vpop.permute.xlu0 %7602 }
 0x692   :  { %v10765_v6 = vpop.f32.mrf.mxu1  ;;  %v10941_v21 = vpop.f32.mrf.mxu0  ;;  %17092 = vst [vmem:[#allocation52_spill] sm:$0xff] %v14881_v59 }
 0x693   :  { %17088 = vst [vmem:[#allocation36_spill] sm:$0xff] %v14866_v19  ;;  %v7707_v23 = vmul.f32 %v14868_v20, %v14866_v19  ;;  %v7786_v6 = vadd.f32 %v7785_v9, %v7706_v51 }
 0x694   :  { %v6489_v56 = vpop.f32.mrf.mxu1  ;;  %v7114_v57 = vpop.f32.mrf.mxu0 }
 0x695   :  { %v6591_v53 = vadd.f32 %v6489_v56, %v17091_v43  ;;  %v14877_v22 = vadd.f32 %v7114_v57, %v6589_v44  ;;  %v7787_v13 = vadd.f32 %v7786_v6, %v7707_v23  ;;  %v14888_v57 = vpop.permute.xlu1 %7607 }
 0x696   :  { %v10766_v1 = vpop.f32.mrf.mxu1  ;;  %v10942_v29 = vpop.f32.mrf.mxu0  ;;  %17094 = vst [vmem:[#allocation53_spill] sm:$0xff] %v14888_v57 }
 0x697   :  { %v7708_v38 = vmul.f32 %v14872_v41, %v14877_v22  ;;  %v17095_v1 = vld [vmem:[#allocation54_spill] sm:$0xff] }
 0x698   :  { %v6494_v37 = vpop.f32.mrf.mxu1  ;;  %v7119_v21 = vpop.f32.mrf.mxu0 }
 0x699   :  { %v6592_v17 = vadd.f32 %v6494_v37, %v17093_v27  ;;  %v14884_v31 = vadd.f32 %v7119_v21, %v6590_v15  ;;  %v7788_v43 = vadd.f32 %v7787_v13, %v7708_v38  ;;  %v17097_v13 = vld [vmem:[#allocation55_spill] sm:$0xff] }
 0x69a   :  { %v10769_v20 = vpop.f32.mrf.mxu1  ;;  %v10945_v19 = vpop.f32.mrf.mxu0 }
 0x69b   :  { %v7709_v44 = vmul.f32 %v14881_v59, %v14884_v31  ;;  %v14892_v20 = vpop.permute.xlu0 %7612 }
 0x69c   :  { %v6497_v56 = vpop.f32.mrf.mxu1  ;;  %v7122_v51 = vpop.f32.mrf.mxu0  ;;  %17096 = vst [vmem:[#allocation54_spill] sm:$0xff] %v14892_v20 }
 0x69d   :  { %v7789_v9 = vadd.f32 %v7788_v43, %v7709_v44  ;;  %v6593_v29 = vadd.f32 %v6497_v56, %v17095_v1  ;;  %v7224_v41 = vadd.f32 %v7122_v51, %v6591_v53  ;;  %v14896_v56 = vpop.permute.xlu1 %7617 }
 0x69e   :  { %v10770_v0 = vpop.f32.mrf.mxu1  ;;  %v10946_v23 = vpop.f32.mrf.mxu0  ;;  %17098 = vst [vmem:[#allocation55_spill] sm:$0xff] %v14896_v56 }
 0x69f   :  { %v7710_v27 = vmul.f32 %v14888_v57, %v7224_v41 }
 0x6a0   :  { %v6502_v15 = vpop.f32.mrf.mxu1  ;;  %v7127_v6 = vpop.f32.mrf.mxu0 }
 0x6a1   :  { %v7790_v19 = vadd.f32 %v7789_v9, %v7710_v27  ;;  %v6594_v38 = vadd.f32 %v6502_v15, %v17097_v13  ;;  %v7225_v37 = vadd.f32 %v7127_v6, %v6592_v17  ;;  %v14899_v9 = vpop.permute.xlu0 %7622  ;;  %v17100_v6 = vld [vmem:[#allocation56_spill] sm:$0xff] }
 0x6a2   :  { %v10773_v21 = vpop.f32.mrf.mxu1  ;;  %v10949_v59 = vpop.f32.mrf.mxu0  ;;  %17099 = vst [vmem:[#allocation128_spill] sm:$0xff] %v14899_v9 }
 0x6a3   :  { %v7711_v33 = vmul.f32 %v14892_v20, %v7225_v37 }
 0x6a4   :  { %v6505_v43 = vpop.f32.mrf.mxu1  ;;  %v7130_v44 = vpop.f32.mrf.mxu0 }
 0x6a5   :  { %v7791_v0 = vadd.f32 %v7790_v19, %v7711_v33  ;;  %v7226_v53 = vadd.f32 %v7130_v44, %v6593_v29  ;;  %v6595_v13 = vadd.f32 %v6505_v43, %v17100_v6  ;;  %v14903_v33 = vpop.permute.xlu1 %7627 }
 0x6a6   :  { %v10774_v51 = vpop.f32.mrf.mxu1  ;;  %v10950_v1 = vpop.f32.mrf.mxu0 }
 0x6a7   :  { %v7712_v23 = vmul.f32 %v14896_v56, %v7226_v53  ;;  %v17101_v1 = vld [vmem:[#allocation57_spill] sm:$0xff] }
 0x6a8   :  { %v6510_v57 = vpop.f32.mrf.mxu1  ;;  %v7135_v7 = vpop.f32.mrf.mxu0 }
 0x6a9   :  { %v7792_v27 = vadd.f32 %v7791_v0, %v7712_v23  ;;  %v7227_v17 = vadd.f32 %v7135_v7, %v6594_v38  ;;  %v6596_v56 = vadd.f32 %v6510_v57, %v17101_v1  ;;  %v7633_v23 = vpop.permute.xlu0 %7632 }
 0x6aa   :  { %v10953_v15 = vpop.f32.mrf.mxu0  ;;  %v10777_v59 = vpop.f32.mrf.mxu1 }
 0x6ab   :  { %v7713_v21 = vmul.f32 %v14899_v9, %v7227_v17 }
 0x6ac   :  { %v7138_v20 = vpop.f32.mrf.mxu0  ;;  %v6513_v35 = vpop.f32.mrf.mxu1 }
 0x6ad   :  { %v7793_v29 = vadd.f32 %v7792_v27, %v7713_v21  ;;  %v7228_v19 = vadd.f32 %v7138_v20, %v6595_v13 }
 0x6ae   :  { %v10954_v44 = vpop.f32.mrf.mxu0  ;;  %v10778_v51 = vpop.f32.mrf.mxu1 }
 0x6af   :  { %v7714_v4 = vmul.f32 %v14903_v33, %v7228_v19 }
 0x6b0   :  { %v7143_v0 = vpop.f32.mrf.mxu0 }
 0x6b1   :  { %v7794_v7 = vadd.f32 %v7793_v29, %v7714_v4  ;;  %v7229_v38 = vadd.f32 %v7143_v0, %v6596_v56  ;;  %v17107_v0 = vld [vmem:[#allocation68_spill] sm:$0xff] }
 0x6b2   :  { %v10957_v15 = vpop.f32.mrf.mxu0 }
 0x6b3   :  { %v7715_v43 = vmul.f32 %v7633_v23, %v7229_v38  ;;  %v17109_v15 = vld [vmem:[#allocation66_spill] sm:$0xff] }
 0x6b4   :  { %v7146_v59 = vpop.f32.mrf.mxu0 }
 0x6b5   :  { %v7795_v6 = vadd.f32 %v7794_v7, %v7715_v43 }
 0x6b6   :  { %v10958_v9 = vpop.f32.mrf.mxu0 }
 0x6b7   :  { %v7796_v35 = vrot.slane %v7795_v6, 4 }
 0x6b9   :  { %v7797_v24 = vadd.f32 %v7796_v35, %v7795_v6 }
 0x6bb   :  { %v7798_v48 = vrot.slane %v7797_v24, 2 }
 0x6bd   :  { %v7799_v27 = vadd.f32 %v7798_v48, %v7797_v24 }
 0x6bf   :  { %v7800_v20 = vrot.slane %v7799_v27, 1 }
 0x6c1   :  { %v7801_v13 = vadd.f32 %v7800_v20, %v7799_v27  ;;  %v17110_v27 = vld [vmem:[#allocation70_spill] sm:$0xff] }
 0x6c3   :  { %v14907_v21 = vmul.f32 0.001953125, %v7801_v13  ;;  %v17111_v13 = vld [vmem:[#allocation61_spill] sm:$0xff] }
 0x6c5   :  { %v14911_v57 = vsub.f32 %v14877_v22, %v14907_v21  ;;  %v14915_v4 = vsub.f32 %v14884_v31, %v14907_v21  ;;  %v14918_v56 = vsub.f32 %v7224_v41, %v14907_v21  ;;  %v14921_v9 = vsub.f32 %v7225_v37, %v14907_v21  ;;  %v17103_v41 = vld [vmem:[#allocation58_spill] sm:$0xff]  ;;  %v17104_v37 = vld [vmem:[#allocation59_spill] sm:$0xff] }
 0x6c6   :  { %v14924_v48 = vsub.f32 %v7226_v53, %v14907_v21  ;;  %v14927_v24 = vsub.f32 %v7227_v17, %v14907_v21  ;;  %v14930_v29 = vsub.f32 %v7228_v19, %v14907_v21  ;;  %v14933_v22 = vsub.f32 %v7229_v38, %v14907_v21  ;;  %v17105_v17 = vld [vmem:[#allocation60_spill] sm:$0xff]  ;;  %v17106_v19 = vld [vmem:[#allocation65_spill] sm:$0xff] }
 0x6c7   :  { %v14940_v44 = vsub.f32 %v17103_v41, %v14907_v21  ;;  %v14944_v53 = vsub.f32 %v17104_v37, %v14907_v21  ;;  %v14948_v51 = vsub.f32 %v17105_v17, %v14907_v21  ;;  %v14956_v38 = vsub.f32 %v14235_v58, %v14907_v21  ;;  %v17112_v41 = vld [vmem:[#allocation72_spill] sm:$0xff] }
 0x6c8   :  { %17102 = vst [vmem:[#allocation56_spill] sm:$0xff] %v14927_v24  ;;  %v14936_v31 = vmul.f32 %v14933_v22, %v7633_v23  ;;  %v14960_v23 = vsub.f32 %v14241_v42, %v14907_v21  ;;  %v14966_v35 = vsub.f32 %v14254_v62, %v14907_v21  ;;  %v14972_v58 = vsub.f32 %v17111_v13, %v14907_v21 }
 0x6c9   :  { %v7884_v1 = vmul.f32 %v14940_v44, %v17106_v19  ;;  %v7885_v7 = vmul.f32 %v14944_v53, %v17107_v0  ;;  %17108 = vst [vmem:[#allocation57_spill] sm:$0xff] %v14956_v38  ;;  %v7886_v43 = vmul.f32 %v14948_v51, %v17109_v15  ;;  %v7887_v20 = vmul.f32 %v14956_v38, %v17110_v27  ;;  %v17115_v27 = vld [vmem:[#allocation74_spill] sm:$0xff] }
 0x6ca   :  { %v7888_v42 = vmul.f32 %v14960_v23, %v17112_v41  ;;  %v14978_v19 = vsub.f32 %v14269_v5, %v14907_v21  ;;  %v14984_v15 = vsub.f32 %v14275_v46, %v14907_v21  ;;  %v7890_v13 = vmul.f32 %v14972_v58, %v17115_v27  ;;  %v17116_v5 = vld [vmem:[#allocation75_spill] sm:$0xff]  ;;  %v17118_v46 = vld [vmem:[#allocation76_spill] sm:$0xff] }
 0x6cb   :  { %v7965_v59 = vmul.f32 %v7884_v1, %v7884_v1  ;;  %v7966_v6 = vmul.f32 %v7885_v7, %v7885_v7  ;;  %v7967_v37 = vmul.f32 %v7886_v43, %v7886_v43  ;;  %v17114_v1 = vld [vmem:[#allocation73_spill] sm:$0xff]  ;;  %v7968_v0 = vmul.f32 %v7887_v20, %v7887_v20 }
 0x6cc   :  { %17113 = vst [vmem:[#allocation58_spill] sm:$0xff] %v14978_v19  ;;  %v7889_v62 = vmul.f32 %v14966_v35, %v17114_v1  ;;  %v7969_v38 = vmul.f32 %v7888_v42, %v7888_v42  ;;  %v14990_v43 = vsub.f32 %v14288_v26, %v14907_v21  ;;  %v14996_v20 = vsub.f32 %v14295_v63, %v14907_v21  ;;  %v17120_v26 = vld [vmem:[#allocation77_spill] sm:$0xff]  ;;  %v17123_v63 = vld [vmem:[#allocation78_spill] sm:$0xff] }
 0x6cd   :  { %v8046_v17 = vadd.f32 %v7966_v6, %v7965_v59  ;;  %v7891_v59 = vmul.f32 %v14978_v19, %v17116_v5  ;;  %v15002_v42 = vsub.f32 %v14303_v52, %v14907_v21  ;;  %v17125_v52 = vld [vmem:[#allocation79_spill] sm:$0xff] }
 0x6ce   :  { %v7970_v6 = vmul.f32 %v7889_v62, %v7889_v62  ;;  %17117 = vst [vmem:[#allocation59_spill] sm:$0xff] %v14996_v20 }
 0x6cf   :  { %v8047_v7 = vadd.f32 %v8046_v17, %v7967_v37  ;;  %v7892_v37 = vmul.f32 %v14984_v15, %v17118_v46  ;;  %v7971_v17 = vmul.f32 %v7890_v13, %v7890_v13  ;;  %17119 = vst [vmem:[#allocation60_spill] sm:$0xff] %v15002_v42  ;;  %v15014_v13 = vsub.f32 %v14322_v2, %v14907_v21  ;;  %v17130_v2 = vld [vmem:[#allocation82_spill] sm:$0xff] }
 0x6d1   :  { %v8048_v41 = vadd.f32 %v8047_v7, %v7968_v0  ;;  %v7893_v0 = vmul.f32 %v14990_v43, %v17120_v26  ;;  %v7972_v7 = vmul.f32 %v7891_v59, %v7891_v59  ;;  %v7973_v19 = vmul.f32 %v7892_v37, %v7892_v37  ;;  %17124 = vst [vmem:[#allocation68_spill] sm:$0xff] %v15014_v13  ;;  %v17128_v37 = vld [vmem:[#allocation63_spill] sm:$0xff] }
 0x6d2   :  { %v15020_v59 = vsub.f32 %v14329_v32, %v14907_v21  ;;  %v17133_v32 = vld [vmem:[#allocation84_spill] sm:$0xff] }
 0x6d3   :  { %v8049_v1 = vadd.f32 %v8048_v41, %v7969_v38  ;;  %v17121_v38 = vld [vmem:[#allocation62_spill] sm:$0xff]  ;;  %v7894_v41 = vmul.f32 %v14996_v20, %v17123_v63 }
 0x6d4   :  { %v15008_v62 = vsub.f32 %v17121_v38, %v14907_v21  ;;  %17126 = vst [vmem:[#allocation66_spill] sm:$0xff] %v15020_v59 }
 0x6d5   :  { %v8050_v27 = vadd.f32 %v8049_v1, %v7970_v6  ;;  %v7895_v6 = vmul.f32 %v15002_v42, %v17125_v52  ;;  %v7974_v1 = vmul.f32 %v7893_v0, %v7893_v0  ;;  %v7975_v38 = vmul.f32 %v7894_v41, %v7894_v41  ;;  %v17134_v41 = vld [vmem:[#allocation37_spill] sm:$0xff] }
 0x6d6   :  { %17122 = vst [vmem:[#allocation65_spill] sm:$0xff] %v15008_v62 }
 0x6d7   :  { %v8051_v5 = vadd.f32 %v8050_v27, %v7971_v17  ;;  %v17127_v17 = vld [vmem:[#allocation81_spill] sm:$0xff]  ;;  %v7976_v20 = vmul.f32 %v7895_v6, %v7895_v6  ;;  %v17137_v6 = vld [vmem:[#allocation38_spill] sm:$0xff] }
 0x6d8   :  { %v7896_v27 = vmul.f32 %v15008_v62, %v17127_v17 }
 0x6d9   :  { %v8052_v46 = vadd.f32 %v8051_v5, %v7972_v7  ;;  %v15026_v7 = vsub.f32 %v17128_v37, %v14907_v21  ;;  %v7897_v5 = vmul.f32 %v15014_v13, %v17130_v2 }
 0x6da   :  { %v7977_v42 = vmul.f32 %v7896_v27, %v7896_v27 }
 0x6db   :  { %v8053_v26 = vadd.f32 %v8052_v46, %v7973_v19  ;;  %17129 = vst [vmem:[#allocation70_spill] sm:$0xff] %v15026_v7  ;;  %v17131_v19 = vld [vmem:[#allocation64_spill] sm:$0xff]  ;;  %v7898_v46 = vmul.f32 %v15020_v59, %v17133_v32  ;;  %v7978_v62 = vmul.f32 %v7897_v5, %v7897_v5 }
 0x6dc   :  { %v15032_v0 = vsub.f32 %v17131_v19, %v14907_v21 }
 0x6dd   :  { %v8054_v63 = vadd.f32 %v8053_v26, %v7974_v1  ;;  %v15038_v1 = vsub.f32 %v17134_v41, %v14907_v21  ;;  %v17136_v26 = vld [vmem:[#allocation86_spill] sm:$0xff]  ;;  %v7979_v13 = vmul.f32 %v7898_v46, %v7898_v46 }
 0x6de   :  { %17132 = vst [vmem:[#allocation61_spill] sm:$0xff] %v15032_v0  ;;  %v7899_v37 = vmul.f32 %v15026_v7, %v17136_v26 }
 0x6df   :  { %v8055_v52 = vadd.f32 %v8054_v63, %v7975_v38  ;;  %17135 = vst [vmem:[#allocation72_spill] sm:$0xff] %v15038_v1  ;;  %v15044_v38 = vsub.f32 %v17137_v6, %v14907_v21  ;;  %v17139_v63 = vld [vmem:[#allocation88_spill] sm:$0xff] }
 0x6e0   :  { %v7900_v19 = vmul.f32 %v15032_v0, %v17139_v63  ;;  %v7980_v59 = vmul.f32 %v7899_v37, %v7899_v37 }
 0x6e1   :  { %v8056_v17 = vadd.f32 %v8055_v52, %v7976_v20  ;;  %17138 = vst [vmem:[#allocation73_spill] sm:$0xff] %v15044_v38  ;;  %v17140_v20 = vld [vmem:[#allocation67_spill] sm:$0xff]  ;;  %v17142_v52 = vld [vmem:[#allocation89_spill] sm:$0xff] }
 0x6e2   :  { %v15050_v27 = vsub.f32 %v17140_v20, %v14907_v21  ;;  %v7901_v41 = vmul.f32 %v15038_v1, %v17142_v52  ;;  %v7981_v7 = vmul.f32 %v7900_v19, %v7900_v19 }
 0x6e3   :  { %v8057_v2 = vadd.f32 %v8056_v17, %v7977_v42  ;;  %v17143_v42 = vld [vmem:[#allocation69_spill] sm:$0xff]  ;;  %v17145_v17 = vld [vmem:[#allocation91_spill] sm:$0xff] }
 0x6e4   :  { %17141 = vst [vmem:[#allocation74_spill] sm:$0xff] %v15050_v27  ;;  %v15056_v5 = vsub.f32 %v17143_v42, %v14907_v21  ;;  %v7902_v6 = vmul.f32 %v15044_v38, %v17145_v17  ;;  %v7982_v0 = vmul.f32 %v7901_v41, %v7901_v41 }
 0x6e5   :  { %v8058_v32 = vadd.f32 %v8057_v2, %v7978_v62  ;;  %v17146_v62 = vld [vmem:[#allocation71_spill] sm:$0xff]  ;;  %v17148_v2 = vld [vmem:[#allocation93_spill] sm:$0xff] }
 0x6e6   :  { %17144 = vst [vmem:[#allocation75_spill] sm:$0xff] %v15056_v5  ;;  %v15062_v46 = vsub.f32 %v17146_v62, %v14907_v21  ;;  %v7903_v20 = vmul.f32 %v15050_v27, %v17148_v2  ;;  %v7983_v1 = vmul.f32 %v7902_v6, %v7902_v6 }
 0x6e7   :  { %v8059_v26 = vadd.f32 %v8058_v32, %v7979_v13  ;;  %v17149_v13 = vld [vmem:[#allocation39_spill] sm:$0xff] }
 0x6e8   :  { %17147 = vst [vmem:[#allocation76_spill] sm:$0xff] %v15062_v46  ;;  %v15068_v37 = vsub.f32 %v17149_v13, %v14907_v21  ;;  %v17151_v32 = vld [vmem:[#allocation95_spill] sm:$0xff]  ;;  %v7984_v38 = vmul.f32 %v7903_v20, %v7903_v20 }
 0x6e9   :  { %v8060_v63 = vadd.f32 %v8059_v26, %v7980_v59  ;;  %v7904_v42 = vmul.f32 %v15056_v5, %v17151_v32  ;;  %v17152_v59 = vld [vmem:[#allocation40_spill] sm:$0xff] }
 0x6ea   :  { %17150 = vst [vmem:[#allocation77_spill] sm:$0xff] %v15068_v37  ;;  %v15074_v19 = vsub.f32 %v17152_v59, %v14907_v21  ;;  %v17154_v26 = vld [vmem:[#allocation96_spill] sm:$0xff] }
 0x6eb   :  { %v8061_v52 = vadd.f32 %v8060_v63, %v7981_v7  ;;  %v7905_v62 = vmul.f32 %v15062_v46, %v17154_v26  ;;  %v17155_v7 = vld [vmem:[#allocation41_spill] sm:$0xff]  ;;  %v17157_v63 = vld [vmem:[#allocation98_spill] sm:$0xff]  ;;  %v7985_v27 = vmul.f32 %v7904_v42, %v7904_v42 }
 0x6ec   :  { %17153 = vst [vmem:[#allocation62_spill] sm:$0xff] %v15074_v19  ;;  %v15080_v41 = vsub.f32 %v17155_v7, %v14907_v21  ;;  %v7906_v13 = vmul.f32 %v15068_v37, %v17157_v63 }
 0x6ed   :  { %v8062_v17 = vadd.f32 %v8061_v52, %v7982_v0  ;;  %v17158_v0 = vld [vmem:[#allocation42_spill] sm:$0xff]  ;;  %v17160_v52 = vld [vmem:[#allocation100_spill] sm:$0xff]  ;;  %v7986_v5 = vmul.f32 %v7905_v62, %v7905_v62 }
 0x6ee   :  { %17156 = vst [vmem:[#allocation78_spill] sm:$0xff] %v15080_v41  ;;  %v15086_v6 = vsub.f32 %v17158_v0, %v14907_v21  ;;  %v7907_v59 = vmul.f32 %v15074_v19, %v17160_v52  ;;  %v7987_v46 = vmul.f32 %v7906_v13, %v7906_v13 }
 0x6ef   :  { %v8063_v2 = vadd.f32 %v8062_v17, %v7983_v1  ;;  %v17161_v1 = vld [vmem:[#allocation43_spill] sm:$0xff]  ;;  %v17163_v17 = vld [vmem:[#allocation101_spill] sm:$0xff] }
 0x6f0   :  { %17159 = vst [vmem:[#allocation79_spill] sm:$0xff] %v15086_v6  ;;  %v15092_v20 = vsub.f32 %v17161_v1, %v14907_v21  ;;  %v7908_v7 = vmul.f32 %v15080_v41, %v17163_v17  ;;  %v7988_v37 = vmul.f32 %v7907_v59, %v7907_v59 }
 0x6f1   :  { %v8064_v32 = vadd.f32 %v8063_v2, %v7984_v38  ;;  %v17164_v38 = vld [vmem:[#allocation80_spill] sm:$0xff]  ;;  %v17166_v2 = vld [vmem:[#allocation102_spill] sm:$0xff] }
 0x6f2   :  { %17162 = vst [vmem:[#allocation81_spill] sm:$0xff] %v15092_v20  ;;  %v15098_v42 = vsub.f32 %v17164_v38, %v14907_v21  ;;  %v7909_v0 = vmul.f32 %v15086_v6, %v17166_v2  ;;  %v7989_v19 = vmul.f32 %v7908_v7, %v7908_v7 }
 0x6f3   :  { %v8065_v26 = vadd.f32 %v8064_v32, %v7985_v27  ;;  %v17167_v27 = vld [vmem:[#allocation83_spill] sm:$0xff] }
 0x6f4   :  { %17165 = vst [vmem:[#allocation63_spill] sm:$0xff] %v15098_v42  ;;  %v15104_v62 = vsub.f32 %v17167_v27, %v14907_v21  ;;  %v17168_v32 = vld [vmem:[#allocation103_spill] sm:$0xff]  ;;  %v7990_v41 = vmul.f32 %v7909_v0, %v7909_v0 }
 0x6f5   :  { %v8066_v63 = vadd.f32 %v8065_v26, %v7986_v5  ;;  %v7910_v1 = vmul.f32 %v15092_v20, %v17168_v32  ;;  %v17169_v5 = vld [vmem:[#allocation85_spill] sm:$0xff]  ;;  %v17171_v26 = vld [vmem:[#allocation46_spill] sm:$0xff] }
 0x6f6   :  { %v15110_v13 = vsub.f32 %v17169_v5, %v14907_v21  ;;  %v7911_v38 = vmul.f32 %v15098_v42, %v17171_v26 }
 0x6f7   :  { %v8067_v52 = vadd.f32 %v8066_v63, %v7987_v46  ;;  %v17172_v46 = vld [vmem:[#allocation87_spill] sm:$0xff]  ;;  %v7991_v6 = vmul.f32 %v7910_v1, %v7910_v1  ;;  %v17180_v1 = vld [vmem:[#allocation49_spill] sm:$0xff] }
 0x6f8   :  { %17170 = vst [vmem:[#allocation82_spill] sm:$0xff] %v15110_v13  ;;  %v15116_v59 = vsub.f32 %v17172_v46, %v14907_v21  ;;  %v17174_v63 = vld [vmem:[#allocation47_spill] sm:$0xff]  ;;  %v7992_v20 = vmul.f32 %v7911_v38, %v7911_v38 }
 0x6f9   :  { %v8068_v17 = vadd.f32 %v8067_v52, %v7988_v37  ;;  %v7912_v27 = vmul.f32 %v15104_v62, %v17174_v63  ;;  %v17175_v37 = vld [vmem:[#allocation90_spill] sm:$0xff]  ;;  %v17177_v52 = vld [vmem:[#allocation104_spill] sm:$0xff] }
 0x6fa   :  { %17173 = vst [vmem:[#allocation64_spill] sm:$0xff] %v15116_v59  ;;  %v15122_v7 = vsub.f32 %v17175_v37, %v14907_v21  ;;  %v7913_v5 = vmul.f32 %v15110_v13, %v17177_v52 }
 0x6fb   :  { %v8069_v2 = vadd.f32 %v8068_v17, %v7989_v19  ;;  %v17178_v19 = vld [vmem:[#allocation92_spill] sm:$0xff]  ;;  %v7993_v42 = vmul.f32 %v7912_v27, %v7912_v27 }
 0x6fc   :  { %17176 = vst [vmem:[#allocation84_spill] sm:$0xff] %v15122_v7  ;;  %v15128_v0 = vsub.f32 %v17178_v19, %v14907_v21  ;;  %v17179_v17 = vld [vmem:[#allocation48_spill] sm:$0xff]  ;;  %v7994_v37 = vmul.f32 %v7913_v5, %v7913_v5 }
 0x6fd   :  { %v8070_v32 = vadd.f32 %v8069_v2, %v7990_v41  ;;  %v7914_v46 = vmul.f32 %v15116_v59, %v17179_v17  ;;  %v15134_v41 = vsub.f32 %v17030_v10, %v14907_v21  ;;  %v7915_v2 = vmul.f32 %v15122_v7, %v17180_v1  ;;  %v17184_v10 = vld [vmem:[#allocation106_spill] sm:$0xff] }
 0x6ff   :  { %v8071_v26 = vadd.f32 %v8070_v32, %v7991_v6  ;;  %v17181_v6 = vld [vmem:[#allocation97_spill] sm:$0xff]  ;;  %v7995_v13 = vmul.f32 %v7914_v46, %v7914_v46  ;;  %v7996_v59 = vmul.f32 %v7915_v2, %v7915_v2  ;;  %v15158_v46 = vsub.f32 %v17038_v30, %v14907_v21  ;;  %v17190_v30 = vld [vmem:[#allocation107_spill] sm:$0xff] }
 0x700   :  { %v15140_v38 = vsub.f32 %v17181_v6, %v14907_v21  ;;  %v17182_v32 = vld [vmem:[#allocation105_spill] sm:$0xff] }
 0x701   :  { %v8072_v63 = vadd.f32 %v8071_v26, %v7992_v20  ;;  %v7916_v19 = vmul.f32 %v15128_v0, %v17182_v32  ;;  %v17183_v20 = vld [vmem:[#allocation99_spill] sm:$0xff]  ;;  %v7917_v26 = vmul.f32 %v15134_v41, %v17184_v10  ;;  %17187 = vst [vmem:[#allocation37_spill] sm:$0xff] %v15158_v46  ;;  %v17189_v2 = vld [vmem:[#allocation9_spill] sm:$0xff] }
 0x702   :  { %v15146_v27 = vsub.f32 %v17183_v20, %v14907_v21 }
 0x703   :  { %v8073_v52 = vadd.f32 %v8072_v63, %v7993_v42  ;;  %v17185_v42 = vld [vmem:[#allocation44_spill] sm:$0xff]  ;;  %v17186_v63 = vld [vmem:[#allocation51_spill] sm:$0xff]  ;;  %v7997_v7 = vmul.f32 %v7916_v19, %v7916_v19  ;;  %v7998_v20 = vmul.f32 %v7917_v26, %v7917_v26  ;;  %v7921_v19 = vmul.f32 %v15158_v46, %v17190_v30 }
 0x704   :  { %v15152_v5 = vsub.f32 %v17185_v42, %v14907_v21  ;;  %v7918_v6 = vmul.f32 %v15140_v38, %v17186_v63 }
 0x705   :  { %v8074_v17 = vadd.f32 %v8073_v52, %v7994_v37  ;;  %v17188_v37 = vld [vmem:[#allocation8_spill] sm:$0xff] }
 0x706   :  { %v7919_v52 = vmul.f32 %v15146_v27, %v17188_v37  ;;  %v7999_v42 = vmul.f32 %v7918_v6, %v7918_v6  ;;  %v15182_v6 = vsub.f32 %v14567_v34, %v14907_v21  ;;  %v17196_v34 = vld [vmem:[#allocation109_spill] sm:$0xff] }
 0x707   :  { %v8075_v1 = vadd.f32 %v8074_v17, %v7995_v13  ;;  %v15164_v13 = vsub.f32 %v14538_v16, %v14907_v21  ;;  %v7920_v17 = vmul.f32 %v15152_v5, %v17189_v2  ;;  %v17191_v16 = vld [vmem:[#allocation10_spill] sm:$0xff] }
 0x709   :  { %v8076_v32 = vadd.f32 %v8075_v1, %v7996_v59  ;;  %v15170_v59 = vsub.f32 %v14547_v12, %v14907_v21  ;;  %v8000_v1 = vmul.f32 %v7919_v52, %v7919_v52  ;;  %v7922_v26 = vmul.f32 %v15164_v13, %v17191_v16  ;;  %v17192_v12 = vld [vmem:[#allocation11_spill] sm:$0xff]  ;;  %v17193_v52 = vld [vmem:[#allocation50_spill] sm:$0xff] }
 0x70b   :  { %v8077_v10 = vadd.f32 %v8076_v32, %v7997_v7  ;;  %v15176_v7 = vsub.f32 %v14558_v49, %v14907_v21  ;;  %v8001_v32 = vmul.f32 %v7920_v17, %v7920_v17  ;;  %v17194_v49 = vld [vmem:[#allocation108_spill] sm:$0xff]  ;;  %v8003_v46 = vmul.f32 %v7922_v26, %v7922_v26 }
 0x70c   :  { %v15194_v17 = vsub.f32 %v14587_v54, %v14907_v21  ;;  %v15206_v26 = vsub.f32 %v14605_v39, %v14907_v21  ;;  %v17198_v54 = vld [vmem:[#allocation14_spill] sm:$0xff] }
 0x70d   :  { %v8078_v63 = vadd.f32 %v8077_v10, %v7998_v20  ;;  %v7923_v20 = vmul.f32 %v15170_v59, %v17192_v12  ;;  %v8002_v10 = vmul.f32 %v7921_v19, %v7921_v19  ;;  %v15200_v19 = vsub.f32 %v14596_v45, %v14907_v21  ;;  %v17199_v45 = vld [vmem:[#allocation15_spill] sm:$0xff]  ;;  %v17200_v39 = vld [vmem:[#allocation110_spill] sm:$0xff] }
 0x70e   :  { %17195 = vst [vmem:[#allocation86_spill] sm:$0xff] %v15194_v17 }
 0x70f   :  { %v8079_v37 = vadd.f32 %v8078_v63, %v7999_v42  ;;  %v15188_v42 = vsub.f32 %v17193_v52, %v14907_v21  ;;  %v7924_v63 = vmul.f32 %v15176_v7, %v17194_v49 }
 0x711   :  { %v8080_v2 = vadd.f32 %v8079_v37, %v8000_v1  ;;  %v7925_v1 = vmul.f32 %v15182_v6, %v17196_v34  ;;  %v8004_v37 = vmul.f32 %v7923_v20, %v7923_v20  ;;  %v8005_v52 = vmul.f32 %v7924_v63, %v7924_v63 }
 0x712   :  { %v7928_v20 = vmul.f32 %v15200_v19, %v17199_v45  ;;  %v15218_v63 = vsub.f32 %v14625_v60, %v14907_v21  ;;  %v17204_v60 = vld [vmem:[#allocation17_spill] sm:$0xff] }
 0x713   :  { %v8081_v30 = vadd.f32 %v8080_v2, %v8001_v32  ;;  %v17197_v32 = vld [vmem:[#allocation13_spill] sm:$0xff] }
 0x714   :  { %v7926_v2 = vmul.f32 %v15188_v42, %v17197_v32 }
 0x715   :  { %v8082_v16 = vadd.f32 %v8081_v30, %v8002_v10  ;;  %v7927_v10 = vmul.f32 %v15194_v17, %v17198_v54  ;;  %v8006_v30 = vmul.f32 %v7925_v1, %v7925_v1  ;;  %v17201_v1 = vld [vmem:[#allocation12_spill] sm:$0xff]  ;;  %v8009_v17 = vmul.f32 %v7928_v20, %v7928_v20 }
 0x716   :  { %v15242_v20 = vsub.f32 %v14663_v14, %v14907_v21  ;;  %v17208_v14 = vld [vmem:[#allocation45_spill] sm:$0xff] }
 0x717   :  { %v8083_v12 = vadd.f32 %v8082_v16, %v8003_v46  ;;  %v15212_v46 = vsub.f32 %v14616_v47, %v14907_v21  ;;  %v8007_v16 = vmul.f32 %v7926_v2, %v7926_v2  ;;  %v17202_v47 = vld [vmem:[#allocation16_spill] sm:$0xff]  ;;  %v15230_v2 = vsub.f32 %v14645_v8, %v14907_v21  ;;  %v17206_v8 = vld [vmem:[#allocation111_spill] sm:$0xff] }
 0x719   :  { %v8084_v49 = vadd.f32 %v8083_v12, %v8004_v37  ;;  %v7929_v37 = vmul.f32 %v15206_v26, %v17200_v39  ;;  %v8008_v12 = vmul.f32 %v7927_v10, %v7927_v10  ;;  %17203 = vst [vmem:[#allocation38_spill] sm:$0xff] %v15230_v2  ;;  %v15236_v10 = vsub.f32 %v14654_v50, %v14907_v21  ;;  %v17207_v50 = vld [vmem:[#allocation19_spill] sm:$0xff] }
 0x71b   :  { %v8085_v34 = vadd.f32 %v8084_v49, %v8005_v52  ;;  %v15224_v52 = vsub.f32 %v17201_v1, %v14907_v21  ;;  %v7930_v49 = vmul.f32 %v15212_v46, %v17202_v47 }
 0x71d   :  { %v8086_v32 = vadd.f32 %v8085_v34, %v8006_v30  ;;  %v7931_v30 = vmul.f32 %v15218_v63, %v17204_v60  ;;  %v8010_v34 = vmul.f32 %v7929_v37, %v7929_v37  ;;  %v8011_v1 = vmul.f32 %v7930_v49, %v7930_v49 }
 0x71e   :  { %v7934_v37 = vmul.f32 %v15236_v10, %v17207_v50  ;;  %v15254_v49 = vsub.f32 %v14683_v28, %v14907_v21  ;;  %v17212_v28 = vld [vmem:[#allocation21_spill] sm:$0xff] }
 0x71f   :  { %v8087_v54 = vadd.f32 %v8086_v32, %v8007_v16  ;;  %v17205_v16 = vld [vmem:[#allocation18_spill] sm:$0xff] }
 0x720   :  { %v7932_v32 = vmul.f32 %v15224_v52, %v17205_v16 }
 0x721   :  { %v8088_v45 = vadd.f32 %v8087_v54, %v8008_v12  ;;  %v7933_v12 = vmul.f32 %v15230_v2, %v17206_v8  ;;  %v8012_v54 = vmul.f32 %v7931_v30, %v7931_v30  ;;  %v17209_v30 = vld [vmem:[#allocation94_spill] sm:$0xff]  ;;  %v8015_v2 = vmul.f32 %v7934_v37, %v7934_v37 }
 0x722   :  { %v15278_v37 = vsub.f32 %v14721_v40, %v14907_v21  ;;  %v17219_v40 = vld [vmem:[#allocation113_spill] sm:$0xff] }
 0x723   :  { %v8089_v39 = vadd.f32 %v8088_v45, %v8009_v17  ;;  %v15248_v17 = vsub.f32 %v14674_v61, %v14907_v21  ;;  %v8013_v45 = vmul.f32 %v7932_v32, %v7932_v32  ;;  %v17210_v61 = vld [vmem:[#allocation20_spill] sm:$0xff]  ;;  %v15266_v32 = vsub.f32 %v14703_v25, %v14907_v21  ;;  %v17215_v25 = vld [vmem:[#allocation23_spill] sm:$0xff] }
 0x724   :  { %17214 = vst [vmem:[#allocation67_spill] sm:$0xff] %v15278_v37 }
 0x725   :  { %v8090_v47 = vadd.f32 %v8089_v39, %v8010_v34  ;;  %v7935_v34 = vmul.f32 %v15242_v20, %v17208_v14  ;;  %v8014_v39 = vmul.f32 %v7933_v12, %v7933_v12  ;;  %17211 = vst [vmem:[#allocation88_spill] sm:$0xff] %v15266_v32  ;;  %v15272_v12 = vsub.f32 %v14712_v11, %v14907_v21  ;;  %v17217_v11 = vld [vmem:[#allocation112_spill] sm:$0xff] }
 0x727   :  { %v8091_v60 = vadd.f32 %v8090_v47, %v8011_v1  ;;  %v15260_v1 = vsub.f32 %v17209_v30, %v14907_v21  ;;  %v7936_v47 = vmul.f32 %v15248_v17, %v17210_v61 }
 0x729   :  { %v8092_v16 = vadd.f32 %v8091_v60, %v8012_v54  ;;  %v7937_v54 = vmul.f32 %v15254_v49, %v17212_v28  ;;  %v8016_v60 = vmul.f32 %v7935_v34, %v7935_v34  ;;  %v8017_v30 = vmul.f32 %v7936_v47, %v7936_v47 }
 0x72a   :  { %v7940_v34 = vmul.f32 %v15272_v12, %v17217_v11  ;;  %v15290_v47 = vsub.f32 %v14741_v3, %v14907_v21  ;;  %v17224_v3 = vld [vmem:[#allocation26_spill] sm:$0xff] }
 0x72b   :  { %v8093_v8 = vadd.f32 %v8092_v16, %v8013_v45  ;;  %v17213_v45 = vld [vmem:[#allocation22_spill] sm:$0xff] }
 0x72c   :  { %v7938_v16 = vmul.f32 %v15260_v1, %v17213_v45  ;;  %17218 = vst [vmem:[#allocation69_spill] sm:$0xff] %v15290_v47 }
 0x72d   :  { %v8094_v50 = vadd.f32 %v8093_v8, %v8014_v39  ;;  %v7939_v39 = vmul.f32 %v15266_v32, %v17215_v25  ;;  %v8018_v8 = vmul.f32 %v7937_v54, %v7937_v54  ;;  %v17220_v54 = vld [vmem:[#allocation24_spill] sm:$0xff]  ;;  %v8021_v32 = vmul.f32 %v7940_v34, %v7940_v34  ;;  %v17227_v34 = vld [vmem:[#allocation27_spill] sm:$0xff] }
 0x72f   :  { %v8095_v14 = vadd.f32 %v8094_v50, %v8015_v2  ;;  %v15284_v2 = vsub.f32 %v14732_v36, %v14907_v21  ;;  %v8019_v50 = vmul.f32 %v7938_v16, %v7938_v16  ;;  %v17222_v36 = vld [vmem:[#allocation25_spill] sm:$0xff]  ;;  %v15302_v16 = vsub.f32 %v14761_v55, %v14907_v21  ;;  %v17229_v55 = vld [vmem:[#allocation115_spill] sm:$0xff] }
 0x731   :  { %v8096_v61 = vadd.f32 %v8095_v14, %v8016_v60  ;;  %17216 = vst [vmem:[#allocation89_spill] sm:$0xff] %v15284_v2  ;;  %v7941_v60 = vmul.f32 %v15278_v37, %v17219_v40  ;;  %v8020_v14 = vmul.f32 %v7939_v39, %v7939_v39  ;;  %17223 = vst [vmem:[#allocation71_spill] sm:$0xff] %v15302_v16 }
 0x732   :  { %v15308_v39 = vsub.f32 %v14770_v18, %v14907_v21  ;;  %v17232_v18 = vld [vmem:[#allocation116_spill] sm:$0xff] }
 0x733   :  { %v8097_v28 = vadd.f32 %v8096_v61, %v8017_v30  ;;  %v15296_v30 = vsub.f32 %v17220_v54, %v14907_v21  ;;  %v7942_v61 = vmul.f32 %v15284_v2, %v17222_v36 }
 0x734   :  { %17225 = vst [vmem:[#allocation93_spill] sm:$0xff] %v15308_v39 }
 0x735   :  { %v8098_v45 = vadd.f32 %v8097_v28, %v8018_v8  ;;  %17221 = vst [vmem:[#allocation91_spill] sm:$0xff] %v15296_v30  ;;  %v7943_v8 = vmul.f32 %v15290_v47, %v17224_v3  ;;  %v8022_v28 = vmul.f32 %v7941_v60, %v7941_v60  ;;  %v8023_v54 = vmul.f32 %v7942_v61, %v7942_v61  ;;  %v17233_v61 = vld [vmem:[#allocation29_spill] sm:$0xff] }
 0x737   :  { %v8099_v25 = vadd.f32 %v8098_v45, %v8019_v50  ;;  %v17226_v50 = vld [vmem:[#allocation114_spill] sm:$0xff]  ;;  %v8024_v2 = vmul.f32 %v7943_v8, %v7943_v8 }
 0x738   :  { %v7944_v45 = vmul.f32 %v15296_v30, %v17226_v50  ;;  %v17236_v8 = vld [vmem:[#allocation30_spill] sm:$0xff] }
 0x739   :  { %v8100_v11 = vadd.f32 %v8099_v25, %v8020_v14  ;;  %v15314_v14 = vsub.f32 %v17227_v34, %v14907_v21  ;;  %v7945_v25 = vmul.f32 %v15302_v16, %v17229_v55 }
 0x73a   :  { %v8025_v47 = vmul.f32 %v7944_v45, %v7944_v45 }
 0x73b   :  { %v8101_v40 = vadd.f32 %v8100_v11, %v8021_v32  ;;  %17228 = vst [vmem:[#allocation39_spill] sm:$0xff] %v15314_v14  ;;  %v17230_v32 = vld [vmem:[#allocation28_spill] sm:$0xff]  ;;  %v7946_v11 = vmul.f32 %v15308_v39, %v17232_v18  ;;  %v8026_v30 = vmul.f32 %v7945_v25, %v7945_v25 }
 0x73c   :  { %v15320_v60 = vsub.f32 %v17230_v32, %v14907_v21 }
 0x73d   :  { %v8102_v36 = vadd.f32 %v8101_v40, %v8022_v28  ;;  %v15326_v28 = vsub.f32 %v17233_v61, %v14907_v21  ;;  %v17235_v40 = vld [vmem:[#allocation117_spill] sm:$0xff]  ;;  %v8027_v16 = vmul.f32 %v7946_v11, %v7946_v11 }
 0x73e   :  { %17231 = vst [vmem:[#allocation95_spill] sm:$0xff] %v15320_v60  ;;  %v7947_v34 = vmul.f32 %v15314_v14, %v17235_v40 }
 0x73f   :  { %v8103_v3 = vadd.f32 %v8102_v36, %v8023_v54  ;;  %17234 = vst [vmem:[#allocation40_spill] sm:$0xff] %v15326_v28  ;;  %v15332_v54 = vsub.f32 %v17236_v8, %v14907_v21  ;;  %v17238_v36 = vld [vmem:[#allocation118_spill] sm:$0xff] }
 0x740   :  { %v7948_v32 = vmul.f32 %v15320_v60, %v17238_v36  ;;  %v8028_v39 = vmul.f32 %v7947_v34, %v7947_v34 }
 0x741   :  { %v8104_v50 = vadd.f32 %v8103_v3, %v8024_v2  ;;  %17237 = vst [vmem:[#allocation96_spill] sm:$0xff] %v15332_v54  ;;  %v17239_v2 = vld [vmem:[#allocation31_spill] sm:$0xff] }
 0x742   :  { %v15338_v45 = vsub.f32 %v17239_v2, %v14907_v21  ;;  %v17241_v3 = vld [vmem:[#allocation119_spill] sm:$0xff]  ;;  %v8029_v14 = vmul.f32 %v7948_v32, %v7948_v32 }
 0x743   :  { %v8105_v55 = vadd.f32 %v8104_v50, %v8025_v47  ;;  %v7949_v61 = vmul.f32 %v15326_v28, %v17241_v3  ;;  %v17242_v47 = vld [vmem:[#allocation32_spill] sm:$0xff] }
 0x744   :  { %17240 = vst [vmem:[#allocation41_spill] sm:$0xff] %v15338_v45  ;;  %v15344_v25 = vsub.f32 %v17242_v47, %v14907_v21  ;;  %v17244_v50 = vld [vmem:[#allocation120_spill] sm:$0xff] }
 0x745   :  { %v8106_v18 = vadd.f32 %v8105_v55, %v8026_v30  ;;  %v7950_v8 = vmul.f32 %v15332_v54, %v17244_v50  ;;  %v17245_v30 = vld [vmem:[#allocation33_spill] sm:$0xff]  ;;  %v8030_v60 = vmul.f32 %v7949_v61, %v7949_v61 }
 0x746   :  { %17243 = vst [vmem:[#allocation98_spill] sm:$0xff] %v15344_v25  ;;  %v15350_v11 = vsub.f32 %v17245_v30, %v14907_v21  ;;  %v17247_v55 = vld [vmem:[#allocation121_spill] sm:$0xff] }
 0x747   :  { %v8107_v40 = vadd.f32 %v8106_v18, %v8027_v16  ;;  %v7951_v2 = vmul.f32 %v15338_v45, %v17247_v55  ;;  %v17248_v16 = vld [vmem:[#allocation34_spill] sm:$0xff]  ;;  %v8031_v28 = vmul.f32 %v7950_v8, %v7950_v8  ;;  %v17254_v8 = vld [vmem:[#allocation125_spill] sm:$0xff] }
 0x748   :  { %17246 = vst [vmem:[#allocation42_spill] sm:$0xff] %v15350_v11  ;;  %v15356_v34 = vsub.f32 %v17248_v16, %v14907_v21  ;;  %v17249_v18 = vld [vmem:[#allocation122_spill] sm:$0xff] }
 0x749   :  { %v8108_v36 = vadd.f32 %v8107_v40, %v8028_v39  ;;  %v7952_v47 = vmul.f32 %v15344_v25, %v17249_v18  ;;  %v17250_v39 = vld [vmem:[#allocation35_spill] sm:$0xff]  ;;  %v8032_v54 = vmul.f32 %v7951_v2, %v7951_v2  ;;  %v17255_v25 = vld [vmem:[#allocation126_spill] sm:$0xff] }
 0x74a   :  { %v15362_v32 = vsub.f32 %v17250_v39, %v14907_v21  ;;  %v17251_v40 = vld [vmem:[#allocation123_spill] sm:$0xff] }
 0x74b   :  { %v8109_v3 = vadd.f32 %v8108_v36, %v8029_v14  ;;  %v7953_v30 = vmul.f32 %v15350_v11, %v17251_v40  ;;  %v17252_v14 = vld [vmem:[#allocation36_spill] sm:$0xff]  ;;  %v8033_v45 = vmul.f32 %v7952_v47, %v7952_v47 }
 0x74c   :  { %v15368_v61 = vsub.f32 %v17252_v14, %v14907_v21  ;;  %v17253_v36 = vld [vmem:[#allocation124_spill] sm:$0xff] }
 0x74d   :  { %v8110_v50 = vadd.f32 %v8109_v3, %v8030_v60  ;;  %v7954_v16 = vmul.f32 %v15356_v34, %v17253_v36  ;;  %v7955_v60 = vmul.f32 %v15362_v32, %v17254_v8  ;;  %v8034_v3 = vmul.f32 %v7953_v30, %v7953_v30  ;;  %v17257_v11 = vld [vmem:[#allocation52_spill] sm:$0xff] }
 0x74e   :  { %v7956_v37 = vmul.f32 %v15368_v61, %v17255_v25  ;;  %v7958_v36 = vmul.f32 %v14915_v4, %v17257_v11 }
 0x74f   :  { %v8111_v55 = vadd.f32 %v8110_v50, %v8031_v28  ;;  %v8035_v40 = vmul.f32 %v7954_v16, %v7954_v16  ;;  %v17256_v28 = vld [vmem:[#allocation127_spill] sm:$0xff]  ;;  %v8036_v21 = vmul.f32 %v7955_v60, %v7955_v60 }
 0x750   :  { %v7957_v50 = vmul.f32 %v14911_v57, %v17256_v28  ;;  %v8037_v47 = vmul.f32 %v7956_v37, %v7956_v37  ;;  %v8039_v16 = vmul.f32 %v7958_v36, %v7958_v36 }
 0x751   :  { %v8112_v18 = vadd.f32 %v8111_v55, %v8032_v54  ;;  %v17258_v55 = vld [vmem:[#allocation53_spill] sm:$0xff] }
 0x752   :  { %v7959_v8 = vmul.f32 %v14918_v56, %v17258_v55  ;;  %v8038_v30 = vmul.f32 %v7957_v50, %v7957_v50 }
 0x753   :  { %v8113_v39 = vadd.f32 %v8112_v18, %v8033_v45  ;;  %v17259_v18 = vld [vmem:[#allocation54_spill] sm:$0xff] }
 0x754   :  { %v7960_v25 = vmul.f32 %v14921_v9, %v17259_v18  ;;  %v8040_v60 = vmul.f32 %v7959_v8, %v7959_v8 }
 0x755   :  { %v8114_v2 = vadd.f32 %v8113_v39, %v8034_v3  ;;  %v17260_v39 = vld [vmem:[#allocation55_spill] sm:$0xff] }
 0x756   :  { %v7961_v28 = vmul.f32 %v14924_v48, %v17260_v39  ;;  %v8041_v37 = vmul.f32 %v7960_v25, %v7960_v25 }
 0x757   :  { %v8115_v14 = vadd.f32 %v8114_v2, %v8035_v40  ;;  %v17261_v2 = vld [vmem:[#allocation128_spill] sm:$0xff] }
 0x758   :  { %v7962_v11 = vmul.f32 %v14927_v24, %v17261_v2  ;;  %v8042_v50 = vmul.f32 %v7961_v28, %v7961_v28  ;;  %v15397_v28 = vld [vmem:[%s16460_s2] ss:$0 sm:$0xff] }
 0x759   :  { %v8116_v54 = vadd.f32 %v8115_v14, %v8036_v21  ;;  %v7963_v14 = vmul.f32 %v14930_v29, %v14903_v33 }
 0x75b   :  { %v8117_v45 = vadd.f32 %v8116_v54, %v8037_v47  ;;  %v8043_v54 = vmul.f32 %v7962_v11, %v7962_v11  ;;  %v8044_v18 = vmul.f32 %v7963_v14, %v7963_v14  ;;  %v17263_v14 = vld [vmem:[#allocation57_spill] sm:$0xff] }
 0x75d   :  { %v8118_v3 = vadd.f32 %v8117_v45, %v8038_v30  ;;  %v8045_v30 = vmul.f32 %v14936_v31, %v14936_v31 }
 0x75f   :  { %v8119_v40 = vadd.f32 %v8118_v3, %v8039_v16 }
 0x761   :  { %v8120_v21 = vadd.f32 %v8119_v40, %v8040_v60 }
 0x763   :  { %v8121_v47 = vadd.f32 %v8120_v21, %v8041_v37  ;;  %v15416_v21 = vld [vmem:[%s16460_s2 + $0x1] ss:$0 sm:$0xff]  ;;  %s11357_s2 = smov [#allocation5]  }
 0x764   :  { %17262 = vst [vmem:[#allocation100_spill] sm:$0xff] %v15416_v21  ;;  %s8555_s27 = sshll.u32 %s11357_s2, 4  ;;  %s16444_s27 = int_to_ptr.vmem [resolvable:$true] %s8555_s27 }
 0x765   :  { %v8122_v55 = vadd.f32 %v8121_v47, %v8042_v50  ;;  %v17264_v47 = vld [vmem:[#allocation58_spill] sm:$0xff]  ;;  %s11327_s28 = scalar_lea.vmem %s16444_s27, 10368  ;;  %p11332_p6 = scmp.lt.s32.totalorder %s16444_s27, %s16444_s27 }
 0x766   :  { %p11328_p5 = scmp.ne.s32.totalorder %s16444_s27, %s11327_s28  ;;  %p11333_p7 = scmp.lt.s32.totalorder %s11327_s28, %s11327_s28 }
 0x767   :  { %v8123_v36 = vadd.f32 %v8122_v55, %v8043_v54 }
 0x768   :  { %p11334_p8 = por %p11333_p7, %p11332_p6 }
 0x769   :  { %v8124_v45 = vadd.f32 %v8123_v36, %v8044_v18 }
 0x76a   :  { %p11335_p9 = pnand %p11334_p8, %p11328_p5 }
 0x76b   :  { %v8125_v8 = vadd.f32 %v8124_v45, %v8045_v30  ;;  %v17267_v30 = vld [vmem:[#allocation65_spill] sm:$0xff] }
 0x76d   :  { %v8126_v16 = vrot.slane %v8125_v8, 4 }
 0x76f   :  { %v8127_v3 = vadd.f32 %v8126_v16, %v8125_v8  ;;  %v17268_v8 = vld [vmem:[#allocation68_spill] sm:$0xff] }
 0x771   :  { %v8128_v39 = vrot.slane %v8127_v3, 2 }
 0x773   :  { %v8129_v2 = vadd.f32 %v8128_v39, %v8127_v3  ;;  %v17270_v39 = vld [vmem:[#allocation70_spill] sm:$0xff] }
 0x775   :  { %v8130_v25 = vrot.slane %v8129_v2, 1 }
 0x777   :  { %v8131_v60 = vadd.f32 %v8130_v25, %v8129_v2  ;;  %v17271_v25 = vld [vmem:[#allocation61_spill] sm:$0xff] }
 0x779   :  { %v8132_v40 = vmul.f32 0.001953125, %v8131_v60 }
 0x77b   :  { %v8133_v24 = vadd.f32 1e-05, %v8132_v40  ;;  %v17272_v40 = vld [vmem:[#allocation72_spill] sm:$0xff] }
 0x77d   :  { %11187 = vrsqrt.f32 %v8133_v24 }
 0x78a   :  { %v15392_v33 = vpop.eup %11187 }
 0x78b   :  { %v8215_v31 = vmul.f32 %v15392_v33, %v14933_v22  ;;  %v15403_v11 = vmul.f32 %v15392_v33, %v14940_v44  ;;  %v15407_v37 = vmul.f32 %v15392_v33, %v14944_v53  ;;  %v15411_v24 = vmul.f32 %v15392_v33, %v14948_v51 }
 0x78c   :  { %v15420_v22 = vmul.f32 %v15392_v33, %v17263_v14  ;;  %v15424_v44 = vmul.f32 %v15392_v33, %v14960_v23  ;;  %v15428_v53 = vmul.f32 %v15392_v33, %v14966_v35  ;;  %v15432_v51 = vmul.f32 %v15392_v33, %v14972_v58  ;;  %v17265_v35 = vld [vmem:[#allocation59_spill] sm:$0xff]  ;;  %v17266_v58 = vld [vmem:[#allocation60_spill] sm:$0xff]  ;;  %v17273_v14 = vld [vmem:[#allocation73_spill] sm:$0xff] }
 0x78d   :  { %v8301_v50 = vmul.f32 %v15397_v28, %v8215_v31  ;;  %v15437_v54 = vmul.f32 %v15392_v33, %v17264_v47  ;;  %v15441_v55 = vmul.f32 %v15392_v33, %v14984_v15  ;;  %v15445_v23 = vmul.f32 %v15392_v33, %v14990_v43  ;;  %v17269_v43 = vld [vmem:[#allocation66_spill] sm:$0xff] }
 0x78e   :  { %v15449_v18 = vmul.f32 %v15392_v33, %v17265_v35  ;;  %v15453_v36 = vmul.f32 %v15392_v33, %v17266_v58  ;;  %v15457_v45 = vmul.f32 %v15392_v33, %v17267_v30  ;;  %v15461_v15 = vmul.f32 %v15392_v33, %v17268_v8  ;;  %v17277_v58 = vld [vmem:[#allocation75_spill] sm:$0xff] }
 0x78f   :  { %v8387_v16 = vadd.f32 %v15416_v21, %v8301_v50  ;;  %v15466_v3 = vmul.f32 %v15392_v33, %v17269_v43  ;;  %v15470_v2 = vmul.f32 %v15392_v33, %v17270_v39  ;;  %v15474_v60 = vmul.f32 %v15392_v33, %v17271_v25  ;;  %v17275_v50 = vld [vmem:[#allocation74_spill] sm:$0xff]  ;;  %v17278_v43 = vld [vmem:[#allocation76_spill] sm:$0xff]  ;;  %v17280_v25 = vld [vmem:[#allocation77_spill] sm:$0xff] }
 0x790   :  { %v15478_v31 = vmul.f32 %v15392_v33, %v17272_v40  ;;  %v15482_v47 = vmul.f32 %v15392_v33, %v17273_v14  ;;  %v15486_v35 = vmul.f32 %v15392_v33, %v17275_v50  ;;  %v15490_v30 = vmul.f32 %v15392_v33, %v17277_v58  ;;  %v17281_v21 = vld [vmem:[#allocation62_spill] sm:$0xff] }
 0x791   :  { %v8468_v8 = vmax.f32 %v8387_v16, 0.0  ;;  %v15494_v39 = vmul.f32 %v15392_v33, %v17278_v43  ;;  %v15498_v40 = vmul.f32 %v15392_v33, %v17280_v25  ;;  %v15502_v14 = vmul.f32 %v15392_v33, %v17281_v21  ;;  %v17287_v16 = vld [vmem:[#allocation81_spill] sm:$0xff] }
 0x792   :  { %17274 = vst [vmem:[#allocation43_spill] sm:$0xff] %v15482_v47  ;;  %17276 = vst [vmem:[#allocation101_spill] sm:$0xff] %v15486_v35  ;;  %v17283_v47 = vld [vmem:[#allocation78_spill] sm:$0xff]  ;;  %v17285_v35 = vld [vmem:[#allocation79_spill] sm:$0xff]  ;;  %v15514_v43 = vmul.f32 %v15392_v33, %v17287_v16  ;;  %v15522_v21 = vmul.f32 %v15392_v33, %v15104_v62  ;;  %v15542_v62 = vmul.f32 %v15392_v33, %v15134_v41 }
 0x793   :  { %17279 = vst [vmem:[#allocation80_spill] sm:$0xff] %v15494_v39  ;;  %17282 = vst [vmem:[#allocation102_spill] sm:$0xff] %v15502_v14  ;;  %v15506_v50 = vmul.f32 %v15392_v33, %v17283_v47  ;;  %v15510_v58 = vmul.f32 %v15392_v33, %v17285_v35  ;;  %v17288_v39 = vld [vmem:[#allocation63_spill] sm:$0xff]  ;;  %v17289_v14 = vld [vmem:[#allocation82_spill] sm:$0xff]  ;;  %v15562_v41 = vmul.f32 %v15392_v33, %v15164_v13 }
 0x794   :  { %v15518_v25 = vmul.f32 %v15392_v33, %v17288_v39  ;;  %8549 = vst [vmem:[#allocation5 + $0x280] sm:$0xff] %v8468_v8  ;;  %v15526_v47 = vmul.f32 %v15392_v33, %v17289_v14  ;;  %v15538_v39 = vmul.f32 %v15392_v33, %v15128_v0  ;;  %v15546_v8 = vmul.f32 %v15392_v33, %v15140_v38 }
 0x795   :  { %17284 = vst [vmem:[#allocation83_spill] sm:$0xff] %v15506_v50  ;;  %17286 = vst [vmem:[#allocation103_spill] sm:$0xff] %v15510_v58  ;;  %v17290_v50 = vld [vmem:[#allocation64_spill] sm:$0xff]  ;;  %v15550_v14 = vmul.f32 %v15392_v33, %v15146_v27  ;;  %v15566_v38 = vmul.f32 %v15392_v33, %v15170_v59  ;;  %v15570_v27 = vmul.f32 %v15392_v33, %v15176_v7 }
 0x796   :  { %v15530_v35 = vmul.f32 %v15392_v33, %v17290_v50  ;;  %v17291_v58 = vld [vmem:[#allocation84_spill] sm:$0xff]  ;;  %v15554_v50 = vmul.f32 %v15392_v33, %v15152_v5  ;;  %v15574_v5 = vmul.f32 %v15392_v33, %v15182_v6  ;;  %v15586_v59 = vmul.f32 %v15392_v33, %v15200_v19 }
 0x797   :  { %v15534_v16 = vmul.f32 %v15392_v33, %v17291_v58  ;;  %v17292_v58 = vld [vmem:[#allocation37_spill] sm:$0xff]  ;;  %v15590_v7 = vmul.f32 %v15392_v33, %v15206_v26  ;;  %v15594_v6 = vmul.f32 %v15392_v33, %v15212_v46  ;;  %v15610_v26 = vmul.f32 %v15392_v33, %v15236_v10 }
 0x798   :  { %v15558_v0 = vmul.f32 %v15392_v33, %v17292_v58  ;;  %v15578_v58 = vmul.f32 %v15392_v33, %v15188_v42  ;;  %v15598_v42 = vmul.f32 %v15392_v33, %v15218_v63  ;;  %v15614_v46 = vmul.f32 %v15392_v33, %v15242_v20 }
 0x799   :  { %v15618_v63 = vmul.f32 %v15392_v33, %v15248_v17  ;;  %v15634_v20 = vmul.f32 %v15392_v33, %v15272_v12 }
 0x79a   :  { %17293 = vst [vmem:[#allocation85_spill] sm:$0xff] %v15558_v0  ;;  %v17294_v0 = vld [vmem:[#allocation86_spill] sm:$0xff]  ;;  %17298 = vst [vmem:[#allocation47_spill] sm:$0xff] %v15614_v46  ;;  %v17305_v46 = vld [vmem:[#allocation67_spill] sm:$0xff] }
 0x79b   :  { %v15582_v13 = vmul.f32 %v15392_v33, %v17294_v0  ;;  %v15602_v0 = vmul.f32 %v15392_v33, %v15224_v52  ;;  %17299 = vst [vmem:[#allocation90_spill] sm:$0xff] %v15618_v63  ;;  %v15622_v52 = vmul.f32 %v15392_v33, %v15254_v49  ;;  %17304 = vst [vmem:[#allocation49_spill] sm:$0xff] %v15634_v20  ;;  %v17307_v63 = vld [vmem:[#allocation89_spill] sm:$0xff] }
 0x79c   :  { %v15638_v17 = vmul.f32 %v15392_v33, %v17305_v46  ;;  %v15642_v49 = vmul.f32 %v15392_v33, %v17307_v63  ;;  %v17315_v20 = vld [vmem:[#allocation93_spill] sm:$0xff] }
 0x79d   :  { %17295 = vst [vmem:[#allocation46_spill] sm:$0xff] %v15582_v13  ;;  %v17296_v13 = vld [vmem:[#allocation38_spill] sm:$0xff]  ;;  %17300 = vst [vmem:[#allocation104_spill] sm:$0xff] %v15622_v52  ;;  %v17309_v52 = vld [vmem:[#allocation69_spill] sm:$0xff]  ;;  %v15658_v46 = vmul.f32 %v15392_v33, %v17315_v20 }
 0x79e   :  { %v15606_v19 = vmul.f32 %v15392_v33, %v17296_v13  ;;  %v15626_v13 = vmul.f32 %v15392_v33, %v15260_v1  ;;  %17306 = vst [vmem:[#allocation97_spill] sm:$0xff] %v15638_v17  ;;  %17308 = vst [vmem:[#allocation105_spill] sm:$0xff] %v15642_v49  ;;  %v15646_v1 = vmul.f32 %v15392_v33, %v17309_v52  ;;  %v17317_v17 = vld [vmem:[#allocation39_spill] sm:$0xff] }
 0x79f   :  { %17316 = vst [vmem:[#allocation51_spill] sm:$0xff] %v15658_v46  ;;  %v15662_v63 = vmul.f32 %v15392_v33, %v17317_v17  ;;  %v17319_v49 = vld [vmem:[#allocation95_spill] sm:$0xff]  ;;  %v17323_v46 = vld [vmem:[#allocation98_spill] sm:$0xff] }
 0x7a0   :  { %17297 = vst [vmem:[#allocation87_spill] sm:$0xff] %v15606_v19  ;;  %17301 = vst [vmem:[#allocation92_spill] sm:$0xff] %v15626_v13  ;;  %v17302_v19 = vld [vmem:[#allocation88_spill] sm:$0xff]  ;;  %v17311_v13 = vld [vmem:[#allocation91_spill] sm:$0xff]  ;;  %v15666_v52 = vmul.f32 %v15392_v33, %v17319_v49  ;;  %v15682_v17 = vmul.f32 %v15392_v33, %v17323_v46  ;;  %v15702_v46 = vmul.f32 %v15392_v33, %v14911_v57 }
 0x7a1   :  { %v15630_v10 = vmul.f32 %v15392_v33, %v17302_v19  ;;  %17310 = vst [vmem:[#allocation99_spill] sm:$0xff] %v15646_v1  ;;  %v15650_v19 = vmul.f32 %v15392_v33, %v17311_v13  ;;  %17318 = vst [vmem:[#allocation8_spill] sm:$0xff] %v15662_v63  ;;  %v17320_v1 = vld [vmem:[#allocation40_spill] sm:$0xff]  ;;  %v17324_v63 = vld [vmem:[#allocation42_spill] sm:$0xff] }
 0x7a2   :  { %v15670_v13 = vmul.f32 %v15392_v33, %v17320_v1  ;;  %v15686_v49 = vmul.f32 %v15392_v33, %v17324_v63  ;;  %v15690_v1 = vmul.f32 %v15392_v33, %v15356_v34  ;;  %v15706_v63 = vmul.f32 %v15392_v33, %v14915_v4 }
 0x7a3   :  { %17303 = vst [vmem:[#allocation48_spill] sm:$0xff] %v15630_v10  ;;  %17312 = vst [vmem:[#allocation106_spill] sm:$0xff] %v15650_v19  ;;  %v17313_v10 = vld [vmem:[#allocation71_spill] sm:$0xff]  ;;  %v17321_v19 = vld [vmem:[#allocation96_spill] sm:$0xff]  ;;  %v15710_v34 = vmul.f32 %v15392_v33, %v14918_v56  ;;  %v15726_v4 = vmul.f32 %v15392_v33, %v14930_v29  ;;  %v15730_v56 = vmul.f32 %v15397_v28, %v15403_v11 }
 0x7a4   :  { %v15654_v12 = vmul.f32 %v15392_v33, %v17313_v10  ;;  %v15674_v10 = vmul.f32 %v15392_v33, %v17321_v19  ;;  %v15694_v19 = vmul.f32 %v15392_v33, %v15362_v32  ;;  %v15714_v32 = vmul.f32 %v15392_v33, %v14921_v9 }
 0x7a5   :  { %v15734_v9 = vmul.f32 %v15397_v28, %v15407_v37  ;;  %v15746_v29 = vmul.f32 %v15397_v28, %v15424_v44  ;;  %v15754_v11 = vmul.f32 %v15397_v28, %v15432_v51  ;;  %v15758_v37 = vmul.f32 %v15397_v28, %v15437_v54 }
 0x7a6   :  { %17314 = vst [vmem:[#allocation44_spill] sm:$0xff] %v15654_v12  ;;  %v17322_v12 = vld [vmem:[#allocation41_spill] sm:$0xff]  ;;  %v15770_v44 = vmul.f32 %v15397_v28, %v15449_v18  ;;  %v15778_v51 = vmul.f32 %v15397_v28, %v15457_v45  ;;  %v15782_v54 = vmul.f32 %v15397_v28, %v15461_v15  ;;  %v15794_v18 = vmul.f32 %v15397_v28, %v15474_v60  ;;  %v17330_v45 = vld [vmem:[#allocation43_spill] sm:$0xff] }
 0x7a7   :  { %v15678_v20 = vmul.f32 %v15392_v33, %v17322_v12  ;;  %v15698_v12 = vmul.f32 %v15392_v33, %v15368_v61  ;;  %v15718_v61 = vmul.f32 %v15392_v33, %v14924_v48  ;;  %v15738_v48 = vmul.f32 %v15397_v28, %v15411_v24 }
 0x7a8   :  { %v15762_v24 = vmul.f32 %v15397_v28, %v15441_v55  ;;  %17327 = vst [vmem:[#allocation107_spill] sm:$0xff] %v15782_v54  ;;  %v15786_v55 = vmul.f32 %v15397_v28, %v15466_v3  ;;  %v15802_v15 = vmul.f32 %v15397_v28, %v17330_v45  ;;  %v17332_v54 = vld [vmem:[#allocation101_spill] sm:$0xff] }
 0x7a9   :  { %17325 = vst [vmem:[#allocation9_spill] sm:$0xff] %v15698_v12  ;;  %v17326_v12 = vld [vmem:[#allocation56_spill] sm:$0xff]  ;;  %v15806_v3 = vmul.f32 %v15397_v28, %v17332_v54 }
 0x7aa   :  { %v15722_v57 = vmul.f32 %v15392_v33, %v17326_v12  ;;  %v15742_v12 = vmul.f32 %v15397_v28, %v15420_v22  ;;  %v15750_v33 = vmul.f32 %v15397_v28, %v15428_v53  ;;  %v15766_v22 = vmul.f32 %v15397_v28, %v15445_v23  ;;  %17331 = vst [vmem:[#allocation50_spill] sm:$0xff] %v15802_v15  ;;  %v17336_v15 = vld [vmem:[#allocation83_spill] sm:$0xff] }
 0x7ab   :  { %v15774_v53 = vmul.f32 %v15397_v28, %v15453_v36  ;;  %v15790_v23 = vmul.f32 %v15397_v28, %v15470_v2  ;;  %v15798_v36 = vmul.f32 %v15397_v28, %v15478_v31  ;;  %17333 = vst [vmem:[#allocation108_spill] sm:$0xff] %v15806_v3  ;;  %v15810_v2 = vmul.f32 %v15397_v28, %v15490_v30  ;;  %v17337_v3 = vld [vmem:[#allocation103_spill] sm:$0xff] }
 0x7ac   :  { %v15818_v31 = vmul.f32 %v15397_v28, %v15498_v40  ;;  %v15826_v54 = vmul.f32 %v15397_v28, %v17336_v15  ;;  %v15830_v30 = vmul.f32 %v15397_v28, %v17337_v3  ;;  %v15838_v40 = vmul.f32 %v15397_v28, %v15518_v25 }
 0x7ad   :  { %17328 = vst [vmem:[#allocation10_spill] sm:$0xff] %v15790_v23  ;;  %17329 = vst [vmem:[#allocation11_spill] sm:$0xff] %v15798_v36  ;;  %v17334_v23 = vld [vmem:[#allocation80_spill] sm:$0xff]  ;;  %v17335_v36 = vld [vmem:[#allocation102_spill] sm:$0xff]  ;;  %v15846_v15 = vmul.f32 %v15397_v28, %v15526_v47  ;;  %v15850_v3 = vmul.f32 %v15397_v28, %v15530_v35  ;;  %v15858_v25 = vmul.f32 %v15397_v28, %v15538_v39 }
 0x7ae   :  { %v15814_v60 = vmul.f32 %v15397_v28, %v17334_v23  ;;  %v15822_v45 = vmul.f32 %v15397_v28, %v17335_v36  ;;  %v15834_v23 = vmul.f32 %v15397_v28, %v15514_v43  ;;  %v15842_v36 = vmul.f32 %v15397_v28, %v15522_v21 }
 0x7af   :  { %v15854_v43 = vmul.f32 %v15397_v28, %v15534_v16  ;;  %v15862_v21 = vmul.f32 %v15397_v28, %v15542_v62  ;;  %v15866_v47 = vmul.f32 %v15397_v28, %v15546_v8  ;;  %v15870_v35 = vmul.f32 %v15397_v28, %v15550_v14 }
 0x7b0   :  { %v15874_v16 = vmul.f32 %v15397_v28, %v15554_v50  ;;  %v15882_v62 = vmul.f32 %v15397_v28, %v15562_v41  ;;  %v15886_v8 = vmul.f32 %v15397_v28, %v15566_v38  ;;  %v15890_v14 = vmul.f32 %v15397_v28, %v15570_v27 }
 0x7b1   :  { %17338 = vst [vmem:[#allocation109_spill] sm:$0xff] %v15854_v43  ;;  %v17339_v43 = vld [vmem:[#allocation85_spill] sm:$0xff]  ;;  %v15894_v50 = vmul.f32 %v15397_v28, %v15574_v5  ;;  %v15906_v38 = vmul.f32 %v15397_v28, %v15586_v59  ;;  %v15910_v27 = vmul.f32 %v15397_v28, %v15590_v7  ;;  %v15914_v5 = vmul.f32 %v15397_v28, %v15594_v6 }
 0x7b2   :  { %v15878_v39 = vmul.f32 %v15397_v28, %v17339_v43  ;;  %v15898_v43 = vmul.f32 %v15397_v28, %v15578_v58  ;;  %v15918_v58 = vmul.f32 %v15397_v28, %v15598_v42  ;;  %v15930_v7 = vmul.f32 %v15397_v28, %v15610_v26 }
 0x7b3   :  { %17343 = vst [vmem:[#allocation15_spill] sm:$0xff] %v15910_v27  ;;  %17344 = vst [vmem:[#allocation110_spill] sm:$0xff] %v15914_v5  ;;  %v17350_v27 = vld [vmem:[#allocation47_spill] sm:$0xff]  ;;  %v17352_v5 = vld [vmem:[#allocation90_spill] sm:$0xff] }
 0x7b4   :  { %17340 = vst [vmem:[#allocation13_spill] sm:$0xff] %v15878_v39  ;;  %v17341_v39 = vld [vmem:[#allocation46_spill] sm:$0xff]  ;;  %17345 = vst [vmem:[#allocation12_spill] sm:$0xff] %v15918_v58  ;;  %v15934_v6 = vmul.f32 %v15397_v28, %v17350_v27  ;;  %v15938_v42 = vmul.f32 %v15397_v28, %v17352_v5  ;;  %v17354_v58 = vld [vmem:[#allocation104_spill] sm:$0xff] }
 0x7b5   :  { %v15902_v41 = vmul.f32 %v15397_v28, %v17341_v39  ;;  %v15922_v39 = vmul.f32 %v15397_v28, %v15602_v0  ;;  %17349 = vst [vmem:[#allocation18_spill] sm:$0xff] %v15930_v7  ;;  %v15942_v0 = vmul.f32 %v15397_v28, %v17354_v58  ;;  %v17360_v7 = vld [vmem:[#allocation49_spill] sm:$0xff] }
 0x7b6   :  { %17351 = vst [vmem:[#allocation111_spill] sm:$0xff] %v15934_v6  ;;  %17353 = vst [vmem:[#allocation19_spill] sm:$0xff] %v15938_v42  ;;  %v15954_v27 = vmul.f32 %v15397_v28, %v17360_v7  ;;  %v17362_v6 = vld [vmem:[#allocation97_spill] sm:$0xff] }
 0x7b7   :  { %17342 = vst [vmem:[#allocation14_spill] sm:$0xff] %v15902_v41  ;;  %17346 = vst [vmem:[#allocation16_spill] sm:$0xff] %v15922_v39  ;;  %v17347_v41 = vld [vmem:[#allocation87_spill] sm:$0xff]  ;;  %v17356_v39 = vld [vmem:[#allocation92_spill] sm:$0xff]  ;;  %v15958_v5 = vmul.f32 %v15397_v28, %v17362_v6 }
 0x7b8   :  { %v15926_v59 = vmul.f32 %v15397_v28, %v17347_v41  ;;  %17355 = vst [vmem:[#allocation45_spill] sm:$0xff] %v15942_v0  ;;  %v15946_v41 = vmul.f32 %v15397_v28, %v17356_v39  ;;  %17361 = vst [vmem:[#allocation21_spill] sm:$0xff] %v15954_v27  ;;  %v17364_v42 = vld [vmem:[#allocation105_spill] sm:$0xff]  ;;  %v17365_v0 = vld [vmem:[#allocation99_spill] sm:$0xff] }
 0x7b9   :  { %17363 = vst [vmem:[#allocation22_spill] sm:$0xff] %v15958_v5  ;;  %v15962_v58 = vmul.f32 %v15397_v28, %v17364_v42  ;;  %v15966_v39 = vmul.f32 %v15397_v28, %v17365_v0  ;;  %v17368_v27 = vld [vmem:[#allocation51_spill] sm:$0xff]  ;;  %v17369_v5 = vld [vmem:[#allocation8_spill] sm:$0xff]  ;;  %v15986_v0 = vmul.f32 %v15397_v28, %v15666_v52  ;;  %v16006_v52 = vmul.f32 %v15397_v28, %v15686_v49 }
 0x7ba   :  { %17348 = vst [vmem:[#allocation17_spill] sm:$0xff] %v15926_v59  ;;  %17357 = vst [vmem:[#allocation94_spill] sm:$0xff] %v15946_v41  ;;  %v17358_v59 = vld [vmem:[#allocation48_spill] sm:$0xff]  ;;  %v17366_v41 = vld [vmem:[#allocation106_spill] sm:$0xff]  ;;  %v15978_v6 = vmul.f32 %v15397_v28, %v17368_v27  ;;  %v15982_v42 = vmul.f32 %v15397_v28, %v17369_v5  ;;  %v15998_v27 = vmul.f32 %v15397_v28, %v15678_v20 }
 0x7bb   :  { %v15950_v26 = vmul.f32 %v15397_v28, %v17358_v59  ;;  %v15970_v59 = vmul.f32 %v15397_v28, %v17366_v41  ;;  %v15990_v41 = vmul.f32 %v15397_v28, %v15670_v13  ;;  %v16002_v5 = vmul.f32 %v15397_v28, %v15682_v17 }
 0x7bc   :  { %v16010_v13 = vmul.f32 %v15397_v28, %v15690_v1  ;;  %v16022_v17 = vmul.f32 %v15397_v28, %v15702_v46  ;;  %v16026_v49 = vmul.f32 %v15397_v28, %v15706_v63  ;;  %v16030_v1 = vmul.f32 %v15397_v28, %v15710_v34 }
 0x7bd   :  { %17359 = vst [vmem:[#allocation20_spill] sm:$0xff] %v15950_v26  ;;  %v17367_v26 = vld [vmem:[#allocation44_spill] sm:$0xff]  ;;  %v16042_v46 = vmul.f32 %v15397_v28, %v15722_v57  ;;  %v16046_v63 = vmul.f32 %v15397_v28, %v15726_v4 }
 0x7be   :  { %v15974_v7 = vmul.f32 %v15397_v28, %v17367_v26  ;;  %v15994_v26 = vmul.f32 %v15397_v28, %v15674_v10  ;;  %v16014_v10 = vmul.f32 %v15397_v28, %v15694_v19  ;;  %17372 = vst [vmem:[#allocation112_spill] sm:$0xff] %v16026_v49  ;;  %v16034_v19 = vmul.f32 %v15397_v28, %v15714_v32  ;;  %v17373_v49 = vld [vmem:[#allocation100_spill] sm:$0xff] }
 0x7bf   :  { %v16050_v34 = vadd.f32 %v17373_v49, %v15730_v56  ;;  %v16054_v32 = vadd.f32 %v17373_v49, %v15734_v9  ;;  %v16062_v57 = vadd.f32 %v17373_v49, %v15742_v12  ;;  %v16070_v4 = vadd.f32 %v17373_v49, %v15750_v33 }
 0x7c0   :  { %17370 = vst [vmem:[#allocation23_spill] sm:$0xff] %v15994_v26  ;;  %v17371_v26 = vld [vmem:[#allocation9_spill] sm:$0xff]  ;;  %v16074_v56 = vadd.f32 %v17373_v49, %v15754_v11  ;;  %v16078_v9 = vadd.f32 %v17373_v49, %v15758_v37  ;;  %v16086_v12 = vadd.f32 %v17373_v49, %v15766_v22  ;;  %v16094_v33 = vadd.f32 %v17373_v49, %v15774_v53  ;;  %v17377_v37 = vld [vmem:[#allocation107_spill] sm:$0xff] }
 0x7c1   :  { %v16018_v20 = vmul.f32 %v15397_v28, %v17371_v26  ;;  %v16038_v26 = vmul.f32 %v15397_v28, %v15718_v61  ;;  %v16058_v61 = vadd.f32 %v17373_v49, %v15738_v48  ;;  %v16066_v28 = vadd.f32 %v17373_v49, %v15746_v29 }
 0x7c2   :  { %v16082_v48 = vadd.f32 %v17373_v49, %v15762_v24  ;;  %17374 = vst [vmem:[#allocation113_spill] sm:$0xff] %v16086_v12  ;;  %v16090_v29 = vadd.f32 %v17373_v49, %v15770_v44  ;;  %17375 = vst [vmem:[#allocation24_spill] sm:$0xff] %v16094_v33  ;;  %v16098_v11 = vadd.f32 %v17373_v49, %v15778_v51  ;;  %v17379_v12 = vld [vmem:[#allocation10_spill] sm:$0xff]  ;;  %v17380_v33 = vld [vmem:[#allocation11_spill] sm:$0xff] }
 0x7c3   :  { %v16102_v24 = vadd.f32 %v17373_v49, %v17377_v37  ;;  %v16106_v22 = vadd.f32 %v17373_v49, %v15786_v55  ;;  %v16110_v44 = vadd.f32 %v17373_v49, %v17379_v12  ;;  %v16114_v53 = vadd.f32 %v17373_v49, %v15794_v18 }
 0x7c4   :  { %17376 = vst [vmem:[#allocation25_spill] sm:$0xff] %v16098_v11  ;;  %v16118_v51 = vadd.f32 %v17373_v49, %v17380_v33  ;;  %v17381_v11 = vld [vmem:[#allocation50_spill] sm:$0xff]  ;;  %v16130_v12 = vadd.f32 %v17373_v49, %v15810_v2  ;;  %v16134_v18 = vadd.f32 %v17373_v49, %v15814_v60  ;;  %v16138_v33 = vadd.f32 %v17373_v49, %v15818_v31 }
 0x7c5   :  { %17378 = vst [vmem:[#allocation26_spill] sm:$0xff] %v16102_v24  ;;  %v16122_v37 = vadd.f32 %v17373_v49, %v17381_v11  ;;  %v17382_v24 = vld [vmem:[#allocation108_spill] sm:$0xff]  ;;  %v16142_v11 = vadd.f32 %v17373_v49, %v15822_v45  ;;  %v16150_v2 = vadd.f32 %v17373_v49, %v15830_v30  ;;  %v16154_v60 = vadd.f32 %v17373_v49, %v15834_v23 }
 0x7c6   :  { %v16126_v55 = vadd.f32 %v17373_v49, %v17382_v24  ;;  %v16146_v24 = vadd.f32 %v17373_v49, %v15826_v54  ;;  %v16158_v31 = vadd.f32 %v17373_v49, %v15838_v40  ;;  %v16162_v45 = vadd.f32 %v17373_v49, %v15842_v36 }
 0x7c7   :  { %17383 = vst [vmem:[#allocation114_spill] sm:$0xff] %v16150_v2  ;;  %v16166_v54 = vadd.f32 %v17373_v49, %v15846_v15  ;;  %v16170_v30 = vadd.f32 %v17373_v49, %v15850_v3  ;;  %v17384_v2 = vld [vmem:[#allocation109_spill] sm:$0xff]  ;;  %v16178_v40 = vadd.f32 %v17373_v49, %v15858_v25  ;;  %v16182_v36 = vadd.f32 %v17373_v49, %v15862_v21 }
 0x7c8   :  { %v16174_v23 = vadd.f32 %v17373_v49, %v17384_v2  ;;  %v16186_v15 = vadd.f32 %v17373_v49, %v15866_v47  ;;  %v16190_v3 = vadd.f32 %v17373_v49, %v15870_v35  ;;  %v16194_v2 = vadd.f32 %v17373_v49, %v15874_v16 }
 0x7c9   :  { %v16202_v21 = vadd.f32 %v17373_v49, %v15882_v62  ;;  %v16206_v47 = vadd.f32 %v17373_v49, %v15886_v8  ;;  %v16210_v35 = vadd.f32 %v17373_v49, %v15890_v14  ;;  %v16214_v16 = vadd.f32 %v17373_v49, %v15894_v50 }
 0x7ca   :  { %17385 = vst [vmem:[#allocation27_spill] sm:$0xff] %v16174_v23  ;;  %v17386_v23 = vld [vmem:[#allocation13_spill] sm:$0xff]  ;;  %v16226_v8 = vadd.f32 %v17373_v49, %v15906_v38 }
 0x7cb   :  { %v16198_v25 = vadd.f32 %v17373_v49, %v17386_v23  ;;  %17388 = vst [vmem:[#allocation28_spill] sm:$0xff] %v16206_v47  ;;  %17389 = vst [vmem:[#allocation116_spill] sm:$0xff] %v16210_v35  ;;  %v16218_v23 = vadd.f32 %v17373_v49, %v15898_v43  ;;  %v17395_v47 = vld [vmem:[#allocation15_spill] sm:$0xff]  ;;  %v17397_v35 = vld [vmem:[#allocation110_spill] sm:$0xff] }
 0x7cc   :  { %17390 = vst [vmem:[#allocation29_spill] sm:$0xff] %v16214_v16  ;;  %17394 = vst [vmem:[#allocation118_spill] sm:$0xff] %v16226_v8  ;;  %v16230_v14 = vadd.f32 %v17373_v49, %v17395_v47  ;;  %v16234_v50 = vadd.f32 %v17373_v49, %v17397_v35  ;;  %v17399_v16 = vld [vmem:[#allocation12_spill] sm:$0xff]  ;;  %v17405_v8 = vld [vmem:[#allocation18_spill] sm:$0xff] }
 0x7cd   :  { %17387 = vst [vmem:[#allocation115_spill] sm:$0xff] %v16198_v25  ;;  %17391 = vst [vmem:[#allocation117_spill] sm:$0xff] %v16218_v23  ;;  %v17392_v25 = vld [vmem:[#allocation14_spill] sm:$0xff]  ;;  %v16238_v43 = vadd.f32 %v17373_v49, %v17399_v16  ;;  %v17401_v23 = vld [vmem:[#allocation16_spill] sm:$0xff]  ;;  %v16250_v47 = vadd.f32 %v17373_v49, %v17405_v8 }
 0x7ce   :  { %v16222_v62 = vadd.f32 %v17373_v49, %v17392_v25  ;;  %17396 = vst [vmem:[#allocation31_spill] sm:$0xff] %v16230_v14  ;;  %17398 = vst [vmem:[#allocation119_spill] sm:$0xff] %v16234_v50  ;;  %v16242_v25 = vadd.f32 %v17373_v49, %v17401_v23  ;;  %v17407_v14 = vld [vmem:[#allocation111_spill] sm:$0xff] }
 0x7cf   :  { %17400 = vst [vmem:[#allocation32_spill] sm:$0xff] %v16238_v43  ;;  %17406 = vst [vmem:[#allocation121_spill] sm:$0xff] %v16250_v47  ;;  %v16254_v35 = vadd.f32 %v17373_v49, %v17407_v14  ;;  %v17409_v50 = vld [vmem:[#allocation19_spill] sm:$0xff]  ;;  %v17410_v43 = vld [vmem:[#allocation45_spill] sm:$0xff] }
 0x7d0   :  { %17393 = vst [vmem:[#allocation30_spill] sm:$0xff] %v16222_v62  ;;  %17402 = vst [vmem:[#allocation120_spill] sm:$0xff] %v16242_v25  ;;  %v17403_v62 = vld [vmem:[#allocation17_spill] sm:$0xff]  ;;  %v16258_v16 = vadd.f32 %v17373_v49, %v17409_v50  ;;  %v16262_v23 = vadd.f32 %v17373_v49, %v17410_v43  ;;  %v17411_v25 = vld [vmem:[#allocation94_spill] sm:$0xff]  ;;  %v16282_v43 = vadd.f32 %v17373_v49, %v15962_v58 }
 0x7d1   :  { %v16246_v38 = vadd.f32 %v17373_v49, %v17403_v62  ;;  %17408 = vst [vmem:[#allocation34_spill] sm:$0xff] %v16254_v35  ;;  %v16266_v62 = vadd.f32 %v17373_v49, %v17411_v25  ;;  %v17413_v47 = vld [vmem:[#allocation21_spill] sm:$0xff]  ;;  %v17414_v35 = vld [vmem:[#allocation22_spill] sm:$0xff]  ;;  %v16286_v25 = vadd.f32 %v17373_v49, %v15966_v39  ;;  %v16302_v58 = vadd.f32 %v17373_v49, %v15982_v42 }
 0x7d2   :  { %v16274_v14 = vadd.f32 %v17373_v49, %v17413_v47  ;;  %v16278_v50 = vadd.f32 %v17373_v49, %v17414_v35  ;;  %v16294_v47 = vadd.f32 %v17373_v49, %v15974_v7  ;;  %v16298_v35 = vadd.f32 %v17373_v49, %v15978_v6 }
 0x7d3   :  { %17404 = vst [vmem:[#allocation33_spill] sm:$0xff] %v16246_v38  ;;  %v17412_v38 = vld [vmem:[#allocation20_spill] sm:$0xff]  ;;  %v16306_v39 = vadd.f32 %v17373_v49, %v15986_v0  ;;  %v16318_v6 = vadd.f32 %v17373_v49, %v15998_v27  ;;  %v16322_v42 = vadd.f32 %v17373_v49, %v16002_v5  ;;  %v16326_v0 = vadd.f32 %v17373_v49, %v16006_v52 }
 0x7d4   :  { %v16270_v8 = vadd.f32 %v17373_v49, %v17412_v38  ;;  %v16290_v38 = vadd.f32 %v17373_v49, %v15970_v59  ;;  %v16310_v59 = vadd.f32 %v17373_v49, %v15990_v41  ;;  %v16330_v41 = vadd.f32 %v17373_v49, %v16010_v13 }
 0x7d5   :  { %17417 = vst [vmem:[#allocation35_spill] sm:$0xff] %v16322_v42  ;;  %v16338_v27 = vadd.f32 %v17373_v49, %v16018_v20  ;;  %v16342_v5 = vadd.f32 %v17373_v49, %v16022_v17  ;;  %v17418_v42 = vld [vmem:[#allocation112_spill] sm:$0xff]  ;;  %v16350_v13 = vadd.f32 %v17373_v49, %v16030_v1  ;;  %v16358_v20 = vadd.f32 %v17373_v49, %v16038_v26 }
 0x7d6   :  { %17415 = vst [vmem:[#allocation122_spill] sm:$0xff] %v16290_v38  ;;  %v17416_v38 = vld [vmem:[#allocation23_spill] sm:$0xff]  ;;  %v16346_v52 = vadd.f32 %v17373_v49, %v17418_v42  ;;  %v16362_v17 = vadd.f32 %v17373_v49, %v16042_v46  ;;  %v16366_v42 = vadd.f32 %v17373_v49, %v16046_v63  ;;  %v8389_v1 = vmax.f32 %v16054_v32, 0.0 }
 0x7d7   :  { %v16314_v7 = vadd.f32 %v17373_v49, %v17416_v38  ;;  %v16334_v38 = vadd.f32 %v17373_v49, %v16014_v10  ;;  %17420 = vst [vmem:[#allocation36_spill] sm:$0xff] %v16350_v13  ;;  %v16354_v10 = vadd.f32 %v17373_v49, %v16034_v19  ;;  %17422 = vst [vmem:[#allocation125_spill] sm:$0xff] %v16358_v20  ;;  %v8390_v13 = vmax.f32 %v16058_v61, 0.0  ;;  %v17425_v49 = vld [vmem:[#allocation113_spill] sm:$0xff] }
 0x7d8   :  { %17419 = vst [vmem:[#allocation123_spill] sm:$0xff] %v16346_v52  ;;  %17423 = vst [vmem:[#allocation126_spill] sm:$0xff] %v16362_v17  ;;  %v8388_v52 = vmax.f32 %v16050_v34, 0.0  ;;  %v8391_v19 = vmax.f32 %v16062_v57, 0.0  ;;  %v8393_v26 = vmax.f32 %v16070_v4, 0.0  ;;  %v8394_v20 = vmax.f32 %v16074_v56, 0.0 }
 0x7d9   :  { %17421 = vst [vmem:[#allocation124_spill] sm:$0xff] %v16354_v10  ;;  %17424 = vst [vmem:[#allocation127_spill] sm:$0xff] %v16366_v42  ;;  %v8392_v10 = vmax.f32 %v16066_v28, 0.0  ;;  %v8395_v46 = vmax.f32 %v16078_v9, 0.0  ;;  %v8396_v17 = vmax.f32 %v16082_v48, 0.0  ;;  %v8397_v63 = vmax.f32 %v17425_v49, 0.0 }
 0x7da   :  { %v8398_v34 = vmax.f32 %v16090_v29, 0.0  ;;  %v17426_v42 = vld [vmem:[#allocation24_spill] sm:$0xff]  ;;  %8469 = vst [vmem:[#allocation5] sm:$0xff] %v8388_v52  ;;  %8470 = vst [vmem:[#allocation5 + $0x8] sm:$0xff] %v8389_v1  ;;  %v17427_v61 = vld [vmem:[#allocation25_spill] sm:$0xff]  ;;  %v8402_v56 = vmax.f32 %v16106_v22, 0.0 }
 0x7db   :  { %v8399_v32 = vmax.f32 %v17426_v42, 0.0  ;;  %8471 = vst [vmem:[#allocation5 + $0x10] sm:$0xff] %v8390_v13  ;;  %8472 = vst [vmem:[#allocation5 + $0x18] sm:$0xff] %v8391_v19  ;;  %v8400_v57 = vmax.f32 %v17427_v61, 0.0  ;;  %v17428_v28 = vld [vmem:[#allocation26_spill] sm:$0xff]  ;;  %v8403_v9 = vmax.f32 %v16110_v44, 0.0 }
 0x7dc   :  { %v8401_v4 = vmax.f32 %v17428_v28, 0.0  ;;  %8473 = vst [vmem:[#allocation5 + $0x20] sm:$0xff] %v8392_v10  ;;  %8474 = vst [vmem:[#allocation5 + $0x28] sm:$0xff] %v8393_v26  ;;  %v8404_v48 = vmax.f32 %v16114_v53, 0.0  ;;  %v8405_v29 = vmax.f32 %v16118_v51, 0.0  ;;  %v8406_v52 = vmax.f32 %v16122_v37, 0.0 }
 0x7dd   :  { %8475 = vst [vmem:[#allocation5 + $0x30] sm:$0xff] %v8394_v20  ;;  %8476 = vst [vmem:[#allocation5 + $0x38] sm:$0xff] %v8395_v46  ;;  %v8407_v13 = vmax.f32 %v16126_v55, 0.0  ;;  %v8408_v22 = vmax.f32 %v16130_v12, 0.0  ;;  %v8409_v44 = vmax.f32 %v16134_v18, 0.0  ;;  %v8410_v10 = vmax.f32 %v16138_v33, 0.0 }
 0x7de   :  { %8477 = vst [vmem:[#allocation5 + $0x40] sm:$0xff] %v8396_v17  ;;  %8478 = vst [vmem:[#allocation5 + $0x48] sm:$0xff] %v8397_v63  ;;  %v8411_v20 = vmax.f32 %v16142_v11, 0.0  ;;  %v8412_v53 = vmax.f32 %v16146_v24, 0.0  ;;  %v17429_v51 = vld [vmem:[#allocation114_spill] sm:$0xff]  ;;  %v8414_v55 = vmax.f32 %v16154_v60, 0.0 }
 0x7df   :  { %8479 = vst [vmem:[#allocation5 + $0x50] sm:$0xff] %v8398_v34  ;;  %8480 = vst [vmem:[#allocation5 + $0x58] sm:$0xff] %v8399_v32  ;;  %v8413_v37 = vmax.f32 %v17429_v51, 0.0  ;;  %v8415_v17 = vmax.f32 %v16158_v31, 0.0  ;;  %v8416_v12 = vmax.f32 %v16162_v45, 0.0  ;;  %v8417_v18 = vmax.f32 %v16166_v54, 0.0 }
 0x7e0   :  { %8481 = vst [vmem:[#allocation5 + $0x60] sm:$0xff] %v8400_v57  ;;  %8482 = vst [vmem:[#allocation5 + $0x68] sm:$0xff] %v8401_v4  ;;  %v8418_v33 = vmax.f32 %v16170_v30, 0.0  ;;  %v17430_v11 = vld [vmem:[#allocation27_spill] sm:$0xff]  ;;  %v8420_v24 = vmax.f32 %v16178_v40, 0.0  ;;  %v8421_v60 = vmax.f32 %v16182_v36, 0.0 }
 0x7e1   :  { %8483 = vst [vmem:[#allocation5 + $0x70] sm:$0xff] %v8402_v56  ;;  %8484 = vst [vmem:[#allocation5 + $0x78] sm:$0xff] %v8403_v9  ;;  %v8419_v42 = vmax.f32 %v17430_v11, 0.0  ;;  %v8422_v31 = vmax.f32 %v16186_v15, 0.0  ;;  %v8423_v1 = vmax.f32 %v16190_v3, 0.0  ;;  %v8424_v45 = vmax.f32 %v16194_v2, 0.0 }
 0x7e2   :  { %8485 = vst [vmem:[#allocation5 + $0x80] sm:$0xff] %v8404_v48  ;;  %8486 = vst [vmem:[#allocation5 + $0x88] sm:$0xff] %v8405_v29  ;;  %v17431_v54 = vld [vmem:[#allocation115_spill] sm:$0xff]  ;;  %v8426_v19 = vmax.f32 %v16202_v21, 0.0  ;;  %v17432_v26 = vld [vmem:[#allocation28_spill] sm:$0xff]  ;;  %v8441_v51 = vmax.f32 %v16262_v23, 0.0 }
 0x7e3   :  { %8487 = vst [vmem:[#allocation5 + $0x90] sm:$0xff] %v8406_v52  ;;  %8488 = vst [vmem:[#allocation5 + $0x98] sm:$0xff] %v8407_v13  ;;  %v8425_v30 = vmax.f32 %v17431_v54, 0.0  ;;  %v8427_v46 = vmax.f32 %v17432_v26, 0.0  ;;  %v17433_v40 = vld [vmem:[#allocation116_spill] sm:$0xff]  ;;  %v17434_v15 = vld [vmem:[#allocation29_spill] sm:$0xff] }
 0x7e4   :  { %8489 = vst [vmem:[#allocation5 + $0xa0] sm:$0xff] %v8408_v22  ;;  %8490 = vst [vmem:[#allocation5 + $0xa8] sm:$0xff] %v8409_v44  ;;  %v8428_v36 = vmax.f32 %v17433_v40, 0.0  ;;  %v8429_v3 = vmax.f32 %v17434_v15, 0.0  ;;  %v17435_v49 = vld [vmem:[#allocation117_spill] sm:$0xff]  ;;  %v17436_v34 = vld [vmem:[#allocation30_spill] sm:$0xff] }
 0x7e5   :  { %8491 = vst [vmem:[#allocation5 + $0xb0] sm:$0xff] %v8410_v10  ;;  %8492 = vst [vmem:[#allocation5 + $0xb8] sm:$0xff] %v8411_v20  ;;  %v8430_v63 = vmax.f32 %v17435_v49, 0.0  ;;  %v8431_v32 = vmax.f32 %v17436_v34, 0.0  ;;  %v17437_v2 = vld [vmem:[#allocation118_spill] sm:$0xff]  ;;  %v17438_v61 = vld [vmem:[#allocation31_spill] sm:$0xff] }
 0x7e6   :  { %8493 = vst [vmem:[#allocation5 + $0xc0] sm:$0xff] %v8412_v53  ;;  %8494 = vst [vmem:[#allocation5 + $0xc8] sm:$0xff] %v8413_v37  ;;  %v8432_v21 = vmax.f32 %v17437_v2, 0.0  ;;  %v8433_v57 = vmax.f32 %v17438_v61, 0.0  ;;  %v17439_v28 = vld [vmem:[#allocation119_spill] sm:$0xff]  ;;  %v17440_v56 = vld [vmem:[#allocation32_spill] sm:$0xff] }
 0x7e7   :  { %8495 = vst [vmem:[#allocation5 + $0xd0] sm:$0xff] %v8414_v55  ;;  %8496 = vst [vmem:[#allocation5 + $0xd8] sm:$0xff] %v8415_v17  ;;  %v8434_v4 = vmax.f32 %v17439_v28, 0.0  ;;  %v8435_v9 = vmax.f32 %v17440_v56, 0.0  ;;  %v17441_v48 = vld [vmem:[#allocation120_spill] sm:$0xff]  ;;  %v17442_v52 = vld [vmem:[#allocation33_spill] sm:$0xff] }
 0x7e8   :  { %8497 = vst [vmem:[#allocation5 + $0xe0] sm:$0xff] %v8416_v12  ;;  %8498 = vst [vmem:[#allocation5 + $0xe8] sm:$0xff] %v8417_v18  ;;  %v8436_v29 = vmax.f32 %v17441_v48, 0.0  ;;  %v8437_v13 = vmax.f32 %v17442_v52, 0.0  ;;  %v17443_v22 = vld [vmem:[#allocation121_spill] sm:$0xff]  ;;  %v17444_v10 = vld [vmem:[#allocation34_spill] sm:$0xff] }
 0x7e9   :  { %8499 = vst [vmem:[#allocation5 + $0xf0] sm:$0xff] %v8418_v33  ;;  %8500 = vst [vmem:[#allocation5 + $0xf8] sm:$0xff] %v8419_v42  ;;  %v8438_v44 = vmax.f32 %v17443_v22, 0.0  ;;  %v8439_v20 = vmax.f32 %v17444_v10, 0.0  ;;  %v8440_v53 = vmax.f32 %v16258_v16, 0.0  ;;  %v8442_v37 = vmax.f32 %v16266_v62, 0.0 }
 0x7ea   :  { %8501 = vst [vmem:[#allocation5 + $0x100] sm:$0xff] %v8420_v24  ;;  %8502 = vst [vmem:[#allocation5 + $0x108] sm:$0xff] %v8421_v60  ;;  %v8443_v55 = vmax.f32 %v16270_v8, 0.0  ;;  %v8444_v17 = vmax.f32 %v16274_v14, 0.0  ;;  %v8445_v12 = vmax.f32 %v16278_v50, 0.0  ;;  %v8446_v18 = vmax.f32 %v16282_v43, 0.0 }
 0x7eb   :  { %8503 = vst [vmem:[#allocation5 + $0x110] sm:$0xff] %v8422_v31  ;;  %8504 = vst [vmem:[#allocation5 + $0x118] sm:$0xff] %v8423_v1  ;;  %v8447_v33 = vmax.f32 %v16286_v25, 0.0  ;;  %v17445_v16 = vld [vmem:[#allocation122_spill] sm:$0xff]  ;;  %v8449_v62 = vmax.f32 %v16294_v47, 0.0  ;;  %v8450_v8 = vmax.f32 %v16298_v35, 0.0 }
 0x7ec   :  { %8505 = vst [vmem:[#allocation5 + $0x120] sm:$0xff] %v8424_v45  ;;  %8506 = vst [vmem:[#allocation5 + $0x128] sm:$0xff] %v8425_v30  ;;  %v8448_v23 = vmax.f32 %v17445_v16, 0.0  ;;  %v8451_v11 = vmax.f32 %v16302_v58, 0.0  ;;  %v8452_v14 = vmax.f32 %v16306_v39, 0.0  ;;  %v8453_v50 = vmax.f32 %v16310_v59, 0.0 }
 0x7ed   :  { %8507 = vst [vmem:[#allocation5 + $0x130] sm:$0xff] %v8426_v19  ;;  %8508 = vst [vmem:[#allocation5 + $0x138] sm:$0xff] %v8427_v46  ;;  %v8454_v43 = vmax.f32 %v16314_v7, 0.0  ;;  %v8455_v25 = vmax.f32 %v16318_v6, 0.0  ;;  %v17446_v47 = vld [vmem:[#allocation35_spill] sm:$0xff]  ;;  %v8457_v58 = vmax.f32 %v16326_v0, 0.0 }
 0x7ee   :  { %8509 = vst [vmem:[#allocation5 + $0x140] sm:$0xff] %v8428_v36  ;;  %8510 = vst [vmem:[#allocation5 + $0x148] sm:$0xff] %v8429_v3  ;;  %v8456_v35 = vmax.f32 %v17446_v47, 0.0  ;;  %v8458_v42 = vmax.f32 %v16330_v41, 0.0  ;;  %v8459_v24 = vmax.f32 %v16334_v38, 0.0  ;;  %v8460_v39 = vmax.f32 %v16338_v27, 0.0 }
 0x7ef   :  { %8511 = vst [vmem:[#allocation5 + $0x150] sm:$0xff] %v8430_v63  ;;  %8512 = vst [vmem:[#allocation5 + $0x158] sm:$0xff] %v8431_v32  ;;  %v8461_v59 = vmax.f32 %v16342_v5, 0.0  ;;  %v17447_v7 = vld [vmem:[#allocation123_spill] sm:$0xff]  ;;  %v17448_v60 = vld [vmem:[#allocation36_spill] sm:$0xff] }
 0x7f0   :  { %8513 = vst [vmem:[#allocation5 + $0x160] sm:$0xff] %v8432_v21  ;;  %8514 = vst [vmem:[#allocation5 + $0x168] sm:$0xff] %v8433_v57  ;;  %v8462_v6 = vmax.f32 %v17447_v7, 0.0  ;;  %v8463_v31 = vmax.f32 %v17448_v60, 0.0  ;;  %v17449_v0 = vld [vmem:[#allocation124_spill] sm:$0xff]  ;;  %v17450_v38 = vld [vmem:[#allocation125_spill] sm:$0xff] }
 0x7f1   :  { %8515 = vst [vmem:[#allocation5 + $0x170] sm:$0xff] %v8434_v4  ;;  %8516 = vst [vmem:[#allocation5 + $0x178] sm:$0xff] %v8435_v9  ;;  %v8464_v41 = vmax.f32 %v17449_v0, 0.0  ;;  %v8465_v1 = vmax.f32 %v17450_v38, 0.0  ;;  %v17451_v45 = vld [vmem:[#allocation126_spill] sm:$0xff]  ;;  %v17452_v54 = vld [vmem:[#allocation127_spill] sm:$0xff] }
 0x7f2   :  { %8517 = vst [vmem:[#allocation5 + $0x180] sm:$0xff] %v8436_v29  ;;  %8518 = vst [vmem:[#allocation5 + $0x188] sm:$0xff] %v8437_v13  ;;  %v8466_v27 = vmax.f32 %v17451_v45, 0.0  ;;  %v8467_v5 = vmax.f32 %v17452_v54, 0.0 }
 0x7f3   :  { %8519 = vst [vmem:[#allocation5 + $0x190] sm:$0xff] %v8438_v44  ;;  %8520 = vst [vmem:[#allocation5 + $0x198] sm:$0xff] %v8439_v20 }
 0x7f4   :  { %8521 = vst [vmem:[#allocation5 + $0x1a0] sm:$0xff] %v8440_v53  ;;  %8522 = vst [vmem:[#allocation5 + $0x1a8] sm:$0xff] %v8441_v51 }
 0x7f5   :  { %8523 = vst [vmem:[#allocation5 + $0x1b0] sm:$0xff] %v8442_v37  ;;  %8524 = vst [vmem:[#allocation5 + $0x1b8] sm:$0xff] %v8443_v55 }
 0x7f6   :  { %8525 = vst [vmem:[#allocation5 + $0x1c0] sm:$0xff] %v8444_v17  ;;  %8526 = vst [vmem:[#allocation5 + $0x1c8] sm:$0xff] %v8445_v12 }
 0x7f7   :  { %8527 = vst [vmem:[#allocation5 + $0x1d0] sm:$0xff] %v8446_v18  ;;  %8528 = vst [vmem:[#allocation5 + $0x1d8] sm:$0xff] %v8447_v33 }
 0x7f8   :  { %8529 = vst [vmem:[#allocation5 + $0x1e0] sm:$0xff] %v8448_v23  ;;  %8530 = vst [vmem:[#allocation5 + $0x1e8] sm:$0xff] %v8449_v62 }
 0x7f9   :  { %8531 = vst [vmem:[#allocation5 + $0x1f0] sm:$0xff] %v8450_v8  ;;  %8532 = vst [vmem:[#allocation5 + $0x1f8] sm:$0xff] %v8451_v11 }
 0x7fa   :  { %8533 = vst [vmem:[#allocation5 + $0x200] sm:$0xff] %v8452_v14  ;;  %8534 = vst [vmem:[#allocation5 + $0x208] sm:$0xff] %v8453_v50 }
 0x7fb   :  { %8535 = vst [vmem:[#allocation5 + $0x210] sm:$0xff] %v8454_v43  ;;  %8536 = vst [vmem:[#allocation5 + $0x218] sm:$0xff] %v8455_v25 }
 0x7fc   :  { %8537 = vst [vmem:[#allocation5 + $0x220] sm:$0xff] %v8456_v35  ;;  %8538 = vst [vmem:[#allocation5 + $0x228] sm:$0xff] %v8457_v58 }
 0x7fd   :  { %8539 = vst [vmem:[#allocation5 + $0x230] sm:$0xff] %v8458_v42  ;;  %8540 = vst [vmem:[#allocation5 + $0x238] sm:$0xff] %v8459_v24 }
 0x7fe   :  { %8541 = vst [vmem:[#allocation5 + $0x240] sm:$0xff] %v8460_v39  ;;  %8542 = vst [vmem:[#allocation5 + $0x248] sm:$0xff] %v8461_v59 }
 0x7ff   :  { %8543 = vst [vmem:[#allocation5 + $0x250] sm:$0xff] %v8462_v6  ;;  %8544 = vst [vmem:[#allocation5 + $0x258] sm:$0xff] %v8463_v31 }
 0x800   :  { %8545 = vst [vmem:[#allocation5 + $0x260] sm:$0xff] %v8464_v41  ;;  %8546 = vst [vmem:[#allocation5 + $0x268] sm:$0xff] %v8465_v1 }
 0x801   :  { %8547 = vst [vmem:[#allocation5 + $0x270] sm:$0xff] %v8466_v27  ;;  %8548 = vst [vmem:[#allocation5 + $0x278] sm:$0xff] %v8467_v5 }
 0x802   :  { %11338 = shalt.err (!%p11335_p9)
}
 0x803   :  { %s11358_s29 = smov 128   ;;  %s11359_s1 = smov 8  }
 0x804   :  { %8561 = dma.vmem_to_hbm [thread:$0]  %s16444_s27, 10368, %s16462_s4, [#allocation4], %s11358_s29, %s11358_s29, %s11359_s1  }
 0x805   :  { %11349 = dma.done.wait [#allocation4], 10368  }
 0x806   :  { %11350 = vsyncadd [#allocation4], 4294956928 }
 0x807   :  { %8565 = vsyncpa [#allocation3], 1 }
 0x808   :  { %8566 = vsyncpa [#allocation4], 1 }

</bundles_post_ra>
